<compile_context>
chip_gen: v7x
topology: tpu7x:2x2x1
jax: 0.10.0
libtpu: 0.0.40
codegen_flags: <defaults>
</compile_context>

<pallas_src>
import functools

import jax
import jax.numpy as jnp
from jax.experimental import pallas as pl
from jax.experimental.pallas import tpu as pltpu

NEG_SLOPE = 0.2


def _round_up(n, m):
    return ((n + m - 1) // m) * m


def _leaky_relu(v):
    return jnp.where(v > 0, v, NEG_SLOPE * v)


def _vmem_limit_bytes():
    """Per-generation scoped-VMEM budget: ~3/4 of physical VMEM, capped at 96 MiB."""
    cap = None
    try:
        cap = getattr(pltpu.get_tpu_info(), "vmem_capacity_bytes", None)
    except Exception:
        cap = None
    if not cap:
        cap = 64 * 1024 * 1024            # conservative fallback (v7x physical VMEM)
    return int(min(cap * 3 // 4, 96 * 1024 * 1024))


def _pick_batch_tile(B):
    """Batch tile: multiple of 16 (bf16 sublane packing), <= 512 rows, and at least
    two grid tiles when the batch allows it (so both v7x TensorCores get work)."""
    tb = min(_round_up(B, 16), 512)
    if B >= 32 and _round_up(B, tb) // tb < 2:
        tb = _round_up((B + 1) // 2, 16)
    return tb


def _encoder_kernel(expr_dim,
                    x_ref, c_ref,
                    w1_ref, b1_ref, w2_ref, b2_ref, w3_ref, b3_ref,
                    w4_ref, b4_ref, wo_ref, bo_ref,
                    out_ref, xc_ref):
    # ---- layer 1: in-kernel concat([x, c]) into VMEM scratch -> single MXU pass -----
    xc_ref[:, :expr_dim] = x_ref[...]
    xc_ref[:, expr_dim:] = c_ref[...]
    h = (jnp.dot(xc_ref[...].astype(jnp.bfloat16), w1_ref[...],
                 preferred_element_type=jnp.float32)
         + b1_ref[...])
    h = _leaky_relu(h).astype(jnp.bfloat16)

    # ---- layers 2-4: fc -> LeakyReLU (dropout == Identity -> no-op) -----------------
    h = jnp.dot(h, w2_ref[...], preferred_element_type=jnp.float32) + b2_ref[...]
    h = _leaky_relu(h).astype(jnp.bfloat16)

    h = jnp.dot(h, w3_ref[...], preferred_element_type=jnp.float32) + b3_ref[...]
    h = _leaky_relu(h).astype(jnp.bfloat16)

    h = jnp.dot(h, w4_ref[...], preferred_element_type=jnp.float32) + b4_ref[...]
    h = _leaky_relu(h).astype(jnp.bfloat16)

    # ---- heads: fc_mu | fc_logv fused into one lane-dense (128-padded) matmul -------
    out = jnp.dot(h, wo_ref[...], preferred_element_type=jnp.float32) + bo_ref[...]
    out_ref[...] = out.astype(out_ref.dtype)


def encoder_pallas(x, c, params, latent_dim, tb=None):
    """Forward pass of Encoder.  Returns (mu, logv), each (B, latent_dim)."""
    B, expr_dim = x.shape
    cond_dim = c.shape[1]
    kcat = expr_dim + cond_dim
    n_out = params["wo"].shape[1]             # lane-padded 2*latent_dim

    if tb is None:
        tb = _pick_batch_tile(B)
    Bp = _round_up(B, tb)

    x = x.astype(jnp.float32)
    c = c.astype(jnp.float32)
    if Bp != B:
        x = jnp.pad(x, ((0, Bp - B), (0, 0)))
        c = jnp.pad(c, ((0, Bp - B), (0, 0)))

    weights = (
        params["w1"], params["b1"],
        params["w2"], params["b2"],
        params["w3"], params["b3"],
        params["w4"], params["b4"],
        params["wo"], params["bo"],
    )

    tile_map = lambda i: (i, 0)
    const_map = lambda i: (0, 0)              # weights stay VMEM-resident across tiles
    resident = pl.Buffered(1)                 # ...and single-buffered (index never moves)

    in_specs = (
        [pl.BlockSpec((tb, expr_dim), tile_map),
         pl.BlockSpec((tb, cond_dim), tile_map)]
        + [pl.BlockSpec(w.shape, const_map, pipeline_mode=resident) for w in weights]
    )

    out = pl.pallas_call(
        functools.partial(_encoder_kernel, expr_dim),
        out_shape=jax.ShapeDtypeStruct((Bp, n_out), jnp.float32),
        grid=(Bp // tb,),
        in_specs=in_specs,
        out_specs=pl.BlockSpec((tb, n_out), tile_map),
        scratch_shapes=[pltpu.VMEM((tb, kcat), jnp.float32)],
        compiler_params=pltpu.CompilerParams(
            dimension_semantics=("parallel",),
            vmem_limit_bytes=_vmem_limit_bytes(),
        ),
    )(x, c, *weights)

    mu = out[:B, :latent_dim]
    logv = out[:B, latent_dim:2 * latent_dim]
    return mu, logv


def init_params(key, expr_dim, cond_dim, latent_dim):
    """Synthetic parameters matching Encoder.__init__ shapes.

    Linear weights are pre-transposed to (in, out) and stored in bf16; fc_mu / fc_logv
    are fused column-wise and lane-padded to a multiple of 128 (zero padding)."""
    def linear(k, din, dout):
        kw, kb = jax.random.split(k)
        bound = 1.0 / (din ** 0.5)
        w = jax.random.uniform(kw, (din, dout), jnp.float32, -bound, bound)
        b = jax.random.uniform(kb, (1, dout), jnp.float32, -bound, bound)
        return w, b

    keys = jax.random.split(key, 6)
    w1, b1 = linear(keys[0], expr_dim + cond_dim, 2048)
    w2, b2 = linear(keys[1], 2048, 1024)
    w3, b3 = linear(keys[2], 1024, 512)
    w4, b4 = linear(keys[3], 512, 256)
    wmu, bmu = linear(keys[4], 256, latent_dim)
    wlv, blv = linear(keys[5], 256, latent_dim)

    n_out = _round_up(2 * latent_dim, 128)
    wo = jnp.zeros((256, n_out), jnp.float32).at[:, :2 * latent_dim].set(
        jnp.concatenate([wmu, wlv], axis=1))
    bo = jnp.zeros((1, n_out), jnp.float32).at[:, :2 * latent_dim].set(
        jnp.concatenate([bmu, blv], axis=1))

    return {
        "w1": w1.astype(jnp.bfloat16), "b1": b1,
        "w2": w2.astype(jnp.bfloat16), "b2": b2,
        "w3": w3.astype(jnp.bfloat16), "b3": b3,
        "w4": w4.astype(jnp.bfloat16), "b4": b4,
        "wo": wo.astype(jnp.bfloat16), "bo": bo,
    }


def encoder_ref(x, c, params, latent_dim):
    """Pure-JAX reference: PyTorch Encoder.forward semantics, mirroring the kernel's
    bf16-matmul / f32-accumulate numerics."""
    act = lambda v: jnp.where(v > 0, v, NEG_SLOPE * v)

    def lin(h, w, b):
        return jnp.dot(h.astype(jnp.bfloat16), w,
                       preferred_element_type=jnp.float32) + b

    h = jnp.concatenate([x, c], axis=1)
    h = act(lin(h, params["w1"], params["b1"]))
    h = act(lin(h, params["w2"], params["b2"]))
    h = act(lin(h, params["w3"], params["b3"]))
    h = act(lin(h, params["w4"], params["b4"]))
    out = lin(h, params["wo"], params["bo"])
    return out[:, :latent_dim], out[:, latent_dim:2 * latent_dim]


if __name__ == "__main__":
    expr_dim, cond_dim, latent_dim = 32, 16, 16
    batch = 8

    key = jax.random.PRNGKey(0)
    kx, kc, kp = jax.random.split(key, 3)
    x = jax.random.normal(kx, (batch, expr_dim), jnp.float32)
    c = jax.random.normal(kc, (batch, cond_dim), jnp.float32)
    params = init_params(kp, expr_dim, cond_dim, latent_dim)

    mu, logv = encoder_pallas(x, c, params, latent_dim)
    jax.block_until_ready((mu, logv))

    mu_ref, logv_ref = encoder_ref(x, c, params, latent_dim)
    assert mu.shape == (batch, latent_dim) and logv.shape == (batch, latent_dim)
    assert jnp.allclose(mu, mu_ref, atol=5e-3, rtol=5e-3), "mu mismatch vs reference"
    assert jnp.allclose(logv, logv_ref, atol=5e-3, rtol=5e-3), "logv mismatch vs reference"

    print("KERNEL_OK")
</pallas_src>

<mosaic_0001>
module attributes {stable_mosaic.version = 11 : i64} {
  func.func @_encoder_kernel(%arg0: i32, %arg1: memref<16x32xf32, #tpu.memory_space<vmem>>, %arg2: memref<16x16xf32, #tpu.memory_space<vmem>>, %arg3: memref<48x2048xbf16, #tpu.memory_space<vmem>>, %arg4: memref<1x2048xf32, #tpu.memory_space<vmem>>, %arg5: memref<2048x1024xbf16, #tpu.memory_space<vmem>>, %arg6: memref<1x1024xf32, #tpu.memory_space<vmem>>, %arg7: memref<1024x512xbf16, #tpu.memory_space<vmem>>, %arg8: memref<1x512xf32, #tpu.memory_space<vmem>>, %arg9: memref<512x256xbf16, #tpu.memory_space<vmem>>, %arg10: memref<1x256xf32, #tpu.memory_space<vmem>>, %arg11: memref<256x128xbf16, #tpu.memory_space<vmem>>, %arg12: memref<1x128xf32, #tpu.memory_space<vmem>>, %arg13: memref<16x128xf32, #tpu.memory_space<vmem>>, %arg14: memref<16x48xf32, #tpu.memory_space<vmem>>) attributes {dimension_semantics = [#tpu.dimension_semantics<parallel>], iteration_bounds = array<i64: 1>, scalar_prefetch = 0 : i64, scratch_operands = 1 : i64, tpu.core_type = #tpu.core_type<tc>, window_params = [{transform_indices = @transform_0, window_bounds = array<i64: 16, 32>}, {transform_indices = @transform_1, window_bounds = array<i64: 16, 16>}, {pipeline_mode = #tpu.pipeline_mode<synchronous>, transform_indices = @transform_2, window_bounds = array<i64: 48, 2048>}, {pipeline_mode = #tpu.pipeline_mode<synchronous>, transform_indices = @transform_3, window_bounds = array<i64: 1, 2048>}, {pipeline_mode = #tpu.pipeline_mode<synchronous>, transform_indices = @transform_4, window_bounds = array<i64: 2048, 1024>}, {pipeline_mode = #tpu.pipeline_mode<synchronous>, transform_indices = @transform_5, window_bounds = array<i64: 1, 1024>}, {pipeline_mode = #tpu.pipeline_mode<synchronous>, transform_indices = @transform_6, window_bounds = array<i64: 1024, 512>}, {pipeline_mode = #tpu.pipeline_mode<synchronous>, transform_indices = @transform_7, window_bounds = array<i64: 1, 512>}, {pipeline_mode = #tpu.pipeline_mode<synchronous>, transform_indices = @transform_8, window_bounds = array<i64: 512, 256>}, {pipeline_mode = #tpu.pipeline_mode<synchronous>, transform_indices = @transform_9, window_bounds = array<i64: 1, 256>}, {pipeline_mode = #tpu.pipeline_mode<synchronous>, transform_indices = @transform_10, window_bounds = array<i64: 256, 128>}, {pipeline_mode = #tpu.pipeline_mode<synchronous>, transform_indices = @transform_11, window_bounds = array<i64: 1, 128>}, {transform_indices = @transform_12, window_bounds = array<i64: 16, 128>}]} {
    %c0 = arith.constant 0 : index
    %c0_0 = arith.constant 0 : index
    %0 = vector.load %arg1[%c0, %c0_0] : memref<16x32xf32, #tpu.memory_space<vmem>>, vector<16x32xf32>
    %c0_1 = arith.constant 0 : index
    %c0_2 = arith.constant 0 : index
    %1 = vector.load %arg14[%c0_1, %c0_2] : memref<16x48xf32, #tpu.memory_space<vmem>>, vector<16x32xf32>
    tpu.vector_store %arg14[%c0_1, %c0_2], %0 {strides = array<i32>} : memref<16x48xf32, #tpu.memory_space<vmem>>, vector<16x32xf32>,
    %c0_3 = arith.constant 0 : index
    %c0_4 = arith.constant 0 : index
    %2 = vector.load %arg2[%c0_3, %c0_4] : memref<16x16xf32, #tpu.memory_space<vmem>>, vector<16x16xf32>
    %c0_5 = arith.constant 0 : index
    %c32 = arith.constant 32 : index
    %3 = vector.load %arg14[%c0_5, %c32] : memref<16x48xf32, #tpu.memory_space<vmem>>, vector<16x16xf32>
    tpu.vector_store %arg14[%c0_5, %c32], %2 {strides = array<i32>} : memref<16x48xf32, #tpu.memory_space<vmem>>, vector<16x16xf32>,
    %c0_6 = arith.constant 0 : index
    %c0_7 = arith.constant 0 : index
    %4 = vector.load %arg14[%c0_6, %c0_7] : memref<16x48xf32, #tpu.memory_space<vmem>>, vector<16x48xf32>
    %5 = arith.truncf %4 : vector<16x48xf32> to vector<16x48xbf16>
    %c0_8 = arith.constant 0 : index
    %c0_9 = arith.constant 0 : index
    %6 = vector.load %arg3[%c0_8, %c0_9] : memref<48x2048xbf16, #tpu.memory_space<vmem>>, vector<48x2048xbf16>
    %cst = arith.constant dense<0.000000e+00> : vector<16x2048xf32>
    %7 = tpu.matmul %5, %6, %cst {dimension_numbers = #tpu.dot_dimension_numbers<[1], [0], [0], [1], [0, 0, 1, 1], [], []>} : vector<16x48xbf16>, vector<48x2048xbf16>, vector<16x2048xf32> -> vector<16x2048xf32>
    %c0_10 = arith.constant 0 : index
    %c0_11 = arith.constant 0 : index
    %8 = vector.load %arg4[%c0_10, %c0_11] : memref<1x2048xf32, #tpu.memory_space<vmem>>, vector<1x2048xf32>
    %9 = vector.broadcast %8 : vector<1x2048xf32> to vector<16x2048xf32>
    %10 = arith.addf %7, %9 : vector<16x2048xf32>
    %cst_12 = arith.constant 0.000000e+00 : f32
    %11 = vector.broadcast %cst_12 : f32 to vector<16x2048xf32>
    %12 = arith.cmpf ogt, %10, %11 : vector<16x2048xf32>
    %cst_13 = arith.constant 2.000000e-01 : f32
    %13 = vector.broadcast %cst_13 : f32 to vector<16x2048xf32>
    %14 = arith.mulf %13, %10 : vector<16x2048xf32>
    %15 = arith.select %12, %10, %14 : vector<16x2048xi1>, vector<16x2048xf32>
    %16 = arith.truncf %15 : vector<16x2048xf32> to vector<16x2048xbf16>
    %c0_14 = arith.constant 0 : index
    %c0_15 = arith.constant 0 : index
    %17 = vector.load %arg5[%c0_14, %c0_15] : memref<2048x1024xbf16, #tpu.memory_space<vmem>>, vector<2048x1024xbf16>
    %cst_16 = arith.constant dense<0.000000e+00> : vector<16x1024xf32>
    %18 = tpu.matmul %16, %17, %cst_16 {dimension_numbers = #tpu.dot_dimension_numbers<[1], [0], [0], [1], [0, 0, 1, 1], [], []>} : vector<16x2048xbf16>, vector<2048x1024xbf16>, vector<16x1024xf32> -> vector<16x1024xf32>
    %c0_17 = arith.constant 0 : index
    %c0_18 = arith.constant 0 : index
    %19 = vector.load %arg6[%c0_17, %c0_18] : memref<1x1024xf32, #tpu.memory_space<vmem>>, vector<1x1024xf32>
    %20 = vector.broadcast %19 : vector<1x1024xf32> to vector<16x1024xf32>
    %21 = arith.addf %18, %20 : vector<16x1024xf32>
    %cst_19 = arith.constant 0.000000e+00 : f32
    %22 = vector.broadcast %cst_19 : f32 to vector<16x1024xf32>
    %23 = arith.cmpf ogt, %21, %22 : vector<16x1024xf32>
    %cst_20 = arith.constant 2.000000e-01 : f32
    %24 = vector.broadcast %cst_20 : f32 to vector<16x1024xf32>
    %25 = arith.mulf %24, %21 : vector<16x1024xf32>
    %26 = arith.select %23, %21, %25 : vector<16x1024xi1>, vector<16x1024xf32>
    %27 = arith.truncf %26 : vector<16x1024xf32> to vector<16x1024xbf16>
    %c0_21 = arith.constant 0 : index
    %c0_22 = arith.constant 0 : index
    %28 = vector.load %arg7[%c0_21, %c0_22] : memref<1024x512xbf16, #tpu.memory_space<vmem>>, vector<1024x512xbf16>
    %cst_23 = arith.constant dense<0.000000e+00> : vector<16x512xf32>
    %29 = tpu.matmul %27, %28, %cst_23 {dimension_numbers = #tpu.dot_dimension_numbers<[1], [0], [0], [1], [0, 0, 1, 1], [], []>} : vector<16x1024xbf16>, vector<1024x512xbf16>, vector<16x512xf32> -> vector<16x512xf32>
    %c0_24 = arith.constant 0 : index
    %c0_25 = arith.constant 0 : index
    %30 = vector.load %arg8[%c0_24, %c0_25] : memref<1x512xf32, #tpu.memory_space<vmem>>, vector<1x512xf32>
    %31 = vector.broadcast %30 : vector<1x512xf32> to vector<16x512xf32>
    %32 = arith.addf %29, %31 : vector<16x512xf32>
    %cst_26 = arith.constant 0.000000e+00 : f32
    %33 = vector.broadcast %cst_26 : f32 to vector<16x512xf32>
    %34 = arith.cmpf ogt, %32, %33 : vector<16x512xf32>
    %cst_27 = arith.constant 2.000000e-01 : f32
    %35 = vector.broadcast %cst_27 : f32 to vector<16x512xf32>
    %36 = arith.mulf %35, %32 : vector<16x512xf32>
    %37 = arith.select %34, %32, %36 : vector<16x512xi1>, vector<16x512xf32>
    %38 = arith.truncf %37 : vector<16x512xf32> to vector<16x512xbf16>
    %c0_28 = arith.constant 0 : index
    %c0_29 = arith.constant 0 : index
    %39 = vector.load %arg9[%c0_28, %c0_29] : memref<512x256xbf16, #tpu.memory_space<vmem>>, vector<512x256xbf16>
    %cst_30 = arith.constant dense<0.000000e+00> : vector<16x256xf32>
    %40 = tpu.matmul %38, %39, %cst_30 {dimension_numbers = #tpu.dot_dimension_numbers<[1], [0], [0], [1], [0, 0, 1, 1], [], []>} : vector<16x512xbf16>, vector<512x256xbf16>, vector<16x256xf32> -> vector<16x256xf32>
    %c0_31 = arith.constant 0 : index
    %c0_32 = arith.constant 0 : index
    %41 = vector.load %arg10[%c0_31, %c0_32] : memref<1x256xf32, #tpu.memory_space<vmem>>, vector<1x256xf32>
    %42 = vector.broadcast %41 : vector<1x256xf32> to vector<16x256xf32>
    %43 = arith.addf %40, %42 : vector<16x256xf32>
    %cst_33 = arith.constant 0.000000e+00 : f32
    %44 = vector.broadcast %cst_33 : f32 to vector<16x256xf32>
    %45 = arith.cmpf ogt, %43, %44 : vector<16x256xf32>
    %cst_34 = arith.constant 2.000000e-01 : f32
    %46 = vector.broadcast %cst_34 : f32 to vector<16x256xf32>
    %47 = arith.mulf %46, %43 : vector<16x256xf32>
    %48 = arith.select %45, %43, %47 : vector<16x256xi1>, vector<16x256xf32>
    %49 = arith.truncf %48 : vector<16x256xf32> to vector<16x256xbf16>
    %c0_35 = arith.constant 0 : index
    %c0_36 = arith.constant 0 : index
    %50 = vector.load %arg11[%c0_35, %c0_36] : memref<256x128xbf16, #tpu.memory_space<vmem>>, vector<256x128xbf16>
    %cst_37 = arith.constant dense<0.000000e+00> : vector<16x128xf32>
    %51 = tpu.matmul %49, %50, %cst_37 {dimension_numbers = #tpu.dot_dimension_numbers<[1], [0], [0], [1], [0, 0, 1, 1], [], []>} : vector<16x256xbf16>, vector<256x128xbf16>, vector<16x128xf32> -> vector<16x128xf32>
    %c0_38 = arith.constant 0 : index
    %c0_39 = arith.constant 0 : index
    %52 = vector.load %arg12[%c0_38, %c0_39] : memref<1x128xf32, #tpu.memory_space<vmem>>, vector<1x128xf32>
    %53 = vector.broadcast %52 : vector<1x128xf32> to vector<16x128xf32>
    %54 = arith.addf %51, %53 : vector<16x128xf32>
    %c0_40 = arith.constant 0 : index
    %c0_41 = arith.constant 0 : index
    %55 = vector.load %arg13[%c0_40, %c0_41] : memref<16x128xf32, #tpu.memory_space<vmem>>, vector<16x128xf32>
    tpu.vector_store %arg13[%c0_40, %c0_41], %54 {strides = array<i32>} : memref<16x128xf32, #tpu.memory_space<vmem>>, vector<16x128xf32>,
    return
  }
  func.func @transform_0(%arg0: i32) -> (i32, i32) {
    %c0_i32 = arith.constant 0 : i32
    %c0_i32_0 = arith.constant 0 : i32
    return %arg0, %c0_i32 : i32, i32
  }
  func.func @transform_1(%arg0: i32) -> (i32, i32) {
    %c0_i32 = arith.constant 0 : i32
    %c0_i32_0 = arith.constant 0 : i32
    return %arg0, %c0_i32 : i32, i32
  }
  func.func @transform_2(%arg0: i32) -> (i32, i32) {
    %c0_i32 = arith.constant 0 : i32
    %c0_i32_0 = arith.constant 0 : i32
    %c0_i32_1 = arith.constant 0 : i32
    return %c0_i32, %c0_i32_0 : i32, i32
  }
  func.func @transform_3(%arg0: i32) -> (i32, i32) {
    %c0_i32 = arith.constant 0 : i32
    %c0_i32_0 = arith.constant 0 : i32
    %c0_i32_1 = arith.constant 0 : i32
    return %c0_i32, %c0_i32_0 : i32, i32
  }
  func.func @transform_4(%arg0: i32) -> (i32, i32) {
    %c0_i32 = arith.constant 0 : i32
    %c0_i32_0 = arith.constant 0 : i32
    %c0_i32_1 = arith.constant 0 : i32
    return %c0_i32, %c0_i32_0 : i32, i32
  }
  func.func @transform_5(%arg0: i32) -> (i32, i32) {
    %c0_i32 = arith.constant 0 : i32
    %c0_i32_0 = arith.constant 0 : i32
    %c0_i32_1 = arith.constant 0 : i32
    return %c0_i32, %c0_i32_0 : i32, i32
  }
  func.func @transform_6(%arg0: i32) -> (i32, i32) {
    %c0_i32 = arith.constant 0 : i32
    %c0_i32_0 = arith.constant 0 : i32
    %c0_i32_1 = arith.constant 0 : i32
    return %c0_i32, %c0_i32_0 : i32, i32
  }
  func.func @transform_7(%arg0: i32) -> (i32, i32) {
    %c0_i32 = arith.constant 0 : i32
    %c0_i32_0 = arith.constant 0 : i32
    %c0_i32_1 = arith.constant 0 : i32
    return %c0_i32, %c0_i32_0 : i32, i32
  }
  func.func @transform_8(%arg0: i32) -> (i32, i32) {
    %c0_i32 = arith.constant 0 : i32
    %c0_i32_0 = arith.constant 0 : i32
    %c0_i32_1 = arith.constant 0 : i32
    return %c0_i32, %c0_i32_0 : i32, i32
  }
  func.func @transform_9(%arg0: i32) -> (i32, i32) {
    %c0_i32 = arith.constant 0 : i32
    %c0_i32_0 = arith.constant 0 : i32
    %c0_i32_1 = arith.constant 0 : i32
    return %c0_i32, %c0_i32_0 : i32, i32
  }
  func.func @transform_10(%arg0: i32) -> (i32, i32) {
    %c0_i32 = arith.constant 0 : i32
    %c0_i32_0 = arith.constant 0 : i32
    %c0_i32_1 = arith.constant 0 : i32
    return %c0_i32, %c0_i32_0 : i32, i32
  }
  func.func @transform_11(%arg0: i32) -> (i32, i32) {
    %c0_i32 = arith.constant 0 : i32
    %c0_i32_0 = arith.constant 0 : i32
    %c0_i32_1 = arith.constant 0 : i32
    return %c0_i32, %c0_i32_0 : i32, i32
  }
  func.func @transform_12(%arg0: i32) -> (i32, i32) {
    %c0_i32 = arith.constant 0 : i32
    %c0_i32_0 = arith.constant 0 : i32
    return %arg0, %c0_i32 : i32, i32
  }
}

</mosaic_0001>

<bundles_post_ra>
// kernel: tpu_custom_call.1
= control target key start
LH: loop header
LB: loop body
LE: loop exit
PB: predicated region body
PF: predicated region fallthrough
CT: control target
= control target key end

     0   :  { %17 = vsyncpa [#allocation4], 0  ;;  %s14404_s0 = inlined_call_operand.hbm [shape: f32[16,32], index: 0, kind: input, shape index: {}]   ;;  %s14405_s1 = inlined_call_operand.hbm [shape: f32[16,16], index: 1, kind: input, shape index: {}]   ;;  %s14406_s2 = inlined_call_operand.hbm [shape: bf16[48,2048], index: 2, kind: input, shape index: {}]   ;;  %s14407_s3 = inlined_call_operand.hbm [shape: f32[1,2048], index: 3, kind: input, shape index: {}]   ;;  %s14408_s4 = inlined_call_operand.hbm [shape: bf16[2048,1024], index: 4, kind: input, shape index: {}]   ;;  %s14409_s5 = inlined_call_operand.hbm [shape: f32[1,1024], index: 5, kind: input, shape index: {}]   ;;  %s14410_s6 = inlined_call_operand.hbm [shape: bf16[1024,512], index: 6, kind: input, shape index: {}]   ;;  %s14411_s7 = inlined_call_operand.hbm [shape: f32[1,512], index: 7, kind: input, shape index: {}]   ;;  %s14412_s8 = inlined_call_operand.hbm [shape: bf16[512,256], index: 8, kind: input, shape index: {}]   ;;  %s14413_s9 = inlined_call_operand.hbm [shape: f32[1,256], index: 9, kind: input, shape index: {}]   ;;  %s14414_s10 = inlined_call_operand.hbm [shape: bf16[256,128], index: 10, kind: input, shape index: {}]   ;;  %s14415_s11 = inlined_call_operand.hbm [shape: f32[1,128], index: 11, kind: input, shape index: {}]   ;;  %s14416_s12 = inlined_call_operand.hbm [shape: f32[16,128], index: 12, kind: output, shape index: {}]  }
   0x1   :  { %18 = vsyncpa [#allocation7], 0 }
   0x2   :  { %19 = vsyncpa [#allocation10], 0 }
   0x3   :  { %20 = vsyncpa [#allocation13], 0 }
   0x4   :  { %21 = vsyncpa [#allocation16], 0 }
   0x5   :  { %22 = vsyncpa [#allocation19], 0 }
   0x6   :  { %23 = vsyncpa [#allocation22], 0 }
   0x7   :  { %24 = vsyncpa [#allocation5], 0  ;;  %s13723_s21 = smov [#allocation6]   ;;  %s13724_s23 = smov [#allocation9]  }
   0x8   :  { %s42_s22 = sshll.u32 %s13723_s21, 4  ;;  %s67_s24 = sshll.u32 %s13724_s23, 4  ;;  %s43_s22 = int_to_ptr.vmem [resolvable:$true] %s42_s22  ;;  %s68_s24 = int_to_ptr.vmem [resolvable:$true] %s67_s24 }
   0x9   :  { %s13421_s27 = scalar_lea.hbm %s14405_s1, 256 }
   0xa   :  { %p13422_p0 = scmp.ne.s32.totalorder %s14405_s1, %s13421_s27  ;;  %p13425_p1 = scmp.lt.u32.totalorder %s13421_s27, %s14405_s1 }
   0xc   :  { %p13427_p2 = pnand %p13425_p1, %p13422_p0 }
   0xe   :  { %13430 = shalt.err (!%p13427_p2)
}
   0xf   :  { %s13431_s14 = scalar_lea.vmem %s43_s22, 256  ;;  %p13436_p4 = scmp.lt.s32.totalorder %s43_s22, %s43_s22 }
  0x10   :  { %p13432_p3 = scmp.ne.s32.totalorder %s43_s22, %s13431_s14  ;;  %p13437_p5 = scmp.lt.s32.totalorder %s13431_s14, %s13431_s14 }
  0x12   :  { %p13438_p6 = por %p13437_p5, %p13436_p4 }
  0x14   :  { %p13439_p7 = pnand %p13438_p6, %p13432_p3 }
  0x16   :  { %13442 = shalt.err (!%p13439_p7)
}
  0x17   :  { %s13725_s15 = smov 128   ;;  %s13726_s16 = smov 8  }
  0x18   :  { %48 = dma.hbm_to_vmem [thread:$0]  %s14405_s1, 256, %s43_s22, [#allocation7], %s13725_s15, %s13725_s15, %s13726_s16  }
  0x19   :  { %s13443_s21 = scalar_lea.hbm %s14407_s3, 256 }
  0x1a   :  { %p13444_p8 = scmp.ne.s32.totalorder %s14407_s3, %s13443_s21  ;;  %p13447_p9 = scmp.lt.u32.totalorder %s13443_s21, %s14407_s3 }
  0x1c   :  { %p13449_p10 = pnand %p13447_p9, %p13444_p8 }
  0x1e   :  { %13452 = shalt.err (!%p13449_p10)
}
  0x1f   :  { %s13453_s28 = scalar_lea.vmem %s68_s24, 256  ;;  %p13458_p12 = scmp.lt.s32.totalorder %s68_s24, %s68_s24 }
  0x20   :  { %p13454_p11 = scmp.ne.s32.totalorder %s68_s24, %s13453_s28  ;;  %p13459_p13 = scmp.lt.s32.totalorder %s13453_s28, %s13453_s28 }
  0x22   :  { %p13460_p0 = por %p13459_p13, %p13458_p12 }
  0x24   :  { %p13461_p1 = pnand %p13460_p0, %p13454_p11 }
  0x26   :  { %13464 = shalt.err (!%p13461_p1)
}
  0x27   :  { %70 = dma.hbm_to_vmem [thread:$0]  %s14407_s3, 256, %s68_s24, [#allocation10]  }
  0x28   :  { %s13727_s29 = smov [#allocation12]   ;;  %s13728_s13 = smov [#allocation15]  }
  0x29   :  { %s89_s30 = sshll.u32 %s13727_s29, 4  ;;  %s111_s14 = sshll.u32 %s13728_s13, 4  ;;  %s90_s30 = int_to_ptr.vmem [resolvable:$true] %s89_s30  ;;  %s112_s14 = int_to_ptr.vmem [resolvable:$true] %s111_s14 }
  0x2a   :  { %s13465_s19 = scalar_lea.hbm %s14409_s5, 128 }
  0x2b   :  { %p13466_p2 = scmp.ne.s32.totalorder %s14409_s5, %s13465_s19  ;;  %p13469_p3 = scmp.lt.u32.totalorder %s13465_s19, %s14409_s5 }
  0x2d   :  { %p13471_p4 = pnand %p13469_p3, %p13466_p2 }
  0x2f   :  { %13474 = shalt.err (!%p13471_p4)
}
  0x30   :  { %s13475_s3 = scalar_lea.vmem %s90_s30, 128  ;;  %p13480_p6 = scmp.lt.s32.totalorder %s90_s30, %s90_s30 }
  0x31   :  { %p13476_p5 = scmp.ne.s32.totalorder %s90_s30, %s13475_s3  ;;  %p13481_p7 = scmp.lt.s32.totalorder %s13475_s3, %s13475_s3 }
  0x33   :  { %p13482_p8 = por %p13481_p7, %p13480_p6 }
  0x35   :  { %p13483_p9 = pnand %p13482_p8, %p13476_p5 }
  0x37   :  { %13486 = shalt.err (!%p13483_p9)
}
  0x38   :  { %92 = dma.hbm_to_vmem [thread:$0]  %s14409_s5, 128, %s90_s30, [#allocation13]  }
  0x39   :  { %s13487_s1 = scalar_lea.hbm %s14411_s7, 64 }
  0x3a   :  { %p13488_p10 = scmp.ne.s32.totalorder %s14411_s7, %s13487_s1  ;;  %p13491_p11 = scmp.lt.u32.totalorder %s13487_s1, %s14411_s7 }
  0x3c   :  { %p13493_p12 = pnand %p13491_p11, %p13488_p10 }
  0x3e   :  { %13496 = shalt.err (!%p13493_p12)
}
  0x3f   :  { %s13497_s18 = scalar_lea.vmem %s112_s14, 64  ;;  %p13502_p0 = scmp.lt.s32.totalorder %s112_s14, %s112_s14 }
  0x40   :  { %p13498_p13 = scmp.ne.s32.totalorder %s112_s14, %s13497_s18  ;;  %p13503_p1 = scmp.lt.s32.totalorder %s13497_s18, %s13497_s18 }
  0x42   :  { %p13504_p2 = por %p13503_p1, %p13502_p0 }
  0x44   :  { %p13505_p3 = pnand %p13504_p2, %p13498_p13 }
  0x46   :  { %13508 = shalt.err (!%p13505_p3)
}
  0x47   :  { %114 = dma.hbm_to_vmem [thread:$0]  %s14411_s7, 64, %s112_s14, [#allocation16]  }
  0x48   :  { %s13729_s19 = smov [#allocation18]   ;;  %s13730_s21 = smov [#allocation3]  }
  0x49   :  { %s133_s20 = sshll.u32 %s13729_s19, 4  ;;  %s30_s23 = sshll.u32 %s13730_s21, 4  ;;  %s134_s20 = int_to_ptr.vmem [resolvable:$true] %s133_s20  ;;  %s13862_s23 = int_to_ptr.vmem [resolvable:$true] %s30_s23 }
  0x4a   :  { %s13509_s24 = scalar_lea.hbm %s14413_s9, 32 }
  0x4b   :  { %p13510_p4 = scmp.ne.s32.totalorder %s14413_s9, %s13509_s24  ;;  %p13513_p5 = scmp.lt.u32.totalorder %s13509_s24, %s14413_s9 }
  0x4d   :  { %p13515_p6 = pnand %p13513_p5, %p13510_p4 }
  0x4f   :  { %13518 = shalt.err (!%p13515_p6)
}
  0x50   :  { %s13519_s7 = scalar_lea.vmem %s134_s20, 32  ;;  %p13524_p8 = scmp.lt.s32.totalorder %s134_s20, %s134_s20 }
  0x51   :  { %p13520_p7 = scmp.ne.s32.totalorder %s134_s20, %s13519_s7  ;;  %p13525_p9 = scmp.lt.s32.totalorder %s13519_s7, %s13519_s7 }
  0x53   :  { %p13526_p10 = por %p13525_p9, %p13524_p8 }
  0x55   :  { %p13527_p11 = pnand %p13526_p10, %p13520_p7 }
  0x57   :  { %13530 = shalt.err (!%p13527_p11)
}
  0x58   :  { %136 = dma.hbm_to_vmem [thread:$0]  %s14413_s9, 32, %s134_s20, [#allocation19]  }
  0x59   :  { %s13531_s17 = scalar_lea.hbm %s14404_s0, 256 }
  0x5a   :  { %p13532_p12 = scmp.ne.s32.totalorder %s14404_s0, %s13531_s17  ;;  %p13535_p13 = scmp.lt.u32.totalorder %s13531_s17, %s14404_s0 }
  0x5c   :  { %p13537_p0 = pnand %p13535_p13, %p13532_p12 }
  0x5e   :  { %13540 = shalt.err (!%p13537_p0)
}
  0x5f   :  { %s13541_s21 = scalar_lea.vmem %s13862_s23, 256  ;;  %p13546_p2 = scmp.lt.s32.totalorder %s13862_s23, %s13862_s23 }
  0x60   :  { %p13542_p1 = scmp.ne.s32.totalorder %s13862_s23, %s13541_s21  ;;  %p13547_p3 = scmp.lt.s32.totalorder %s13541_s21, %s13541_s21 }
  0x62   :  { %p13548_p4 = por %p13547_p3, %p13546_p2 }
  0x64   :  { %p13549_p5 = pnand %p13548_p4, %p13542_p1 }
  0x66   :  { %13552 = shalt.err (!%p13549_p5)
}
  0x67   :  { %36 = dma.hbm_to_vmem [thread:$0]  %s14404_s0, 256, %s13862_s23, [#allocation4], %s13725_s15, %s13725_s15, %s13726_s16  }
  0x68   :  { %s13731_s25 = smov [#allocation8]   ;;  %s13553_s27 = scalar_lea.hbm %s14406_s2, 6144 }
  0x69   :  { %s54_s3 = sshll.u32 %s13731_s25, 4  ;;  %p13554_p6 = scmp.ne.s32.totalorder %s14406_s2, %s13553_s27  ;;  %s55_s3 = int_to_ptr.vmem [resolvable:$true] %s54_s3 }
  0x6a   :  { %p13557_p7 = scmp.lt.u32.totalorder %s13553_s27, %s14406_s2 }
  0x6c   :  { %p13559_p8 = pnand %p13557_p7, %p13554_p6 }
  0x6e   :  { %13562 = shalt.err (!%p13559_p8)
}
  0x6f   :  { %s13563_s22 = scalar_lea.vmem %s55_s3, 6144  ;;  %p13568_p10 = scmp.lt.s32.totalorder %s55_s3, %s55_s3 }
  0x70   :  { %p13564_p9 = scmp.ne.s32.totalorder %s55_s3, %s13563_s22  ;;  %p13569_p11 = scmp.lt.s32.totalorder %s13563_s22, %s13563_s22 }
  0x72   :  { %p13570_p12 = por %p13569_p11, %p13568_p10 }
  0x74   :  { %p13571_p13 = pnand %p13570_p12, %p13564_p9 }
  0x76   :  { %13574 = shalt.err (!%p13571_p13)
}
  0x77   :  { %s13732_s0 = smov 1024   ;;  %s13733_s23 = smov 64  }
  0x78   :  { %60 = dma.hbm_to_vmem [thread:$0]  %s14406_s2, 6144, %s55_s3, [#allocation7], %s13732_s0, %s13732_s0, %s13733_s23  }
  0x79   :  { %s13734_s17 = smov [#allocation11]   ;;  %s13575_s19 = scalar_lea.hbm %s14408_s4, 131072 }
  0x7a   :  { %s76_s18 = sshll.u32 %s13734_s17, 4  ;;  %p13576_p0 = scmp.ne.s32.totalorder %s14408_s4, %s13575_s19  ;;  %s77_s18 = int_to_ptr.vmem [resolvable:$true] %s76_s18 }
  0x7b   :  { %p13579_p1 = scmp.lt.u32.totalorder %s13575_s19, %s14408_s4 }
  0x7d   :  { %p13581_p2 = pnand %p13579_p1, %p13576_p0 }
  0x7f   :  { %13584 = shalt.err (!%p13581_p2)
}
  0x80   :  { %s13585_s24 = scalar_lea.vmem %s77_s18, 131072  ;;  %p13590_p4 = scmp.lt.s32.totalorder %s77_s18, %s77_s18 }
  0x81   :  { %p13586_p3 = scmp.ne.s32.totalorder %s77_s18, %s13585_s24  ;;  %p13591_p5 = scmp.lt.s32.totalorder %s13585_s24, %s13585_s24 }
  0x83   :  { %p13592_p6 = por %p13591_p5, %p13590_p4 }
  0x85   :  { %p13593_p7 = pnand %p13592_p6, %p13586_p3 }
  0x87   :  { %13596 = shalt.err (!%p13593_p7)
}
  0x88   :  { %s13735_s2 = smov 512   ;;  %s13736_s3 = smov 32  }
  0x89   :  { %82 = dma.hbm_to_vmem [thread:$0]  %s14408_s4, 131072, %s77_s18, [#allocation10], %s13735_s2, %s13735_s2, %s13736_s3  }
  0x8a   :  { %s13737_s28 = smov [#allocation14]   ;;  %s13597_s22 = scalar_lea.hbm %s14410_s6, 32768 }
  0x8b   :  { %s98_s1 = sshll.u32 %s13737_s28, 4  ;;  %p13598_p8 = scmp.ne.s32.totalorder %s14410_s6, %s13597_s22  ;;  %s99_s1 = int_to_ptr.vmem [resolvable:$true] %s98_s1 }
  0x8c   :  { %p13601_p9 = scmp.lt.u32.totalorder %s13597_s22, %s14410_s6 }
  0x8e   :  { %p13603_p10 = pnand %p13601_p9, %p13598_p8 }
  0x90   :  { %13606 = shalt.err (!%p13603_p10)
}
  0x91   :  { %s13607_s5 = scalar_lea.vmem %s99_s1, 32768  ;;  %p13612_p12 = scmp.lt.s32.totalorder %s99_s1, %s99_s1 }
  0x92   :  { %p13608_p11 = scmp.ne.s32.totalorder %s99_s1, %s13607_s5  ;;  %p13613_p13 = scmp.lt.s32.totalorder %s13607_s5, %s13607_s5 }
  0x94   :  { %p13614_p0 = por %p13613_p13, %p13612_p12 }
  0x96   :  { %p13615_p1 = pnand %p13614_p0, %p13608_p11 }
  0x98   :  { %13618 = shalt.err (!%p13615_p1)
}
  0x99   :  { %s13738_s4 = smov 256   ;;  %s13739_s18 = smov 16  }
  0x9a   :  { %104 = dma.hbm_to_vmem [thread:$0]  %s14410_s6, 32768, %s99_s1, [#allocation13], %s13738_s4, %s13738_s4, %s13739_s18  }
  0x9b   :  { %s13740_s21 = smov [#allocation17]   ;;  %s13741_s20 = smov [#allocation20]  }
  0x9c   :  { %s120_s9 = sshll.u32 %s13740_s21, 4  ;;  %s142_s25 = sshll.u32 %s13741_s20, 4  ;;  %s121_s9 = int_to_ptr.vmem [resolvable:$true] %s120_s9  ;;  %s143_s25 = int_to_ptr.vmem [resolvable:$true] %s142_s25 }
  0x9d   :  { %s13619_s26 = scalar_lea.hbm %s14412_s8, 8192 }
  0x9e   :  { %p13620_p2 = scmp.ne.s32.totalorder %s14412_s8, %s13619_s26  ;;  %p13623_p3 = scmp.lt.u32.totalorder %s13619_s26, %s14412_s8 }
  0xa0   :  { %p13625_p4 = pnand %p13623_p3, %p13620_p2 }
  0xa2   :  { %13628 = shalt.err (!%p13625_p4)
}
  0xa3   :  { %s13629_s6 = scalar_lea.vmem %s121_s9, 8192  ;;  %p13634_p6 = scmp.lt.s32.totalorder %s121_s9, %s121_s9 }
  0xa4   :  { %p13630_p5 = scmp.ne.s32.totalorder %s121_s9, %s13629_s6  ;;  %p13635_p7 = scmp.lt.s32.totalorder %s13629_s6, %s13629_s6 }
  0xa6   :  { %p13636_p8 = por %p13635_p7, %p13634_p6 }
  0xa8   :  { %p13637_p9 = pnand %p13636_p8, %p13630_p5 }
  0xaa   :  { %13640 = shalt.err (!%p13637_p9)
}
  0xab   :  { %126 = dma.hbm_to_vmem [thread:$0]  %s14412_s8, 8192, %s121_s9, [#allocation16], %s13725_s15, %s13725_s15, %s13726_s16  }
  0xac   :  { %s13641_s13 = scalar_lea.hbm %s14414_s10, 2048 }
  0xad   :  { %p13642_p10 = scmp.ne.s32.totalorder %s14414_s10, %s13641_s13  ;;  %p13645_p11 = scmp.lt.u32.totalorder %s13641_s13, %s14414_s10 }
  0xaf   :  { %p13647_p12 = pnand %p13645_p11, %p13642_p10 }
  0xb1   :  { %13650 = shalt.err (!%p13647_p12)
}
  0xb2   :  { %s13651_s30 = scalar_lea.vmem %s143_s25, 2048  ;;  %p13656_p0 = scmp.lt.s32.totalorder %s143_s25, %s143_s25 }
  0xb3   :  { %p13652_p13 = scmp.ne.s32.totalorder %s143_s25, %s13651_s30  ;;  %p13657_p1 = scmp.lt.s32.totalorder %s13651_s30, %s13651_s30 }
  0xb5   :  { %p13658_p2 = por %p13657_p1, %p13656_p0 }
  0xb7   :  { %p13659_p3 = pnand %p13658_p2, %p13652_p13 }
  0xb9   :  { %13662 = shalt.err (!%p13659_p3)
}
  0xba   :  { %s13742_s8 = smov 4   ;;  %s13743_s9 = smov [#allocation21]  }
  0xbb   :  { %148 = dma.hbm_to_vmem [thread:$0]  %s14414_s10, 2048, %s143_s25, [#allocation19], %s13733_s23, %s13733_s23, %s13742_s8  }
  0xbc   :  { %s155_s20 = sshll.u32 %s13743_s9, 4  ;;  %s13663_s26 = scalar_lea.hbm %s14415_s11, 16  ;;  %s156_s20 = int_to_ptr.vmem [resolvable:$true] %s155_s20 }
  0xbd   :  { %p13664_p4 = scmp.ne.s32.totalorder %s14415_s11, %s13663_s26  ;;  %p13667_p5 = scmp.lt.u32.totalorder %s13663_s26, %s14415_s11 }
  0xbf   :  { %p13669_p6 = pnand %p13667_p5, %p13664_p4 }
  0xc1   :  { %13672 = shalt.err (!%p13669_p6)
}
  0xc2   :  { %s13673_s6 = scalar_lea.vmem %s156_s20, 16  ;;  %s13677_s10 = scalar_lea.vmem %s156_s20, 32 }
  0xc3   :  { %p13674_p7 = scmp.ne.s32.totalorder %s156_s20, %s13673_s6  ;;  %p13678_p8 = scmp.lt.s32.totalorder %s156_s20, %s156_s20 }
  0xc4   :  { %p13679_p9 = scmp.lt.s32.totalorder %s13677_s10, %s13673_s6 }
  0xc6   :  { %p13680_p10 = por %p13679_p9, %p13678_p8 }
  0xc8   :  { %p13681_p11 = pnand %p13680_p10, %p13674_p7 }
  0xca   :  { %13684 = shalt.err (!%p13681_p11)
}
  0xcb   :  { %158 = dma.hbm_to_vmem [thread:$0]  %s14415_s11, 16, %s156_s20, [#allocation22]  }
  0xcc   :  { %13707 = dma.done.wait [#allocation4], 256  }
  0xcd   :  { %13708 = vsyncadd [#allocation4], 4294967040 }
  0xce   :  { %13709 = dma.done.wait [#allocation7], 6400  }
  0xcf   :  { %13710 = vsyncadd [#allocation7], 4294960896 }
  0xd0   :  { %13711 = dma.done.wait [#allocation10], 131328  }
  0xd1   :  { %13712 = vsyncadd [#allocation10], 4294835968 }
  0xd2   :  { %13713 = dma.done.wait [#allocation13], 32896  }
  0xd3   :  { %13714 = vsyncadd [#allocation13], 4294934400 }
  0xd4   :  { %13715 = dma.done.wait [#allocation16], 8256  }
  0xd5   :  { %13716 = vsyncadd [#allocation16], 4294959040 }
  0xd6   :  { %13717 = dma.done.wait [#allocation19], 2080  }
  0xd7   :  { %13718 = vsyncadd [#allocation19], 4294965216 }
  0xd8   :  { %13719 = dma.done.wait [#allocation22], 16  }
  0xd9   :  { %13720 = vsyncadd [#allocation22], 4294967280  ;;  %v13744_v0 = vmov 0   ;;  %vm198_vm0 = vcmask 261120   ;;  %v201_v1 = vld [vmem:[#allocation6] sm:$0xff]  ;;  %v202_v2 = vld [vmem:[#allocation6 + $0x8] sm:$0xff] }
  0xda   :  { %625 = vmatprep.mubr.bf16.mxu0 %v13744_v0  ;;  %754 = vmatprep.mubr.bf16.mxu1 %v13744_v0  ;;  %v196_v3 = vld [vmem:[#allocation3] sm:$0xff]  ;;  %v220_v6 = vld [vmem:[#allocation8 + $0x18] sm:$0xff]  ;;  %v197_v10 = vld [vmem:[#allocation3 + $0x8] sm:$0xff]  ;;  %vm211_vm1 = vcmask 392448   ;;  %vm589_vm2 = vcmask 392192   ;;  %s13745_s11 = smov [#allocation23]  }
  0xdb   :  { %205 = vrot.lane.b32.xlu0 %v201_v1, %s13736_s3  ;;  %199 = vst.msk [vmem:[#allocation2] sm:$0xff] %vm198_vm0, %v196_v3  ;;  %v217_v4 = vld [vmem:[#allocation8] sm:$0xff]  ;;  %v228_v8 = vld [vmem:[#allocation8 + $0x58] sm:$0xff]  ;;  %200 = vst.msk [vmem:[#allocation2 + $0x8] sm:$0xff] %vm198_vm0, %v197_v10 }
  0xdc   :  { %v225_v5 = vld [vmem:[#allocation8 + $0x40] sm:$0xff]  ;;  %v11301_v12 = vcombine.high %v220_v6, %v228_v8  ;;  %v11300_v13 = vcombine.low %v220_v6, %v228_v8  ;;  %v236_v15 = vld [vmem:[#allocation8 + $0x98] sm:$0xff]  ;;  %v218_v23 = vld [vmem:[#allocation8 + $0x8] sm:$0xff] }
  0xdd   :  { %v11295_v7 = vcombine.high %v217_v4, %v225_v5  ;;  %v11294_v9 = vcombine.low %v217_v4, %v225_v5  ;;  %v233_v11 = vld [vmem:[#allocation8 + $0x80] sm:$0xff]  ;;  %v244_v16 = vld [vmem:[#allocation8 + $0xd8] sm:$0xff]  ;;  %v226_v24 = vld [vmem:[#allocation8 + $0x48] sm:$0xff] }
  0xde   :  { %v241_v14 = vld [vmem:[#allocation8 + $0xc0] sm:$0xff]  ;;  %v11317_v18 = vcombine.high %v236_v15, %v244_v16  ;;  %v252_v21 = vld [vmem:[#allocation8 + $0x118] sm:$0xff]  ;;  %722 = vmatprep.subr.bf16.mxu1 %v11301_v12  ;;  %v11316_v26 = vcombine.low %v236_v15, %v244_v16  ;;  %v11296_v27 = vcombine.low %v218_v23, %v226_v24  ;;  %v222_v28 = vld [vmem:[#allocation8 + $0x28] sm:$0xff]  ;;  %v11297_v35 = vcombine.high %v218_v23, %v226_v24 }
  0xdf   :  { %593 = vmatprep.subr.bf16.mxu0 %v11295_v7  ;;  %v11311_v17 = vcombine.high %v233_v11, %v241_v14  ;;  %v249_v19 = vld [vmem:[#allocation8 + $0x100] sm:$0xff]  ;;  %207 = vrot.lane.b32.xlu0 %v202_v2, %s13736_s3  ;;  %v260_v22 = vld [vmem:[#allocation8 + $0x158] sm:$0xff]  ;;  %v11310_v25 = vcombine.low %v233_v11, %v241_v14  ;;  %v230_v29 = vld [vmem:[#allocation8 + $0x68] sm:$0xff]  ;;  %s11276_s3 = sshll.u32 %s13745_s11, 4  ;;  %s11277_s3 = int_to_ptr.vmem [resolvable:$true] %s11276_s3 }
  0xe0   :  { %v257_v20 = vld [vmem:[#allocation8 + $0x140] sm:$0xff]  ;;  %594 = vmatpush1.bf16.msra.mxu0 %v11294_v9  ;;  %723 = vmatpush1.bf16.msra.mxu1 %v11300_v13  ;;  %v11333_v31 = vcombine.high %v252_v21, %v260_v22  ;;  %v11304_v32 = vcombine.low %v222_v28, %v230_v29  ;;  %v11332_v34 = vcombine.low %v252_v21, %v260_v22  ;;  %v234_v39 = vld [vmem:[#allocation8 + $0x88] sm:$0xff]  ;;  %v219_v54 = vld [vmem:[#allocation8 + $0x10] sm:$0xff]  ;;  %s13685_s1 = scalar_lea.vmem %s11277_s3, 256  ;;  %p13690_p13 = scmp.lt.s32.totalorder %s11277_s3, %s11277_s3 }
  0xe1   :  { %595 = vmatprep.subr.bf16.mxu0 %v11311_v17  ;;  %724 = vmatprep.subr.bf16.mxu1 %v11317_v18  ;;  %v11327_v30 = vcombine.high %v249_v19, %v257_v20  ;;  %v11326_v33 = vcombine.low %v249_v19, %v257_v20  ;;  %v11305_v36 = vcombine.high %v222_v28, %v230_v29  ;;  %v242_v40 = vld [vmem:[#allocation8 + $0xc8] sm:$0xff]  ;;  %v227_v55 = vld [vmem:[#allocation8 + $0x50] sm:$0xff]  ;;  %v224_v56 = vld [vmem:[#allocation8 + $0x38] sm:$0xff]  ;;  %p13686_p12 = scmp.ne.s32.totalorder %s11277_s3, %s13685_s1  ;;  %p13691_p0 = scmp.lt.s32.totalorder %s13685_s1, %s13685_s1 }
  0xe2   :  { %v238_v41 = vld [vmem:[#allocation8 + $0xa8] sm:$0xff]  ;;  %v11313_v50 = vcombine.high %v234_v39, %v242_v40  ;;  %v11312_v52 = vcombine.low %v234_v39, %v242_v40  ;;  %v232_v57 = vld [vmem:[#allocation8 + $0x78] sm:$0xff]  ;;  %v235_v62 = vld [vmem:[#allocation8 + $0x90] sm:$0xff]  ;;  %v11299_v3 = vcombine.high %v219_v54, %v227_v55  ;;  %v11298_v5 = vcombine.low %v219_v54, %v227_v55 }
  0xe3   :  { %v246_v42 = vld [vmem:[#allocation8 + $0xe8] sm:$0xff]  ;;  %v243_v63 = vld [vmem:[#allocation8 + $0xd0] sm:$0xff]  ;;  %v240_v1 = vld [vmem:[#allocation8 + $0xb8] sm:$0xff]  ;;  %v11309_v4 = vcombine.high %v224_v56, %v232_v57  ;;  %v11308_v6 = vcombine.low %v224_v56, %v232_v57  ;;  %p13692_p1 = por %p13691_p0, %p13690_p13 }
  0xe4   :  { %596 = vmatpush1.bf16.msra.mxu0 %v11310_v25  ;;  %725 = vmatpush1.bf16.msra.mxu1 %v11316_v26  ;;  %v250_v45 = vld [vmem:[#allocation8 + $0x108] sm:$0xff]  ;;  %v11321_v51 = vcombine.high %v238_v41, %v246_v42  ;;  %v11320_v53 = vcombine.low %v238_v41, %v246_v42  ;;  %v248_v2 = vld [vmem:[#allocation8 + $0xf8] sm:$0xff]  ;;  %v251_v7 = vld [vmem:[#allocation8 + $0x110] sm:$0xff]  ;;  %v11315_v11 = vcombine.high %v235_v62, %v243_v63 }
  0xe5   :  { %597 = vmatprep.subr.bf16.mxu0 %v11327_v30  ;;  %726 = vmatprep.subr.bf16.mxu1 %v11333_v31  ;;  %v258_v46 = vld [vmem:[#allocation8 + $0x148] sm:$0xff]  ;;  %v259_v8 = vld [vmem:[#allocation8 + $0x150] sm:$0xff]  ;;  %v256_v9 = vld [vmem:[#allocation8 + $0x138] sm:$0xff]  ;;  %v11325_v12 = vcombine.high %v240_v1, %v248_v2  ;;  %v11314_v13 = vcombine.low %v235_v62, %v243_v63  ;;  %v11324_v14 = vcombine.low %v240_v1, %v248_v2  ;;  %p13693_p2 = pnand %p13692_p1, %p13686_p12 }
  0xe6   :  { %v254_v47 = vld [vmem:[#allocation8 + $0x128] sm:$0xff]  ;;  %v11329_v58 = vcombine.high %v250_v45, %v258_v46  ;;  %v11328_v60 = vcombine.low %v250_v45, %v258_v46  ;;  %v264_v10 = vld [vmem:[#allocation8 + $0x178] sm:$0xff]  ;;  %v221_v15 = vld [vmem:[#allocation8 + $0x20] sm:$0xff]  ;;  %v11331_v19 = vcombine.high %v251_v7, %v259_v8  ;;  %v11330_v21 = vcombine.low %v251_v7, %v259_v8 }
  0xe7   :  { %v262_v48 = vld [vmem:[#allocation8 + $0x168] sm:$0xff]  ;;  %v229_v16 = vld [vmem:[#allocation8 + $0x60] sm:$0xff]  ;;  %v1049_v17 = vld [vmem:[#allocation11] sm:$0xff]  ;;  %v11341_v20 = vcombine.high %v256_v9, %v264_v10  ;;  %v11340_v22 = vcombine.low %v256_v9, %v264_v10 }
  0xe8   :  { %598 = vmatpush1.bf16.msra.mxu0 %v11326_v33  ;;  %727 = vmatpush1.bf16.msra.mxu1 %v11332_v34  ;;  %v11337_v59 = vcombine.high %v254_v47, %v262_v48  ;;  %v11336_v61 = vcombine.low %v254_v47, %v262_v48  ;;  %v1053_v18 = vld [vmem:[#allocation11 + $0x20] sm:$0xff]  ;;  %v237_v23 = vld [vmem:[#allocation8 + $0xa0] sm:$0xff]  ;;  %v11303_v25 = vcombine.high %v221_v15, %v229_v16 }
  0xe9   :  { %636 = vmatprep.subr.bf16.mxu0 %v11297_v35  ;;  %808 = vmatprep.subr.bf16.mxu1 %v11305_v36  ;;  %v245_v24 = vld [vmem:[#allocation8 + $0xe0] sm:$0xff]  ;;  %v11351_v26 = vcombine.high %v1049_v17, %v1053_v18  ;;  %v1061_v28 = vld [vmem:[#allocation11 + $0x60] sm:$0xff]  ;;  %v11302_v29 = vcombine.low %v221_v15, %v229_v16  ;;  %v11350_v31 = vcombine.low %v1049_v17, %v1053_v18 }
  0xea   :  { %v11319_v30 = vcombine.high %v237_v23, %v245_v24  ;;  %v261_v33 = vld [vmem:[#allocation8 + $0x160] sm:$0xff]  ;;  %v1065_v35 = vld [vmem:[#allocation11 + $0x80] sm:$0xff] }
  0xeb   :  { %v1069_v36 = vld [vmem:[#allocation11 + $0xa0] sm:$0xff] }
  0xec   :  { %v223_v40 = vld [vmem:[#allocation8 + $0x30] sm:$0xff]  ;;  %v11367_v42 = vcombine.high %v1065_v35, %v1069_v36  ;;  %v11366_v47 = vcombine.low %v1065_v35, %v1069_v36 }
  0xed   :  { %v231_v41 = vld [vmem:[#allocation8 + $0x70] sm:$0xff] }
  0xee   :  { %v11307_v46 = vcombine.high %v223_v40, %v231_v41  ;;  %v239_v48 = vld [vmem:[#allocation8 + $0xb0] sm:$0xff]  ;;  %v11306_v54 = vcombine.low %v223_v40, %v231_v41 }
  0xef   :  { %v255_v57 = vld [vmem:[#allocation8 + $0x130] sm:$0xff] }
  0xf0   :  { %v1177_v2 = vld [vmem:[#allocation11 + $0x400] sm:$0xff] }
  0xf1   :  { %v1185_v10 = vld [vmem:[#allocation11 + $0x440] sm:$0xff] }
  0xf2   :  { %v1193_v17 = vld [vmem:[#allocation11 + $0x480] sm:$0xff] }
  0xf3   :  { %v1197_v18 = vld [vmem:[#allocation11 + $0x4a0] sm:$0xff] }
  0xf4   :  { %v1129_v35 = vld [vmem:[#allocation11 + $0x280] sm:$0xff] }
  0xf5   :  { %v1133_v36 = vld [vmem:[#allocation11 + $0x2a0] sm:$0xff] }
  0xf6   :  { %v1217_v40 = vld [vmem:[#allocation11 + $0x540] sm:$0xff] }
  0xf7   :  { %v1221_v41 = vld [vmem:[#allocation11 + $0x560] sm:$0xff] }
 0x14d   :  { %v206_v37 = vpop.permute.xlu0 %205 }
 0x14e   :  { %212 = vst.msk [vmem:[#allocation2] sm:$0xff] %vm211_vm1, %v206_v37  ;;  %v11318_v37 = vcombine.low %v237_v23, %v245_v24  ;;  %v11495_v23 = vcombine.high %v1193_v17, %v1197_v18 }
 0x151   :  { %v208_v38 = vpop.permute.xlu0 %207 }
 0x152   :  { %213 = vst.msk [vmem:[#allocation2 + $0x8] sm:$0xff] %vm211_vm1, %v208_v38 }
 0x155   :  { %v214_v43 = vld [vmem:[#allocation2] sm:$0xff] }
 0x159   :  { %v215_v44 = vld [vmem:[#allocation2 + $0x8] sm:$0xff] }
 0x15a   :  { %v13981_v49 = vpack.c.bf16 %v215_v44, %v214_v43  ;;  %v1073_v43 = vld [vmem:[#allocation11 + $0xc0] sm:$0xff] }
 0x15b   :  { %v1077_v44 = vld [vmem:[#allocation11 + $0xe0] sm:$0xff] }
 0x15c   :  { %11342 = vmatmul.mubr.msk.bf16.vlgmr.msra.gmra.mrb[0].mxu0 %vm589_vm2, %v13981_v49  ;;  %11345 = vmatmul.mubr.msk.bf16.vlgmr.msra.gmra.mrb[0].mxu1 %vm589_vm2, %v13981_v49  ;;  %v11374_v56 = vcombine.low %v1073_v43, %v1077_v44 }
 0x15d   :  { %637 = vmatpush1.bf16.msra.mxu0 %v11296_v27  ;;  %809 = vmatpush1.bf16.msra.mxu1 %v11304_v32  ;;  %v1057_v27 = vld [vmem:[#allocation11 + $0x40] sm:$0xff]  ;;  %v253_v32 = vld [vmem:[#allocation8 + $0x120] sm:$0xff] }
 0x15e   :  { %638 = vmatprep.subr.bf16.mxu0 %v11313_v50  ;;  %810 = vmatprep.subr.bf16.mxu1 %v11321_v51  ;;  %v11359_v34 = vcombine.high %v1057_v27, %v1061_v28  ;;  %v11335_v38 = vcombine.high %v253_v32, %v261_v33  ;;  %v11358_v39 = vcombine.low %v1057_v27, %v1061_v28  ;;  %v247_v50 = vld [vmem:[#allocation8 + $0xf0] sm:$0xff] }
 0x15f   :  { %668 = vmatprep.mubr.bf16.mxu0 %v13744_v0  ;;  %840 = vmatprep.mubr.bf16.mxu1 %v13744_v0  ;;  %v11334_v45 = vcombine.low %v253_v32, %v261_v33  ;;  %v11375_v51 = vcombine.high %v1073_v43, %v1077_v44  ;;  %v11323_v55 = vcombine.high %v239_v48, %v247_v50  ;;  %v1121_v28 = vld [vmem:[#allocation11 + $0x240] sm:$0xff] }
 0x160   :  { %v11322_v62 = vcombine.low %v239_v48, %v247_v50  ;;  %v1209_v32 = vld [vmem:[#allocation11 + $0x500] sm:$0xff] }
 0x161   :  { %639 = vmatpush1.bf16.msra.mxu0 %v11312_v52  ;;  %811 = vmatpush1.bf16.msra.mxu1 %v11320_v53  ;;  %v1081_v52 = vld [vmem:[#allocation11 + $0x100] sm:$0xff] }
 0x162   :  { %640 = vmatprep.subr.bf16.mxu0 %v11329_v58  ;;  %812 = vmatprep.subr.bf16.mxu1 %v11337_v59  ;;  %v1085_v53 = vld [vmem:[#allocation11 + $0x120] sm:$0xff] }
 0x163   :  { %v263_v58 = vld [vmem:[#allocation8 + $0x170] sm:$0xff]  ;;  %v11383_v59 = vcombine.high %v1081_v52, %v1085_v53  ;;  %v11382_v1 = vcombine.low %v1081_v52, %v1085_v53 }
 0x164   :  { %v11339_v63 = vcombine.high %v255_v57, %v263_v58  ;;  %v11338_v7 = vcombine.low %v255_v57, %v263_v58  ;;  %v1213_v33 = vld [vmem:[#allocation11 + $0x520] sm:$0xff] }
 0x165   :  { %641 = vmatpush1.bf16.msra.mxu0 %v11328_v60  ;;  %813 = vmatpush1.bf16.msra.mxu1 %v11336_v61  ;;  %v1089_v60 = vld [vmem:[#allocation11 + $0x140] sm:$0xff] }
 0x166   :  { %679 = vmatprep.subr.bf16.mxu0 %v11299_v3  ;;  %894 = vmatprep.subr.bf16.mxu1 %v11309_v4  ;;  %v1093_v61 = vld [vmem:[#allocation11 + $0x160] sm:$0xff] }
 0x167   :  { %v1181_v3 = vld [vmem:[#allocation11 + $0x420] sm:$0xff]  ;;  %v11391_v4 = vcombine.high %v1089_v60, %v1093_v61  ;;  %v11390_v9 = vcombine.low %v1089_v60, %v1093_v61 }
 0x168   :  { %11343 = vmatmul.mubr.msk.bf16.vlgmr.msra.gmra.mrb[4].mxu0 %vm589_vm2, %v13981_v49  ;;  %11347 = vmatmul.mubr.msk.bf16.vlgmr.msra.gmra.mrb[4].mxu1 %vm589_vm2, %v13981_v49  ;;  %v11479_v8 = vcombine.high %v1177_v2, %v1181_v3  ;;  %v1137_v43 = vld [vmem:[#allocation11 + $0x2c0] sm:$0xff] }
 0x169   :  { %680 = vmatpush1.bf16.msra.mxu0 %v11298_v5  ;;  %895 = vmatpush1.bf16.msra.mxu1 %v11308_v6  ;;  %v1097_v5 = vld [vmem:[#allocation11 + $0x180] sm:$0xff] }
 0x16a   :  { %681 = vmatprep.subr.bf16.mxu0 %v11315_v11  ;;  %896 = vmatprep.subr.bf16.mxu1 %v11325_v12  ;;  %v1101_v6 = vld [vmem:[#allocation11 + $0x1a0] sm:$0xff] }
 0x16b   :  { %711 = vmatprep.mubr.bf16.mxu0 %v13744_v0  ;;  %926 = vmatprep.mubr.bf16.mxu1 %v13744_v0  ;;  %v1189_v11 = vld [vmem:[#allocation11 + $0x460] sm:$0xff]  ;;  %v11398_v16 = vcombine.low %v1097_v5, %v1101_v6 }
 0x16c   :  { %v1105_v12 = vld [vmem:[#allocation11 + $0x1c0] sm:$0xff]  ;;  %v11487_v15 = vcombine.high %v1185_v10, %v1189_v11 }
 0x16d   :  { %682 = vmatpush1.bf16.msra.mxu0 %v11314_v13  ;;  %897 = vmatpush1.bf16.msra.mxu1 %v11324_v14  ;;  %v1109_v13 = vld [vmem:[#allocation11 + $0x1e0] sm:$0xff]  ;;  %v11478_v14 = vcombine.low %v1177_v2, %v1181_v3 }
 0x16e   :  { %683 = vmatprep.subr.bf16.mxu0 %v11331_v19  ;;  %898 = vmatprep.subr.bf16.mxu1 %v11341_v20  ;;  %v11407_v19 = vcombine.high %v1105_v12, %v1109_v13  ;;  %v1113_v20 = vld [vmem:[#allocation11 + $0x200] sm:$0xff]  ;;  %v11406_v24 = vcombine.low %v1105_v12, %v1109_v13 }
 0x16f   :  { %v1141_v44 = vld [vmem:[#allocation11 + $0x2e0] sm:$0xff] }
 0x170   :  { %v1225_v48 = vld [vmem:[#allocation11 + $0x580] sm:$0xff] }
 0x171   :  { %684 = vmatpush1.bf16.msra.mxu0 %v11330_v21  ;;  %899 = vmatpush1.bf16.msra.mxu1 %v11340_v22  ;;  %v1117_v21 = vld [vmem:[#allocation11 + $0x220] sm:$0xff]  ;;  %v11486_v22 = vcombine.low %v1185_v10, %v1189_v11 }
 0x172   :  { %765 = vmatprep.subr.bf16.mxu0 %v11303_v25  ;;  %7235 = vmatprep.subr.bf16.mxu1 %v11351_v26  ;;  %v1201_v25 = vld [vmem:[#allocation11 + $0x4c0] sm:$0xff]  ;;  %v11415_v27 = vcombine.high %v1113_v20, %v1117_v21 }
 0x173   :  { %v1205_v26 = vld [vmem:[#allocation11 + $0x4e0] sm:$0xff] }
 0x174   :  { %11344 = vmatmul.mubr.msk.bf16.vlgmr.msra.gmra.mrb[8].mxu0 %vm589_vm2, %v13981_v49  ;;  %11349 = vmatmul.mubr.msk.bf16.vlgmr.msra.gmra.mrb[8].mxu1 %vm589_vm2, %v13981_v49  ;;  %v1229_v50 = vld [vmem:[#allocation11 + $0x5a0] sm:$0xff] }
 0x175   :  { %766 = vmatpush1.bf16.msra.mxu0 %v11302_v29  ;;  %797 = vmatprep.mubr.bf16.mxu0 %v13744_v0  ;;  %v1125_v29 = vld [vmem:[#allocation11 + $0x260] sm:$0xff] }
 0x176   :  { %767 = vmatprep.subr.bf16.mxu0 %v11319_v30  ;;  %7236 = vmatpush1.bf16.msra.mxu1 %v11350_v31  ;;  %v11494_v30 = vcombine.low %v1193_v17, %v1197_v18  ;;  %v11503_v31 = vcombine.high %v1201_v25, %v1205_v26  ;;  %v1145_v52 = vld [vmem:[#allocation11 + $0x300] sm:$0xff] }
 0x177   :  { %7237 = vmatprep.subr.bf16.mxu1 %v11359_v34  ;;  %v11423_v34 = vcombine.high %v1121_v28, %v1125_v29  ;;  %v1149_v53 = vld [vmem:[#allocation11 + $0x320] sm:$0xff] }
 0x178   :  { %v1233_v57 = vld [vmem:[#allocation11 + $0x5c0] sm:$0xff] }
 0x179   :  { %768 = vmatpush1.bf16.msra.mxu0 %v11318_v37  ;;  %v11502_v37 = vcombine.low %v1201_v25, %v1205_v26  ;;  %v1237_v58 = vld [vmem:[#allocation11 + $0x5e0] sm:$0xff] }
 0x17a   :  { %769 = vmatprep.subr.bf16.mxu0 %v11335_v38  ;;  %7238 = vmatpush1.bf16.msra.mxu1 %v11358_v39  ;;  %v11511_v38 = vcombine.high %v1209_v32, %v1213_v33  ;;  %v11422_v39 = vcombine.low %v1121_v28, %v1125_v29  ;;  %v1153_v60 = vld [vmem:[#allocation11 + $0x340] sm:$0xff] }
 0x17b   :  { %7239 = vmatprep.subr.bf16.mxu1 %v11367_v42  ;;  %v11431_v42 = vcombine.high %v1129_v35, %v1133_v36  ;;  %v1157_v61 = vld [vmem:[#allocation11 + $0x360] sm:$0xff] }
 0x17c   :  { %v1241_v2 = vld [vmem:[#allocation11 + $0x600] sm:$0xff] }
 0x17d   :  { %770 = vmatpush1.bf16.msra.mxu0 %v11334_v45  ;;  %v11510_v45 = vcombine.low %v1209_v32, %v1213_v33  ;;  %v1245_v3 = vld [vmem:[#allocation11 + $0x620] sm:$0xff]  ;;  %v14005_v33 = vld [vmem:[#allocation11 + $0x8] sm:$0xff] }
 0x17e   :  { %851 = vmatprep.subr.bf16.mxu0 %v11307_v46  ;;  %7240 = vmatpush1.bf16.msra.mxu1 %v11366_v47  ;;  %v11519_v46 = vcombine.high %v1217_v40, %v1221_v41  ;;  %v11430_v47 = vcombine.low %v1129_v35, %v1133_v36  ;;  %v11542_v10 = vcombine.low %v1241_v2, %v1245_v3  ;;  %v1261_v12 = vld [vmem:[#allocation11 + $0x6a0] sm:$0xff] }
 0x17f   :  { %7241 = vmatprep.subr.bf16.mxu1 %v11375_v51  ;;  %v11439_v51 = vcombine.high %v1137_v43, %v1141_v44  ;;  %v1161_v18 = vld [vmem:[#allocation11 + $0x380] sm:$0xff] }
 0x180   :  { %11346 = vmatmul.mubr.msk.bf16.vlgmr.msra.gmra.mrb[12].mxu0 %vm589_vm2, %v13981_v49  ;;  %v1169_v26 = vld [vmem:[#allocation11 + $0x3c0] sm:$0xff] }
 0x181   :  { %852 = vmatpush1.bf16.msra.mxu0 %v11306_v54  ;;  %883 = vmatprep.mubr.bf16.mxu0 %v13744_v0  ;;  %v11399_v0 = vcombine.high %v1097_v5, %v1101_v6  ;;  %v11518_v54 = vcombine.low %v1217_v40, %v1221_v41  ;;  %v11534_v5 = vcombine.low %v1233_v57, %v1237_v58  ;;  %v1293_v40 = vld [vmem:[#allocation11 + $0x7a0] sm:$0xff] }
 0x182   :  { %853 = vmatprep.subr.bf16.mxu0 %v11323_v55  ;;  %7242 = vmatpush1.bf16.msra.mxu1 %v11374_v56  ;;  %v11527_v55 = vcombine.high %v1225_v48, %v1229_v50  ;;  %v11438_v56 = vcombine.low %v1137_v43, %v1141_v44  ;;  %v11543_v6 = vcombine.high %v1241_v2, %v1245_v3  ;;  %v1297_v43 = vld [vmem:[#allocation11 + $0x7c0] sm:$0xff] }
 0x183   :  { %7243 = vmatprep.subr.bf16.mxu1 %v11383_v59  ;;  %v11447_v59 = vcombine.high %v1145_v52, %v1149_v53  ;;  %v1301_v44 = vld [vmem:[#allocation11 + $0x7e0] sm:$0xff] }
 0x185   :  { %854 = vmatpush1.bf16.msra.mxu0 %v11322_v62  ;;  %v11526_v62 = vcombine.low %v1225_v48, %v1229_v50  ;;  %v14015_v48 = vld [vmem:[#allocation11 + $0x820] sm:$0xff] }
 0x186   :  { %855 = vmatprep.subr.bf16.mxu0 %v11339_v63  ;;  %7244 = vmatpush1.bf16.msra.mxu1 %v11382_v1  ;;  %v11535_v63 = vcombine.high %v1233_v57, %v1237_v58  ;;  %v11446_v1 = vcombine.low %v1145_v52, %v1149_v53  ;;  %v269_v52 = vlaneseq }
 0x187   :  { %7245 = vmatprep.subr.bf16.mxu1 %v11391_v4  ;;  %v11455_v4 = vcombine.high %v1153_v60, %v1157_v61 }
 0x188   :  { %v270_v53 = vshrl.u32 %v269_v52, 7  ;;  %v14079_v52 = vld [vmem:[#allocation11 + $0xc8] sm:$0xff] }
 0x189   :  { %856 = vmatpush1.bf16.msra.mxu0 %v11338_v7  ;;  %v11454_v7 = vcombine.low %v1153_v60, %v1157_v61 }
 0x18a   :  { %7278 = vmatprep.subr.bf16.mxu0 %v11479_v8  ;;  %7246 = vmatpush1.bf16.msra.mxu1 %v11390_v9  ;;  %v1249_v8 = vld [vmem:[#allocation11 + $0x640] sm:$0xff]  ;;  %v14027_v57 = vsub.s32 1, %v270_v53  ;;  %v14029_v58 = vsub.s32 7, %v270_v53  ;;  %v14035_v61 = vsub.s32 2, %v270_v53  ;;  %v14043_v2 = vsub.s32 3, %v270_v53 }
 0x18b   :  { %7247 = vmatprep.subr.bf16.mxu1 %v11399_v0  ;;  %v1253_v9 = vld [vmem:[#allocation11 + $0x660] sm:$0xff] }
 0x18c   :  { %11348 = vmatmul.mubr.msk.bf16.vlgmr.msra.gmra.mrb[16].mxu0 %vm589_vm2, %v13981_v49  ;;  %v11414_v49 = vcombine.low %v1113_v20, %v1117_v21  ;;  %v11551_v11 = vcombine.high %v1249_v8, %v1253_v9  ;;  %v1257_v0 = vld [vmem:[#allocation11 + $0x680] sm:$0xff]  ;;  %v11550_v13 = vcombine.low %v1249_v8, %v1253_v9 }
 0x18d   :  { %7279 = vmatpush1.bf16.msra.mxu0 %v11478_v14  ;;  %v11559_v14 = vcombine.high %v1257_v0, %v1261_v12  ;;  %v11558_v17 = vcombine.low %v1257_v0, %v1261_v12 }
 0x18e   :  { %7280 = vmatprep.subr.bf16.mxu0 %v11487_v15  ;;  %7248 = vmatpush1.bf16.msra.mxu1 %v11398_v16  ;;  %v1265_v15 = vld [vmem:[#allocation11 + $0x6c0] sm:$0xff] }
 0x18f   :  { %7249 = vmatprep.subr.bf16.mxu1 %v11407_v19  ;;  %v1269_v16 = vld [vmem:[#allocation11 + $0x6e0] sm:$0xff] }
 0x190   :  { %v1165_v19 = vld [vmem:[#allocation11 + $0x3a0] sm:$0xff]  ;;  %v11567_v20 = vcombine.high %v1265_v15, %v1269_v16  ;;  %v11566_v25 = vcombine.low %v1265_v15, %v1269_v16 }
 0x191   :  { %7281 = vmatpush1.bf16.msra.mxu0 %v11486_v22  ;;  %v11463_v21 = vcombine.high %v1161_v18, %v1165_v19  ;;  %v11462_v22 = vcombine.low %v1161_v18, %v1165_v19  ;;  %v14061_v19 = vsub.s32 4, %v270_v53 }
 0x192   :  { %7282 = vmatprep.subr.bf16.mxu0 %v11495_v23  ;;  %7250 = vmatpush1.bf16.msra.mxu1 %v11406_v24  ;;  %v1273_v23 = vld [vmem:[#allocation11 + $0x700] sm:$0xff] }
 0x193   :  { %7251 = vmatprep.subr.bf16.mxu1 %v11415_v27  ;;  %v1277_v24 = vld [vmem:[#allocation11 + $0x720] sm:$0xff] }
 0x194   :  { %v1173_v27 = vld [vmem:[#allocation11 + $0x3e0] sm:$0xff]  ;;  %v11575_v28 = vcombine.high %v1273_v23, %v1277_v24  ;;  %v11574_v32 = vcombine.low %v1273_v23, %v1277_v24 }
 0x195   :  { %7283 = vmatpush1.bf16.msra.mxu0 %v11494_v30  ;;  %v11471_v29 = vcombine.high %v1169_v26, %v1173_v27  ;;  %v11470_v30 = vcombine.low %v1169_v26, %v1173_v27 }
 0x196   :  { %7284 = vmatprep.subr.bf16.mxu0 %v11503_v31  ;;  %7252 = vmatpush1.bf16.msra.mxu1 %v11414_v49  ;;  %v1281_v31 = vld [vmem:[#allocation11 + $0x740] sm:$0xff] }
 0x197   :  { %7253 = vmatprep.subr.bf16.mxu1 %v11423_v34  ;;  %v1285_v49 = vld [vmem:[#allocation11 + $0x760] sm:$0xff]  ;;  %v14007_v34 = vld [vmem:[#allocation11 + $0x28] sm:$0xff] }
 0x198   :  { %v11583_v35 = vcombine.high %v1281_v31, %v1285_v49  ;;  %v11353_v36 = vcombine.high %v14005_v33, %v14007_v34 }
 0x199   :  { %7285 = vmatpush1.bf16.msra.mxu0 %v11502_v37  ;;  %v11352_v37 = vcombine.low %v14005_v33, %v14007_v34 }
 0x19a   :  { %7286 = vmatprep.subr.bf16.mxu0 %v11511_v38  ;;  %7254 = vmatpush1.bf16.msra.mxu1 %v11422_v39  ;;  %v11582_v38 = vcombine.low %v1281_v31, %v1285_v49  ;;  %v1289_v39 = vld [vmem:[#allocation11 + $0x780] sm:$0xff]  ;;  %v14067_v31 = vld [vmem:[#allocation11 + $0x68] sm:$0xff] }
 0x19b   :  { %7255 = vmatprep.subr.bf16.mxu1 %v11431_v42  ;;  %v11591_v41 = vcombine.high %v1289_v39, %v1293_v40  ;;  %v11590_v42 = vcombine.low %v1289_v39, %v1293_v40 }
 0x19d   :  { %7287 = vmatpush1.bf16.msra.mxu0 %v11510_v45  ;;  %v11599_v45 = vcombine.high %v1297_v43, %v1301_v44 }
 0x19e   :  { %7288 = vmatprep.subr.bf16.mxu0 %v11519_v46  ;;  %7256 = vmatpush1.bf16.msra.mxu1 %v11430_v47  ;;  %v11598_v46 = vcombine.low %v1297_v43, %v1301_v44  ;;  %v14013_v47 = vld [vmem:[#allocation11 + $0x800] sm:$0xff]  ;;  %v14073_v43 = vld [vmem:[#allocation11 + $0xa8] sm:$0xff] }
 0x19f   :  { %7257 = vmatprep.subr.bf16.mxu1 %v11439_v51  ;;  %v11607_v50 = vcombine.high %v14013_v47, %v14015_v48  ;;  %v11606_v51 = vcombine.low %v14013_v47, %v14015_v48 }
 0x1a1   :  { %7289 = vmatpush1.bf16.msra.mxu0 %v11518_v54  ;;  %v14021_v54 = vsub.s32 0, %v270_v53 }
 0x1a2   :  { %7290 = vmatprep.subr.bf16.mxu0 %v11527_v55  ;;  %7258 = vmatpush1.bf16.msra.mxu1 %v11438_v56  ;;  %v14023_v55 = vsub.s32 6, %v270_v53  ;;  %v14025_v56 = vld [vmem:[#allocation9] sm:$0xff] }
 0x1a3   :  { %7259 = vmatprep.subr.bf16.mxu1 %v11447_v59  ;;  %v272_v59 = vrot.slane %v14025_v56, %v14021_v54  ;;  %v14047_v9 = vrot.slane %v14025_v56, %v14035_v61 }
 0x1a4   :  { %v296_v60 = vrot.slane %v14025_v56, %v14023_v55 }
 0x1a5   :  { %7291 = vmatpush1.bf16.msra.mxu0 %v11526_v62  ;;  %v276_v62 = vrot.slane %v14025_v56, %v14027_v57 }
 0x1a6   :  { %7292 = vmatprep.subr.bf16.mxu0 %v11535_v63  ;;  %7260 = vmatpush1.bf16.msra.mxu1 %v11446_v1  ;;  %v300_v63 = vrot.slane %v14025_v56, %v14029_v58  ;;  %v14041_v1 = vld [vmem:[#allocation9 + $0x8] sm:$0xff] }
 0x1a7   :  { %7261 = vmatprep.subr.bf16.mxu1 %v11455_v4  ;;  %v14059_v15 = vrot.slane %v14041_v1, %v14043_v2 }
 0x1a9   :  { %7293 = vmatpush1.bf16.msra.mxu0 %v11534_v5 }
 0x1aa   :  { %7294 = vmatprep.subr.bf16.mxu0 %v11543_v6  ;;  %7262 = vmatpush1.bf16.msra.mxu1 %v11454_v7 }
 0x1ab   :  { %7263 = vmatprep.subr.bf16.mxu1 %v11463_v21 }
 0x1ad   :  { %7295 = vmatpush1.bf16.msra.mxu0 %v11542_v10  ;;  %v14051_v10 = vrot.slane %v14041_v1, %v14035_v61 }
 0x1ae   :  { %7296 = vmatprep.subr.bf16.mxu0 %v11551_v11  ;;  %7264 = vmatpush1.bf16.msra.mxu1 %v11462_v22 }
 0x1af   :  { %7265 = vmatprep.subr.bf16.mxu1 %v11471_v29 }
 0x1b1   :  { %7297 = vmatpush1.bf16.msra.mxu0 %v11550_v13 }
 0x1b2   :  { %7298 = vmatprep.subr.bf16.mxu0 %v11559_v14  ;;  %7266 = vmatpush1.bf16.msra.mxu1 %v11470_v30  ;;  %v14055_v14 = vrot.slane %v14025_v56, %v14043_v2  ;;  %v14065_v30 = vld [vmem:[#allocation11 + $0x48] sm:$0xff] }
 0x1b3   :  { %7579 = vmatprep.subr.bf16.mxu1 %v11353_v36 }
 0x1b5   :  { %7299 = vmatpush1.bf16.msra.mxu0 %v11558_v17 }
 0x1b6   :  { %7300 = vmatprep.subr.bf16.mxu0 %v11567_v20  ;;  %v14063_v20 = vsub.s32 5, %v270_v53  ;;  %v14081_v53 = vld [vmem:[#allocation11 + $0xe8] sm:$0xff] }
 0x1b9   :  { %7301 = vmatpush1.bf16.msra.mxu0 %v11566_v25 }
 0x1ba   :  { %7302 = vmatprep.subr.bf16.mxu0 %v11575_v28 }
 0x1bd   :  { %7303 = vmatpush1.bf16.msra.mxu0 %v11574_v32 }
 0x1be   :  { %7304 = vmatprep.subr.bf16.mxu0 %v11583_v35 }
 0x1c1   :  { %7305 = vmatpush1.bf16.msra.mxu0 %v11582_v38 }
 0x1c2   :  { %7306 = vmatprep.subr.bf16.mxu0 %v11591_v41 }
 0x1c5   :  { %7307 = vmatpush1.bf16.msra.mxu0 %v11590_v42  ;;  %v14071_v42 = vld [vmem:[#allocation11 + $0x88] sm:$0xff] }
 0x1c6   :  { %7308 = vmatprep.subr.bf16.mxu0 %v11599_v45 }
 0x1c9   :  { %7309 = vmatpush1.bf16.msra.mxu0 %v11598_v46 }
 0x1ca   :  { %7321 = vmatprep.subr.bf16.mxu0 %v11607_v50 }
 0x22f   :  { %v627_v3 = vpop.f32.mrb[0].mxu0  ;;  %v756_v4 = vpop.f32.mrb[0].mxu1 }
 0x230   :  { %v628_v5 = vadd.f32 %v627_v3, %v272_v59  ;;  %v757_v6 = vadd.f32 %v756_v4, %v296_v60  ;;  %v629_v7 = vpop.f32.mrb[1].mxu0  ;;  %v758_v8 = vpop.f32.mrb[1].mxu1  ;;  %v11360_v4 = vcombine.low %v14065_v30, %v14067_v31 }
 0x231   :  { %v630_v11 = vadd.f32 %v629_v7, %v276_v62  ;;  %v759_v0 = vadd.f32 %v758_v8, %v300_v63  ;;  %v631_v12 = vpop.f32.mrb[2].mxu0  ;;  %v760_v13 = vpop.f32.mrb[2].mxu1  ;;  %v14097_v7 = vrot.slane %v14025_v56, %v14061_v19 }
 0x232   :  { %vm937_vm3 = vcmp.gt.f32.partialorder %v628_v5, 0.0  ;;  %v969_v16 = vmul.f32 0.2, %v628_v5  ;;  %vm943_vm4 = vcmp.gt.f32.partialorder %v757_v6, 0.0  ;;  %v975_v17 = vmul.f32 0.2, %v757_v6 }
 0x233   :  { %vm938_vm5 = vcmp.gt.f32.partialorder %v630_v11, 0.0  ;;  %v970_v18 = vmul.f32 0.2, %v630_v11  ;;  %vm944_vm6 = vcmp.gt.f32.partialorder %v759_v0, 0.0  ;;  %v976_v21 = vmul.f32 0.2, %v759_v0 }
 0x234   :  { %v632_v22 = vadd.f32 %v631_v12, %v272_v59  ;;  %v761_v23 = vadd.f32 %v760_v13, %v296_v60  ;;  %v633_v24 = vpop.f32.mrb[3].mxu0  ;;  %v762_v25 = vpop.f32.mrb[3].mxu1  ;;  %v1001_v26 = vsel %vm937_vm3, %v628_v5, %v969_v16  ;;  %v1007_v27 = vsel %vm943_vm4, %v757_v6, %v975_v17  ;;  %v14108_v17 = vld [vmem:[#allocation11 + $0x840] sm:$0xff] }
 0x235   :  { %v634_v28 = vadd.f32 %v633_v24, %v276_v62  ;;  %v763_v29 = vadd.f32 %v762_v25, %v300_v63  ;;  %v1002_v38 = vsel %vm938_vm5, %v630_v11, %v970_v18  ;;  %v1008_v39 = vsel %vm944_vm6, %v759_v0, %v976_v21  ;;  %v14110_v18 = vld [vmem:[#allocation11 + $0x860] sm:$0xff] }
 0x236   :  { %vm953_vm7 = vcmp.gt.f32.partialorder %v632_v22, 0.0  ;;  %v985_v49 = vmul.f32 0.2, %v632_v22  ;;  %vm959_vm8 = vcmp.gt.f32.partialorder %v761_v23, 0.0  ;;  %v991_v32 = vmul.f32 0.2, %v761_v23 }
 0x237   :  { %vm954_vm9 = vcmp.gt.f32.partialorder %v634_v28, 0.0  ;;  %v986_v35 = vmul.f32 0.2, %v634_v28  ;;  %vm960_vm10 = vcmp.gt.f32.partialorder %v763_v29, 0.0  ;;  %v992_v36 = vmul.f32 0.2, %v763_v29 }
 0x238   :  { %v1017_v40 = vsel %vm953_vm7, %v632_v22, %v985_v49  ;;  %v1023_v41 = vsel %vm959_vm8, %v761_v23, %v991_v32  ;;  %v11361_v62 = vcombine.high %v14065_v30, %v14067_v31  ;;  %v11368_v5 = vcombine.low %v14071_v42, %v14073_v43 }
 0x239   :  { %v14075_v44 = vpack.c.bf16 %v1017_v40, %v1001_v26  ;;  %v14077_v45 = vpack.c.bf16 %v1023_v41, %v1007_v27  ;;  %v1018_v46 = vsel %vm954_vm9, %v634_v28, %v986_v35  ;;  %v1024_v50 = vsel %vm960_vm10, %v763_v29, %v992_v36  ;;  %v14139_v40 = vld [vmem:[#allocation11 + $0x128] sm:$0xff] }
 0x23a   :  { %v14083_v59 = vpack.c.bf16 %v1018_v46, %v1002_v38  ;;  %v14085_v60 = vpack.c.bf16 %v1024_v50, %v1008_v39  ;;  %v11369_v6 = vcombine.high %v14071_v42, %v14073_v43  ;;  %v14104_v13 = vrot.slane %v14041_v1, %v14023_v55  ;;  %v14137_v39 = vld [vmem:[#allocation11 + $0x108] sm:$0xff] }
 0x23b   :  { %v670_v63 = vpop.f32.mrb[4].mxu0  ;;  %v842_v3 = vpop.f32.mrb[4].mxu1  ;;  %v11377_v16 = vcombine.high %v14079_v52, %v14081_v53  ;;  %v11376_v25 = vcombine.low %v14079_v52, %v14081_v53  ;;  %v14119_v26 = vrot.slane %v14025_v56, %v14063_v20  ;;  %v14127_v30 = vrot.slane %v14041_v1, %v14029_v58 }
 0x23c   :  { %v671_v8 = vadd.f32 %v670_v63, %v14047_v9  ;;  %v843_v11 = vadd.f32 %v842_v3, %v14051_v10  ;;  %7267 = vmatprep.mubr.bf16.mxu1 %v14083_v59  ;;  %v672_v0 = vpop.f32.mrb[5].mxu0  ;;  %v844_v12 = vpop.f32.mrb[5].mxu1  ;;  %v11615_v56 = vcombine.high %v14108_v17, %v14110_v18  ;;  %v14145_v3 = vld [vmem:[#allocation11 + $0x8a0] sm:$0xff] }
 0x23d   :  { %v673_v21 = vadd.f32 %v672_v0, %v14055_v14  ;;  %v845_v22 = vadd.f32 %v844_v12, %v14059_v15  ;;  %7268 = vmatmul.mubr.bf16.vlgmr.msra.gmra.mrb[12].mxu1 %v14075_v44  ;;  %v674_v23 = vpop.f32.mrb[6].mxu0  ;;  %v846_v24 = vpop.f32.mrb[6].mxu1 }
 0x23e   :  { %vm939_vm11 = vcmp.gt.f32.partialorder %v671_v8, 0.0  ;;  %v971_v27 = vmul.f32 0.2, %v671_v8  ;;  %vm947_vm12 = vcmp.gt.f32.partialorder %v843_v11, 0.0  ;;  %v979_v28 = vmul.f32 0.2, %v843_v11  ;;  %7580 = vmatpush1.bf16.msra.mxu1 %v11352_v37  ;;  %7611 = vmatprep.mubr.bf16.mxu1 %v14083_v59 }
 0x23f   :  { %vm940_vm13 = vcmp.gt.f32.partialorder %v673_v21, 0.0  ;;  %v972_v29 = vmul.f32 0.2, %v673_v21  ;;  %7581 = vmatprep.subr.bf16.mxu1 %v11361_v62  ;;  %vm948_vm14 = vcmp.gt.f32.partialorder %v845_v22, 0.0  ;;  %v980_v31 = vmul.f32 0.2, %v845_v22 }
 0x240   :  { %v675_v49 = vadd.f32 %v674_v23, %v14047_v9  ;;  %v847_v32 = vadd.f32 %v846_v24, %v14051_v10  ;;  %v676_v33 = vpop.f32.mrb[7].mxu0  ;;  %v848_v34 = vpop.f32.mrb[7].mxu1  ;;  %v1003_v37 = vsel %vm939_vm11, %v671_v8, %v971_v27  ;;  %v1011_v35 = vsel %vm947_vm12, %v843_v11, %v979_v28  ;;  %v14141_v10 = vld [vmem:[#allocation11 + $0x880] sm:$0xff]  ;;  %v14147_v8 = vld [vmem:[#allocation11 + $0x148] sm:$0xff] }
 0x241   :  { %v677_v36 = vadd.f32 %v676_v33, %v14055_v14  ;;  %v849_v38 = vadd.f32 %v848_v34, %v14059_v15  ;;  %v1004_v14 = vsel %vm940_vm13, %v673_v21, %v972_v29  ;;  %v1012_v15 = vsel %vm948_vm14, %v845_v22, %v980_v31  ;;  %v14149_v11 = vld [vmem:[#allocation11 + $0x168] sm:$0xff]  ;;  %v14155_v24 = vld [vmem:[#allocation11 + $0x8c0] sm:$0xff] }
 0x242   :  { %vm955_vm15 = vcmp.gt.f32.partialorder %v675_v49, 0.0  ;;  %v987_v41 = vmul.f32 0.2, %v675_v49  ;;  %vm963_vm0 = vcmp.gt.f32.partialorder %v847_v32, 0.0  ;;  %v995_v9 = vmul.f32 0.2, %v847_v32  ;;  %7582 = vmatpush1.bf16.msra.mxu1 %v11360_v4 }
 0x243   :  { %vm956_vm1 = vcmp.gt.f32.partialorder %v677_v36, 0.0  ;;  %v988_v46 = vmul.f32 0.2, %v677_v36  ;;  %vm964_vm2 = vcmp.gt.f32.partialorder %v849_v38, 0.0  ;;  %v996_v50 = vmul.f32 0.2, %v849_v38  ;;  %7583 = vmatprep.subr.bf16.mxu1 %v11369_v6 }
 0x244   :  { %v1019_v62 = vsel %vm955_vm15, %v675_v49, %v987_v41  ;;  %v1027_v63 = vsel %vm963_vm0, %v847_v32, %v995_v9  ;;  %v14157_v6 = vld [vmem:[#allocation11 + $0x8e0] sm:$0xff]  ;;  %v11614_v27 = vcombine.low %v14108_v17, %v14110_v18  ;;  %v11385_v28 = vcombine.high %v14137_v39, %v14139_v40 }
 0x245   :  { %v14151_v4 = vpack.c.bf16 %v1019_v62, %v1003_v37  ;;  %v14153_v0 = vpack.c.bf16 %v1027_v63, %v1011_v35  ;;  %v1020_v12 = vsel %vm956_vm1, %v677_v36, %v988_v46  ;;  %v1028_v23 = vsel %vm964_vm2, %v849_v38, %v996_v50  ;;  %v14188_v36 = vld [vmem:[#allocation11 + $0x188] sm:$0xff] }
 0x246   :  { %v14159_v21 = vpack.c.bf16 %v1020_v12, %v1004_v14  ;;  %v14161_v22 = vpack.c.bf16 %v1028_v23, %v1012_v15  ;;  %7584 = vmatpush1.bf16.msra.mxu1 %v11368_v5  ;;  %v11384_v49 = vcombine.low %v14137_v39, %v14139_v40  ;;  %v11622_v32 = vcombine.low %v14141_v10, %v14145_v3  ;;  %v14190_v38 = vld [vmem:[#allocation11 + $0x1a8] sm:$0xff]  ;;  %v14222_v23 = vld [vmem:[#allocation11 + $0x900] sm:$0xff] }
 0x247   :  { %v713_v29 = vpop.f32.mrb[8].mxu0  ;;  %v928_v31 = vpop.f32.mrb[8].mxu1  ;;  %7585 = vmatprep.subr.bf16.mxu1 %v11377_v16  ;;  %v11623_v42 = vcombine.high %v14141_v10, %v14145_v3  ;;  %v11393_v43 = vcombine.high %v14147_v8, %v14149_v11  ;;  %v11392_v37 = vcombine.low %v14147_v8, %v14149_v11  ;;  %v11630_v35 = vcombine.low %v14155_v24, %v14157_v6  ;;  %v1118_v10 = vld [vmem:[#allocation11 + $0x228] sm:$0xff] }
 0x248   :  { %7310 = vmatprep.mubr.bf16.mxu0 %v14159_v21  ;;  %v714_v5 = vadd.f32 %v713_v29, %v14097_v7  ;;  %v929_v33 = vadd.f32 %v928_v31, %v14104_v13  ;;  %v715_v34 = vpop.f32.mrb[9].mxu0  ;;  %v930_v16 = vpop.f32.mrb[9].mxu1  ;;  %v11631_v46 = vcombine.high %v14155_v24, %v14157_v6  ;;  %v14199_v50 = vrot.slane %v14041_v1, %v14021_v54  ;;  %v1341_v31 = vld [vmem:[#allocation11 + $0x920] sm:$0xff] }
 0x249   :  { %7311 = vmatmul.mubr.bf16.vlgmr.msra.gmra.mrb[20].mxu0 %v14151_v4  ;;  %v716_v39 = vadd.f32 %v715_v34, %v14119_v26  ;;  %v931_v40 = vadd.f32 %v930_v16, %v14127_v30  ;;  %v717_v41 = vpop.f32.mrb[10].mxu0  ;;  %v932_v9 = vpop.f32.mrb[10].mxu1  ;;  %v11401_v63 = vcombine.high %v14188_v36, %v14190_v38  ;;  %v14214_v8 = vrot.slane %v14041_v1, %v14027_v57 }
 0x24a   :  { %vm941_vm3 = vcmp.gt.f32.partialorder %v714_v5, 0.0  ;;  %v973_v14 = vmul.f32 0.2, %v714_v5  ;;  %vm951_vm4 = vcmp.gt.f32.partialorder %v929_v33, 0.0  ;;  %v983_v15 = vmul.f32 0.2, %v929_v33  ;;  %7322 = vmatpush1.bf16.msra.mxu0 %v11606_v51  ;;  %7586 = vmatpush1.bf16.msra.mxu1 %v11376_v25 }
 0x24b   :  { %vm942_vm5 = vcmp.gt.f32.partialorder %v716_v39, 0.0  ;;  %v974_v62 = vmul.f32 0.2, %v716_v39  ;;  %7323 = vmatprep.subr.bf16.mxu0 %v11615_v56  ;;  %7587 = vmatprep.subr.bf16.mxu1 %v11385_v28  ;;  %vm952_vm6 = vcmp.gt.f32.partialorder %v931_v40, 0.0  ;;  %v984_v47 = vmul.f32 0.2, %v931_v40 }
 0x24c   :  { %v718_v48 = vadd.f32 %v717_v41, %v14097_v7  ;;  %v933_v51 = vadd.f32 %v932_v9, %v14104_v13  ;;  %v719_v52 = vpop.f32.mrb[11].mxu0  ;;  %v934_v53 = vpop.f32.mrb[11].mxu1  ;;  %v1005_v25 = vsel %vm941_vm3, %v714_v5, %v973_v14  ;;  %v1015_v17 = vsel %vm951_vm4, %v929_v33, %v983_v15  ;;  %v1106_v5 = vld [vmem:[#allocation11 + $0x1c8] sm:$0xff]  ;;  %v1345_v14 = vld [vmem:[#allocation11 + $0x940] sm:$0xff] }
 0x24d   :  { %v720_v18 = vadd.f32 %v719_v52, %v14119_v26  ;;  %v935_v56 = vadd.f32 %v934_v53, %v14127_v30  ;;  %v1006_v28 = vsel %vm942_vm5, %v716_v39, %v974_v62  ;;  %v1016_v26 = vsel %vm952_vm6, %v931_v40, %v984_v47  ;;  %v1110_v33 = vld [vmem:[#allocation11 + $0x1e8] sm:$0xff]  ;;  %v1349_v15 = vld [vmem:[#allocation11 + $0x960] sm:$0xff] }
 0x24e   :  { %vm957_vm7 = vcmp.gt.f32.partialorder %v718_v48, 0.0  ;;  %v989_v11 = vmul.f32 0.2, %v718_v48  ;;  %vm967_vm8 = vcmp.gt.f32.partialorder %v933_v51, 0.0  ;;  %v999_v12 = vmul.f32 0.2, %v933_v51  ;;  %7324 = vmatpush1.bf16.msra.mxu0 %v11614_v27  ;;  %7588 = vmatpush1.bf16.msra.mxu1 %v11384_v49 }
 0x24f   :  { %vm958_vm9 = vcmp.gt.f32.partialorder %v720_v18, 0.0  ;;  %v990_v7 = vmul.f32 0.2, %v720_v18  ;;  %vm968_vm10 = vcmp.gt.f32.partialorder %v935_v56, 0.0  ;;  %v1000_v13 = vmul.f32 0.2, %v935_v56  ;;  %7325 = vmatprep.subr.bf16.mxu0 %v11623_v42  ;;  %7589 = vmatprep.subr.bf16.mxu1 %v11393_v43 }
 0x250   :  { %v1021_v29 = vsel %vm957_vm7, %v718_v48, %v989_v11  ;;  %v1031_v30 = vsel %vm967_vm8, %v933_v51, %v999_v12  ;;  %v11400_v42 = vcombine.low %v14188_v36, %v14190_v38  ;;  %v11639_v39 = vcombine.high %v14222_v23, %v1341_v31  ;;  %v1114_v48 = vld [vmem:[#allocation11 + $0x208] sm:$0xff]  ;;  %v1353_v52 = vld [vmem:[#allocation11 + $0x980] sm:$0xff] }
 0x251   :  { %v14226_v34 = vpack.c.bf16 %v1021_v29, %v1005_v25  ;;  %v14228_v27 = vpack.c.bf16 %v1031_v30, %v1015_v17  ;;  %v1022_v49 = vsel %vm958_vm9, %v720_v18, %v990_v7  ;;  %v1032_v16 = vsel %vm968_vm10, %v935_v56, %v1000_v13  ;;  %v1357_v53 = vld [vmem:[#allocation11 + $0x9a0] sm:$0xff]  ;;  %v1122_v56 = vld [vmem:[#allocation11 + $0x248] sm:$0xff] }
 0x252   :  { %v14230_v41 = vpack.c.bf16 %v1022_v49, %v1006_v28  ;;  %v14232_v9 = vpack.c.bf16 %v1032_v16, %v1016_v26  ;;  %7326 = vmatpush1.bf16.msra.mxu0 %v11622_v32  ;;  %7590 = vmatpush1.bf16.msra.mxu1 %v11392_v37  ;;  %v11409_v40 = vcombine.high %v1106_v5, %v1110_v33  ;;  %v1126_v11 = vld [vmem:[#allocation11 + $0x268] sm:$0xff]  ;;  %v1361_v29 = vld [vmem:[#allocation11 + $0x9c0] sm:$0xff] }
 0x253   :  { %7327 = vmatprep.subr.bf16.mxu0 %v11631_v46  ;;  %v799_v43 = vpop.f32.mrb[12].mxu0  ;;  %7591 = vmatprep.subr.bf16.mxu1 %v11401_v63  ;;  %v11638_v37 = vcombine.low %v14222_v23, %v1341_v31  ;;  %v11408_v63 = vcombine.low %v1106_v5, %v1110_v33  ;;  %v11647_v51 = vcombine.high %v1345_v14, %v1349_v15  ;;  %v1365_v5 = vld [vmem:[#allocation11 + $0x9e0] sm:$0xff]  ;;  %v1130_v33 = vld [vmem:[#allocation11 + $0x288] sm:$0xff] }
 0x254   :  { %7353 = vmatprep.mubr.bf16.mxu0 %v14230_v41  ;;  %v800_v62 = vadd.f32 %v799_v43, %v14199_v50  ;;  %v801_v47 = vpop.f32.mrb[13].mxu0  ;;  %v11417_v18 = vcombine.high %v1114_v48, %v1118_v10  ;;  %v11646_v6 = vcombine.low %v1345_v14, %v1349_v15  ;;  %v11655_v12 = vcombine.high %v1353_v52, %v1357_v53  ;;  %v1134_v49 = vld [vmem:[#allocation11 + $0x2a8] sm:$0xff]  ;;  %v1369_v15 = vld [vmem:[#allocation11 + $0xa00] sm:$0xff] }
 0x255   :  { %v802_v3 = vadd.f32 %v801_v47, %v14214_v8  ;;  %v803_v32 = vpop.f32.mrb[14].mxu0  ;;  %v11425_v13 = vcombine.high %v1122_v56, %v1126_v11  ;;  %v320_v31 = vrot.slane %v14041_v1, %v14061_v19  ;;  %v324_v16 = vrot.slane %v14041_v1, %v14063_v20 }
 0x256   :  { %v977_v36 = vmul.f32 0.2, %v800_v62  ;;  %7328 = vmatpush1.bf16.msra.mxu0 %v11630_v35  ;;  %7592 = vmatpush1.bf16.msra.mxu1 %v11400_v42  ;;  %v804_v38 = vadd.f32 %v803_v32, %v14199_v50  ;;  %v805_v46 = vpop.f32.mrb[15].mxu0  ;;  %vm945_vm11 = vcmp.gt.f32.partialorder %v800_v62, 0.0  ;;  %v11416_v50 = vcombine.low %v1114_v48, %v1118_v10  ;;  %v1138_v10 = vld [vmem:[#allocation11 + $0x2c8] sm:$0xff] }
 0x257   :  { %v978_v25 = vmul.f32 0.2, %v802_v3  ;;  %v806_v17 = vadd.f32 %v805_v46, %v14214_v8  ;;  %7329 = vmatprep.subr.bf16.mxu0 %v11639_v39  ;;  %7593 = vmatprep.subr.bf16.mxu1 %v11409_v40  ;;  %vm946_vm12 = vcmp.gt.f32.partialorder %v802_v3, 0.0  ;;  %v11654_v42 = vcombine.low %v1353_v52, %v1357_v53  ;;  %v1377_v52 = vld [vmem:[#allocation11 + $0xa40] sm:$0xff] }
 0x258   :  { %vm961_vm13 = vcmp.gt.f32.partialorder %v804_v38, 0.0  ;;  %v993_v24 = vmul.f32 0.2, %v804_v38  ;;  %v1009_v23 = vsel %vm945_vm11, %v800_v62, %v977_v36  ;;  %v11424_v43 = vcombine.low %v1122_v56, %v1126_v11  ;;  %v1373_v62 = vld [vmem:[#allocation11 + $0xa20] sm:$0xff]  ;;  %v1146_v56 = vld [vmem:[#allocation11 + $0x308] sm:$0xff] }
 0x259   :  { %vm962_vm14 = vcmp.gt.f32.partialorder %v806_v17, 0.0  ;;  %v994_v35 = vmul.f32 0.2, %v806_v17  ;;  %v1010_v8 = vsel %vm946_vm12, %v802_v3, %v978_v25  ;;  %v11663_v40 = vcombine.high %v1361_v29, %v1365_v5  ;;  %v1142_v3 = vld [vmem:[#allocation11 + $0x2e8] sm:$0xff]  ;;  %v1381_v53 = vld [vmem:[#allocation11 + $0xa60] sm:$0xff] }
 0x25a   :  { %v1025_v7 = vsel %vm961_vm13, %v804_v38, %v993_v24  ;;  %7330 = vmatpush1.bf16.msra.mxu0 %v11638_v37  ;;  %7594 = vmatpush1.bf16.msra.mxu1 %v11408_v63  ;;  %v11433_v14 = vcombine.high %v1130_v33, %v1134_v49  ;;  %v11662_v36 = vcombine.low %v1361_v29, %v1365_v5  ;;  %v1150_v11 = vld [vmem:[#allocation11 + $0x328] sm:$0xff] }
 0x25b   :  { %v14250_v28 = vpack.c.bf16 %v1025_v7, %v1009_v23  ;;  %v1026_v26 = vsel %vm962_vm14, %v806_v17, %v994_v35  ;;  %7331 = vmatprep.subr.bf16.mxu0 %v11647_v51  ;;  %7595 = vmatprep.subr.bf16.mxu1 %v11417_v18  ;;  %v11432_v63 = vcombine.low %v1130_v33, %v1134_v49  ;;  %v1389_v33 = vld [vmem:[#allocation11 + $0xaa0] sm:$0xff]  ;;  %v1154_v49 = vld [vmem:[#allocation11 + $0x348] sm:$0xff] }
 0x25c   :  { %v14252_v30 = vpack.c.bf16 %v1026_v26, %v1010_v8  ;;  %v11671_v51 = vcombine.high %v1369_v15, %v1373_v62  ;;  %v11441_v18 = vcombine.high %v1138_v10, %v1142_v3 }
 0x25e   :  { %7332 = vmatpush1.bf16.msra.mxu0 %v11646_v6  ;;  %7596 = vmatpush1.bf16.msra.mxu1 %v11416_v50  ;;  %v11670_v6 = vcombine.low %v1369_v15, %v1373_v62  ;;  %v11440_v50 = vcombine.low %v1138_v10, %v1142_v3  ;;  %v1397_v15 = vld [vmem:[#allocation11 + $0xae0] sm:$0xff]  ;;  %v1162_v62 = vld [vmem:[#allocation11 + $0x388] sm:$0xff] }
 0x25f   :  { %7333 = vmatprep.subr.bf16.mxu0 %v11655_v12  ;;  %v885_v39 = vpop.f32.mrb[16].mxu0  ;;  %7597 = vmatprep.subr.bf16.mxu1 %v11425_v13  ;;  %v11679_v12 = vcombine.high %v1377_v52, %v1381_v53  ;;  %v11449_v13 = vcombine.high %v1146_v56, %v1150_v11 }
 0x260   :  { %v886_v47 = vadd.f32 %v885_v39, %v320_v31  ;;  %v887_v48 = vpop.f32.mrb[17].mxu0 }
 0x261   :  { %v888_v32 = vadd.f32 %v887_v48, %v324_v16  ;;  %v889_v37 = vpop.f32.mrb[18].mxu0 }
 0x262   :  { %v981_v38 = vmul.f32 0.2, %v886_v47  ;;  %7334 = vmatpush1.bf16.msra.mxu0 %v11654_v42  ;;  %7598 = vmatpush1.bf16.msra.mxu1 %v11424_v43  ;;  %v890_v1 = vadd.f32 %v889_v37, %v320_v31  ;;  %v891_v46 = vpop.f32.mrb[19].mxu0  ;;  %vm949_vm15 = vcmp.gt.f32.partialorder %v886_v47, 0.0  ;;  %v1385_v31 = vld [vmem:[#allocation11 + $0xa80] sm:$0xff]  ;;  %v11678_v42 = vcombine.low %v1377_v52, %v1381_v53 }
 0x263   :  { %v982_v25 = vmul.f32 0.2, %v888_v32  ;;  %v892_v17 = vadd.f32 %v891_v46, %v324_v16  ;;  %7335 = vmatprep.subr.bf16.mxu0 %v11663_v40  ;;  %7599 = vmatprep.subr.bf16.mxu1 %v11433_v14  ;;  %vm950_vm0 = vcmp.gt.f32.partialorder %v888_v32, 0.0  ;;  %v1158_v16 = vld [vmem:[#allocation11 + $0x368] sm:$0xff]  ;;  %v11448_v43 = vcombine.low %v1146_v56, %v1150_v11  ;;  %v1393_v14 = vld [vmem:[#allocation11 + $0xac0] sm:$0xff] }
 0x264   :  { %vm965_vm1 = vcmp.gt.f32.partialorder %v890_v1, 0.0  ;;  %v997_v24 = vmul.f32 0.2, %v890_v1  ;;  %v1013_v23 = vsel %vm949_vm15, %v886_v47, %v981_v38  ;;  %v11687_v39 = vcombine.high %v1385_v31, %v1389_v33  ;;  %v1166_v47 = vld [vmem:[#allocation11 + $0x3a8] sm:$0xff]  ;;  %v1401_v37 = vld [vmem:[#allocation11 + $0xb00] sm:$0xff] }
 0x265   :  { %vm966_vm2 = vcmp.gt.f32.partialorder %v892_v17, 0.0  ;;  %v998_v35 = vmul.f32 0.2, %v892_v17  ;;  %v1014_v8 = vsel %vm950_vm0, %v888_v32, %v982_v25  ;;  %v11457_v40 = vcombine.high %v1154_v49, %v1158_v16  ;;  %v1170_v38 = vld [vmem:[#allocation11 + $0x3c8] sm:$0xff]  ;;  %v1409_v53 = vld [vmem:[#allocation11 + $0xb40] sm:$0xff] }
 0x266   :  { %v1029_v7 = vsel %vm965_vm1, %v890_v1, %v997_v24  ;;  %7336 = vmatpush1.bf16.msra.mxu0 %v11662_v36  ;;  %7600 = vmatpush1.bf16.msra.mxu1 %v11432_v63  ;;  %v11686_v48 = vcombine.low %v1385_v31, %v1389_v33  ;;  %v11456_v10 = vcombine.low %v1154_v49, %v1158_v16  ;;  %v1405_v36 = vld [vmem:[#allocation11 + $0xb20] sm:$0xff]  ;;  %v1174_v1 = vld [vmem:[#allocation11 + $0x3e8] sm:$0xff] }
 0x267   :  { %v14259_v26 = vpack.c.bf16 %v1029_v7, %v1013_v23  ;;  %v1030_v29 = vsel %vm966_vm2, %v892_v17, %v998_v35  ;;  %7337 = vmatprep.subr.bf16.mxu0 %v11671_v51  ;;  %7601 = vmatprep.subr.bf16.mxu1 %v11441_v18  ;;  %v11695_v3 = vcombine.high %v1393_v14, %v1397_v15  ;;  %v1413_v25 = vld [vmem:[#allocation11 + $0xb60] sm:$0xff]  ;;  %v1178_v17 = vld [vmem:[#allocation11 + $0x408] sm:$0xff] }
 0x268   :  { %v14261_v5 = vpack.c.bf16 %v1030_v29, %v1014_v8  ;;  %v11465_v32 = vcombine.high %v1162_v62, %v1166_v47  ;;  %v11694_v46 = vcombine.low %v1393_v14, %v1397_v15  ;;  %v11464_v63 = vcombine.low %v1162_v62, %v1166_v47  ;;  %v1182_v18 = vld [vmem:[#allocation11 + $0x428] sm:$0xff]  ;;  %v1417_v35 = vld [vmem:[#allocation11 + $0xb80] sm:$0xff] }
 0x269   :  { %v11703_v51 = vcombine.high %v1401_v37, %v1405_v36  ;;  %v11473_v52 = vcombine.high %v1170_v38, %v1174_v1  ;;  %v11702_v56 = vcombine.low %v1401_v37, %v1405_v36  ;;  %v11472_v11 = vcombine.low %v1170_v38, %v1174_v1  ;;  %v1190_v23 = vld [vmem:[#allocation11 + $0x468] sm:$0xff]  ;;  %v1425_v29 = vld [vmem:[#allocation11 + $0xbc0] sm:$0xff] }
 0x26a   :  { %7338 = vmatpush1.bf16.msra.mxu0 %v11670_v6  ;;  %7602 = vmatpush1.bf16.msra.mxu1 %v11440_v50  ;;  %v11711_v24 = vcombine.high %v1409_v53, %v1413_v25  ;;  %v11481_v6 = vcombine.high %v1178_v17, %v1182_v18  ;;  %v1421_v50 = vld [vmem:[#allocation11 + $0xba0] sm:$0xff]  ;;  %v11710_v7 = vcombine.low %v1409_v53, %v1413_v25  ;;  %v1194_v49 = vld [vmem:[#allocation11 + $0x488] sm:$0xff] }
 0x26b   :  { %7339 = vmatprep.subr.bf16.mxu0 %v11679_v12  ;;  %7603 = vmatprep.subr.bf16.mxu1 %v11449_v13  ;;  %v1186_v12 = vld [vmem:[#allocation11 + $0x448] sm:$0xff]  ;;  %v11480_v13 = vcombine.low %v1178_v17, %v1182_v18  ;;  %v11719_v8 = vcombine.high %v1417_v35, %v1421_v50  ;;  %v1429_v33 = vld [vmem:[#allocation11 + $0xbe0] sm:$0xff] }
 0x26c   :  { %v11489_v31 = vcombine.high %v1186_v12, %v1190_v23  ;;  %v1198_v16 = vld [vmem:[#allocation11 + $0x4a8] sm:$0xff]  ;;  %v1433_v14 = vld [vmem:[#allocation11 + $0xc00] sm:$0xff] }
 0x26d   :  { %v1437_v15 = vld [vmem:[#allocation11 + $0xc20] sm:$0xff]  ;;  %v1202_v62 = vld [vmem:[#allocation11 + $0x4c8] sm:$0xff] }
 0x26e   :  { %7340 = vmatpush1.bf16.msra.mxu0 %v11678_v42  ;;  %7604 = vmatpush1.bf16.msra.mxu1 %v11448_v43  ;;  %v11718_v42 = vcombine.low %v1417_v35, %v1421_v50  ;;  %v11488_v43 = vcombine.low %v1186_v12, %v1190_v23  ;;  %v1206_v47 = vld [vmem:[#allocation11 + $0x4e8] sm:$0xff]  ;;  %v1441_v37 = vld [vmem:[#allocation11 + $0xc40] sm:$0xff] }
 0x26f   :  { %7341 = vmatprep.subr.bf16.mxu0 %v11687_v39  ;;  %7605 = vmatprep.subr.bf16.mxu1 %v11457_v40  ;;  %v11727_v39 = vcombine.high %v1425_v29, %v1429_v33  ;;  %v11497_v40 = vcombine.high %v1194_v49, %v1198_v16  ;;  %v1445_v36 = vld [vmem:[#allocation11 + $0xc60] sm:$0xff]  ;;  %v1210_v38 = vld [vmem:[#allocation11 + $0x508] sm:$0xff] }
 0x270   :  { %v1214_v1 = vld [vmem:[#allocation11 + $0x528] sm:$0xff]  ;;  %v1449_v53 = vld [vmem:[#allocation11 + $0xc80] sm:$0xff] }
 0x271   :  { %v1453_v25 = vld [vmem:[#allocation11 + $0xca0] sm:$0xff]  ;;  %v1218_v17 = vld [vmem:[#allocation11 + $0x548] sm:$0xff] }
 0x272   :  { %7342 = vmatpush1.bf16.msra.mxu0 %v11686_v48  ;;  %7606 = vmatpush1.bf16.msra.mxu1 %v11456_v10  ;;  %v11726_v48 = vcombine.low %v1425_v29, %v1429_v33  ;;  %v11496_v10 = vcombine.low %v1194_v49, %v1198_v16  ;;  %v1222_v18 = vld [vmem:[#allocation11 + $0x568] sm:$0xff]  ;;  %v1457_v35 = vld [vmem:[#allocation11 + $0xcc0] sm:$0xff] }
 0x273   :  { %7343 = vmatprep.subr.bf16.mxu0 %v11695_v3  ;;  %7607 = vmatprep.subr.bf16.mxu1 %v11465_v32  ;;  %v11735_v3 = vcombine.high %v1433_v14, %v1437_v15  ;;  %v11505_v32 = vcombine.high %v1202_v62, %v1206_v47  ;;  %v1461_v50 = vld [vmem:[#allocation11 + $0xce0] sm:$0xff]  ;;  %v1226_v12 = vld [vmem:[#allocation11 + $0x588] sm:$0xff] }
 0x274   :  { %v1230_v23 = vld [vmem:[#allocation11 + $0x5a8] sm:$0xff]  ;;  %v1469_v33 = vld [vmem:[#allocation11 + $0xd20] sm:$0xff] }
 0x275   :  { %v11529_v29 = vcombine.high %v1226_v12, %v1230_v23  ;;  %v1234_v49 = vld [vmem:[#allocation11 + $0x5c8] sm:$0xff] }
 0x276   :  { %7344 = vmatpush1.bf16.msra.mxu0 %v11694_v46  ;;  %7608 = vmatpush1.bf16.msra.mxu1 %v11464_v63  ;;  %v11734_v46 = vcombine.low %v1433_v14, %v1437_v15  ;;  %v11504_v63 = vcombine.low %v1202_v62, %v1206_v47  ;;  %v1238_v16 = vld [vmem:[#allocation11 + $0x5e8] sm:$0xff]  ;;  %v1473_v14 = vld [vmem:[#allocation11 + $0xd40] sm:$0xff] }
 0x277   :  { %7345 = vmatprep.subr.bf16.mxu0 %v11703_v51  ;;  %7609 = vmatprep.subr.bf16.mxu1 %v11473_v52  ;;  %v11743_v51 = vcombine.high %v1441_v37, %v1445_v36  ;;  %v11513_v52 = vcombine.high %v1210_v38, %v1214_v1  ;;  %v1477_v15 = vld [vmem:[#allocation11 + $0xd60] sm:$0xff]  ;;  %v1242_v62 = vld [vmem:[#allocation11 + $0x608] sm:$0xff] }
 0x278   :  { %v1246_v47 = vld [vmem:[#allocation11 + $0x628] sm:$0xff] }
 0x27a   :  { %7346 = vmatpush1.bf16.msra.mxu0 %v11702_v56  ;;  %7610 = vmatpush1.bf16.msra.mxu1 %v11472_v11  ;;  %v11742_v56 = vcombine.low %v1441_v37, %v1445_v36  ;;  %v11512_v11 = vcombine.low %v1210_v38, %v1214_v1  ;;  %v1481_v37 = vld [vmem:[#allocation11 + $0xd80] sm:$0xff]  ;;  %v1250_v38 = vld [vmem:[#allocation11 + $0x648] sm:$0xff] }
 0x27b   :  { %7347 = vmatprep.subr.bf16.mxu0 %v11711_v24  ;;  %7622 = vmatprep.subr.bf16.mxu1 %v11481_v6  ;;  %v11751_v24 = vcombine.high %v1449_v53, %v1453_v25  ;;  %v11521_v6 = vcombine.high %v1218_v17, %v1222_v18  ;;  %v1485_v36 = vld [vmem:[#allocation11 + $0xda0] sm:$0xff]  ;;  %v1254_v1 = vld [vmem:[#allocation11 + $0x668] sm:$0xff] }
 0x27d   :  { %7612 = vmatmul.mubr.bf16.vlgmr.msra.gmra.mrb[16].mxu1 %v14075_v44 }
 0x27e   :  { %7348 = vmatpush1.bf16.msra.mxu0 %v11710_v7  ;;  %7623 = vmatpush1.bf16.msra.mxu1 %v11480_v13  ;;  %v11750_v7 = vcombine.low %v1449_v53, %v1453_v25  ;;  %v11520_v13 = vcombine.low %v1218_v17, %v1222_v18  ;;  %v1489_v53 = vld [vmem:[#allocation11 + $0xdc0] sm:$0xff]  ;;  %v1258_v17 = vld [vmem:[#allocation11 + $0x688] sm:$0xff] }
 0x27f   :  { %7654 = vmatprep.mubr.bf16.mxu1 %v14159_v21  ;;  %7349 = vmatprep.subr.bf16.mxu0 %v11719_v8  ;;  %v11759_v8 = vcombine.high %v1457_v35, %v1461_v50  ;;  %v1493_v25 = vld [vmem:[#allocation11 + $0xde0] sm:$0xff]  ;;  %v1262_v18 = vld [vmem:[#allocation11 + $0x6a8] sm:$0xff] }
 0x280   :  { %7624 = vmatprep.subr.bf16.mxu1 %v11489_v31  ;;  %v1465_v31 = vld [vmem:[#allocation11 + $0xd00] sm:$0xff] }
 0x282   :  { %7350 = vmatpush1.bf16.msra.mxu0 %v11718_v42  ;;  %7625 = vmatpush1.bf16.msra.mxu1 %v11488_v43  ;;  %v11758_v42 = vcombine.low %v1457_v35, %v1461_v50  ;;  %v11528_v43 = vcombine.low %v1226_v12, %v1230_v23  ;;  %v1497_v35 = vld [vmem:[#allocation11 + $0xe00] sm:$0xff]  ;;  %v1266_v12 = vld [vmem:[#allocation11 + $0x6c8] sm:$0xff] }
 0x283   :  { %7351 = vmatprep.subr.bf16.mxu0 %v11727_v39  ;;  %7626 = vmatprep.subr.bf16.mxu1 %v11497_v40  ;;  %v11767_v39 = vcombine.high %v1465_v31, %v1469_v33  ;;  %v11537_v40 = vcombine.high %v1234_v49, %v1238_v16  ;;  %v1501_v50 = vld [vmem:[#allocation11 + $0xe20] sm:$0xff]  ;;  %v1270_v23 = vld [vmem:[#allocation11 + $0x6e8] sm:$0xff] }
 0x286   :  { %7352 = vmatpush1.bf16.msra.mxu0 %v11726_v48  ;;  %7627 = vmatpush1.bf16.msra.mxu1 %v11496_v10  ;;  %v11766_v48 = vcombine.low %v1465_v31, %v1469_v33  ;;  %v11536_v10 = vcombine.low %v1234_v49, %v1238_v16  ;;  %v1505_v31 = vld [vmem:[#allocation11 + $0xe40] sm:$0xff]  ;;  %v1274_v49 = vld [vmem:[#allocation11 + $0x708] sm:$0xff] }
 0x287   :  { %7364 = vmatprep.subr.bf16.mxu0 %v11735_v3  ;;  %7628 = vmatprep.subr.bf16.mxu1 %v11505_v32  ;;  %v11775_v3 = vcombine.high %v1473_v14, %v1477_v15  ;;  %v11545_v32 = vcombine.high %v1242_v62, %v1246_v47  ;;  %v1509_v33 = vld [vmem:[#allocation11 + $0xe60] sm:$0xff]  ;;  %v1278_v16 = vld [vmem:[#allocation11 + $0x728] sm:$0xff] }
 0x289   :  { %7354 = vmatmul.mubr.bf16.vlgmr.msra.gmra.mrb[20].mxu0 %v14226_v34 }
 0x28a   :  { %7365 = vmatpush1.bf16.msra.mxu0 %v11734_v46  ;;  %7396 = vmatprep.mubr.bf16.mxu0 %v14085_v60  ;;  %v11774_v46 = vcombine.low %v1473_v14, %v1477_v15  ;;  %v1513_v14 = vld [vmem:[#allocation11 + $0xe80] sm:$0xff] }
 0x28b   :  { %7629 = vmatpush1.bf16.msra.mxu1 %v11504_v63  ;;  %7366 = vmatprep.subr.bf16.mxu0 %v11743_v51  ;;  %v11544_v63 = vcombine.low %v1242_v62, %v1246_v47  ;;  %v11783_v51 = vcombine.high %v1481_v37, %v1485_v36  ;;  %v1517_v15 = vld [vmem:[#allocation11 + $0xea0] sm:$0xff]  ;;  %v1282_v62 = vld [vmem:[#allocation11 + $0x748] sm:$0xff] }
 0x28c   :  { %7630 = vmatprep.subr.bf16.mxu1 %v11513_v52  ;;  %v11553_v52 = vcombine.high %v1250_v38, %v1254_v1  ;;  %v1286_v47 = vld [vmem:[#allocation11 + $0x768] sm:$0xff] }
 0x28e   :  { %7367 = vmatpush1.bf16.msra.mxu0 %v11742_v56  ;;  %v11782_v56 = vcombine.low %v1481_v37, %v1485_v36  ;;  %v1521_v37 = vld [vmem:[#allocation11 + $0xec0] sm:$0xff] }
 0x28f   :  { %7631 = vmatpush1.bf16.msra.mxu1 %v11512_v11  ;;  %7368 = vmatprep.subr.bf16.mxu0 %v11751_v24  ;;  %v11552_v11 = vcombine.low %v1250_v38, %v1254_v1  ;;  %v11791_v24 = vcombine.high %v1489_v53, %v1493_v25  ;;  %v1525_v36 = vld [vmem:[#allocation11 + $0xee0] sm:$0xff]  ;;  %v1290_v38 = vld [vmem:[#allocation11 + $0x788] sm:$0xff] }
 0x290   :  { %7632 = vmatprep.subr.bf16.mxu1 %v11521_v6  ;;  %v11561_v6 = vcombine.high %v1258_v17, %v1262_v18  ;;  %v1294_v1 = vld [vmem:[#allocation11 + $0x7a8] sm:$0xff] }
 0x292   :  { %7369 = vmatpush1.bf16.msra.mxu0 %v11750_v7  ;;  %v11790_v7 = vcombine.low %v1489_v53, %v1493_v25  ;;  %v1529_v53 = vld [vmem:[#allocation11 + $0xf00] sm:$0xff] }
 0x293   :  { %7633 = vmatpush1.bf16.msra.mxu1 %v11520_v13  ;;  %7370 = vmatprep.subr.bf16.mxu0 %v11759_v8  ;;  %v11560_v13 = vcombine.low %v1258_v17, %v1262_v18  ;;  %v11799_v8 = vcombine.high %v1497_v35, %v1501_v50  ;;  %v1533_v25 = vld [vmem:[#allocation11 + $0xf20] sm:$0xff]  ;;  %v1298_v17 = vld [vmem:[#allocation11 + $0x7c8] sm:$0xff] }
 0x294   :  { %7634 = vmatprep.subr.bf16.mxu1 %v11529_v29  ;;  %v11569_v29 = vcombine.high %v1266_v12, %v1270_v23  ;;  %v1302_v18 = vld [vmem:[#allocation11 + $0x7e8] sm:$0xff] }
 0x296   :  { %7371 = vmatpush1.bf16.msra.mxu0 %v11758_v42  ;;  %v11798_v42 = vcombine.low %v1497_v35, %v1501_v50  ;;  %v1537_v35 = vld [vmem:[#allocation11 + $0xf40] sm:$0xff] }
 0x297   :  { %7635 = vmatpush1.bf16.msra.mxu1 %v11528_v43  ;;  %7372 = vmatprep.subr.bf16.mxu0 %v11767_v39  ;;  %v11568_v43 = vcombine.low %v1266_v12, %v1270_v23  ;;  %v11807_v39 = vcombine.high %v1505_v31, %v1509_v33  ;;  %v1541_v50 = vld [vmem:[#allocation11 + $0xf60] sm:$0xff]  ;;  %v1306_v12 = vld [vmem:[#allocation11 + $0x808] sm:$0xff] }
 0x298   :  { %7636 = vmatprep.subr.bf16.mxu1 %v11537_v40  ;;  %v11577_v40 = vcombine.high %v1274_v49, %v1278_v16  ;;  %v1310_v23 = vld [vmem:[#allocation11 + $0x828] sm:$0xff] }
 0x29a   :  { %7373 = vmatpush1.bf16.msra.mxu0 %v11766_v48  ;;  %v11806_v48 = vcombine.low %v1505_v31, %v1509_v33  ;;  %v1545_v31 = vld [vmem:[#allocation11 + $0xf80] sm:$0xff] }
 0x29b   :  { %7637 = vmatpush1.bf16.msra.mxu1 %v11536_v10  ;;  %7374 = vmatprep.subr.bf16.mxu0 %v11775_v3  ;;  %v11576_v10 = vcombine.low %v1274_v49, %v1278_v16  ;;  %v11815_v3 = vcombine.high %v1513_v14, %v1517_v15  ;;  %v1549_v33 = vld [vmem:[#allocation11 + $0xfa0] sm:$0xff]  ;;  %v1314_v49 = vld [vmem:[#allocation11 + $0x848] sm:$0xff] }
 0x29c   :  { %7638 = vmatprep.subr.bf16.mxu1 %v11545_v32  ;;  %v11585_v32 = vcombine.high %v1282_v62, %v1286_v47  ;;  %v1318_v16 = vld [vmem:[#allocation11 + $0x868] sm:$0xff] }
 0x29e   :  { %7375 = vmatpush1.bf16.msra.mxu0 %v11774_v46  ;;  %v11814_v46 = vcombine.low %v1513_v14, %v1517_v15  ;;  %v1553_v14 = vld [vmem:[#allocation11 + $0xfc0] sm:$0xff] }
 0x29f   :  { %7639 = vmatpush1.bf16.msra.mxu1 %v11544_v63  ;;  %7376 = vmatprep.subr.bf16.mxu0 %v11783_v51  ;;  %v11584_v63 = vcombine.low %v1282_v62, %v1286_v47  ;;  %v11823_v51 = vcombine.high %v1521_v37, %v1525_v36  ;;  %v1557_v15 = vld [vmem:[#allocation11 + $0xfe0] sm:$0xff]  ;;  %v1322_v62 = vld [vmem:[#allocation11 + $0x888] sm:$0xff] }
 0x2a0   :  { %7640 = vmatprep.subr.bf16.mxu1 %v11553_v52  ;;  %v11593_v52 = vcombine.high %v1290_v38, %v1294_v1  ;;  %v1326_v47 = vld [vmem:[#allocation11 + $0x8a8] sm:$0xff] }
 0x2a2   :  { %7377 = vmatpush1.bf16.msra.mxu0 %v11782_v56  ;;  %v11822_v56 = vcombine.low %v1521_v37, %v1525_v36  ;;  %v1561_v37 = vld [vmem:[#allocation11 + $0x1000] sm:$0xff] }
 0x2a3   :  { %7641 = vmatpush1.bf16.msra.mxu1 %v11552_v11  ;;  %7378 = vmatprep.subr.bf16.mxu0 %v11791_v24  ;;  %v11592_v11 = vcombine.low %v1290_v38, %v1294_v1  ;;  %v11831_v24 = vcombine.high %v1529_v53, %v1533_v25  ;;  %v1565_v36 = vld [vmem:[#allocation11 + $0x1020] sm:$0xff]  ;;  %v1330_v38 = vld [vmem:[#allocation11 + $0x8c8] sm:$0xff] }
 0x2a4   :  { %7642 = vmatprep.subr.bf16.mxu1 %v11561_v6  ;;  %v11601_v6 = vcombine.high %v1298_v17, %v1302_v18  ;;  %v1334_v1 = vld [vmem:[#allocation11 + $0x8e8] sm:$0xff] }
 0x2a6   :  { %7379 = vmatpush1.bf16.msra.mxu0 %v11790_v7  ;;  %v11830_v7 = vcombine.low %v1529_v53, %v1533_v25  ;;  %v1569_v53 = vld [vmem:[#allocation11 + $0x1040] sm:$0xff] }
 0x2a7   :  { %7643 = vmatpush1.bf16.msra.mxu1 %v11560_v13  ;;  %7380 = vmatprep.subr.bf16.mxu0 %v11799_v8  ;;  %v11600_v13 = vcombine.low %v1298_v17, %v1302_v18  ;;  %v11839_v8 = vcombine.high %v1537_v35, %v1541_v50  ;;  %v1573_v25 = vld [vmem:[#allocation11 + $0x1060] sm:$0xff]  ;;  %v1338_v17 = vld [vmem:[#allocation11 + $0x908] sm:$0xff] }
 0x2a8   :  { %7644 = vmatprep.subr.bf16.mxu1 %v11569_v29  ;;  %v11609_v29 = vcombine.high %v1306_v12, %v1310_v23  ;;  %v1342_v18 = vld [vmem:[#allocation11 + $0x928] sm:$0xff] }
 0x2aa   :  { %7381 = vmatpush1.bf16.msra.mxu0 %v11798_v42  ;;  %v11838_v42 = vcombine.low %v1537_v35, %v1541_v50  ;;  %v1577_v35 = vld [vmem:[#allocation11 + $0x1080] sm:$0xff] }
 0x2ab   :  { %7645 = vmatpush1.bf16.msra.mxu1 %v11568_v43  ;;  %7382 = vmatprep.subr.bf16.mxu0 %v11807_v39  ;;  %v11608_v43 = vcombine.low %v1306_v12, %v1310_v23  ;;  %v11847_v39 = vcombine.high %v1545_v31, %v1549_v33  ;;  %v1581_v50 = vld [vmem:[#allocation11 + $0x10a0] sm:$0xff]  ;;  %v1346_v12 = vld [vmem:[#allocation11 + $0x948] sm:$0xff] }
 0x2ac   :  { %7646 = vmatprep.subr.bf16.mxu1 %v11577_v40  ;;  %v11617_v40 = vcombine.high %v1314_v49, %v1318_v16  ;;  %v1350_v23 = vld [vmem:[#allocation11 + $0x968] sm:$0xff] }
 0x2ae   :  { %7383 = vmatpush1.bf16.msra.mxu0 %v11806_v48  ;;  %v11846_v48 = vcombine.low %v1545_v31, %v1549_v33  ;;  %v1585_v31 = vld [vmem:[#allocation11 + $0x10c0] sm:$0xff] }
 0x2af   :  { %7647 = vmatpush1.bf16.msra.mxu1 %v11576_v10  ;;  %7384 = vmatprep.subr.bf16.mxu0 %v11815_v3  ;;  %v11616_v10 = vcombine.low %v1314_v49, %v1318_v16  ;;  %v11855_v3 = vcombine.high %v1553_v14, %v1557_v15  ;;  %v1589_v33 = vld [vmem:[#allocation11 + $0x10e0] sm:$0xff]  ;;  %v1354_v49 = vld [vmem:[#allocation11 + $0x988] sm:$0xff] }
 0x2b0   :  { %7648 = vmatprep.subr.bf16.mxu1 %v11585_v32  ;;  %v11625_v32 = vcombine.high %v1322_v62, %v1326_v47  ;;  %v1358_v16 = vld [vmem:[#allocation11 + $0x9a8] sm:$0xff] }
 0x2b2   :  { %7385 = vmatpush1.bf16.msra.mxu0 %v11814_v46  ;;  %v11854_v46 = vcombine.low %v1553_v14, %v1557_v15  ;;  %v1593_v14 = vld [vmem:[#allocation11 + $0x1100] sm:$0xff] }
 0x2b3   :  { %7649 = vmatpush1.bf16.msra.mxu1 %v11584_v63  ;;  %7386 = vmatprep.subr.bf16.mxu0 %v11823_v51  ;;  %v11624_v63 = vcombine.low %v1322_v62, %v1326_v47  ;;  %v11863_v51 = vcombine.high %v1561_v37, %v1565_v36  ;;  %v1597_v15 = vld [vmem:[#allocation11 + $0x1120] sm:$0xff]  ;;  %v1362_v62 = vld [vmem:[#allocation11 + $0x9c8] sm:$0xff] }
 0x2b4   :  { %7650 = vmatprep.subr.bf16.mxu1 %v11593_v52  ;;  %v11633_v52 = vcombine.high %v1330_v38, %v1334_v1  ;;  %v1366_v47 = vld [vmem:[#allocation11 + $0x9e8] sm:$0xff] }
 0x2b6   :  { %7387 = vmatpush1.bf16.msra.mxu0 %v11822_v56  ;;  %v11862_v56 = vcombine.low %v1561_v37, %v1565_v36  ;;  %v1601_v37 = vld [vmem:[#allocation11 + $0x1140] sm:$0xff] }
 0x2b7   :  { %7651 = vmatpush1.bf16.msra.mxu1 %v11592_v11  ;;  %7388 = vmatprep.subr.bf16.mxu0 %v11831_v24  ;;  %v11632_v11 = vcombine.low %v1330_v38, %v1334_v1  ;;  %v11871_v24 = vcombine.high %v1569_v53, %v1573_v25  ;;  %v1605_v36 = vld [vmem:[#allocation11 + $0x1160] sm:$0xff]  ;;  %v1370_v38 = vld [vmem:[#allocation11 + $0xa08] sm:$0xff] }
 0x2b8   :  { %7652 = vmatprep.subr.bf16.mxu1 %v11601_v6  ;;  %v11641_v6 = vcombine.high %v1338_v17, %v1342_v18  ;;  %v1374_v1 = vld [vmem:[#allocation11 + $0xa28] sm:$0xff] }
 0x2ba   :  { %7389 = vmatpush1.bf16.msra.mxu0 %v11830_v7  ;;  %v11870_v7 = vcombine.low %v1569_v53, %v1573_v25  ;;  %v1609_v53 = vld [vmem:[#allocation11 + $0x1180] sm:$0xff] }
 0x2bb   :  { %7653 = vmatpush1.bf16.msra.mxu1 %v11600_v13  ;;  %7390 = vmatprep.subr.bf16.mxu0 %v11839_v8  ;;  %v11640_v13 = vcombine.low %v1338_v17, %v1342_v18  ;;  %v11879_v8 = vcombine.high %v1577_v35, %v1581_v50  ;;  %v1613_v25 = vld [vmem:[#allocation11 + $0x11a0] sm:$0xff]  ;;  %v1378_v17 = vld [vmem:[#allocation11 + $0xa48] sm:$0xff] }
 0x2bc   :  { %7665 = vmatprep.subr.bf16.mxu1 %v11609_v29  ;;  %v11649_v29 = vcombine.high %v1346_v12, %v1350_v23  ;;  %v1382_v18 = vld [vmem:[#allocation11 + $0xa68] sm:$0xff] }
 0x2be   :  { %7391 = vmatpush1.bf16.msra.mxu0 %v11838_v42  ;;  %7655 = vmatmul.mubr.bf16.vlgmr.msra.gmra.mrb[16].mxu1 %v14151_v4  ;;  %v11878_v42 = vcombine.low %v1577_v35, %v1581_v50  ;;  %v1617_v35 = vld [vmem:[#allocation11 + $0x11c0] sm:$0xff] }
 0x2bf   :  { %7666 = vmatpush1.bf16.msra.mxu1 %v11608_v43  ;;  %7697 = vmatprep.mubr.bf16.mxu1 %v14230_v41  ;;  %v11648_v43 = vcombine.low %v1346_v12, %v1350_v23  ;;  %v1621_v50 = vld [vmem:[#allocation11 + $0x11e0] sm:$0xff]  ;;  %v1386_v12 = vld [vmem:[#allocation11 + $0xa88] sm:$0xff] }
 0x2c0   :  { %7392 = vmatprep.subr.bf16.mxu0 %v11847_v39  ;;  %7667 = vmatprep.subr.bf16.mxu1 %v11617_v40  ;;  %v11887_v39 = vcombine.high %v1585_v31, %v1589_v33  ;;  %v11657_v40 = vcombine.high %v1354_v49, %v1358_v16  ;;  %v1390_v23 = vld [vmem:[#allocation11 + $0xaa8] sm:$0xff] }
 0x2c2   :  { %7393 = vmatpush1.bf16.msra.mxu0 %v11846_v48  ;;  %v11886_v48 = vcombine.low %v1585_v31, %v1589_v33  ;;  %v1625_v31 = vld [vmem:[#allocation11 + $0x1200] sm:$0xff] }
 0x2c3   :  { %7668 = vmatpush1.bf16.msra.mxu1 %v11616_v10  ;;  %7394 = vmatprep.subr.bf16.mxu0 %v11855_v3  ;;  %v11656_v10 = vcombine.low %v1354_v49, %v1358_v16  ;;  %v11895_v3 = vcombine.high %v1593_v14, %v1597_v15  ;;  %v1629_v33 = vld [vmem:[#allocation11 + $0x1220] sm:$0xff]  ;;  %v1394_v49 = vld [vmem:[#allocation11 + $0xac8] sm:$0xff] }
 0x2c4   :  { %7669 = vmatprep.subr.bf16.mxu1 %v11625_v32  ;;  %v11665_v32 = vcombine.high %v1362_v62, %v1366_v47  ;;  %v1398_v16 = vld [vmem:[#allocation11 + $0xae8] sm:$0xff] }
 0x2c6   :  { %7395 = vmatpush1.bf16.msra.mxu0 %v11854_v46  ;;  %v11894_v46 = vcombine.low %v1593_v14, %v1597_v15  ;;  %v1633_v14 = vld [vmem:[#allocation11 + $0x1240] sm:$0xff] }
 0x2c7   :  { %7670 = vmatpush1.bf16.msra.mxu1 %v11624_v63  ;;  %7407 = vmatprep.subr.bf16.mxu0 %v11863_v51  ;;  %v11664_v63 = vcombine.low %v1362_v62, %v1366_v47  ;;  %v11903_v51 = vcombine.high %v1601_v37, %v1605_v36  ;;  %v1637_v15 = vld [vmem:[#allocation11 + $0x1260] sm:$0xff]  ;;  %v1402_v62 = vld [vmem:[#allocation11 + $0xb08] sm:$0xff] }
 0x2c8   :  { %7671 = vmatprep.subr.bf16.mxu1 %v11633_v52  ;;  %v11673_v52 = vcombine.high %v1370_v38, %v1374_v1  ;;  %v1406_v47 = vld [vmem:[#allocation11 + $0xb28] sm:$0xff] }
 0x2c9   :  { %7397 = vmatmul.mubr.bf16.vlgmr.msra.gmra.mrb[20].mxu0 %v14077_v45 }
 0x2ca   :  { %7408 = vmatpush1.bf16.msra.mxu0 %v11862_v56  ;;  %7439 = vmatprep.mubr.bf16.mxu0 %v14252_v30  ;;  %v11902_v56 = vcombine.low %v1601_v37, %v1605_v36  ;;  %v1641_v37 = vld [vmem:[#allocation11 + $0x1280] sm:$0xff] }
 0x2cb   :  { %7672 = vmatpush1.bf16.msra.mxu1 %v11632_v11  ;;  %7409 = vmatprep.subr.bf16.mxu0 %v11871_v24  ;;  %v11672_v11 = vcombine.low %v1370_v38, %v1374_v1  ;;  %v11911_v24 = vcombine.high %v1609_v53, %v1613_v25  ;;  %v1645_v36 = vld [vmem:[#allocation11 + $0x12a0] sm:$0xff]  ;;  %v1410_v38 = vld [vmem:[#allocation11 + $0xb48] sm:$0xff] }
 0x2cc   :  { %7673 = vmatprep.subr.bf16.mxu1 %v11641_v6  ;;  %v11681_v6 = vcombine.high %v1378_v17, %v1382_v18  ;;  %v1414_v1 = vld [vmem:[#allocation11 + $0xb68] sm:$0xff] }
 0x2ce   :  { %7410 = vmatpush1.bf16.msra.mxu0 %v11870_v7  ;;  %v11910_v7 = vcombine.low %v1609_v53, %v1613_v25  ;;  %v1649_v53 = vld [vmem:[#allocation11 + $0x12c0] sm:$0xff] }
 0x2cf   :  { %7674 = vmatpush1.bf16.msra.mxu1 %v11640_v13  ;;  %7411 = vmatprep.subr.bf16.mxu0 %v11879_v8  ;;  %v11680_v13 = vcombine.low %v1378_v17, %v1382_v18  ;;  %v11919_v8 = vcombine.high %v1617_v35, %v1621_v50  ;;  %v1653_v25 = vld [vmem:[#allocation11 + $0x12e0] sm:$0xff]  ;;  %v1418_v17 = vld [vmem:[#allocation11 + $0xb88] sm:$0xff] }
 0x2d0   :  { %7675 = vmatprep.subr.bf16.mxu1 %v11649_v29  ;;  %v11689_v29 = vcombine.high %v1386_v12, %v1390_v23  ;;  %v1422_v18 = vld [vmem:[#allocation11 + $0xba8] sm:$0xff] }
 0x2d2   :  { %7412 = vmatpush1.bf16.msra.mxu0 %v11878_v42  ;;  %v11918_v42 = vcombine.low %v1617_v35, %v1621_v50  ;;  %v1657_v35 = vld [vmem:[#allocation11 + $0x1300] sm:$0xff] }
 0x2d3   :  { %7676 = vmatpush1.bf16.msra.mxu1 %v11648_v43  ;;  %7413 = vmatprep.subr.bf16.mxu0 %v11887_v39  ;;  %v11688_v43 = vcombine.low %v1386_v12, %v1390_v23  ;;  %v11927_v39 = vcombine.high %v1625_v31, %v1629_v33  ;;  %v1661_v50 = vld [vmem:[#allocation11 + $0x1320] sm:$0xff]  ;;  %v1426_v12 = vld [vmem:[#allocation11 + $0xbc8] sm:$0xff] }
 0x2d4   :  { %7677 = vmatprep.subr.bf16.mxu1 %v11657_v40  ;;  %v11697_v40 = vcombine.high %v1394_v49, %v1398_v16  ;;  %v1430_v23 = vld [vmem:[#allocation11 + $0xbe8] sm:$0xff] }
 0x2d6   :  { %7414 = vmatpush1.bf16.msra.mxu0 %v11886_v48  ;;  %v11926_v48 = vcombine.low %v1625_v31, %v1629_v33  ;;  %v1665_v31 = vld [vmem:[#allocation11 + $0x1340] sm:$0xff] }
 0x2d7   :  { %7678 = vmatpush1.bf16.msra.mxu1 %v11656_v10  ;;  %7415 = vmatprep.subr.bf16.mxu0 %v11895_v3  ;;  %v11696_v10 = vcombine.low %v1394_v49, %v1398_v16  ;;  %v11935_v3 = vcombine.high %v1633_v14, %v1637_v15  ;;  %v1669_v33 = vld [vmem:[#allocation11 + $0x1360] sm:$0xff]  ;;  %v1434_v49 = vld [vmem:[#allocation11 + $0xc08] sm:$0xff] }
 0x2d8   :  { %7679 = vmatprep.subr.bf16.mxu1 %v11665_v32  ;;  %v11705_v32 = vcombine.high %v1402_v62, %v1406_v47  ;;  %v1438_v16 = vld [vmem:[#allocation11 + $0xc28] sm:$0xff] }
 0x2da   :  { %7416 = vmatpush1.bf16.msra.mxu0 %v11894_v46  ;;  %v11934_v46 = vcombine.low %v1633_v14, %v1637_v15  ;;  %v1673_v14 = vld [vmem:[#allocation11 + $0x1380] sm:$0xff] }
 0x2db   :  { %7680 = vmatpush1.bf16.msra.mxu1 %v11664_v63  ;;  %7417 = vmatprep.subr.bf16.mxu0 %v11903_v51  ;;  %v11704_v63 = vcombine.low %v1402_v62, %v1406_v47  ;;  %v11943_v51 = vcombine.high %v1641_v37, %v1645_v36  ;;  %v1677_v15 = vld [vmem:[#allocation11 + $0x13a0] sm:$0xff]  ;;  %v1442_v62 = vld [vmem:[#allocation11 + $0xc48] sm:$0xff] }
 0x2dc   :  { %7681 = vmatprep.subr.bf16.mxu1 %v11673_v52  ;;  %v11713_v52 = vcombine.high %v1410_v38, %v1414_v1  ;;  %v1446_v47 = vld [vmem:[#allocation11 + $0xc68] sm:$0xff] }
 0x2de   :  { %7418 = vmatpush1.bf16.msra.mxu0 %v11902_v56  ;;  %v11942_v56 = vcombine.low %v1641_v37, %v1645_v36  ;;  %v1681_v37 = vld [vmem:[#allocation11 + $0x13c0] sm:$0xff] }
 0x2df   :  { %7682 = vmatpush1.bf16.msra.mxu1 %v11672_v11  ;;  %7419 = vmatprep.subr.bf16.mxu0 %v11911_v24  ;;  %v11712_v11 = vcombine.low %v1410_v38, %v1414_v1  ;;  %v11951_v24 = vcombine.high %v1649_v53, %v1653_v25  ;;  %v1685_v36 = vld [vmem:[#allocation11 + $0x13e0] sm:$0xff]  ;;  %v1450_v38 = vld [vmem:[#allocation11 + $0xc88] sm:$0xff] }
 0x2e0   :  { %7683 = vmatprep.subr.bf16.mxu1 %v11681_v6  ;;  %v11721_v6 = vcombine.high %v1418_v17, %v1422_v18  ;;  %v1454_v1 = vld [vmem:[#allocation11 + $0xca8] sm:$0xff] }
 0x2e2   :  { %7420 = vmatpush1.bf16.msra.mxu0 %v11910_v7  ;;  %v11950_v7 = vcombine.low %v1649_v53, %v1653_v25  ;;  %v1689_v53 = vld [vmem:[#allocation11 + $0x1400] sm:$0xff] }
 0x2e3   :  { %7684 = vmatpush1.bf16.msra.mxu1 %v11680_v13  ;;  %7421 = vmatprep.subr.bf16.mxu0 %v11919_v8  ;;  %v11720_v13 = vcombine.low %v1418_v17, %v1422_v18  ;;  %v11959_v8 = vcombine.high %v1657_v35, %v1661_v50  ;;  %v1693_v25 = vld [vmem:[#allocation11 + $0x1420] sm:$0xff]  ;;  %v1458_v17 = vld [vmem:[#allocation11 + $0xcc8] sm:$0xff] }
 0x2e4   :  { %7685 = vmatprep.subr.bf16.mxu1 %v11689_v29  ;;  %v11729_v29 = vcombine.high %v1426_v12, %v1430_v23  ;;  %v1462_v18 = vld [vmem:[#allocation11 + $0xce8] sm:$0xff] }
 0x2e6   :  { %7422 = vmatpush1.bf16.msra.mxu0 %v11918_v42  ;;  %v11958_v42 = vcombine.low %v1657_v35, %v1661_v50  ;;  %v1697_v35 = vld [vmem:[#allocation11 + $0x1440] sm:$0xff] }
 0x2e7   :  { %7686 = vmatpush1.bf16.msra.mxu1 %v11688_v43  ;;  %7423 = vmatprep.subr.bf16.mxu0 %v11927_v39  ;;  %v11728_v43 = vcombine.low %v1426_v12, %v1430_v23  ;;  %v11967_v39 = vcombine.high %v1665_v31, %v1669_v33  ;;  %v1701_v50 = vld [vmem:[#allocation11 + $0x1460] sm:$0xff]  ;;  %v1466_v12 = vld [vmem:[#allocation11 + $0xd08] sm:$0xff] }
 0x2e8   :  { %7687 = vmatprep.subr.bf16.mxu1 %v11697_v40  ;;  %v11737_v40 = vcombine.high %v1434_v49, %v1438_v16  ;;  %v1470_v23 = vld [vmem:[#allocation11 + $0xd28] sm:$0xff] }
 0x2ea   :  { %7424 = vmatpush1.bf16.msra.mxu0 %v11926_v48  ;;  %v11966_v48 = vcombine.low %v1665_v31, %v1669_v33  ;;  %v1705_v31 = vld [vmem:[#allocation11 + $0x1480] sm:$0xff] }
 0x2eb   :  { %7688 = vmatpush1.bf16.msra.mxu1 %v11696_v10  ;;  %7425 = vmatprep.subr.bf16.mxu0 %v11935_v3  ;;  %v11736_v10 = vcombine.low %v1434_v49, %v1438_v16  ;;  %v11975_v3 = vcombine.high %v1673_v14, %v1677_v15  ;;  %v1709_v33 = vld [vmem:[#allocation11 + $0x14a0] sm:$0xff]  ;;  %v1474_v49 = vld [vmem:[#allocation11 + $0xd48] sm:$0xff] }
 0x2ec   :  { %7689 = vmatprep.subr.bf16.mxu1 %v11705_v32  ;;  %v11745_v32 = vcombine.high %v1442_v62, %v1446_v47  ;;  %v1478_v16 = vld [vmem:[#allocation11 + $0xd68] sm:$0xff] }
 0x2ee   :  { %7426 = vmatpush1.bf16.msra.mxu0 %v11934_v46  ;;  %v11974_v46 = vcombine.low %v1673_v14, %v1677_v15  ;;  %v1713_v14 = vld [vmem:[#allocation11 + $0x14c0] sm:$0xff] }
 0x2ef   :  { %7690 = vmatpush1.bf16.msra.mxu1 %v11704_v63  ;;  %7427 = vmatprep.subr.bf16.mxu0 %v11943_v51  ;;  %v11744_v63 = vcombine.low %v1442_v62, %v1446_v47  ;;  %v11983_v51 = vcombine.high %v1681_v37, %v1685_v36  ;;  %v1717_v15 = vld [vmem:[#allocation11 + $0x14e0] sm:$0xff]  ;;  %v1482_v62 = vld [vmem:[#allocation11 + $0xd88] sm:$0xff] }
 0x2f0   :  { %7691 = vmatprep.subr.bf16.mxu1 %v11713_v52  ;;  %v11753_v52 = vcombine.high %v1450_v38, %v1454_v1  ;;  %v1486_v47 = vld [vmem:[#allocation11 + $0xda8] sm:$0xff] }
 0x2f2   :  { %7428 = vmatpush1.bf16.msra.mxu0 %v11942_v56  ;;  %v11982_v56 = vcombine.low %v1681_v37, %v1685_v36  ;;  %v11785_v37 = vcombine.high %v1482_v62, %v1486_v47  ;;  %v1721_v36 = vld [vmem:[#allocation11 + $0x1500] sm:$0xff] }
 0x2f3   :  { %7692 = vmatpush1.bf16.msra.mxu1 %v11712_v11  ;;  %7429 = vmatprep.subr.bf16.mxu0 %v11951_v24  ;;  %v11752_v11 = vcombine.low %v1450_v38, %v1454_v1  ;;  %v11991_v24 = vcombine.high %v1689_v53, %v1693_v25  ;;  %v1725_v38 = vld [vmem:[#allocation11 + $0x1520] sm:$0xff] }
 0x2f4   :  { %7693 = vmatprep.subr.bf16.mxu1 %v11721_v6  ;;  %v11761_v6 = vcombine.high %v1458_v17, %v1462_v18 }
 0x2f6   :  { %7430 = vmatpush1.bf16.msra.mxu0 %v11950_v7  ;;  %v11990_v7 = vcombine.low %v1689_v53, %v1693_v25  ;;  %v11784_v25 = vcombine.low %v1482_v62, %v1486_v47 }
 0x2f7   :  { %7694 = vmatpush1.bf16.msra.mxu1 %v11720_v13  ;;  %7431 = vmatprep.subr.bf16.mxu0 %v11959_v8  ;;  %v11760_v13 = vcombine.low %v1458_v17, %v1462_v18  ;;  %v11999_v8 = vcombine.high %v1697_v35, %v1701_v50  ;;  %v12023_v17 = vcombine.high %v1721_v36, %v1725_v38 }
 0x2f8   :  { %7695 = vmatprep.subr.bf16.mxu1 %v11729_v29  ;;  %v11769_v29 = vcombine.high %v1466_v12, %v1470_v23 }
 0x2fa   :  { %7432 = vmatpush1.bf16.msra.mxu0 %v11958_v42  ;;  %v11998_v42 = vcombine.low %v1697_v35, %v1701_v50  ;;  %v12022_v35 = vcombine.low %v1721_v36, %v1725_v38 }
 0x2fb   :  { %7696 = vmatpush1.bf16.msra.mxu1 %v11728_v43  ;;  %7433 = vmatprep.subr.bf16.mxu0 %v11967_v39  ;;  %v11768_v43 = vcombine.low %v1466_v12, %v1470_v23  ;;  %v12007_v39 = vcombine.high %v1705_v31, %v1709_v33 }
 0x2fc   :  { %7708 = vmatprep.subr.bf16.mxu1 %v11737_v40  ;;  %v11777_v40 = vcombine.high %v1474_v49, %v1478_v16 }
 0x2fe   :  { %7434 = vmatpush1.bf16.msra.mxu0 %v11966_v48  ;;  %7698 = vmatmul.mubr.bf16.vlgmr.msra.gmra.mrb[16].mxu1 %v14226_v34  ;;  %v12006_v48 = vcombine.low %v1705_v31, %v1709_v33 }
 0x2ff   :  { %7709 = vmatpush1.bf16.msra.mxu1 %v11736_v10  ;;  %7740 = vmatprep.mubr.bf16.mxu1 %v14085_v60  ;;  %v11776_v10 = vcombine.low %v1474_v49, %v1478_v16 }
 0x300   :  { %7435 = vmatprep.subr.bf16.mxu0 %v11975_v3  ;;  %7710 = vmatprep.subr.bf16.mxu1 %v11745_v32  ;;  %v12015_v3 = vcombine.high %v1713_v14, %v1717_v15 }
 0x302   :  { %7436 = vmatpush1.bf16.msra.mxu0 %v11974_v46  ;;  %v1490_v46 = vld [vmem:[#allocation11 + $0xdc8] sm:$0xff] }
 0x303   :  { %7711 = vmatpush1.bf16.msra.mxu1 %v11744_v63  ;;  %7437 = vmatprep.subr.bf16.mxu0 %v11983_v51  ;;  %v1494_v63 = vld [vmem:[#allocation11 + $0xde8] sm:$0xff] }
 0x304   :  { %7712 = vmatprep.subr.bf16.mxu1 %v11753_v52  ;;  %v12014_v52 = vcombine.low %v1713_v14, %v1717_v15  ;;  %v11793_v18 = vcombine.high %v1490_v46, %v1494_v63  ;;  %v11792_v50 = vcombine.low %v1490_v46, %v1494_v63 }
 0x306   :  { %7438 = vmatpush1.bf16.msra.mxu0 %v11982_v56  ;;  %v1729_v56 = vld [vmem:[#allocation11 + $0x1540] sm:$0xff] }
 0x307   :  { %7713 = vmatpush1.bf16.msra.mxu1 %v11752_v11  ;;  %7450 = vmatprep.subr.bf16.mxu0 %v11991_v24  ;;  %v1733_v11 = vld [vmem:[#allocation11 + $0x1560] sm:$0xff]  ;;  %v1498_v24 = vld [vmem:[#allocation11 + $0xe08] sm:$0xff] }
 0x308   :  { %7714 = vmatprep.subr.bf16.mxu1 %v11761_v6  ;;  %v1502_v6 = vld [vmem:[#allocation11 + $0xe28] sm:$0xff]  ;;  %v12031_v12 = vcombine.high %v1729_v56, %v1733_v11  ;;  %v12030_v31 = vcombine.low %v1729_v56, %v1733_v11 }
 0x309   :  { %7440 = vmatmul.mubr.bf16.vlgmr.msra.gmra.mrb[20].mxu0 %v14250_v28  ;;  %v11801_v23 = vcombine.high %v1498_v24, %v1502_v6  ;;  %v11800_v33 = vcombine.low %v1498_v24, %v1502_v6 }
 0x30a   :  { %7451 = vmatpush1.bf16.msra.mxu0 %v11990_v7  ;;  %7482 = vmatprep.mubr.bf16.mxu0 %v14161_v22  ;;  %v1737_v7 = vld [vmem:[#allocation11 + $0x1580] sm:$0xff] }
 0x30b   :  { %7715 = vmatpush1.bf16.msra.mxu1 %v11760_v13  ;;  %7452 = vmatprep.subr.bf16.mxu0 %v11999_v8  ;;  %v1741_v13 = vld [vmem:[#allocation11 + $0x15a0] sm:$0xff]  ;;  %v1506_v8 = vld [vmem:[#allocation11 + $0xe48] sm:$0xff] }
 0x30c   :  { %7716 = vmatprep.subr.bf16.mxu1 %v11769_v29  ;;  %v1510_v29 = vld [vmem:[#allocation11 + $0xe68] sm:$0xff]  ;;  %v12039_v49 = vcombine.high %v1737_v7, %v1741_v13  ;;  %v12038_v14 = vcombine.low %v1737_v7, %v1741_v13 }
 0x30d   :  { %v11809_v16 = vcombine.high %v1506_v8, %v1510_v29  ;;  %v11808_v15 = vcombine.low %v1506_v8, %v1510_v29 }
 0x30e   :  { %7453 = vmatpush1.bf16.msra.mxu0 %v11998_v42  ;;  %v1745_v42 = vld [vmem:[#allocation11 + $0x15c0] sm:$0xff] }
 0x30f   :  { %7717 = vmatpush1.bf16.msra.mxu1 %v11768_v43  ;;  %7454 = vmatprep.subr.bf16.mxu0 %v12007_v39  ;;  %v1749_v43 = vld [vmem:[#allocation11 + $0x15e0] sm:$0xff]  ;;  %v1514_v39 = vld [vmem:[#allocation11 + $0xe88] sm:$0xff] }
 0x310   :  { %v14275_v32 = vpop.f32.mrb[12].mxu1  ;;  %7718 = vmatprep.subr.bf16.mxu1 %v11777_v40  ;;  %v1518_v40 = vld [vmem:[#allocation11 + $0xea8] sm:$0xff]  ;;  %v12047_v62 = vcombine.high %v1745_v42, %v1749_v43  ;;  %v12046_v36 = vcombine.low %v1745_v42, %v1749_v43 }
 0x311   :  { %v14277_v1 = vpop.f32.mrb[13].mxu1  ;;  %v11817_v47 = vcombine.high %v1514_v39, %v1518_v40  ;;  %v11816_v38 = vcombine.low %v1514_v39, %v1518_v40 }
 0x312   :  { %7455 = vmatpush1.bf16.msra.mxu0 %v12006_v48  ;;  %v14279_v51 = vpop.f32.mrb[14].mxu1  ;;  %v1753_v48 = vld [vmem:[#allocation11 + $0x1600] sm:$0xff] }
 0x313   :  { %7719 = vmatpush1.bf16.msra.mxu1 %v11776_v10  ;;  %v14281_v53 = vpop.f32.mrb[15].mxu1  ;;  %7456 = vmatprep.subr.bf16.mxu0 %v12015_v3  ;;  %v1757_v10 = vld [vmem:[#allocation11 + $0x1620] sm:$0xff]  ;;  %v1522_v3 = vld [vmem:[#allocation11 + $0xec8] sm:$0xff] }
 0x314   :  { %7720 = vmatprep.subr.bf16.mxu1 %v11785_v37  ;;  %v1526_v37 = vld [vmem:[#allocation11 + $0xee8] sm:$0xff]  ;;  %v12055_v46 = vcombine.high %v1753_v48, %v1757_v10  ;;  %v12054_v56 = vcombine.low %v1753_v48, %v1757_v10 }
 0x315   :  { %v11825_v63 = vcombine.high %v1522_v3, %v1526_v37  ;;  %v11824_v11 = vcombine.low %v1522_v3, %v1526_v37 }
 0x316   :  { %7457 = vmatpush1.bf16.msra.mxu0 %v12014_v52  ;;  %v1761_v52 = vld [vmem:[#allocation11 + $0x1640] sm:$0xff] }
 0x317   :  { %7721 = vmatpush1.bf16.msra.mxu1 %v11784_v25  ;;  %7458 = vmatprep.subr.bf16.mxu0 %v12023_v17  ;;  %v1765_v25 = vld [vmem:[#allocation11 + $0x1660] sm:$0xff]  ;;  %v1530_v17 = vld [vmem:[#allocation11 + $0xf08] sm:$0xff] }
 0x318   :  { %7722 = vmatprep.subr.bf16.mxu1 %v11793_v18  ;;  %v1534_v18 = vld [vmem:[#allocation11 + $0xf28] sm:$0xff]  ;;  %v12063_v24 = vcombine.high %v1761_v52, %v1765_v25  ;;  %v12062_v7 = vcombine.low %v1761_v52, %v1765_v25 }
 0x319   :  { %v11833_v6 = vcombine.high %v1530_v17, %v1534_v18  ;;  %v11832_v13 = vcombine.low %v1530_v17, %v1534_v18 }
 0x31a   :  { %7459 = vmatpush1.bf16.msra.mxu0 %v12022_v35  ;;  %v1769_v35 = vld [vmem:[#allocation11 + $0x1680] sm:$0xff] }
 0x31b   :  { %7723 = vmatpush1.bf16.msra.mxu1 %v11792_v50  ;;  %7460 = vmatprep.subr.bf16.mxu0 %v12031_v12  ;;  %v1773_v50 = vld [vmem:[#allocation11 + $0x16a0] sm:$0xff]  ;;  %v1538_v12 = vld [vmem:[#allocation11 + $0xf48] sm:$0xff] }
 0x31c   :  { %7724 = vmatprep.subr.bf16.mxu1 %v11801_v23  ;;  %v1542_v23 = vld [vmem:[#allocation11 + $0xf68] sm:$0xff]  ;;  %v12071_v8 = vcombine.high %v1769_v35, %v1773_v50  ;;  %v12070_v42 = vcombine.low %v1769_v35, %v1773_v50 }
 0x31d   :  { %v11841_v29 = vcombine.high %v1538_v12, %v1542_v23  ;;  %v11840_v43 = vcombine.low %v1538_v12, %v1542_v23 }
 0x31e   :  { %7461 = vmatpush1.bf16.msra.mxu0 %v12030_v31  ;;  %v1777_v31 = vld [vmem:[#allocation11 + $0x16c0] sm:$0xff] }
 0x31f   :  { %7725 = vmatpush1.bf16.msra.mxu1 %v11800_v33  ;;  %7462 = vmatprep.subr.bf16.mxu0 %v12039_v49  ;;  %v1781_v33 = vld [vmem:[#allocation11 + $0x16e0] sm:$0xff]  ;;  %v1546_v49 = vld [vmem:[#allocation11 + $0xf88] sm:$0xff] }
 0x320   :  { %7726 = vmatprep.subr.bf16.mxu1 %v11809_v16  ;;  %v1550_v16 = vld [vmem:[#allocation11 + $0xfa8] sm:$0xff]  ;;  %v12079_v39 = vcombine.high %v1777_v31, %v1781_v33  ;;  %v12078_v48 = vcombine.low %v1777_v31, %v1781_v33 }
 0x321   :  { %v11849_v40 = vcombine.high %v1546_v49, %v1550_v16  ;;  %v11848_v10 = vcombine.low %v1546_v49, %v1550_v16 }
 0x322   :  { %7463 = vmatpush1.bf16.msra.mxu0 %v12038_v14  ;;  %v1785_v14 = vld [vmem:[#allocation11 + $0x1700] sm:$0xff] }
 0x323   :  { %7727 = vmatpush1.bf16.msra.mxu1 %v11808_v15  ;;  %7464 = vmatprep.subr.bf16.mxu0 %v12047_v62  ;;  %v1789_v15 = vld [vmem:[#allocation11 + $0x1720] sm:$0xff]  ;;  %v1554_v62 = vld [vmem:[#allocation11 + $0xfc8] sm:$0xff] }
 0x324   :  { %7728 = vmatprep.subr.bf16.mxu1 %v11817_v47  ;;  %v1558_v47 = vld [vmem:[#allocation11 + $0xfe8] sm:$0xff]  ;;  %v12087_v3 = vcombine.high %v1785_v14, %v1789_v15  ;;  %v12086_v52 = vcombine.low %v1785_v14, %v1789_v15 }
 0x325   :  { %v11857_v37 = vcombine.high %v1554_v62, %v1558_v47  ;;  %v11856_v25 = vcombine.low %v1554_v62, %v1558_v47 }
 0x326   :  { %7465 = vmatpush1.bf16.msra.mxu0 %v12046_v36  ;;  %v1793_v36 = vld [vmem:[#allocation11 + $0x1740] sm:$0xff] }
 0x327   :  { %7729 = vmatpush1.bf16.msra.mxu1 %v11816_v38  ;;  %7466 = vmatprep.subr.bf16.mxu0 %v12055_v46  ;;  %v1797_v38 = vld [vmem:[#allocation11 + $0x1760] sm:$0xff]  ;;  %v1562_v46 = vld [vmem:[#allocation11 + $0x1008] sm:$0xff] }
 0x328   :  { %7730 = vmatprep.subr.bf16.mxu1 %v11825_v63  ;;  %v1566_v63 = vld [vmem:[#allocation11 + $0x1028] sm:$0xff]  ;;  %v12095_v17 = vcombine.high %v1793_v36, %v1797_v38  ;;  %v12094_v35 = vcombine.low %v1793_v36, %v1797_v38 }
 0x329   :  { %v11865_v18 = vcombine.high %v1562_v46, %v1566_v63  ;;  %v11864_v50 = vcombine.low %v1562_v46, %v1566_v63 }
 0x32a   :  { %7467 = vmatpush1.bf16.msra.mxu0 %v12054_v56  ;;  %v1801_v56 = vld [vmem:[#allocation11 + $0x1780] sm:$0xff] }
 0x32b   :  { %7731 = vmatpush1.bf16.msra.mxu1 %v11824_v11  ;;  %7468 = vmatprep.subr.bf16.mxu0 %v12063_v24  ;;  %v1805_v11 = vld [vmem:[#allocation11 + $0x17a0] sm:$0xff]  ;;  %v1570_v24 = vld [vmem:[#allocation11 + $0x1048] sm:$0xff] }
 0x32c   :  { %7732 = vmatprep.subr.bf16.mxu1 %v11833_v6  ;;  %v1574_v6 = vld [vmem:[#allocation11 + $0x1068] sm:$0xff]  ;;  %v12103_v12 = vcombine.high %v1801_v56, %v1805_v11  ;;  %v12102_v31 = vcombine.low %v1801_v56, %v1805_v11 }
 0x32d   :  { %v11873_v23 = vcombine.high %v1570_v24, %v1574_v6  ;;  %v11872_v33 = vcombine.low %v1570_v24, %v1574_v6 }
 0x32e   :  { %7469 = vmatpush1.bf16.msra.mxu0 %v12062_v7  ;;  %v1809_v7 = vld [vmem:[#allocation11 + $0x17c0] sm:$0xff] }
 0x32f   :  { %7733 = vmatpush1.bf16.msra.mxu1 %v11832_v13  ;;  %7470 = vmatprep.subr.bf16.mxu0 %v12071_v8  ;;  %v1813_v13 = vld [vmem:[#allocation11 + $0x17e0] sm:$0xff]  ;;  %v1578_v8 = vld [vmem:[#allocation11 + $0x1088] sm:$0xff] }
 0x330   :  { %7734 = vmatprep.subr.bf16.mxu1 %v11841_v29  ;;  %v1582_v29 = vld [vmem:[#allocation11 + $0x10a8] sm:$0xff]  ;;  %v12111_v49 = vcombine.high %v1809_v7, %v1813_v13  ;;  %v12110_v14 = vcombine.low %v1809_v7, %v1813_v13 }
 0x331   :  { %v11881_v16 = vcombine.high %v1578_v8, %v1582_v29  ;;  %v11880_v15 = vcombine.low %v1578_v8, %v1582_v29 }
 0x332   :  { %7471 = vmatpush1.bf16.msra.mxu0 %v12070_v42  ;;  %v1817_v42 = vld [vmem:[#allocation11 + $0x1800] sm:$0xff] }
 0x333   :  { %7735 = vmatpush1.bf16.msra.mxu1 %v11840_v43  ;;  %7472 = vmatprep.subr.bf16.mxu0 %v12079_v39  ;;  %v1821_v43 = vld [vmem:[#allocation11 + $0x1820] sm:$0xff]  ;;  %v1586_v39 = vld [vmem:[#allocation11 + $0x10c8] sm:$0xff] }
 0x334   :  { %7736 = vmatprep.subr.bf16.mxu1 %v11849_v40  ;;  %v1590_v40 = vld [vmem:[#allocation11 + $0x10e8] sm:$0xff]  ;;  %v12119_v62 = vcombine.high %v1817_v42, %v1821_v43  ;;  %v12118_v36 = vcombine.low %v1817_v42, %v1821_v43 }
 0x335   :  { %v11889_v47 = vcombine.high %v1586_v39, %v1590_v40  ;;  %v11888_v38 = vcombine.low %v1586_v39, %v1590_v40 }
 0x336   :  { %7473 = vmatpush1.bf16.msra.mxu0 %v12078_v48  ;;  %v1825_v48 = vld [vmem:[#allocation11 + $0x1840] sm:$0xff] }
 0x337   :  { %7737 = vmatpush1.bf16.msra.mxu1 %v11848_v10  ;;  %7474 = vmatprep.subr.bf16.mxu0 %v12087_v3  ;;  %v1829_v10 = vld [vmem:[#allocation11 + $0x1860] sm:$0xff]  ;;  %v1594_v3 = vld [vmem:[#allocation11 + $0x1108] sm:$0xff] }
 0x338   :  { %7738 = vmatprep.subr.bf16.mxu1 %v11857_v37  ;;  %v1598_v37 = vld [vmem:[#allocation11 + $0x1128] sm:$0xff]  ;;  %v12127_v46 = vcombine.high %v1825_v48, %v1829_v10  ;;  %v12126_v56 = vcombine.low %v1825_v48, %v1829_v10 }
 0x339   :  { %v11897_v63 = vcombine.high %v1594_v3, %v1598_v37  ;;  %v11896_v11 = vcombine.low %v1594_v3, %v1598_v37 }
 0x33a   :  { %7475 = vmatpush1.bf16.msra.mxu0 %v12086_v52  ;;  %v1833_v52 = vld [vmem:[#allocation11 + $0x1880] sm:$0xff] }
 0x33b   :  { %7739 = vmatpush1.bf16.msra.mxu1 %v11856_v25  ;;  %7476 = vmatprep.subr.bf16.mxu0 %v12095_v17  ;;  %v1837_v25 = vld [vmem:[#allocation11 + $0x18a0] sm:$0xff]  ;;  %v1602_v17 = vld [vmem:[#allocation11 + $0x1148] sm:$0xff] }
 0x33c   :  { %7751 = vmatprep.subr.bf16.mxu1 %v11865_v18  ;;  %v1606_v18 = vld [vmem:[#allocation11 + $0x1168] sm:$0xff]  ;;  %v12135_v24 = vcombine.high %v1833_v52, %v1837_v25  ;;  %v12134_v7 = vcombine.low %v1833_v52, %v1837_v25 }
 0x33d   :  { %v11905_v6 = vcombine.high %v1602_v17, %v1606_v18  ;;  %v11904_v13 = vcombine.low %v1602_v17, %v1606_v18 }
 0x33e   :  { %7477 = vmatpush1.bf16.msra.mxu0 %v12094_v35  ;;  %7741 = vmatmul.mubr.bf16.vlgmr.msra.gmra.mrb[16].mxu1 %v14077_v45  ;;  %v1841_v35 = vld [vmem:[#allocation11 + $0x18c0] sm:$0xff] }
 0x33f   :  { %7752 = vmatpush1.bf16.msra.mxu1 %v11864_v50  ;;  %7783 = vmatprep.mubr.bf16.mxu1 %v14252_v30  ;;  %v1845_v50 = vld [vmem:[#allocation11 + $0x18e0] sm:$0xff] }
 0x340   :  { %7478 = vmatprep.subr.bf16.mxu0 %v12103_v12  ;;  %7753 = vmatprep.subr.bf16.mxu1 %v11873_v23  ;;  %v1610_v12 = vld [vmem:[#allocation11 + $0x1188] sm:$0xff]  ;;  %v12143_v8 = vcombine.high %v1841_v35, %v1845_v50  ;;  %v12142_v42 = vcombine.low %v1841_v35, %v1845_v50 }
 0x341   :  { %v1614_v23 = vld [vmem:[#allocation11 + $0x11a8] sm:$0xff] }
 0x342   :  { %7479 = vmatpush1.bf16.msra.mxu0 %v12102_v31  ;;  %v11913_v29 = vcombine.high %v1610_v12, %v1614_v23  ;;  %v1849_v31 = vld [vmem:[#allocation11 + $0x1900] sm:$0xff]  ;;  %v11912_v43 = vcombine.low %v1610_v12, %v1614_v23 }
 0x343   :  { %7754 = vmatpush1.bf16.msra.mxu1 %v11872_v33  ;;  %7480 = vmatprep.subr.bf16.mxu0 %v12111_v49  ;;  %v1853_v33 = vld [vmem:[#allocation11 + $0x1920] sm:$0xff]  ;;  %v1618_v49 = vld [vmem:[#allocation11 + $0x11c8] sm:$0xff] }
 0x344   :  { %7755 = vmatprep.subr.bf16.mxu1 %v11881_v16  ;;  %v1622_v16 = vld [vmem:[#allocation11 + $0x11e8] sm:$0xff]  ;;  %v12151_v39 = vcombine.high %v1849_v31, %v1853_v33  ;;  %v12150_v48 = vcombine.low %v1849_v31, %v1853_v33 }
 0x345   :  { %v11921_v40 = vcombine.high %v1618_v49, %v1622_v16  ;;  %v11920_v10 = vcombine.low %v1618_v49, %v1622_v16 }
 0x346   :  { %7481 = vmatpush1.bf16.msra.mxu0 %v12110_v14  ;;  %v1857_v14 = vld [vmem:[#allocation11 + $0x1940] sm:$0xff] }
 0x347   :  { %7756 = vmatpush1.bf16.msra.mxu1 %v11880_v15  ;;  %7493 = vmatprep.subr.bf16.mxu0 %v12119_v62  ;;  %v1861_v15 = vld [vmem:[#allocation11 + $0x1960] sm:$0xff]  ;;  %v1626_v62 = vld [vmem:[#allocation11 + $0x1208] sm:$0xff] }
 0x348   :  { %7757 = vmatprep.subr.bf16.mxu1 %v11889_v47  ;;  %v1630_v47 = vld [vmem:[#allocation11 + $0x1228] sm:$0xff]  ;;  %v12159_v3 = vcombine.high %v1857_v14, %v1861_v15  ;;  %v12158_v52 = vcombine.low %v1857_v14, %v1861_v15 }
 0x349   :  { %7483 = vmatmul.mubr.bf16.vlgmr.msra.gmra.mrb[20].mxu0 %v14153_v0  ;;  %v11929_v37 = vcombine.high %v1626_v62, %v1630_v47  ;;  %v11928_v25 = vcombine.low %v1626_v62, %v1630_v47 }
 0x34a   :  { %7494 = vmatpush1.bf16.msra.mxu0 %v12118_v36  ;;  %7525 = vmatprep.mubr.bf16.mxu0 %v14261_v5  ;;  %v1865_v36 = vld [vmem:[#allocation11 + $0x1980] sm:$0xff] }
 0x34b   :  { %7758 = vmatpush1.bf16.msra.mxu1 %v11888_v38  ;;  %7495 = vmatprep.subr.bf16.mxu0 %v12127_v46  ;;  %v1869_v38 = vld [vmem:[#allocation11 + $0x19a0] sm:$0xff]  ;;  %v1634_v46 = vld [vmem:[#allocation11 + $0x1248] sm:$0xff] }
 0x34c   :  { %7759 = vmatprep.subr.bf16.mxu1 %v11897_v63  ;;  %v1638_v63 = vld [vmem:[#allocation11 + $0x1268] sm:$0xff]  ;;  %v12167_v17 = vcombine.high %v1865_v36, %v1869_v38  ;;  %v12166_v35 = vcombine.low %v1865_v36, %v1869_v38 }
 0x34d   :  { %v11937_v18 = vcombine.high %v1634_v46, %v1638_v63  ;;  %v11936_v50 = vcombine.low %v1634_v46, %v1638_v63 }
 0x34e   :  { %7496 = vmatpush1.bf16.msra.mxu0 %v12126_v56  ;;  %v1873_v56 = vld [vmem:[#allocation11 + $0x19c0] sm:$0xff] }
 0x34f   :  { %7760 = vmatpush1.bf16.msra.mxu1 %v11896_v11  ;;  %7497 = vmatprep.subr.bf16.mxu0 %v12135_v24  ;;  %v1877_v11 = vld [vmem:[#allocation11 + $0x19e0] sm:$0xff]  ;;  %v1642_v24 = vld [vmem:[#allocation11 + $0x1288] sm:$0xff] }
 0x350   :  { %7761 = vmatprep.subr.bf16.mxu1 %v11905_v6  ;;  %v1646_v6 = vld [vmem:[#allocation11 + $0x12a8] sm:$0xff]  ;;  %v12175_v12 = vcombine.high %v1873_v56, %v1877_v11  ;;  %v12174_v31 = vcombine.low %v1873_v56, %v1877_v11 }
 0x351   :  { %v11945_v23 = vcombine.high %v1642_v24, %v1646_v6  ;;  %v11944_v33 = vcombine.low %v1642_v24, %v1646_v6 }
 0x352   :  { %7498 = vmatpush1.bf16.msra.mxu0 %v12134_v7  ;;  %v1881_v7 = vld [vmem:[#allocation11 + $0x1a00] sm:$0xff] }
 0x353   :  { %7762 = vmatpush1.bf16.msra.mxu1 %v11904_v13  ;;  %7499 = vmatprep.subr.bf16.mxu0 %v12143_v8  ;;  %v1885_v13 = vld [vmem:[#allocation11 + $0x1a20] sm:$0xff]  ;;  %v1650_v8 = vld [vmem:[#allocation11 + $0x12c8] sm:$0xff] }
 0x354   :  { %7763 = vmatprep.subr.bf16.mxu1 %v11913_v29  ;;  %v1654_v29 = vld [vmem:[#allocation11 + $0x12e8] sm:$0xff]  ;;  %v12183_v49 = vcombine.high %v1881_v7, %v1885_v13  ;;  %v12182_v14 = vcombine.low %v1881_v7, %v1885_v13 }
 0x355   :  { %v11953_v16 = vcombine.high %v1650_v8, %v1654_v29  ;;  %v11952_v15 = vcombine.low %v1650_v8, %v1654_v29 }
 0x356   :  { %7500 = vmatpush1.bf16.msra.mxu0 %v12142_v42  ;;  %v1889_v42 = vld [vmem:[#allocation11 + $0x1a40] sm:$0xff] }
 0x357   :  { %7764 = vmatpush1.bf16.msra.mxu1 %v11912_v43  ;;  %7501 = vmatprep.subr.bf16.mxu0 %v12151_v39  ;;  %v1893_v43 = vld [vmem:[#allocation11 + $0x1a60] sm:$0xff]  ;;  %v1658_v39 = vld [vmem:[#allocation11 + $0x1308] sm:$0xff] }
 0x358   :  { %7765 = vmatprep.subr.bf16.mxu1 %v11921_v40  ;;  %v1662_v40 = vld [vmem:[#allocation11 + $0x1328] sm:$0xff]  ;;  %v12191_v62 = vcombine.high %v1889_v42, %v1893_v43  ;;  %v12190_v36 = vcombine.low %v1889_v42, %v1893_v43 }
 0x359   :  { %v11961_v47 = vcombine.high %v1658_v39, %v1662_v40  ;;  %v11960_v38 = vcombine.low %v1658_v39, %v1662_v40 }
 0x35a   :  { %7502 = vmatpush1.bf16.msra.mxu0 %v12150_v48  ;;  %v1897_v48 = vld [vmem:[#allocation11 + $0x1a80] sm:$0xff] }
 0x35b   :  { %7766 = vmatpush1.bf16.msra.mxu1 %v11920_v10  ;;  %7503 = vmatprep.subr.bf16.mxu0 %v12159_v3  ;;  %v1901_v10 = vld [vmem:[#allocation11 + $0x1aa0] sm:$0xff]  ;;  %v1666_v3 = vld [vmem:[#allocation11 + $0x1348] sm:$0xff] }
 0x35c   :  { %7767 = vmatprep.subr.bf16.mxu1 %v11929_v37  ;;  %v1670_v37 = vld [vmem:[#allocation11 + $0x1368] sm:$0xff]  ;;  %v12199_v46 = vcombine.high %v1897_v48, %v1901_v10  ;;  %v12198_v56 = vcombine.low %v1897_v48, %v1901_v10 }
 0x35d   :  { %v11969_v63 = vcombine.high %v1666_v3, %v1670_v37  ;;  %v11968_v11 = vcombine.low %v1666_v3, %v1670_v37 }
 0x35e   :  { %7504 = vmatpush1.bf16.msra.mxu0 %v12158_v52  ;;  %v1905_v52 = vld [vmem:[#allocation11 + $0x1ac0] sm:$0xff] }
 0x35f   :  { %7768 = vmatpush1.bf16.msra.mxu1 %v11928_v25  ;;  %7505 = vmatprep.subr.bf16.mxu0 %v12167_v17  ;;  %v1909_v25 = vld [vmem:[#allocation11 + $0x1ae0] sm:$0xff]  ;;  %v1674_v17 = vld [vmem:[#allocation11 + $0x1388] sm:$0xff] }
 0x360   :  { %7769 = vmatprep.subr.bf16.mxu1 %v11937_v18  ;;  %v1678_v18 = vld [vmem:[#allocation11 + $0x13a8] sm:$0xff]  ;;  %v12207_v24 = vcombine.high %v1905_v52, %v1909_v25  ;;  %v12206_v7 = vcombine.low %v1905_v52, %v1909_v25 }
 0x361   :  { %v11977_v6 = vcombine.high %v1674_v17, %v1678_v18  ;;  %v11976_v13 = vcombine.low %v1674_v17, %v1678_v18 }
 0x362   :  { %7506 = vmatpush1.bf16.msra.mxu0 %v12166_v35  ;;  %v1913_v35 = vld [vmem:[#allocation11 + $0x1b00] sm:$0xff] }
 0x363   :  { %7770 = vmatpush1.bf16.msra.mxu1 %v11936_v50  ;;  %7507 = vmatprep.subr.bf16.mxu0 %v12175_v12  ;;  %v1917_v50 = vld [vmem:[#allocation11 + $0x1b20] sm:$0xff]  ;;  %v1682_v12 = vld [vmem:[#allocation11 + $0x13c8] sm:$0xff] }
 0x364   :  { %7771 = vmatprep.subr.bf16.mxu1 %v11945_v23  ;;  %v1686_v23 = vld [vmem:[#allocation11 + $0x13e8] sm:$0xff]  ;;  %v12215_v8 = vcombine.high %v1913_v35, %v1917_v50  ;;  %v12214_v42 = vcombine.low %v1913_v35, %v1917_v50 }
 0x365   :  { %v11985_v29 = vcombine.high %v1682_v12, %v1686_v23  ;;  %v11984_v43 = vcombine.low %v1682_v12, %v1686_v23 }
 0x366   :  { %7508 = vmatpush1.bf16.msra.mxu0 %v12174_v31  ;;  %v1921_v31 = vld [vmem:[#allocation11 + $0x1b40] sm:$0xff] }
 0x367   :  { %7772 = vmatpush1.bf16.msra.mxu1 %v11944_v33  ;;  %7509 = vmatprep.subr.bf16.mxu0 %v12183_v49  ;;  %v1925_v33 = vld [vmem:[#allocation11 + $0x1b60] sm:$0xff]  ;;  %v1690_v49 = vld [vmem:[#allocation11 + $0x1408] sm:$0xff] }
 0x368   :  { %7773 = vmatprep.subr.bf16.mxu1 %v11953_v16  ;;  %v1694_v16 = vld [vmem:[#allocation11 + $0x1428] sm:$0xff]  ;;  %v12223_v39 = vcombine.high %v1921_v31, %v1925_v33  ;;  %v12222_v48 = vcombine.low %v1921_v31, %v1925_v33 }
 0x369   :  { %v11993_v40 = vcombine.high %v1690_v49, %v1694_v16  ;;  %v11992_v10 = vcombine.low %v1690_v49, %v1694_v16 }
 0x36a   :  { %7510 = vmatpush1.bf16.msra.mxu0 %v12182_v14  ;;  %v1929_v14 = vld [vmem:[#allocation11 + $0x1b80] sm:$0xff] }
 0x36b   :  { %7774 = vmatpush1.bf16.msra.mxu1 %v11952_v15  ;;  %7511 = vmatprep.subr.bf16.mxu0 %v12191_v62  ;;  %v1933_v15 = vld [vmem:[#allocation11 + $0x1ba0] sm:$0xff]  ;;  %v1698_v62 = vld [vmem:[#allocation11 + $0x1448] sm:$0xff] }
 0x36c   :  { %7775 = vmatprep.subr.bf16.mxu1 %v11961_v47  ;;  %v1702_v47 = vld [vmem:[#allocation11 + $0x1468] sm:$0xff]  ;;  %v12231_v3 = vcombine.high %v1929_v14, %v1933_v15  ;;  %v12230_v52 = vcombine.low %v1929_v14, %v1933_v15 }
 0x36d   :  { %v12001_v37 = vcombine.high %v1698_v62, %v1702_v47  ;;  %v12000_v25 = vcombine.low %v1698_v62, %v1702_v47 }
 0x36e   :  { %7512 = vmatpush1.bf16.msra.mxu0 %v12190_v36  ;;  %v1937_v36 = vld [vmem:[#allocation11 + $0x1bc0] sm:$0xff] }
 0x36f   :  { %7776 = vmatpush1.bf16.msra.mxu1 %v11960_v38  ;;  %7513 = vmatprep.subr.bf16.mxu0 %v12199_v46  ;;  %v1941_v38 = vld [vmem:[#allocation11 + $0x1be0] sm:$0xff]  ;;  %v1706_v46 = vld [vmem:[#allocation11 + $0x1488] sm:$0xff] }
 0x370   :  { %7777 = vmatprep.subr.bf16.mxu1 %v11969_v63  ;;  %v1710_v63 = vld [vmem:[#allocation11 + $0x14a8] sm:$0xff]  ;;  %v12239_v17 = vcombine.high %v1937_v36, %v1941_v38  ;;  %v12238_v35 = vcombine.low %v1937_v36, %v1941_v38 }
 0x371   :  { %v12009_v18 = vcombine.high %v1706_v46, %v1710_v63  ;;  %v12008_v50 = vcombine.low %v1706_v46, %v1710_v63 }
 0x372   :  { %7514 = vmatpush1.bf16.msra.mxu0 %v12198_v56  ;;  %v1945_v56 = vld [vmem:[#allocation11 + $0x1c00] sm:$0xff] }
 0x373   :  { %7778 = vmatpush1.bf16.msra.mxu1 %v11968_v11  ;;  %7515 = vmatprep.subr.bf16.mxu0 %v12207_v24  ;;  %v1949_v11 = vld [vmem:[#allocation11 + $0x1c20] sm:$0xff]  ;;  %v1714_v24 = vld [vmem:[#allocation11 + $0x14c8] sm:$0xff] }
 0x374   :  { %7779 = vmatprep.subr.bf16.mxu1 %v11977_v6  ;;  %v1718_v6 = vld [vmem:[#allocation11 + $0x14e8] sm:$0xff]  ;;  %v12247_v12 = vcombine.high %v1945_v56, %v1949_v11  ;;  %v12246_v31 = vcombine.low %v1945_v56, %v1949_v11 }
 0x375   :  { %v12017_v23 = vcombine.high %v1714_v24, %v1718_v6  ;;  %v12016_v33 = vcombine.low %v1714_v24, %v1718_v6 }
 0x376   :  { %7516 = vmatpush1.bf16.msra.mxu0 %v12206_v7  ;;  %v1953_v7 = vld [vmem:[#allocation11 + $0x1c40] sm:$0xff] }
 0x377   :  { %7780 = vmatpush1.bf16.msra.mxu1 %v11976_v13  ;;  %7517 = vmatprep.subr.bf16.mxu0 %v12215_v8  ;;  %v1957_v13 = vld [vmem:[#allocation11 + $0x1c60] sm:$0xff]  ;;  %v1722_v8 = vld [vmem:[#allocation11 + $0x1508] sm:$0xff] }
 0x378   :  { %7781 = vmatprep.subr.bf16.mxu1 %v11985_v29  ;;  %v1726_v29 = vld [vmem:[#allocation11 + $0x1528] sm:$0xff]  ;;  %v12255_v49 = vcombine.high %v1953_v7, %v1957_v13  ;;  %v12254_v14 = vcombine.low %v1953_v7, %v1957_v13 }
 0x379   :  { %v12025_v16 = vcombine.high %v1722_v8, %v1726_v29  ;;  %v12024_v15 = vcombine.low %v1722_v8, %v1726_v29 }
 0x37a   :  { %7518 = vmatpush1.bf16.msra.mxu0 %v12214_v42  ;;  %v1961_v42 = vld [vmem:[#allocation11 + $0x1c80] sm:$0xff] }
 0x37b   :  { %7782 = vmatpush1.bf16.msra.mxu1 %v11984_v43  ;;  %7519 = vmatprep.subr.bf16.mxu0 %v12223_v39  ;;  %v1965_v43 = vld [vmem:[#allocation11 + $0x1ca0] sm:$0xff]  ;;  %v1730_v39 = vld [vmem:[#allocation11 + $0x1548] sm:$0xff] }
 0x37c   :  { %7794 = vmatprep.subr.bf16.mxu1 %v11993_v40  ;;  %v1734_v40 = vld [vmem:[#allocation11 + $0x1568] sm:$0xff]  ;;  %v12263_v62 = vcombine.high %v1961_v42, %v1965_v43  ;;  %v12262_v36 = vcombine.low %v1961_v42, %v1965_v43 }
 0x37d   :  { %v12033_v47 = vcombine.high %v1730_v39, %v1734_v40  ;;  %v12032_v38 = vcombine.low %v1730_v39, %v1734_v40 }
 0x37e   :  { %7520 = vmatpush1.bf16.msra.mxu0 %v12222_v48  ;;  %7784 = vmatmul.mubr.bf16.vlgmr.msra.gmra.mrb[16].mxu1 %v14250_v28  ;;  %v1969_v48 = vld [vmem:[#allocation11 + $0x1cc0] sm:$0xff] }
 0x37f   :  { %7795 = vmatpush1.bf16.msra.mxu1 %v11992_v10  ;;  %7826 = vmatprep.mubr.bf16.mxu1 %v14161_v22  ;;  %v1973_v10 = vld [vmem:[#allocation11 + $0x1ce0] sm:$0xff] }
 0x380   :  { %7521 = vmatprep.subr.bf16.mxu0 %v12231_v3  ;;  %7796 = vmatprep.subr.bf16.mxu1 %v12001_v37  ;;  %v1738_v3 = vld [vmem:[#allocation11 + $0x1588] sm:$0xff]  ;;  %v12271_v46 = vcombine.high %v1969_v48, %v1973_v10  ;;  %v12270_v56 = vcombine.low %v1969_v48, %v1973_v10 }
 0x381   :  { %v1742_v37 = vld [vmem:[#allocation11 + $0x15a8] sm:$0xff] }
 0x382   :  { %7522 = vmatpush1.bf16.msra.mxu0 %v12230_v52  ;;  %v12041_v63 = vcombine.high %v1738_v3, %v1742_v37  ;;  %v1977_v52 = vld [vmem:[#allocation11 + $0x1d00] sm:$0xff]  ;;  %v12040_v11 = vcombine.low %v1738_v3, %v1742_v37 }
 0x383   :  { %7797 = vmatpush1.bf16.msra.mxu1 %v12000_v25  ;;  %7523 = vmatprep.subr.bf16.mxu0 %v12239_v17  ;;  %v1981_v25 = vld [vmem:[#allocation11 + $0x1d20] sm:$0xff]  ;;  %v1746_v17 = vld [vmem:[#allocation11 + $0x15c8] sm:$0xff] }
 0x384   :  { %7798 = vmatprep.subr.bf16.mxu1 %v12009_v18  ;;  %v1750_v18 = vld [vmem:[#allocation11 + $0x15e8] sm:$0xff]  ;;  %v12279_v24 = vcombine.high %v1977_v52, %v1981_v25  ;;  %v12278_v7 = vcombine.low %v1977_v52, %v1981_v25 }
 0x385   :  { %v12049_v6 = vcombine.high %v1746_v17, %v1750_v18  ;;  %v12048_v13 = vcombine.low %v1746_v17, %v1750_v18 }
 0x386   :  { %7524 = vmatpush1.bf16.msra.mxu0 %v12238_v35  ;;  %v1985_v35 = vld [vmem:[#allocation11 + $0x1d40] sm:$0xff] }
 0x387   :  { %7799 = vmatpush1.bf16.msra.mxu1 %v12008_v50  ;;  %7536 = vmatprep.subr.bf16.mxu0 %v12247_v12  ;;  %v1989_v50 = vld [vmem:[#allocation11 + $0x1d60] sm:$0xff]  ;;  %v1754_v12 = vld [vmem:[#allocation11 + $0x1608] sm:$0xff] }
 0x388   :  { %7800 = vmatprep.subr.bf16.mxu1 %v12017_v23  ;;  %v1758_v23 = vld [vmem:[#allocation11 + $0x1628] sm:$0xff]  ;;  %v12287_v8 = vcombine.high %v1985_v35, %v1989_v50  ;;  %v12286_v42 = vcombine.low %v1985_v35, %v1989_v50 }
 0x389   :  { %7526 = vmatmul.mubr.bf16.vlgmr.msra.gmra.mrb[20].mxu0 %v14259_v26  ;;  %v12057_v29 = vcombine.high %v1754_v12, %v1758_v23  ;;  %v12056_v43 = vcombine.low %v1754_v12, %v1758_v23 }
 0x38a   :  { %7537 = vmatpush1.bf16.msra.mxu0 %v12246_v31  ;;  %7568 = vmatprep.mubr.bf16.mxu0 %v14232_v9  ;;  %v1993_v31 = vld [vmem:[#allocation11 + $0x1d80] sm:$0xff] }
 0x38b   :  { %7801 = vmatpush1.bf16.msra.mxu1 %v12016_v33  ;;  %7538 = vmatprep.subr.bf16.mxu0 %v12255_v49  ;;  %v1997_v33 = vld [vmem:[#allocation11 + $0x1da0] sm:$0xff]  ;;  %v1762_v49 = vld [vmem:[#allocation11 + $0x1648] sm:$0xff] }
 0x38c   :  { %7802 = vmatprep.subr.bf16.mxu1 %v12025_v16  ;;  %v1766_v16 = vld [vmem:[#allocation11 + $0x1668] sm:$0xff]  ;;  %v12295_v39 = vcombine.high %v1993_v31, %v1997_v33  ;;  %v12294_v48 = vcombine.low %v1993_v31, %v1997_v33 }
 0x38d   :  { %v12065_v40 = vcombine.high %v1762_v49, %v1766_v16  ;;  %v12064_v10 = vcombine.low %v1762_v49, %v1766_v16 }
 0x38e   :  { %7539 = vmatpush1.bf16.msra.mxu0 %v12254_v14  ;;  %v2001_v14 = vld [vmem:[#allocation11 + $0x1dc0] sm:$0xff] }
 0x38f   :  { %7803 = vmatpush1.bf16.msra.mxu1 %v12024_v15  ;;  %7540 = vmatprep.subr.bf16.mxu0 %v12263_v62  ;;  %v2005_v15 = vld [vmem:[#allocation11 + $0x1de0] sm:$0xff]  ;;  %v1770_v62 = vld [vmem:[#allocation11 + $0x1688] sm:$0xff] }
 0x390   :  { %7804 = vmatprep.subr.bf16.mxu1 %v12033_v47  ;;  %v1774_v47 = vld [vmem:[#allocation11 + $0x16a8] sm:$0xff]  ;;  %v12303_v3 = vcombine.high %v2001_v14, %v2005_v15  ;;  %v12302_v52 = vcombine.low %v2001_v14, %v2005_v15 }
 0x391   :  { %v12073_v37 = vcombine.high %v1770_v62, %v1774_v47  ;;  %v12072_v25 = vcombine.low %v1770_v62, %v1774_v47 }
 0x392   :  { %7541 = vmatpush1.bf16.msra.mxu0 %v12262_v36  ;;  %v2009_v36 = vld [vmem:[#allocation11 + $0x1e00] sm:$0xff] }
 0x393   :  { %7805 = vmatpush1.bf16.msra.mxu1 %v12032_v38  ;;  %7542 = vmatprep.subr.bf16.mxu0 %v12271_v46  ;;  %v2013_v38 = vld [vmem:[#allocation11 + $0x1e20] sm:$0xff]  ;;  %v1778_v46 = vld [vmem:[#allocation11 + $0x16c8] sm:$0xff] }
 0x394   :  { %7806 = vmatprep.subr.bf16.mxu1 %v12041_v63  ;;  %v1782_v63 = vld [vmem:[#allocation11 + $0x16e8] sm:$0xff]  ;;  %v12311_v17 = vcombine.high %v2009_v36, %v2013_v38  ;;  %v12310_v35 = vcombine.low %v2009_v36, %v2013_v38 }
 0x395   :  { %v12081_v18 = vcombine.high %v1778_v46, %v1782_v63  ;;  %v12080_v50 = vcombine.low %v1778_v46, %v1782_v63 }
 0x396   :  { %7543 = vmatpush1.bf16.msra.mxu0 %v12270_v56  ;;  %v2017_v56 = vld [vmem:[#allocation11 + $0x1e40] sm:$0xff] }
 0x397   :  { %7807 = vmatpush1.bf16.msra.mxu1 %v12040_v11  ;;  %7544 = vmatprep.subr.bf16.mxu0 %v12279_v24  ;;  %v2021_v11 = vld [vmem:[#allocation11 + $0x1e60] sm:$0xff]  ;;  %v1786_v24 = vld [vmem:[#allocation11 + $0x1708] sm:$0xff] }
 0x398   :  { %7808 = vmatprep.subr.bf16.mxu1 %v12049_v6  ;;  %v1790_v6 = vld [vmem:[#allocation11 + $0x1728] sm:$0xff]  ;;  %v12319_v12 = vcombine.high %v2017_v56, %v2021_v11  ;;  %v12318_v31 = vcombine.low %v2017_v56, %v2021_v11 }
 0x399   :  { %v12089_v23 = vcombine.high %v1786_v24, %v1790_v6  ;;  %v12088_v33 = vcombine.low %v1786_v24, %v1790_v6 }
 0x39a   :  { %7545 = vmatpush1.bf16.msra.mxu0 %v12278_v7  ;;  %v2025_v7 = vld [vmem:[#allocation11 + $0x1e80] sm:$0xff] }
 0x39b   :  { %7809 = vmatpush1.bf16.msra.mxu1 %v12048_v13  ;;  %7546 = vmatprep.subr.bf16.mxu0 %v12287_v8  ;;  %v2029_v13 = vld [vmem:[#allocation11 + $0x1ea0] sm:$0xff]  ;;  %v1794_v8 = vld [vmem:[#allocation11 + $0x1748] sm:$0xff] }
 0x39c   :  { %7810 = vmatprep.subr.bf16.mxu1 %v12057_v29  ;;  %v1798_v29 = vld [vmem:[#allocation11 + $0x1768] sm:$0xff]  ;;  %v12327_v49 = vcombine.high %v2025_v7, %v2029_v13  ;;  %v12326_v14 = vcombine.low %v2025_v7, %v2029_v13 }
 0x39d   :  { %v12097_v16 = vcombine.high %v1794_v8, %v1798_v29  ;;  %v12096_v15 = vcombine.low %v1794_v8, %v1798_v29 }
 0x39e   :  { %7547 = vmatpush1.bf16.msra.mxu0 %v12286_v42  ;;  %v2033_v42 = vld [vmem:[#allocation11 + $0x1ec0] sm:$0xff] }
 0x39f   :  { %7811 = vmatpush1.bf16.msra.mxu1 %v12056_v43  ;;  %7548 = vmatprep.subr.bf16.mxu0 %v12295_v39  ;;  %v2037_v43 = vld [vmem:[#allocation11 + $0x1ee0] sm:$0xff]  ;;  %v1802_v39 = vld [vmem:[#allocation11 + $0x1788] sm:$0xff] }
 0x3a0   :  { %7812 = vmatprep.subr.bf16.mxu1 %v12065_v40  ;;  %v1806_v40 = vld [vmem:[#allocation11 + $0x17a8] sm:$0xff]  ;;  %v12335_v62 = vcombine.high %v2033_v42, %v2037_v43  ;;  %v12334_v36 = vcombine.low %v2033_v42, %v2037_v43 }
 0x3a1   :  { %v12105_v47 = vcombine.high %v1802_v39, %v1806_v40  ;;  %v12104_v38 = vcombine.low %v1802_v39, %v1806_v40 }
 0x3a2   :  { %7549 = vmatpush1.bf16.msra.mxu0 %v12294_v48  ;;  %v2041_v48 = vld [vmem:[#allocation11 + $0x1f00] sm:$0xff] }
 0x3a3   :  { %7813 = vmatpush1.bf16.msra.mxu1 %v12064_v10  ;;  %7550 = vmatprep.subr.bf16.mxu0 %v12303_v3  ;;  %v2045_v10 = vld [vmem:[#allocation11 + $0x1f20] sm:$0xff]  ;;  %v1810_v3 = vld [vmem:[#allocation11 + $0x17c8] sm:$0xff] }
 0x3a4   :  { %7814 = vmatprep.subr.bf16.mxu1 %v12073_v37  ;;  %v1814_v37 = vld [vmem:[#allocation11 + $0x17e8] sm:$0xff]  ;;  %v12343_v46 = vcombine.high %v2041_v48, %v2045_v10  ;;  %v12342_v56 = vcombine.low %v2041_v48, %v2045_v10 }
 0x3a5   :  { %v12113_v63 = vcombine.high %v1810_v3, %v1814_v37  ;;  %v12112_v11 = vcombine.low %v1810_v3, %v1814_v37 }
 0x3a6   :  { %7551 = vmatpush1.bf16.msra.mxu0 %v12302_v52  ;;  %v2049_v52 = vld [vmem:[#allocation11 + $0x1f40] sm:$0xff] }
 0x3a7   :  { %7815 = vmatpush1.bf16.msra.mxu1 %v12072_v25  ;;  %7552 = vmatprep.subr.bf16.mxu0 %v12311_v17  ;;  %v2053_v25 = vld [vmem:[#allocation11 + $0x1f60] sm:$0xff]  ;;  %v1818_v17 = vld [vmem:[#allocation11 + $0x1808] sm:$0xff] }
 0x3a8   :  { %7816 = vmatprep.subr.bf16.mxu1 %v12081_v18  ;;  %v1822_v18 = vld [vmem:[#allocation11 + $0x1828] sm:$0xff]  ;;  %v12351_v24 = vcombine.high %v2049_v52, %v2053_v25  ;;  %v12350_v7 = vcombine.low %v2049_v52, %v2053_v25 }
 0x3a9   :  { %v12121_v6 = vcombine.high %v1818_v17, %v1822_v18  ;;  %v12120_v13 = vcombine.low %v1818_v17, %v1822_v18 }
 0x3aa   :  { %7553 = vmatpush1.bf16.msra.mxu0 %v12310_v35  ;;  %v2057_v35 = vld [vmem:[#allocation11 + $0x1f80] sm:$0xff] }
 0x3ab   :  { %7817 = vmatpush1.bf16.msra.mxu1 %v12080_v50  ;;  %7554 = vmatprep.subr.bf16.mxu0 %v12319_v12  ;;  %v2061_v50 = vld [vmem:[#allocation11 + $0x1fa0] sm:$0xff]  ;;  %v1826_v12 = vld [vmem:[#allocation11 + $0x1848] sm:$0xff] }
 0x3ac   :  { %7818 = vmatprep.subr.bf16.mxu1 %v12089_v23  ;;  %v1830_v23 = vld [vmem:[#allocation11 + $0x1868] sm:$0xff]  ;;  %v12359_v8 = vcombine.high %v2057_v35, %v2061_v50  ;;  %v12358_v42 = vcombine.low %v2057_v35, %v2061_v50 }
 0x3ad   :  { %v12129_v29 = vcombine.high %v1826_v12, %v1830_v23  ;;  %v12128_v43 = vcombine.low %v1826_v12, %v1830_v23 }
 0x3ae   :  { %7555 = vmatpush1.bf16.msra.mxu0 %v12318_v31  ;;  %v2065_v31 = vld [vmem:[#allocation11 + $0x1fc0] sm:$0xff] }
 0x3af   :  { %7819 = vmatpush1.bf16.msra.mxu1 %v12088_v33  ;;  %7556 = vmatprep.subr.bf16.mxu0 %v12327_v49  ;;  %v2069_v33 = vld [vmem:[#allocation11 + $0x1fe0] sm:$0xff]  ;;  %v1834_v49 = vld [vmem:[#allocation11 + $0x1888] sm:$0xff] }
 0x3b0   :  { %7820 = vmatprep.subr.bf16.mxu1 %v12097_v16  ;;  %v1838_v16 = vld [vmem:[#allocation11 + $0x18a8] sm:$0xff]  ;;  %v12367_v39 = vcombine.high %v2065_v31, %v2069_v33  ;;  %v12366_v48 = vcombine.low %v2065_v31, %v2069_v33 }
 0x3b1   :  { %v12137_v40 = vcombine.high %v1834_v49, %v1838_v16  ;;  %v12136_v10 = vcombine.low %v1834_v49, %v1838_v16 }
 0x3b2   :  { %7557 = vmatpush1.bf16.msra.mxu0 %v12326_v14  ;;  %v1051_v14 = vld [vmem:[#allocation11 + $0x10] sm:$0xff] }
 0x3b3   :  { %7821 = vmatpush1.bf16.msra.mxu1 %v12096_v15  ;;  %7558 = vmatprep.subr.bf16.mxu0 %v12335_v62  ;;  %v1055_v15 = vld [vmem:[#allocation11 + $0x30] sm:$0xff]  ;;  %v1842_v62 = vld [vmem:[#allocation11 + $0x18c8] sm:$0xff] }
 0x3b4   :  { %7822 = vmatprep.subr.bf16.mxu1 %v12105_v47  ;;  %v1846_v47 = vld [vmem:[#allocation11 + $0x18e8] sm:$0xff]  ;;  %v11355_v3 = vcombine.high %v1051_v14, %v1055_v15  ;;  %v11354_v52 = vcombine.low %v1051_v14, %v1055_v15 }
 0x3b5   :  { %v12145_v37 = vcombine.high %v1842_v62, %v1846_v47  ;;  %v12144_v25 = vcombine.low %v1842_v62, %v1846_v47 }
 0x3b6   :  { %7559 = vmatpush1.bf16.msra.mxu0 %v12334_v36  ;;  %v1059_v36 = vld [vmem:[#allocation11 + $0x50] sm:$0xff] }
 0x3b7   :  { %7823 = vmatpush1.bf16.msra.mxu1 %v12104_v38  ;;  %7560 = vmatprep.subr.bf16.mxu0 %v12343_v46  ;;  %v1063_v38 = vld [vmem:[#allocation11 + $0x70] sm:$0xff]  ;;  %v1850_v46 = vld [vmem:[#allocation11 + $0x1908] sm:$0xff] }
 0x3b8   :  { %7824 = vmatprep.subr.bf16.mxu1 %v12113_v63  ;;  %v1854_v63 = vld [vmem:[#allocation11 + $0x1928] sm:$0xff]  ;;  %v11363_v17 = vcombine.high %v1059_v36, %v1063_v38  ;;  %v11362_v35 = vcombine.low %v1059_v36, %v1063_v38 }
 0x3b9   :  { %v12153_v18 = vcombine.high %v1850_v46, %v1854_v63  ;;  %v12152_v50 = vcombine.low %v1850_v46, %v1854_v63 }
 0x3ba   :  { %7561 = vmatpush1.bf16.msra.mxu0 %v12342_v56  ;;  %v1067_v56 = vld [vmem:[#allocation11 + $0x90] sm:$0xff] }
 0x3bb   :  { %7825 = vmatpush1.bf16.msra.mxu1 %v12112_v11  ;;  %7562 = vmatprep.subr.bf16.mxu0 %v12351_v24  ;;  %v1071_v11 = vld [vmem:[#allocation11 + $0xb0] sm:$0xff]  ;;  %v1858_v24 = vld [vmem:[#allocation11 + $0x1948] sm:$0xff] }
 0x3bc   :  { %7837 = vmatprep.subr.bf16.mxu1 %v12121_v6  ;;  %v1862_v6 = vld [vmem:[#allocation11 + $0x1968] sm:$0xff]  ;;  %v11371_v12 = vcombine.high %v1067_v56, %v1071_v11  ;;  %v11370_v31 = vcombine.low %v1067_v56, %v1071_v11 }
 0x3bd   :  { %v12161_v23 = vcombine.high %v1858_v24, %v1862_v6  ;;  %v12160_v33 = vcombine.low %v1858_v24, %v1862_v6 }
 0x3be   :  { %7563 = vmatpush1.bf16.msra.mxu0 %v12350_v7  ;;  %7827 = vmatmul.mubr.bf16.vlgmr.msra.gmra.mrb[16].mxu1 %v14153_v0  ;;  %v1075_v7 = vld [vmem:[#allocation11 + $0xd0] sm:$0xff] }
 0x3bf   :  { %7838 = vmatpush1.bf16.msra.mxu1 %v12120_v13  ;;  %7869 = vmatprep.mubr.bf16.mxu1 %v14261_v5  ;;  %v1079_v13 = vld [vmem:[#allocation11 + $0xf0] sm:$0xff] }
 0x3c0   :  { %7564 = vmatprep.subr.bf16.mxu0 %v12359_v8  ;;  %7839 = vmatprep.subr.bf16.mxu1 %v12129_v29  ;;  %v1866_v8 = vld [vmem:[#allocation11 + $0x1988] sm:$0xff]  ;;  %v11379_v49 = vcombine.high %v1075_v7, %v1079_v13  ;;  %v11378_v14 = vcombine.low %v1075_v7, %v1079_v13 }
 0x3c1   :  { %v1870_v29 = vld [vmem:[#allocation11 + $0x19a8] sm:$0xff] }
 0x3c2   :  { %7565 = vmatpush1.bf16.msra.mxu0 %v12358_v42  ;;  %v12169_v16 = vcombine.high %v1866_v8, %v1870_v29  ;;  %v1083_v42 = vld [vmem:[#allocation11 + $0x110] sm:$0xff]  ;;  %v12168_v15 = vcombine.low %v1866_v8, %v1870_v29 }
 0x3c3   :  { %7840 = vmatpush1.bf16.msra.mxu1 %v12128_v43  ;;  %7566 = vmatprep.subr.bf16.mxu0 %v12367_v39  ;;  %v1087_v43 = vld [vmem:[#allocation11 + $0x130] sm:$0xff]  ;;  %v1874_v39 = vld [vmem:[#allocation11 + $0x19c8] sm:$0xff] }
 0x3c4   :  { %7841 = vmatprep.subr.bf16.mxu1 %v12137_v40  ;;  %v1878_v40 = vld [vmem:[#allocation11 + $0x19e8] sm:$0xff]  ;;  %v11387_v62 = vcombine.high %v1083_v42, %v1087_v43  ;;  %v11386_v36 = vcombine.low %v1083_v42, %v1087_v43 }
 0x3c5   :  { %v12177_v47 = vcombine.high %v1874_v39, %v1878_v40  ;;  %v12176_v38 = vcombine.low %v1874_v39, %v1878_v40 }
 0x3c6   :  { %7567 = vmatpush1.bf16.msra.mxu0 %v12366_v48  ;;  %v1091_v48 = vld [vmem:[#allocation11 + $0x150] sm:$0xff] }
 0x3c7   :  { %7842 = vmatpush1.bf16.msra.mxu1 %v12136_v10  ;;  %7923 = vmatprep.subr.bf16.mxu0 %v11355_v3  ;;  %v1095_v10 = vld [vmem:[#allocation11 + $0x170] sm:$0xff]  ;;  %v1882_v3 = vld [vmem:[#allocation11 + $0x1a08] sm:$0xff] }
 0x3c8   :  { %7843 = vmatprep.subr.bf16.mxu1 %v12145_v37  ;;  %v1886_v37 = vld [vmem:[#allocation11 + $0x1a28] sm:$0xff]  ;;  %v11395_v46 = vcombine.high %v1091_v48, %v1095_v10  ;;  %v11394_v56 = vcombine.low %v1091_v48, %v1095_v10 }
 0x3c9   :  { %7569 = vmatmul.mubr.bf16.vlgmr.msra.gmra.mrb[20].mxu0 %v14228_v27  ;;  %v12185_v63 = vcombine.high %v1882_v3, %v1886_v37  ;;  %v12184_v11 = vcombine.low %v1882_v3, %v1886_v37 }
 0x3ca   :  { %7924 = vmatpush1.bf16.msra.mxu0 %v11354_v52  ;;  %7955 = vmatprep.mubr.bf16.mxu0 %v14083_v59  ;;  %v1099_v52 = vld [vmem:[#allocation11 + $0x190] sm:$0xff] }
 0x3cb   :  { %7844 = vmatpush1.bf16.msra.mxu1 %v12144_v25  ;;  %7925 = vmatprep.subr.bf16.mxu0 %v11363_v17  ;;  %v1103_v25 = vld [vmem:[#allocation11 + $0x1b0] sm:$0xff]  ;;  %v1890_v17 = vld [vmem:[#allocation11 + $0x1a48] sm:$0xff] }
 0x3cc   :  { %7845 = vmatprep.subr.bf16.mxu1 %v12153_v18  ;;  %v1894_v18 = vld [vmem:[#allocation11 + $0x1a68] sm:$0xff]  ;;  %v11403_v24 = vcombine.high %v1099_v52, %v1103_v25  ;;  %v11402_v7 = vcombine.low %v1099_v52, %v1103_v25 }
 0x3cd   :  { %v12193_v6 = vcombine.high %v1890_v17, %v1894_v18  ;;  %v12192_v13 = vcombine.low %v1890_v17, %v1894_v18 }
 0x3ce   :  { %7926 = vmatpush1.bf16.msra.mxu0 %v11362_v35  ;;  %v1107_v35 = vld [vmem:[#allocation11 + $0x1d0] sm:$0xff] }
 0x3cf   :  { %7846 = vmatpush1.bf16.msra.mxu1 %v12152_v50  ;;  %7927 = vmatprep.subr.bf16.mxu0 %v11371_v12  ;;  %v1111_v50 = vld [vmem:[#allocation11 + $0x1f0] sm:$0xff]  ;;  %v1898_v12 = vld [vmem:[#allocation11 + $0x1a88] sm:$0xff] }
 0x3d0   :  { %7847 = vmatprep.subr.bf16.mxu1 %v12161_v23  ;;  %v1902_v23 = vld [vmem:[#allocation11 + $0x1aa8] sm:$0xff]  ;;  %v11411_v8 = vcombine.high %v1107_v35, %v1111_v50  ;;  %v11410_v42 = vcombine.low %v1107_v35, %v1111_v50 }
 0x3d1   :  { %v12201_v29 = vcombine.high %v1898_v12, %v1902_v23  ;;  %v12200_v43 = vcombine.low %v1898_v12, %v1902_v23 }
 0x3d2   :  { %7928 = vmatpush1.bf16.msra.mxu0 %v11370_v31  ;;  %v1115_v31 = vld [vmem:[#allocation11 + $0x210] sm:$0xff] }
 0x3d3   :  { %7848 = vmatpush1.bf16.msra.mxu1 %v12160_v33  ;;  %7929 = vmatprep.subr.bf16.mxu0 %v11379_v49  ;;  %v1119_v33 = vld [vmem:[#allocation11 + $0x230] sm:$0xff]  ;;  %v1906_v49 = vld [vmem:[#allocation11 + $0x1ac8] sm:$0xff] }
 0x3d4   :  { %7849 = vmatprep.subr.bf16.mxu1 %v12169_v16  ;;  %v1910_v16 = vld [vmem:[#allocation11 + $0x1ae8] sm:$0xff]  ;;  %v11419_v39 = vcombine.high %v1115_v31, %v1119_v33  ;;  %v11418_v48 = vcombine.low %v1115_v31, %v1119_v33 }
 0x3d5   :  { %v12209_v40 = vcombine.high %v1906_v49, %v1910_v16  ;;  %v12208_v10 = vcombine.low %v1906_v49, %v1910_v16 }
 0x3d6   :  { %7930 = vmatpush1.bf16.msra.mxu0 %v11378_v14  ;;  %v1123_v14 = vld [vmem:[#allocation11 + $0x250] sm:$0xff] }
 0x3d7   :  { %7850 = vmatpush1.bf16.msra.mxu1 %v12168_v15  ;;  %7931 = vmatprep.subr.bf16.mxu0 %v11387_v62  ;;  %v1127_v15 = vld [vmem:[#allocation11 + $0x270] sm:$0xff]  ;;  %v1914_v62 = vld [vmem:[#allocation11 + $0x1b08] sm:$0xff] }
 0x3d8   :  { %7851 = vmatprep.subr.bf16.mxu1 %v12177_v47  ;;  %v1918_v47 = vld [vmem:[#allocation11 + $0x1b28] sm:$0xff]  ;;  %v11427_v3 = vcombine.high %v1123_v14, %v1127_v15  ;;  %v11426_v52 = vcombine.low %v1123_v14, %v1127_v15 }
 0x3d9   :  { %v12217_v37 = vcombine.high %v1914_v62, %v1918_v47  ;;  %v12216_v25 = vcombine.low %v1914_v62, %v1918_v47 }
 0x3da   :  { %7932 = vmatpush1.bf16.msra.mxu0 %v11386_v36  ;;  %v1131_v36 = vld [vmem:[#allocation11 + $0x290] sm:$0xff] }
 0x3db   :  { %7852 = vmatpush1.bf16.msra.mxu1 %v12176_v38  ;;  %7933 = vmatprep.subr.bf16.mxu0 %v11395_v46  ;;  %v1135_v38 = vld [vmem:[#allocation11 + $0x2b0] sm:$0xff]  ;;  %v1922_v46 = vld [vmem:[#allocation11 + $0x1b48] sm:$0xff] }
 0x3dc   :  { %7853 = vmatprep.subr.bf16.mxu1 %v12185_v63  ;;  %v1926_v63 = vld [vmem:[#allocation11 + $0x1b68] sm:$0xff]  ;;  %v11435_v17 = vcombine.high %v1131_v36, %v1135_v38  ;;  %v11434_v35 = vcombine.low %v1131_v36, %v1135_v38 }
 0x3dd   :  { %v12225_v18 = vcombine.high %v1922_v46, %v1926_v63  ;;  %v12224_v50 = vcombine.low %v1922_v46, %v1926_v63 }
 0x3de   :  { %7934 = vmatpush1.bf16.msra.mxu0 %v11394_v56  ;;  %v1139_v56 = vld [vmem:[#allocation11 + $0x2d0] sm:$0xff] }
 0x3df   :  { %7854 = vmatpush1.bf16.msra.mxu1 %v12184_v11  ;;  %7935 = vmatprep.subr.bf16.mxu0 %v11403_v24  ;;  %v1143_v11 = vld [vmem:[#allocation11 + $0x2f0] sm:$0xff]  ;;  %v1930_v24 = vld [vmem:[#allocation11 + $0x1b88] sm:$0xff] }
 0x3e0   :  { %7855 = vmatprep.subr.bf16.mxu1 %v12193_v6  ;;  %v1934_v6 = vld [vmem:[#allocation11 + $0x1ba8] sm:$0xff]  ;;  %v11443_v12 = vcombine.high %v1139_v56, %v1143_v11  ;;  %v11442_v31 = vcombine.low %v1139_v56, %v1143_v11 }
 0x3e1   :  { %v12233_v23 = vcombine.high %v1930_v24, %v1934_v6  ;;  %v12232_v33 = vcombine.low %v1930_v24, %v1934_v6 }
 0x3e2   :  { %7936 = vmatpush1.bf16.msra.mxu0 %v11402_v7  ;;  %v1147_v7 = vld [vmem:[#allocation11 + $0x310] sm:$0xff] }
 0x3e3   :  { %7856 = vmatpush1.bf16.msra.mxu1 %v12192_v13  ;;  %7937 = vmatprep.subr.bf16.mxu0 %v11411_v8  ;;  %v1151_v13 = vld [vmem:[#allocation11 + $0x330] sm:$0xff]  ;;  %v1938_v8 = vld [vmem:[#allocation11 + $0x1bc8] sm:$0xff] }
 0x3e4   :  { %7857 = vmatprep.subr.bf16.mxu1 %v12201_v29  ;;  %v1942_v29 = vld [vmem:[#allocation11 + $0x1be8] sm:$0xff]  ;;  %v11451_v49 = vcombine.high %v1147_v7, %v1151_v13  ;;  %v11450_v14 = vcombine.low %v1147_v7, %v1151_v13 }
 0x3e5   :  { %v12241_v16 = vcombine.high %v1938_v8, %v1942_v29  ;;  %v12240_v15 = vcombine.low %v1938_v8, %v1942_v29 }
 0x3e6   :  { %7938 = vmatpush1.bf16.msra.mxu0 %v11410_v42  ;;  %v1155_v42 = vld [vmem:[#allocation11 + $0x350] sm:$0xff] }
 0x3e7   :  { %7858 = vmatpush1.bf16.msra.mxu1 %v12200_v43  ;;  %7939 = vmatprep.subr.bf16.mxu0 %v11419_v39  ;;  %v1159_v43 = vld [vmem:[#allocation11 + $0x370] sm:$0xff]  ;;  %v1946_v39 = vld [vmem:[#allocation11 + $0x1c08] sm:$0xff] }
 0x3e8   :  { %7859 = vmatprep.subr.bf16.mxu1 %v12209_v40  ;;  %v1950_v40 = vld [vmem:[#allocation11 + $0x1c28] sm:$0xff]  ;;  %v11459_v62 = vcombine.high %v1155_v42, %v1159_v43  ;;  %v11458_v36 = vcombine.low %v1155_v42, %v1159_v43 }
 0x3e9   :  { %v12249_v47 = vcombine.high %v1946_v39, %v1950_v40  ;;  %v12248_v38 = vcombine.low %v1946_v39, %v1950_v40 }
 0x3ea   :  { %7940 = vmatpush1.bf16.msra.mxu0 %v11418_v48  ;;  %v1163_v48 = vld [vmem:[#allocation11 + $0x390] sm:$0xff] }
 0x3eb   :  { %7860 = vmatpush1.bf16.msra.mxu1 %v12208_v10  ;;  %7941 = vmatprep.subr.bf16.mxu0 %v11427_v3  ;;  %v1167_v10 = vld [vmem:[#allocation11 + $0x3b0] sm:$0xff]  ;;  %v1954_v3 = vld [vmem:[#allocation11 + $0x1c48] sm:$0xff] }
 0x3ec   :  { %7861 = vmatprep.subr.bf16.mxu1 %v12217_v37  ;;  %v1958_v37 = vld [vmem:[#allocation11 + $0x1c68] sm:$0xff]  ;;  %v11467_v46 = vcombine.high %v1163_v48, %v1167_v10  ;;  %v11466_v56 = vcombine.low %v1163_v48, %v1167_v10 }
 0x3ed   :  { %v12257_v63 = vcombine.high %v1954_v3, %v1958_v37  ;;  %v12256_v11 = vcombine.low %v1954_v3, %v1958_v37 }
 0x3ee   :  { %7942 = vmatpush1.bf16.msra.mxu0 %v11426_v52  ;;  %v1171_v52 = vld [vmem:[#allocation11 + $0x3d0] sm:$0xff] }
 0x3ef   :  { %7862 = vmatpush1.bf16.msra.mxu1 %v12216_v25  ;;  %7943 = vmatprep.subr.bf16.mxu0 %v11435_v17  ;;  %v1175_v25 = vld [vmem:[#allocation11 + $0x3f0] sm:$0xff]  ;;  %v1962_v17 = vld [vmem:[#allocation11 + $0x1c88] sm:$0xff] }
 0x3f0   :  { %7863 = vmatprep.subr.bf16.mxu1 %v12225_v18  ;;  %v1966_v18 = vld [vmem:[#allocation11 + $0x1ca8] sm:$0xff]  ;;  %v11475_v24 = vcombine.high %v1171_v52, %v1175_v25  ;;  %v11474_v7 = vcombine.low %v1171_v52, %v1175_v25 }
 0x3f1   :  { %v12265_v6 = vcombine.high %v1962_v17, %v1966_v18  ;;  %v12264_v13 = vcombine.low %v1962_v17, %v1966_v18 }
 0x3f2   :  { %7944 = vmatpush1.bf16.msra.mxu0 %v11434_v35  ;;  %v1179_v35 = vld [vmem:[#allocation11 + $0x410] sm:$0xff] }
 0x3f3   :  { %7864 = vmatpush1.bf16.msra.mxu1 %v12224_v50  ;;  %7945 = vmatprep.subr.bf16.mxu0 %v11443_v12  ;;  %v1183_v50 = vld [vmem:[#allocation11 + $0x430] sm:$0xff]  ;;  %v1970_v12 = vld [vmem:[#allocation11 + $0x1cc8] sm:$0xff] }
 0x3f4   :  { %7865 = vmatprep.subr.bf16.mxu1 %v12233_v23  ;;  %v1974_v23 = vld [vmem:[#allocation11 + $0x1ce8] sm:$0xff]  ;;  %v11483_v8 = vcombine.high %v1179_v35, %v1183_v50  ;;  %v11482_v42 = vcombine.low %v1179_v35, %v1183_v50 }
 0x3f5   :  { %v12273_v29 = vcombine.high %v1970_v12, %v1974_v23  ;;  %v12272_v43 = vcombine.low %v1970_v12, %v1974_v23 }
 0x3f6   :  { %7946 = vmatpush1.bf16.msra.mxu0 %v11442_v31  ;;  %v1187_v31 = vld [vmem:[#allocation11 + $0x450] sm:$0xff] }
 0x3f7   :  { %7866 = vmatpush1.bf16.msra.mxu1 %v12232_v33  ;;  %7947 = vmatprep.subr.bf16.mxu0 %v11451_v49  ;;  %v1191_v33 = vld [vmem:[#allocation11 + $0x470] sm:$0xff]  ;;  %v1978_v49 = vld [vmem:[#allocation11 + $0x1d08] sm:$0xff] }
 0x3f8   :  { %7867 = vmatprep.subr.bf16.mxu1 %v12241_v16  ;;  %v1982_v16 = vld [vmem:[#allocation11 + $0x1d28] sm:$0xff]  ;;  %v11491_v39 = vcombine.high %v1187_v31, %v1191_v33  ;;  %v11490_v48 = vcombine.low %v1187_v31, %v1191_v33 }
 0x3f9   :  { %v12281_v40 = vcombine.high %v1978_v49, %v1982_v16  ;;  %v12280_v10 = vcombine.low %v1978_v49, %v1982_v16 }
 0x3fa   :  { %7948 = vmatpush1.bf16.msra.mxu0 %v11450_v14  ;;  %v1195_v14 = vld [vmem:[#allocation11 + $0x490] sm:$0xff] }
 0x3fb   :  { %7868 = vmatpush1.bf16.msra.mxu1 %v12240_v15  ;;  %7949 = vmatprep.subr.bf16.mxu0 %v11459_v62  ;;  %v1199_v15 = vld [vmem:[#allocation11 + $0x4b0] sm:$0xff]  ;;  %v1986_v62 = vld [vmem:[#allocation11 + $0x1d48] sm:$0xff] }
 0x3fc   :  { %7880 = vmatprep.subr.bf16.mxu1 %v12249_v47  ;;  %v1990_v47 = vld [vmem:[#allocation11 + $0x1d68] sm:$0xff]  ;;  %v11499_v3 = vcombine.high %v1195_v14, %v1199_v15  ;;  %v11498_v52 = vcombine.low %v1195_v14, %v1199_v15 }
 0x3fd   :  { %v12289_v37 = vcombine.high %v1986_v62, %v1990_v47  ;;  %v12288_v25 = vcombine.low %v1986_v62, %v1990_v47 }
 0x3fe   :  { %7870 = vmatmul.mubr.bf16.vlgmr.msra.gmra.mrb[16].mxu1 %v14259_v26  ;;  %7950 = vmatpush1.bf16.msra.mxu0 %v11458_v36  ;;  %v1203_v36 = vld [vmem:[#allocation11 + $0x4d0] sm:$0xff] }
 0x3ff   :  { %7881 = vmatpush1.bf16.msra.mxu1 %v12248_v38  ;;  %7912 = vmatprep.mubr.bf16.mxu1 %v14232_v9  ;;  %v1207_v38 = vld [vmem:[#allocation11 + $0x4f0] sm:$0xff] }
 0x400   :  { %7951 = vmatprep.subr.bf16.mxu0 %v11467_v46  ;;  %7882 = vmatprep.subr.bf16.mxu1 %v12257_v63  ;;  %v1994_v46 = vld [vmem:[#allocation11 + $0x1d88] sm:$0xff]  ;;  %v11507_v17 = vcombine.high %v1203_v36, %v1207_v38  ;;  %v11506_v35 = vcombine.low %v1203_v36, %v1207_v38 }
 0x401   :  { %v1998_v63 = vld [vmem:[#allocation11 + $0x1da8] sm:$0xff] }
 0x402   :  { %7952 = vmatpush1.bf16.msra.mxu0 %v11466_v56  ;;  %v12297_v18 = vcombine.high %v1994_v46, %v1998_v63  ;;  %v1211_v56 = vld [vmem:[#allocation11 + $0x510] sm:$0xff]  ;;  %v12296_v50 = vcombine.low %v1994_v46, %v1998_v63 }
 0x403   :  { %7883 = vmatpush1.bf16.msra.mxu1 %v12256_v11  ;;  %7953 = vmatprep.subr.bf16.mxu0 %v11475_v24  ;;  %v1215_v11 = vld [vmem:[#allocation11 + $0x530] sm:$0xff]  ;;  %v2002_v24 = vld [vmem:[#allocation11 + $0x1dc8] sm:$0xff] }
 0x404   :  { %7884 = vmatprep.subr.bf16.mxu1 %v12265_v6  ;;  %v2006_v6 = vld [vmem:[#allocation11 + $0x1de8] sm:$0xff]  ;;  %v11515_v12 = vcombine.high %v1211_v56, %v1215_v11  ;;  %v11514_v31 = vcombine.low %v1211_v56, %v1215_v11 }
 0x405   :  { %v12305_v23 = vcombine.high %v2002_v24, %v2006_v6  ;;  %v12304_v33 = vcombine.low %v2002_v24, %v2006_v6 }
 0x406   :  { %7954 = vmatpush1.bf16.msra.mxu0 %v11474_v7  ;;  %v1219_v7 = vld [vmem:[#allocation11 + $0x550] sm:$0xff] }
 0x407   :  { %7885 = vmatpush1.bf16.msra.mxu1 %v12264_v13  ;;  %7966 = vmatprep.subr.bf16.mxu0 %v11483_v8  ;;  %v1223_v13 = vld [vmem:[#allocation11 + $0x570] sm:$0xff]  ;;  %v2010_v8 = vld [vmem:[#allocation11 + $0x1e08] sm:$0xff] }
 0x408   :  { %7886 = vmatprep.subr.bf16.mxu1 %v12273_v29  ;;  %v2014_v29 = vld [vmem:[#allocation11 + $0x1e28] sm:$0xff]  ;;  %v11523_v49 = vcombine.high %v1219_v7, %v1223_v13  ;;  %v11522_v14 = vcombine.low %v1219_v7, %v1223_v13 }
 0x409   :  { %7956 = vmatmul.mubr.bf16.vlgmr.msra.gmra.mrb[24].mxu0 %v14075_v44  ;;  %v12313_v16 = vcombine.high %v2010_v8, %v2014_v29  ;;  %v12312_v15 = vcombine.low %v2010_v8, %v2014_v29 }
 0x40a   :  { %7967 = vmatpush1.bf16.msra.mxu0 %v11482_v42  ;;  %7998 = vmatprep.mubr.bf16.mxu0 %v14159_v21  ;;  %v1227_v42 = vld [vmem:[#allocation11 + $0x590] sm:$0xff] }
 0x40b   :  { %7887 = vmatpush1.bf16.msra.mxu1 %v12272_v43  ;;  %7968 = vmatprep.subr.bf16.mxu0 %v11491_v39  ;;  %v1231_v43 = vld [vmem:[#allocation11 + $0x5b0] sm:$0xff]  ;;  %v2018_v39 = vld [vmem:[#allocation11 + $0x1e48] sm:$0xff] }
 0x40c   :  { %7888 = vmatprep.subr.bf16.mxu1 %v12281_v40  ;;  %v2022_v40 = vld [vmem:[#allocation11 + $0x1e68] sm:$0xff]  ;;  %v11531_v62 = vcombine.high %v1227_v42, %v1231_v43  ;;  %v11530_v36 = vcombine.low %v1227_v42, %v1231_v43 }
 0x40d   :  { %v12321_v47 = vcombine.high %v2018_v39, %v2022_v40  ;;  %v12320_v38 = vcombine.low %v2018_v39, %v2022_v40 }
 0x40e   :  { %7969 = vmatpush1.bf16.msra.mxu0 %v11490_v48  ;;  %v1235_v48 = vld [vmem:[#allocation11 + $0x5d0] sm:$0xff] }
 0x40f   :  { %7889 = vmatpush1.bf16.msra.mxu1 %v12280_v10  ;;  %7970 = vmatprep.subr.bf16.mxu0 %v11499_v3  ;;  %v1239_v10 = vld [vmem:[#allocation11 + $0x5f0] sm:$0xff]  ;;  %v2026_v3 = vld [vmem:[#allocation11 + $0x1e88] sm:$0xff] }
 0x410   :  { %7890 = vmatprep.subr.bf16.mxu1 %v12289_v37  ;;  %v2030_v37 = vld [vmem:[#allocation11 + $0x1ea8] sm:$0xff]  ;;  %v11539_v46 = vcombine.high %v1235_v48, %v1239_v10  ;;  %v11538_v56 = vcombine.low %v1235_v48, %v1239_v10 }
 0x411   :  { %v12329_v63 = vcombine.high %v2026_v3, %v2030_v37  ;;  %v12328_v11 = vcombine.low %v2026_v3, %v2030_v37 }
 0x412   :  { %7971 = vmatpush1.bf16.msra.mxu0 %v11498_v52  ;;  %v1243_v52 = vld [vmem:[#allocation11 + $0x610] sm:$0xff] }
 0x413   :  { %7891 = vmatpush1.bf16.msra.mxu1 %v12288_v25  ;;  %7972 = vmatprep.subr.bf16.mxu0 %v11507_v17  ;;  %v1247_v25 = vld [vmem:[#allocation11 + $0x630] sm:$0xff]  ;;  %v2034_v17 = vld [vmem:[#allocation11 + $0x1ec8] sm:$0xff] }
 0x414   :  { %7892 = vmatprep.subr.bf16.mxu1 %v12297_v18  ;;  %v2038_v18 = vld [vmem:[#allocation11 + $0x1ee8] sm:$0xff]  ;;  %v11547_v24 = vcombine.high %v1243_v52, %v1247_v25  ;;  %v11546_v7 = vcombine.low %v1243_v52, %v1247_v25 }
 0x415   :  { %v12337_v6 = vcombine.high %v2034_v17, %v2038_v18  ;;  %v12336_v13 = vcombine.low %v2034_v17, %v2038_v18 }
 0x416   :  { %7973 = vmatpush1.bf16.msra.mxu0 %v11506_v35  ;;  %v1251_v35 = vld [vmem:[#allocation11 + $0x650] sm:$0xff] }
 0x417   :  { %7893 = vmatpush1.bf16.msra.mxu1 %v12296_v50  ;;  %7974 = vmatprep.subr.bf16.mxu0 %v11515_v12  ;;  %v1255_v50 = vld [vmem:[#allocation11 + $0x670] sm:$0xff]  ;;  %v2042_v12 = vld [vmem:[#allocation11 + $0x1f08] sm:$0xff] }
 0x418   :  { %7894 = vmatprep.subr.bf16.mxu1 %v12305_v23  ;;  %v2046_v23 = vld [vmem:[#allocation11 + $0x1f28] sm:$0xff]  ;;  %v11555_v8 = vcombine.high %v1251_v35, %v1255_v50  ;;  %v11554_v42 = vcombine.low %v1251_v35, %v1255_v50 }
 0x419   :  { %v12345_v29 = vcombine.high %v2042_v12, %v2046_v23  ;;  %v12344_v43 = vcombine.low %v2042_v12, %v2046_v23 }
 0x41a   :  { %7975 = vmatpush1.bf16.msra.mxu0 %v11514_v31  ;;  %v1259_v31 = vld [vmem:[#allocation11 + $0x690] sm:$0xff] }
 0x41b   :  { %7895 = vmatpush1.bf16.msra.mxu1 %v12304_v33  ;;  %7976 = vmatprep.subr.bf16.mxu0 %v11523_v49  ;;  %v1263_v33 = vld [vmem:[#allocation11 + $0x6b0] sm:$0xff]  ;;  %v2050_v49 = vld [vmem:[#allocation11 + $0x1f48] sm:$0xff] }
 0x41c   :  { %7896 = vmatprep.subr.bf16.mxu1 %v12313_v16  ;;  %v2054_v16 = vld [vmem:[#allocation11 + $0x1f68] sm:$0xff]  ;;  %v11563_v39 = vcombine.high %v1259_v31, %v1263_v33  ;;  %v11562_v48 = vcombine.low %v1259_v31, %v1263_v33 }
 0x41d   :  { %v12353_v40 = vcombine.high %v2050_v49, %v2054_v16  ;;  %v12352_v10 = vcombine.low %v2050_v49, %v2054_v16 }
 0x41e   :  { %7977 = vmatpush1.bf16.msra.mxu0 %v11522_v14  ;;  %v1267_v14 = vld [vmem:[#allocation11 + $0x6d0] sm:$0xff] }
 0x41f   :  { %7897 = vmatpush1.bf16.msra.mxu1 %v12312_v15  ;;  %7978 = vmatprep.subr.bf16.mxu0 %v11531_v62  ;;  %v1271_v15 = vld [vmem:[#allocation11 + $0x6f0] sm:$0xff]  ;;  %v2058_v62 = vld [vmem:[#allocation11 + $0x1f88] sm:$0xff] }
 0x420   :  { %7898 = vmatprep.subr.bf16.mxu1 %v12321_v47  ;;  %v2062_v47 = vld [vmem:[#allocation11 + $0x1fa8] sm:$0xff]  ;;  %v11571_v3 = vcombine.high %v1267_v14, %v1271_v15  ;;  %v11570_v52 = vcombine.low %v1267_v14, %v1271_v15 }
 0x421   :  { %v12361_v37 = vcombine.high %v2058_v62, %v2062_v47  ;;  %v12360_v25 = vcombine.low %v2058_v62, %v2062_v47 }
 0x422   :  { %7979 = vmatpush1.bf16.msra.mxu0 %v11530_v36  ;;  %v1275_v36 = vld [vmem:[#allocation11 + $0x710] sm:$0xff] }
 0x423   :  { %7899 = vmatpush1.bf16.msra.mxu1 %v12320_v38  ;;  %7980 = vmatprep.subr.bf16.mxu0 %v11539_v46  ;;  %v1279_v38 = vld [vmem:[#allocation11 + $0x730] sm:$0xff]  ;;  %v2066_v46 = vld [vmem:[#allocation11 + $0x1fc8] sm:$0xff] }
 0x424   :  { %7900 = vmatprep.subr.bf16.mxu1 %v12329_v63  ;;  %v2070_v63 = vld [vmem:[#allocation11 + $0x1fe8] sm:$0xff]  ;;  %v11579_v17 = vcombine.high %v1275_v36, %v1279_v38  ;;  %v11578_v35 = vcombine.low %v1275_v36, %v1279_v38 }
 0x425   :  { %v12369_v18 = vcombine.high %v2066_v46, %v2070_v63  ;;  %v12368_v50 = vcombine.low %v2066_v46, %v2070_v63 }
 0x426   :  { %7981 = vmatpush1.bf16.msra.mxu0 %v11538_v56  ;;  %v1283_v56 = vld [vmem:[#allocation11 + $0x750] sm:$0xff] }
 0x427   :  { %7901 = vmatpush1.bf16.msra.mxu1 %v12328_v11  ;;  %7982 = vmatprep.subr.bf16.mxu0 %v11547_v24  ;;  %v1287_v11 = vld [vmem:[#allocation11 + $0x770] sm:$0xff]  ;;  %v1052_v24 = vld [vmem:[#allocation11 + $0x18] sm:$0xff] }
 0x428   :  { %7902 = vmatprep.subr.bf16.mxu1 %v12337_v6  ;;  %v1056_v6 = vld [vmem:[#allocation11 + $0x38] sm:$0xff]  ;;  %v11587_v12 = vcombine.high %v1283_v56, %v1287_v11  ;;  %v11586_v31 = vcombine.low %v1283_v56, %v1287_v11 }
 0x429   :  { %v11357_v23 = vcombine.high %v1052_v24, %v1056_v6  ;;  %v11356_v33 = vcombine.low %v1052_v24, %v1056_v6  ;;  %v1323_v6 = vld [vmem:[#allocation11 + $0x890] sm:$0xff] }
 0x42a   :  { %7983 = vmatpush1.bf16.msra.mxu0 %v11546_v7  ;;  %v1291_v7 = vld [vmem:[#allocation11 + $0x790] sm:$0xff] }
 0x42b   :  { %7903 = vmatpush1.bf16.msra.mxu1 %v12336_v13  ;;  %7984 = vmatprep.subr.bf16.mxu0 %v11555_v8  ;;  %v1295_v13 = vld [vmem:[#allocation11 + $0x7b0] sm:$0xff]  ;;  %v1060_v8 = vld [vmem:[#allocation11 + $0x58] sm:$0xff] }
 0x42c   :  { %7904 = vmatprep.subr.bf16.mxu1 %v12345_v29  ;;  %v1064_v29 = vld [vmem:[#allocation11 + $0x78] sm:$0xff]  ;;  %v11595_v49 = vcombine.high %v1291_v7, %v1295_v13  ;;  %v11594_v14 = vcombine.low %v1291_v7, %v1295_v13 }
 0x42d   :  { %v11365_v16 = vcombine.high %v1060_v8, %v1064_v29  ;;  %v11364_v15 = vcombine.low %v1060_v8, %v1064_v29  ;;  %v1331_v29 = vld [vmem:[#allocation11 + $0x8d0] sm:$0xff] }
 0x42e   :  { %7985 = vmatpush1.bf16.msra.mxu0 %v11554_v42  ;;  %v1299_v42 = vld [vmem:[#allocation11 + $0x7d0] sm:$0xff] }
 0x42f   :  { %7905 = vmatpush1.bf16.msra.mxu1 %v12344_v43  ;;  %7986 = vmatprep.subr.bf16.mxu0 %v11563_v39  ;;  %v1303_v43 = vld [vmem:[#allocation11 + $0x7f0] sm:$0xff]  ;;  %v1068_v39 = vld [vmem:[#allocation11 + $0x98] sm:$0xff] }
 0x430   :  { %7906 = vmatprep.subr.bf16.mxu1 %v12353_v40  ;;  %v1072_v40 = vld [vmem:[#allocation11 + $0xb8] sm:$0xff]  ;;  %v11603_v62 = vcombine.high %v1299_v42, %v1303_v43  ;;  %v11602_v36 = vcombine.low %v1299_v42, %v1303_v43 }
 0x431   :  { %v11373_v47 = vcombine.high %v1068_v39, %v1072_v40  ;;  %v11372_v38 = vcombine.low %v1068_v39, %v1072_v40  ;;  %v1339_v40 = vld [vmem:[#allocation11 + $0x910] sm:$0xff] }
 0x432   :  { %7987 = vmatpush1.bf16.msra.mxu0 %v11562_v48  ;;  %v1307_v48 = vld [vmem:[#allocation11 + $0x810] sm:$0xff] }
 0x433   :  { %7907 = vmatpush1.bf16.msra.mxu1 %v12352_v10  ;;  %7988 = vmatprep.subr.bf16.mxu0 %v11571_v3  ;;  %v1311_v10 = vld [vmem:[#allocation11 + $0x830] sm:$0xff]  ;;  %v1076_v3 = vld [vmem:[#allocation11 + $0xd8] sm:$0xff] }
 0x434   :  { %7908 = vmatprep.subr.bf16.mxu1 %v12361_v37  ;;  %v1080_v37 = vld [vmem:[#allocation11 + $0xf8] sm:$0xff]  ;;  %v11611_v46 = vcombine.high %v1307_v48, %v1311_v10 }
 0x435   :  { %v11381_v63 = vcombine.high %v1076_v3, %v1080_v37  ;;  %v11380_v56 = vcombine.low %v1076_v3, %v1080_v37  ;;  %v1347_v37 = vld [vmem:[#allocation11 + $0x950] sm:$0xff] }
 0x436   :  { %7989 = vmatpush1.bf16.msra.mxu0 %v11570_v52  ;;  %v1315_v52 = vld [vmem:[#allocation11 + $0x850] sm:$0xff] }
 0x437   :  { %7909 = vmatpush1.bf16.msra.mxu1 %v12360_v25  ;;  %7990 = vmatprep.subr.bf16.mxu0 %v11579_v17  ;;  %v1319_v25 = vld [vmem:[#allocation11 + $0x870] sm:$0xff]  ;;  %v1088_v17 = vld [vmem:[#allocation11 + $0x138] sm:$0xff] }
 0x438   :  { %7910 = vmatprep.subr.bf16.mxu1 %v12369_v18  ;;  %v11610_v18 = vcombine.low %v1307_v48, %v1311_v10  ;;  %v11619_v11 = vcombine.high %v1315_v52, %v1319_v25 }
 0x43a   :  { %7991 = vmatpush1.bf16.msra.mxu0 %v11578_v35  ;;  %v1327_v35 = vld [vmem:[#allocation11 + $0x8b0] sm:$0xff] }
 0x43b   :  { %7911 = vmatpush1.bf16.msra.mxu1 %v12368_v50  ;;  %7992 = vmatprep.subr.bf16.mxu0 %v11587_v12  ;;  %v1092_v50 = vld [vmem:[#allocation11 + $0x158] sm:$0xff]  ;;  %v11627_v13 = vcombine.high %v1323_v6, %v1327_v35 }
 0x43c   :  { %8267 = vmatprep.subr.bf16.mxu1 %v11357_v23  ;;  %v1096_v12 = vld [vmem:[#allocation11 + $0x178] sm:$0xff]  ;;  %v11618_v23 = vcombine.low %v1315_v52, %v1319_v25 }
 0x43d   :  { %v11397_v8 = vcombine.high %v1092_v50, %v1096_v12  ;;  %v11396_v42 = vcombine.low %v1092_v50, %v1096_v12  ;;  %v1363_v12 = vld [vmem:[#allocation11 + $0x9d0] sm:$0xff] }
 0x43e   :  { %7913 = vmatmul.mubr.bf16.vlgmr.msra.gmra.mrb[16].mxu1 %v14228_v27  ;;  %7993 = vmatpush1.bf16.msra.mxu0 %v11586_v31  ;;  %v1335_v31 = vld [vmem:[#allocation11 + $0x8f0] sm:$0xff] }
 0x43f   :  { %8268 = vmatpush1.bf16.msra.mxu1 %v11356_v33  ;;  %8299 = vmatprep.mubr.bf16.mxu1 %v14083_v59  ;;  %v1084_v59 = vld [vmem:[#allocation11 + $0x118] sm:$0xff]  ;;  %v11635_v43 = vcombine.high %v1331_v29, %v1335_v31 }
 0x440   :  { %7994 = vmatprep.subr.bf16.mxu0 %v11595_v49  ;;  %8269 = vmatprep.subr.bf16.mxu1 %v11365_v16  ;;  %v11389_v24 = vcombine.high %v1084_v59, %v1088_v17  ;;  %v11388_v7 = vcombine.low %v1084_v59, %v1088_v17  ;;  %v1100_v33 = vld [vmem:[#allocation11 + $0x198] sm:$0xff]  ;;  %v11626_v16 = vcombine.low %v1323_v6, %v1327_v35  ;;  %v1355_v17 = vld [vmem:[#allocation11 + $0x990] sm:$0xff] }
 0x441   :  { %v1104_v49 = vld [vmem:[#allocation11 + $0x1b8] sm:$0xff] }
 0x442   :  { %7995 = vmatpush1.bf16.msra.mxu0 %v11594_v14  ;;  %v11405_v39 = vcombine.high %v1100_v33, %v1104_v49  ;;  %v1343_v14 = vld [vmem:[#allocation11 + $0x930] sm:$0xff]  ;;  %v11404_v48 = vcombine.low %v1100_v33, %v1104_v49 }
 0x443   :  { %8270 = vmatpush1.bf16.msra.mxu1 %v11364_v15  ;;  %7996 = vmatprep.subr.bf16.mxu0 %v11603_v62  ;;  %v1108_v15 = vld [vmem:[#allocation11 + $0x1d8] sm:$0xff]  ;;  %v11643_v10 = vcombine.high %v1339_v40, %v1343_v14  ;;  %v1371_v49 = vld [vmem:[#allocation11 + $0xa10] sm:$0xff] }
 0x444   :  { %8271 = vmatprep.subr.bf16.mxu1 %v11373_v47  ;;  %v1112_v62 = vld [vmem:[#allocation11 + $0x1f8] sm:$0xff]  ;;  %v11634_v47 = vcombine.low %v1331_v29, %v1335_v31 }
 0x445   :  { %v11413_v3 = vcombine.high %v1108_v15, %v1112_v62  ;;  %v11412_v52 = vcombine.low %v1108_v15, %v1112_v62  ;;  %v1379_v62 = vld [vmem:[#allocation11 + $0xa50] sm:$0xff] }
 0x446   :  { %7997 = vmatpush1.bf16.msra.mxu0 %v11602_v36  ;;  %v1351_v36 = vld [vmem:[#allocation11 + $0x970] sm:$0xff] }
 0x447   :  { %8272 = vmatpush1.bf16.msra.mxu1 %v11372_v38  ;;  %8009 = vmatprep.subr.bf16.mxu0 %v11611_v46  ;;  %v1116_v38 = vld [vmem:[#allocation11 + $0x218] sm:$0xff]  ;;  %v11651_v25 = vcombine.high %v1347_v37, %v1351_v36 }
 0x448   :  { %8273 = vmatprep.subr.bf16.mxu1 %v11381_v63  ;;  %v1120_v46 = vld [vmem:[#allocation11 + $0x238] sm:$0xff]  ;;  %v11642_v63 = vcombine.low %v1339_v40, %v1343_v14 }
 0x449   :  { %7999 = vmatmul.mubr.bf16.vlgmr.msra.gmra.mrb[24].mxu0 %v14151_v4  ;;  %v11421_v59 = vcombine.high %v1116_v38, %v1120_v46  ;;  %v11420_v6 = vcombine.low %v1116_v38, %v1120_v46  ;;  %v1387_v46 = vld [vmem:[#allocation11 + $0xa90] sm:$0xff] }
 0x44a   :  { %8010 = vmatpush1.bf16.msra.mxu0 %v11610_v18  ;;  %8041 = vmatprep.mubr.bf16.mxu0 %v14230_v41  ;;  %v1359_v18 = vld [vmem:[#allocation11 + $0x9b0] sm:$0xff] }
 0x44b   :  { %8274 = vmatpush1.bf16.msra.mxu1 %v11380_v56  ;;  %8011 = vmatprep.subr.bf16.mxu0 %v11619_v11  ;;  %v1124_v56 = vld [vmem:[#allocation11 + $0x258] sm:$0xff]  ;;  %v11659_v35 = vcombine.high %v1355_v17, %v1359_v18 }
 0x44c   :  { %8275 = vmatprep.subr.bf16.mxu1 %v11389_v24  ;;  %v1128_v11 = vld [vmem:[#allocation11 + $0x278] sm:$0xff]  ;;  %v11650_v24 = vcombine.low %v1347_v37, %v1351_v36 }
 0x44d   :  { %v11429_v50 = vcombine.high %v1124_v56, %v1128_v11  ;;  %v11428_v29 = vcombine.low %v1124_v56, %v1128_v11  ;;  %v1395_v11 = vld [vmem:[#allocation11 + $0xad0] sm:$0xff] }
 0x44e   :  { %8012 = vmatpush1.bf16.msra.mxu0 %v11618_v23  ;;  %v1367_v23 = vld [vmem:[#allocation11 + $0x9f0] sm:$0xff] }
 0x44f   :  { %8276 = vmatpush1.bf16.msra.mxu1 %v11388_v7  ;;  %8013 = vmatprep.subr.bf16.mxu0 %v11627_v13  ;;  %v1132_v7 = vld [vmem:[#allocation11 + $0x298] sm:$0xff]  ;;  %v11667_v31 = vcombine.high %v1363_v12, %v1367_v23 }
 0x450   :  { %8277 = vmatprep.subr.bf16.mxu1 %v11397_v8  ;;  %v1136_v13 = vld [vmem:[#allocation11 + $0x2b8] sm:$0xff]  ;;  %v11658_v8 = vcombine.low %v1355_v17, %v1359_v18 }
 0x451   :  { %v11437_v33 = vcombine.high %v1132_v7, %v1136_v13  ;;  %v11436_v40 = vcombine.low %v1132_v7, %v1136_v13  ;;  %v1403_v13 = vld [vmem:[#allocation11 + $0xb10] sm:$0xff] }
 0x452   :  { %8014 = vmatpush1.bf16.msra.mxu0 %v11626_v16  ;;  %v1375_v16 = vld [vmem:[#allocation11 + $0xa30] sm:$0xff] }
 0x453   :  { %8278 = vmatpush1.bf16.msra.mxu1 %v11396_v42  ;;  %8015 = vmatprep.subr.bf16.mxu0 %v11635_v43  ;;  %v1140_v42 = vld [vmem:[#allocation11 + $0x2d8] sm:$0xff]  ;;  %v11675_v14 = vcombine.high %v1371_v49, %v1375_v16 }
 0x454   :  { %8279 = vmatprep.subr.bf16.mxu1 %v11405_v39  ;;  %v1144_v43 = vld [vmem:[#allocation11 + $0x2f8] sm:$0xff]  ;;  %v11666_v39 = vcombine.low %v1363_v12, %v1367_v23 }
 0x455   :  { %v11445_v15 = vcombine.high %v1140_v42, %v1144_v43  ;;  %v11444_v37 = vcombine.low %v1140_v42, %v1144_v43  ;;  %v1411_v43 = vld [vmem:[#allocation11 + $0xb50] sm:$0xff] }
 0x456   :  { %8016 = vmatpush1.bf16.msra.mxu0 %v11634_v47  ;;  %v1383_v47 = vld [vmem:[#allocation11 + $0xa70] sm:$0xff] }
 0x457   :  { %8280 = vmatpush1.bf16.msra.mxu1 %v11404_v48  ;;  %8017 = vmatprep.subr.bf16.mxu0 %v11643_v10  ;;  %v1148_v48 = vld [vmem:[#allocation11 + $0x318] sm:$0xff]  ;;  %v11683_v36 = vcombine.high %v1379_v62, %v1383_v47 }
 0x458   :  { %8281 = vmatprep.subr.bf16.mxu1 %v11413_v3  ;;  %v1152_v10 = vld [vmem:[#allocation11 + $0x338] sm:$0xff]  ;;  %v11674_v3 = vcombine.low %v1371_v49, %v1375_v16 }
 0x459   :  { %v11453_v38 = vcombine.high %v1148_v48, %v1152_v10  ;;  %v11452_v17 = vcombine.low %v1148_v48, %v1152_v10  ;;  %v1419_v10 = vld [vmem:[#allocation11 + $0xb90] sm:$0xff] }
 0x45a   :  { %8018 = vmatpush1.bf16.msra.mxu0 %v11642_v63  ;;  %v1391_v63 = vld [vmem:[#allocation11 + $0xab0] sm:$0xff] }
 0x45b   :  { %8282 = vmatpush1.bf16.msra.mxu1 %v11412_v52  ;;  %8019 = vmatprep.subr.bf16.mxu0 %v11651_v25  ;;  %v1156_v52 = vld [vmem:[#allocation11 + $0x358] sm:$0xff]  ;;  %v11691_v18 = vcombine.high %v1387_v46, %v1391_v63 }
 0x45c   :  { %8283 = vmatprep.subr.bf16.mxu1 %v11421_v59  ;;  %v1160_v25 = vld [vmem:[#allocation11 + $0x378] sm:$0xff]  ;;  %v11682_v59 = vcombine.low %v1379_v62, %v1383_v47 }
 0x45d   :  { %v11461_v56 = vcombine.high %v1156_v52, %v1160_v25  ;;  %v11460_v12 = vcombine.low %v1156_v52, %v1160_v25  ;;  %v1427_v25 = vld [vmem:[#allocation11 + $0xbd0] sm:$0xff] }
 0x45e   :  { %8020 = vmatpush1.bf16.msra.mxu0 %v11650_v24  ;;  %v1399_v24 = vld [vmem:[#allocation11 + $0xaf0] sm:$0xff] }
 0x45f   :  { %8284 = vmatpush1.bf16.msra.mxu1 %v11420_v6  ;;  %8021 = vmatprep.subr.bf16.mxu0 %v11659_v35  ;;  %v1164_v6 = vld [vmem:[#allocation11 + $0x398] sm:$0xff]  ;;  %v11699_v23 = vcombine.high %v1395_v11, %v1399_v24 }
 0x460   :  { %8285 = vmatprep.subr.bf16.mxu1 %v11429_v50  ;;  %v1168_v35 = vld [vmem:[#allocation11 + $0x3b8] sm:$0xff]  ;;  %v11690_v50 = vcombine.low %v1387_v46, %v1391_v63 }
 0x461   :  { %v11469_v7 = vcombine.high %v1164_v6, %v1168_v35  ;;  %v11468_v49 = vcombine.low %v1164_v6, %v1168_v35  ;;  %v1435_v35 = vld [vmem:[#allocation11 + $0xc10] sm:$0xff] }
 0x462   :  { %8022 = vmatpush1.bf16.msra.mxu0 %v11658_v8  ;;  %v1407_v8 = vld [vmem:[#allocation11 + $0xb30] sm:$0xff] }
 0x463   :  { %8286 = vmatpush1.bf16.msra.mxu1 %v11428_v29  ;;  %8023 = vmatprep.subr.bf16.mxu0 %v11667_v31  ;;  %v1172_v29 = vld [vmem:[#allocation11 + $0x3d8] sm:$0xff]  ;;  %v11707_v16 = vcombine.high %v1403_v13, %v1407_v8 }
 0x464   :  { %8287 = vmatprep.subr.bf16.mxu1 %v11437_v33  ;;  %v1176_v31 = vld [vmem:[#allocation11 + $0x3f8] sm:$0xff]  ;;  %v11698_v33 = vcombine.low %v1395_v11, %v1399_v24 }
 0x465   :  { %v11477_v42 = vcombine.high %v1172_v29, %v1176_v31  ;;  %v11476_v62 = vcombine.low %v1172_v29, %v1176_v31  ;;  %v1443_v29 = vld [vmem:[#allocation11 + $0xc50] sm:$0xff] }
 0x466   :  { %8024 = vmatpush1.bf16.msra.mxu0 %v11666_v39  ;;  %v1415_v39 = vld [vmem:[#allocation11 + $0xb70] sm:$0xff] }
 0x467   :  { %8288 = vmatpush1.bf16.msra.mxu1 %v11436_v40  ;;  %8025 = vmatprep.subr.bf16.mxu0 %v11675_v14  ;;  %v1180_v40 = vld [vmem:[#allocation11 + $0x418] sm:$0xff]  ;;  %v11715_v47 = vcombine.high %v1411_v43, %v1415_v39  ;;  %v1447_v31 = vld [vmem:[#allocation11 + $0xc70] sm:$0xff] }
 0x468   :  { %8289 = vmatprep.subr.bf16.mxu1 %v11445_v15  ;;  %v1184_v14 = vld [vmem:[#allocation11 + $0x438] sm:$0xff]  ;;  %v11706_v15 = vcombine.low %v1403_v13, %v1407_v8 }
 0x469   :  { %v11485_v48 = vcombine.high %v1180_v40, %v1184_v14  ;;  %v11484_v46 = vcombine.low %v1180_v40, %v1184_v14  ;;  %v1455_v40 = vld [vmem:[#allocation11 + $0xcb0] sm:$0xff]  ;;  %v1220_v14 = vld [vmem:[#allocation11 + $0x558] sm:$0xff] }
 0x46a   :  { %8026 = vmatpush1.bf16.msra.mxu0 %v11674_v3  ;;  %v1423_v3 = vld [vmem:[#allocation11 + $0xbb0] sm:$0xff] }
 0x46b   :  { %8290 = vmatpush1.bf16.msra.mxu1 %v11444_v37  ;;  %8027 = vmatprep.subr.bf16.mxu0 %v11683_v36  ;;  %v1188_v37 = vld [vmem:[#allocation11 + $0x458] sm:$0xff]  ;;  %v11723_v63 = vcombine.high %v1419_v10, %v1423_v3 }
 0x46c   :  { %8291 = vmatprep.subr.bf16.mxu1 %v11453_v38  ;;  %v1192_v36 = vld [vmem:[#allocation11 + $0x478] sm:$0xff]  ;;  %v11714_v38 = vcombine.low %v1411_v43, %v1415_v39  ;;  %v1451_v39 = vld [vmem:[#allocation11 + $0xc90] sm:$0xff] }
 0x46d   :  { %v11493_v52 = vcombine.high %v1188_v37, %v1192_v36  ;;  %v11492_v11 = vcombine.low %v1188_v37, %v1192_v36  ;;  %v1463_v37 = vld [vmem:[#allocation11 + $0xcf0] sm:$0xff]  ;;  %v1228_v36 = vld [vmem:[#allocation11 + $0x598] sm:$0xff] }
 0x46e   :  { %8028 = vmatpush1.bf16.msra.mxu0 %v11682_v59  ;;  %v1431_v59 = vld [vmem:[#allocation11 + $0xbf0] sm:$0xff] }
 0x46f   :  { %8292 = vmatpush1.bf16.msra.mxu1 %v11452_v17  ;;  %8029 = vmatprep.subr.bf16.mxu0 %v11691_v18  ;;  %v1196_v17 = vld [vmem:[#allocation11 + $0x498] sm:$0xff]  ;;  %v11731_v24 = vcombine.high %v1427_v25, %v1431_v59 }
 0x470   :  { %8293 = vmatprep.subr.bf16.mxu1 %v11461_v56  ;;  %v1200_v18 = vld [vmem:[#allocation11 + $0x4b8] sm:$0xff]  ;;  %v11722_v56 = vcombine.low %v1419_v10, %v1423_v3  ;;  %v1459_v3 = vld [vmem:[#allocation11 + $0xcd0] sm:$0xff] }
 0x471   :  { %v11501_v6 = vcombine.high %v1196_v17, %v1200_v18  ;;  %v11500_v13 = vcombine.low %v1196_v17, %v1200_v18  ;;  %v1471_v17 = vld [vmem:[#allocation11 + $0xd30] sm:$0xff]  ;;  %v1236_v18 = vld [vmem:[#allocation11 + $0x5d8] sm:$0xff] }
 0x472   :  { %8030 = vmatpush1.bf16.msra.mxu0 %v11690_v50  ;;  %v1439_v50 = vld [vmem:[#allocation11 + $0xc30] sm:$0xff] }
 0x473   :  { %8294 = vmatpush1.bf16.msra.mxu1 %v11460_v12  ;;  %8031 = vmatprep.subr.bf16.mxu0 %v11699_v23  ;;  %v1204_v12 = vld [vmem:[#allocation11 + $0x4d8] sm:$0xff]  ;;  %v11739_v8 = vcombine.high %v1435_v35, %v1439_v50 }
 0x474   :  { %8295 = vmatprep.subr.bf16.mxu1 %v11469_v7  ;;  %v1208_v23 = vld [vmem:[#allocation11 + $0x4f8] sm:$0xff]  ;;  %v11730_v7 = vcombine.low %v1427_v25, %v1431_v59  ;;  %v1467_v59 = vld [vmem:[#allocation11 + $0xd10] sm:$0xff] }
 0x476   :  { %8032 = vmatpush1.bf16.msra.mxu0 %v11698_v33  ;;  %v1216_v33 = vld [vmem:[#allocation11 + $0x538] sm:$0xff] }
 0x477   :  { %8296 = vmatpush1.bf16.msra.mxu1 %v11468_v49  ;;  %8033 = vmatprep.subr.bf16.mxu0 %v11707_v16  ;;  %v11738_v49 = vcombine.low %v1435_v35, %v1439_v50  ;;  %v11508_v16 = vcombine.low %v1204_v12, %v1208_v23  ;;  %v14307_v35 = vld [vmem:[#allocation12] sm:$0xff] }
 0x478   :  { %8297 = vmatprep.subr.bf16.mxu1 %v11477_v42  ;;  %v11747_v42 = vcombine.high %v1443_v29, %v1447_v31 }
 0x47a   :  { %8034 = vmatpush1.bf16.msra.mxu0 %v11706_v15  ;;  %v1224_v15 = vld [vmem:[#allocation11 + $0x578] sm:$0xff] }
 0x47b   :  { %8298 = vmatpush1.bf16.msra.mxu1 %v11476_v62  ;;  %8035 = vmatprep.subr.bf16.mxu0 %v11715_v47  ;;  %v11746_v62 = vcombine.low %v1443_v29, %v1447_v31  ;;  %v11525_v10 = vcombine.high %v1220_v14, %v1224_v15 }
 0x47c   :  { %8310 = vmatprep.subr.bf16.mxu1 %v11485_v48  ;;  %v11755_v48 = vcombine.high %v1451_v39, %v1455_v40 }
 0x47e   :  { %8036 = vmatpush1.bf16.msra.mxu0 %v11714_v38  ;;  %8300 = vmatmul.mubr.bf16.vlgmr.msra.gmra.mrb[20].mxu1 %v14075_v44  ;;  %v11509_v44 = vcombine.high %v1204_v12, %v1208_v23  ;;  %v1232_v38 = vld [vmem:[#allocation11 + $0x5b8] sm:$0xff]  ;;  %v1475_v12 = vld [vmem:[#allocation11 + $0xd50] sm:$0xff] }
 0x47f   :  { %8311 = vmatpush1.bf16.msra.mxu1 %v11484_v46  ;;  %8342 = vmatprep.mubr.bf16.mxu1 %v14159_v21  ;;  %v1212_v21 = vld [vmem:[#allocation11 + $0x518] sm:$0xff]  ;;  %v11754_v46 = vcombine.low %v1451_v39, %v1455_v40  ;;  %v11533_v25 = vcombine.high %v1228_v36, %v1232_v38  ;;  %v1479_v23 = vld [vmem:[#allocation11 + $0xd70] sm:$0xff] }
 0x480   :  { %8037 = vmatprep.subr.bf16.mxu0 %v11723_v63  ;;  %8312 = vmatprep.subr.bf16.mxu1 %v11493_v52  ;;  %v11517_v43 = vcombine.high %v1212_v21, %v1216_v33  ;;  %v11516_v47 = vcombine.low %v1212_v21, %v1216_v33  ;;  %v11524_v63 = vcombine.low %v1220_v14, %v1224_v15 }
 0x481   :  { %v11763_v52 = vcombine.high %v1459_v3, %v1463_v37  ;;  %v11779_v31 = vcombine.high %v1475_v12, %v1479_v23  ;;  %v2082_v21 = vrot.slane %v14307_v35, %v14027_v57  ;;  %v11778_v39 = vcombine.low %v1475_v12, %v1479_v23  ;;  %v1503_v12 = vld [vmem:[#allocation11 + $0xe30] sm:$0xff]  ;;  %v1268_v23 = vld [vmem:[#allocation11 + $0x6d8] sm:$0xff] }
 0x482   :  { %8038 = vmatpush1.bf16.msra.mxu0 %v11722_v56  ;;  %v1240_v56 = vld [vmem:[#allocation11 + $0x5f8] sm:$0xff] }
 0x483   :  { %8313 = vmatpush1.bf16.msra.mxu1 %v11492_v11  ;;  %8039 = vmatprep.subr.bf16.mxu0 %v11731_v24  ;;  %v11762_v11 = vcombine.low %v1459_v3, %v1463_v37  ;;  %v11532_v24 = vcombine.low %v1228_v36, %v1232_v38  ;;  %v11541_v50 = vcombine.high %v1236_v18, %v1240_v56  ;;  %v1495_v3 = vld [vmem:[#allocation11 + $0xdf0] sm:$0xff] }
 0x484   :  { %8314 = vmatprep.subr.bf16.mxu1 %v11501_v6  ;;  %v11771_v6 = vcombine.high %v1467_v59, %v1471_v17  ;;  %v11540_v29 = vcombine.low %v1236_v18, %v1240_v56 }
 0x486   :  { %8040 = vmatpush1.bf16.msra.mxu0 %v11730_v7  ;;  %v1244_v7 = vld [vmem:[#allocation11 + $0x618] sm:$0xff] }
 0x487   :  { %8315 = vmatpush1.bf16.msra.mxu1 %v11500_v13  ;;  %8052 = vmatprep.subr.bf16.mxu0 %v11739_v8  ;;  %v1248_v13 = vld [vmem:[#allocation11 + $0x638] sm:$0xff]  ;;  %v11770_v8 = vcombine.low %v1467_v59, %v1471_v17 }
 0x488   :  { %8316 = vmatprep.subr.bf16.mxu1 %v11509_v44  ;;  %v2078_v44 = vrot.slane %v14307_v35, %v14021_v54  ;;  %v11549_v33 = vcombine.high %v1244_v7, %v1248_v13  ;;  %v11548_v14 = vcombine.low %v1244_v7, %v1248_v13  ;;  %v1272_v7 = vld [vmem:[#allocation11 + $0x6f8] sm:$0xff] }
 0x489   :  { %8042 = vmatmul.mubr.bf16.vlgmr.msra.gmra.mrb[24].mxu0 %v14226_v34 }
 0x48a   :  { %8053 = vmatpush1.bf16.msra.mxu0 %v11738_v49  ;;  %8084 = vmatprep.mubr.bf16.mxu0 %v14085_v60  ;;  %v1483_v49 = vld [vmem:[#allocation11 + $0xd90] sm:$0xff]  ;;  %v7270_v40 = vadd.f32 %v14275_v32, %v2078_v44  ;;  %v7274_v37 = vadd.f32 %v14279_v51, %v2078_v44 }
 0x48b   :  { %8317 = vmatpush1.bf16.msra.mxu1 %v11508_v16  ;;  %8054 = vmatprep.subr.bf16.mxu0 %v11747_v42  ;;  %v1487_v16 = vld [vmem:[#allocation11 + $0xdb0] sm:$0xff]  ;;  %v1252_v42 = vld [vmem:[#allocation11 + $0x658] sm:$0xff] }
 0x48c   :  { %8318 = vmatprep.subr.bf16.mxu1 %v11517_v43  ;;  %v1256_v43 = vld [vmem:[#allocation11 + $0x678] sm:$0xff]  ;;  %v11787_v15 = vcombine.high %v1483_v49, %v1487_v16  ;;  %v11786_v59 = vcombine.low %v1483_v49, %v1487_v16  ;;  %v11573_v49 = vcombine.high %v1268_v23, %v1272_v7  ;;  %v1507_v16 = vld [vmem:[#allocation11 + $0xe50] sm:$0xff] }
 0x48d   :  { %v11556_v56 = vcombine.low %v1252_v42, %v1256_v43 }
 0x48e   :  { %8055 = vmatpush1.bf16.msra.mxu0 %v11746_v62  ;;  %v7272_v62 = vadd.f32 %v14277_v1, %v2082_v21 }
 0x48f   :  { %8319 = vmatpush1.bf16.msra.mxu1 %v11516_v47  ;;  %8056 = vmatprep.subr.bf16.mxu0 %v11755_v48  ;;  %v11557_v48 = vcombine.high %v1252_v42, %v1256_v43  ;;  %v1511_v42 = vld [vmem:[#allocation11 + $0xe70] sm:$0xff] }
 0x490   :  { %8320 = vmatprep.subr.bf16.mxu1 %v11525_v10  ;;  %v1491_v10 = vld [vmem:[#allocation11 + $0xdd0] sm:$0xff] }
 0x492   :  { %8057 = vmatpush1.bf16.msra.mxu0 %v11754_v46  ;;  %v1260_v46 = vld [vmem:[#allocation11 + $0x698] sm:$0xff] }
 0x493   :  { %8321 = vmatpush1.bf16.msra.mxu1 %v11524_v63  ;;  %8058 = vmatprep.subr.bf16.mxu0 %v11763_v52  ;;  %v1264_v63 = vld [vmem:[#allocation11 + $0x6b8] sm:$0xff]  ;;  %v7276_v52 = vadd.f32 %v14281_v53, %v2082_v21 }
 0x494   :  { %8322 = vmatprep.subr.bf16.mxu1 %v11533_v25  ;;  %v11564_v44 = vcombine.low %v1260_v46, %v1264_v63 }
 0x496   :  { %8059 = vmatpush1.bf16.msra.mxu0 %v11762_v11  ;;  %v11795_v11 = vcombine.high %v1491_v10, %v1495_v3 }
 0x497   :  { %8323 = vmatpush1.bf16.msra.mxu1 %v11532_v24  ;;  %8060 = vmatprep.subr.bf16.mxu0 %v11771_v6  ;;  %v11565_v6 = vcombine.high %v1260_v46, %v1264_v63  ;;  %v11810_v46 = vcombine.low %v1507_v16, %v1511_v42 }
 0x498   :  { %8324 = vmatprep.subr.bf16.mxu1 %v11541_v50  ;;  %v1499_v50 = vld [vmem:[#allocation11 + $0xe10] sm:$0xff] }
 0x499   :  { %v11803_v21 = vcombine.high %v1499_v50, %v1503_v12 }
 0x49a   :  { %8061 = vmatpush1.bf16.msra.mxu0 %v11770_v8  ;;  %v11794_v8 = vcombine.low %v1491_v10, %v1495_v3  ;;  %v1515_v3 = vld [vmem:[#allocation11 + $0xe90] sm:$0xff] }
 0x49b   :  { %8325 = vmatpush1.bf16.msra.mxu1 %v11540_v29  ;;  %8062 = vmatprep.subr.bf16.mxu0 %v11779_v31 }
 0x49c   :  { %v7570_v47 = vpop.f32.mrb[20].mxu0  ;;  %8326 = vmatprep.subr.bf16.mxu1 %v11549_v33 }
 0x49d   :  { %v12734_v36 = vadd.f32 %v7570_v47, %v7270_v40  ;;  %v7572_v38 = vpop.f32.mrb[21].mxu0  ;;  %v1276_v40 = vld [vmem:[#allocation11 + $0x718] sm:$0xff]  ;;  %v11572_v47 = vcombine.low %v1268_v23, %v1272_v7 }
 0x49e   :  { %v12736_v32 = vadd.f32 %v7572_v38, %v7272_v62  ;;  %v7574_v25 = vpop.f32.mrb[22].mxu0  ;;  %8063 = vmatpush1.bf16.msra.mxu0 %v11778_v39  ;;  %v11802_v62 = vcombine.low %v1499_v50, %v1503_v12  ;;  %v1288_v38 = vld [vmem:[#allocation11 + $0x778] sm:$0xff] }
 0x49f   :  { %v8627_v17 = vmul.f32 0.2, %v12734_v36  ;;  %v12738_v18 = vadd.f32 %v7574_v25, %v7274_v37  ;;  %v7576_v1 = vpop.f32.mrb[23].mxu0  ;;  %8327 = vmatpush1.bf16.msra.mxu1 %v11548_v14  ;;  %8064 = vmatprep.subr.bf16.mxu0 %v11787_v15  ;;  %vm8611_vm3 = vcmp.gt.f32.partialorder %v12734_v36, 0.0  ;;  %v1280_v14 = vld [vmem:[#allocation11 + $0x738] sm:$0xff]  ;;  %v1519_v37 = vld [vmem:[#allocation11 + $0xeb0] sm:$0xff] }
 0x4a0   :  { %v8628_v24 = vmul.f32 0.2, %v12736_v32  ;;  %v12740_v51 = vadd.f32 %v7576_v1, %v7276_v52  ;;  %8328 = vmatprep.subr.bf16.mxu1 %v11557_v48  ;;  %vm8612_vm4 = vcmp.gt.f32.partialorder %v12736_v32, 0.0  ;;  %v11811_v48 = vcombine.high %v1507_v16, %v1511_v42  ;;  %v1523_v25 = vld [vmem:[#allocation11 + $0xed0] sm:$0xff]  ;;  %v1300_v50 = vld [vmem:[#allocation11 + $0x7d8] sm:$0xff] }
 0x4a1   :  { %vm8619_vm5 = vcmp.gt.f32.partialorder %v12738_v18, 0.0  ;;  %v8635_v53 = vmul.f32 0.2, %v12738_v18  ;;  %v8643_v29 = vsel %vm8611_vm3, %v12734_v36, %v8627_v17  ;;  %v11581_v10 = vcombine.high %v1276_v40, %v1280_v14  ;;  %v1284_v36 = vld [vmem:[#allocation11 + $0x758] sm:$0xff] }
 0x4a2   :  { %vm8620_vm6 = vcmp.gt.f32.partialorder %v12740_v51, 0.0  ;;  %v8636_v13 = vmul.f32 0.2, %v12740_v51  ;;  %8065 = vmatpush1.bf16.msra.mxu0 %v11786_v59  ;;  %v8644_v43 = vsel %vm8612_vm4, %v12736_v32, %v8628_v24  ;;  %v11580_v63 = vcombine.low %v1276_v40, %v1280_v14  ;;  %v1527_v59 = vld [vmem:[#allocation11 + $0xef0] sm:$0xff]  ;;  %v1292_v17 = vld [vmem:[#allocation11 + $0x798] sm:$0xff] }
 0x4a3   :  { %v8651_v31 = vsel %vm8619_vm5, %v12738_v18, %v8635_v53  ;;  %8329 = vmatpush1.bf16.msra.mxu1 %v11556_v56  ;;  %8066 = vmatprep.subr.bf16.mxu0 %v11795_v11  ;;  %v11819_v52 = vcombine.high %v1515_v3, %v1519_v37  ;;  %v11589_v32 = vcombine.high %v1284_v36, %v1288_v38  ;;  %v1296_v18 = vld [vmem:[#allocation11 + $0x7b8] sm:$0xff] }
 0x4a4   :  { %v14318_v33 = vpack.c.bf16 %v8651_v31, %v8643_v29  ;;  %8330 = vmatprep.subr.bf16.mxu1 %v11565_v6  ;;  %v8652_v39 = vsel %vm8620_vm6, %v12740_v51, %v8636_v13  ;;  %v11818_v1 = vcombine.low %v1515_v3, %v1519_v37  ;;  %v11588_v56 = vcombine.low %v1284_v36, %v1288_v38  ;;  %v1531_v51 = vld [vmem:[#allocation11 + $0xf10] sm:$0xff]  ;;  %v1304_v12 = vld [vmem:[#allocation11 + $0x7f8] sm:$0xff] }
 0x4a5   :  { %v14322_v15 = vpack.c.bf16 %v8652_v39, %v8644_v43  ;;  %v11827_v11 = vcombine.high %v1523_v25, %v1527_v59  ;;  %v11597_v24 = vcombine.high %v1292_v17, %v1296_v18  ;;  %v1535_v6 = vld [vmem:[#allocation11 + $0xf30] sm:$0xff]  ;;  %v11826_v53 = vcombine.low %v1523_v25, %v1527_v59  ;;  %v1308_v29 = vld [vmem:[#allocation11 + $0x818] sm:$0xff] }
 0x4a6   :  { %8067 = vmatpush1.bf16.msra.mxu0 %v11794_v8  ;;  %v11596_v23 = vcombine.low %v1292_v17, %v1296_v18  ;;  %v11835_v7 = vcombine.high %v1531_v51, %v1535_v6  ;;  %v11605_v13 = vcombine.high %v1300_v50, %v1304_v12  ;;  %v1539_v8 = vld [vmem:[#allocation11 + $0xf50] sm:$0xff]  ;;  %v1312_v31 = vld [vmem:[#allocation11 + $0x838] sm:$0xff] }
 0x4a7   :  { %8331 = vmatpush1.bf16.msra.mxu1 %v11564_v44  ;;  %8068 = vmatprep.subr.bf16.mxu0 %v11803_v21  ;;  %v1543_v44 = vld [vmem:[#allocation11 + $0xf70] sm:$0xff]  ;;  %v11834_v21 = vcombine.low %v1531_v51, %v1535_v6  ;;  %v11613_v42 = vcombine.high %v1308_v29, %v1312_v31  ;;  %v1316_v40 = vld [vmem:[#allocation11 + $0x858] sm:$0xff] }
 0x4a8   :  { %8332 = vmatprep.subr.bf16.mxu1 %v11573_v49  ;;  %v11604_v49 = vcombine.low %v1300_v50, %v1304_v12  ;;  %v11843_v16 = vcombine.high %v1539_v8, %v1543_v44  ;;  %v1547_v43 = vld [vmem:[#allocation11 + $0xf90] sm:$0xff]  ;;  %v1320_v14 = vld [vmem:[#allocation11 + $0x878] sm:$0xff] }
 0x4a9   :  { %v1551_v39 = vld [vmem:[#allocation11 + $0xfb0] sm:$0xff]  ;;  %v1324_v36 = vld [vmem:[#allocation11 + $0x898] sm:$0xff] }
 0x4aa   :  { %8069 = vmatpush1.bf16.msra.mxu0 %v11802_v62  ;;  %v11842_v62 = vcombine.low %v1539_v8, %v1543_v44  ;;  %v1555_v3 = vld [vmem:[#allocation11 + $0xfd0] sm:$0xff]  ;;  %v1328_v38 = vld [vmem:[#allocation11 + $0x8b8] sm:$0xff] }
 0x4ab   :  { %8333 = vmatpush1.bf16.msra.mxu1 %v11572_v47  ;;  %8070 = vmatprep.subr.bf16.mxu0 %v11811_v48  ;;  %v11612_v47 = vcombine.low %v1308_v29, %v1312_v31  ;;  %v11851_v48 = vcombine.high %v1547_v43, %v1551_v39  ;;  %v1559_v37 = vld [vmem:[#allocation11 + $0xff0] sm:$0xff]  ;;  %v1332_v17 = vld [vmem:[#allocation11 + $0x8d8] sm:$0xff] }
 0x4ac   :  { %8334 = vmatprep.subr.bf16.mxu1 %v11581_v10  ;;  %v11621_v10 = vcombine.high %v1316_v40, %v1320_v14  ;;  %v1563_v25 = vld [vmem:[#allocation11 + $0x1010] sm:$0xff]  ;;  %v1336_v18 = vld [vmem:[#allocation11 + $0x8f8] sm:$0xff] }
 0x4ad   :  { %v1567_v59 = vld [vmem:[#allocation11 + $0x1030] sm:$0xff]  ;;  %v1344_v6 = vld [vmem:[#allocation11 + $0x938] sm:$0xff]  ;;  %v11636_v12 = vcombine.low %v1332_v17, %v1336_v18 }
 0x4ae   :  { %8071 = vmatpush1.bf16.msra.mxu0 %v11810_v46  ;;  %v11850_v46 = vcombine.low %v1547_v43, %v1551_v39  ;;  %v1575_v51 = vld [vmem:[#allocation11 + $0x1070] sm:$0xff]  ;;  %v11866_v50 = vcombine.low %v1563_v25, %v1567_v59  ;;  %v1348_v8 = vld [vmem:[#allocation11 + $0x958] sm:$0xff] }
 0x4af   :  { %8335 = vmatpush1.bf16.msra.mxu1 %v11580_v63  ;;  %8072 = vmatprep.subr.bf16.mxu0 %v11819_v52  ;;  %v11620_v63 = vcombine.low %v1316_v40, %v1320_v14  ;;  %v11859_v52 = vcombine.high %v1555_v3, %v1559_v37  ;;  %v1352_v44 = vld [vmem:[#allocation11 + $0x978] sm:$0xff] }
 0x4b0   :  { %8336 = vmatprep.subr.bf16.mxu1 %v11589_v32  ;;  %v11629_v32 = vcombine.high %v1324_v36, %v1328_v38  ;;  %v1356_v43 = vld [vmem:[#allocation11 + $0x998] sm:$0xff]  ;;  %v11652_v14 = vcombine.low %v1348_v8, %v1352_v44 }
 0x4b1   :  { %v1360_v39 = vld [vmem:[#allocation11 + $0x9b8] sm:$0xff] }
 0x4b2   :  { %8073 = vmatpush1.bf16.msra.mxu0 %v11818_v1  ;;  %v11858_v1 = vcombine.low %v1555_v3, %v1559_v37  ;;  %v1364_v3 = vld [vmem:[#allocation11 + $0x9d8] sm:$0xff] }
 0x4b3   :  { %8337 = vmatpush1.bf16.msra.mxu1 %v11588_v56  ;;  %8074 = vmatprep.subr.bf16.mxu0 %v11827_v11  ;;  %v11628_v56 = vcombine.low %v1324_v36, %v1328_v38  ;;  %v11867_v11 = vcombine.high %v1563_v25, %v1567_v59  ;;  %v1368_v37 = vld [vmem:[#allocation11 + $0x9f8] sm:$0xff]  ;;  %v11660_v38 = vcombine.low %v1356_v43, %v1360_v39 }
 0x4b4   :  { %8338 = vmatprep.subr.bf16.mxu1 %v11597_v24  ;;  %v1571_v24 = vld [vmem:[#allocation11 + $0x1050] sm:$0xff]  ;;  %v1372_v25 = vld [vmem:[#allocation11 + $0xa18] sm:$0xff] }
 0x4b5   :  { %v11874_v29 = vcombine.low %v1571_v24, %v1575_v51  ;;  %v1376_v59 = vld [vmem:[#allocation11 + $0xa38] sm:$0xff] }
 0x4b6   :  { %8075 = vmatpush1.bf16.msra.mxu0 %v11826_v53  ;;  %v11875_v53 = vcombine.high %v1571_v24, %v1575_v51  ;;  %v1380_v24 = vld [vmem:[#allocation11 + $0xa58] sm:$0xff] }
 0x4b7   :  { %8339 = vmatpush1.bf16.msra.mxu1 %v11596_v23  ;;  %8076 = vmatprep.subr.bf16.mxu0 %v11835_v7  ;;  %v1579_v7 = vld [vmem:[#allocation11 + $0x1090] sm:$0xff]  ;;  %v1384_v51 = vld [vmem:[#allocation11 + $0xa78] sm:$0xff] }
 0x4b8   :  { %8340 = vmatprep.subr.bf16.mxu1 %v11605_v13  ;;  %v1583_v13 = vld [vmem:[#allocation11 + $0x10b0] sm:$0xff] }
 0x4b9   :  { %v11882_v40 = vcombine.low %v1579_v7, %v1583_v13 }
 0x4ba   :  { %8077 = vmatpush1.bf16.msra.mxu0 %v11834_v21  ;;  %v11883_v21 = vcombine.high %v1579_v7, %v1583_v13  ;;  %v1388_v7 = vld [vmem:[#allocation11 + $0xa98] sm:$0xff] }
 0x4bb   :  { %8341 = vmatpush1.bf16.msra.mxu1 %v11604_v49  ;;  %8078 = vmatprep.subr.bf16.mxu0 %v11843_v16  ;;  %v11653_v49 = vcombine.high %v1348_v8, %v1352_v44  ;;  %v1587_v16 = vld [vmem:[#allocation11 + $0x10d0] sm:$0xff]  ;;  %v1392_v13 = vld [vmem:[#allocation11 + $0xab8] sm:$0xff]  ;;  %v11684_v44 = vcombine.low %v1380_v24, %v1384_v51 }
 0x4bc   :  { %8353 = vmatprep.subr.bf16.mxu1 %v11613_v42  ;;  %v1591_v42 = vld [vmem:[#allocation11 + $0x10f0] sm:$0xff] }
 0x4bd   :  { %v11890_v36 = vcombine.low %v1587_v16, %v1591_v42 }
 0x4be   :  { %8079 = vmatpush1.bf16.msra.mxu0 %v11842_v62  ;;  %8343 = vmatmul.mubr.bf16.vlgmr.msra.gmra.mrb[20].mxu1 %v14151_v4  ;;  %v11637_v4 = vcombine.high %v1332_v17, %v1336_v18  ;;  %v11891_v62 = vcombine.high %v1587_v16, %v1591_v42  ;;  %v11668_v18 = vcombine.low %v1364_v3, %v1368_v37  ;;  %v1396_v16 = vld [vmem:[#allocation11 + $0xad8] sm:$0xff] }
 0x4bf   :  { %8354 = vmatpush1.bf16.msra.mxu1 %v11612_v47  ;;  %8385 = vmatprep.mubr.bf16.mxu1 %v14230_v41  ;;  %v1340_v41 = vld [vmem:[#allocation11 + $0x918] sm:$0xff]  ;;  %v11661_v47 = vcombine.high %v1356_v43, %v1360_v39  ;;  %v11692_v39 = vcombine.low %v1388_v7, %v1392_v13 }
 0x4c0   :  { %8080 = vmatprep.subr.bf16.mxu0 %v11851_v48  ;;  %8355 = vmatprep.subr.bf16.mxu1 %v11621_v10  ;;  %v11645_v23 = vcombine.high %v1340_v41, %v1344_v6  ;;  %v11644_v31 = vcombine.low %v1340_v41, %v1344_v6  ;;  %v1595_v48 = vld [vmem:[#allocation11 + $0x1110] sm:$0xff]  ;;  %v11676_v6 = vcombine.low %v1372_v25, %v1376_v59  ;;  %v1400_v42 = vld [vmem:[#allocation11 + $0xaf8] sm:$0xff] }
 0x4c1   :  { %v1599_v10 = vld [vmem:[#allocation11 + $0x1130] sm:$0xff] }
 0x4c2   :  { %8081 = vmatpush1.bf16.msra.mxu0 %v11850_v46  ;;  %v11899_v46 = vcombine.high %v1595_v48, %v1599_v10  ;;  %v11898_v17 = vcombine.low %v1595_v48, %v1599_v10  ;;  %v1404_v48 = vld [vmem:[#allocation11 + $0xb18] sm:$0xff] }
 0x4c3   :  { %8356 = vmatpush1.bf16.msra.mxu1 %v11620_v63  ;;  %8082 = vmatprep.subr.bf16.mxu0 %v11859_v52  ;;  %v11669_v63 = vcombine.high %v1364_v3, %v1368_v37  ;;  %v1603_v52 = vld [vmem:[#allocation11 + $0x1150] sm:$0xff]  ;;  %v1408_v10 = vld [vmem:[#allocation11 + $0xb38] sm:$0xff]  ;;  %v11700_v37 = vcombine.low %v1396_v16, %v1400_v42 }
 0x4c4   :  { %8357 = vmatprep.subr.bf16.mxu1 %v11629_v32  ;;  %v1607_v32 = vld [vmem:[#allocation11 + $0x1170] sm:$0xff] }
 0x4c5   :  { %v11906_v41 = vcombine.low %v1603_v52, %v1607_v32 }
 0x4c6   :  { %8083 = vmatpush1.bf16.msra.mxu0 %v11858_v1  ;;  %v11907_v1 = vcombine.high %v1603_v52, %v1607_v32  ;;  %v1412_v52 = vld [vmem:[#allocation11 + $0xb58] sm:$0xff] }
 0x4c7   :  { %8358 = vmatpush1.bf16.msra.mxu1 %v11628_v56  ;;  %8095 = vmatprep.subr.bf16.mxu0 %v11867_v11  ;;  %v11677_v56 = vcombine.high %v1372_v25, %v1376_v59  ;;  %v1611_v11 = vld [vmem:[#allocation11 + $0x1190] sm:$0xff]  ;;  %v1416_v32 = vld [vmem:[#allocation11 + $0xb78] sm:$0xff]  ;;  %v11708_v59 = vcombine.low %v1404_v48, %v1408_v10 }
 0x4c8   :  { %8359 = vmatprep.subr.bf16.mxu1 %v11637_v4  ;;  %v1615_v4 = vld [vmem:[#allocation11 + $0x11b0] sm:$0xff] }
 0x4c9   :  { %8085 = vmatmul.mubr.bf16.vlgmr.msra.gmra.mrb[24].mxu0 %v14077_v45  ;;  %v11914_v8 = vcombine.low %v1611_v11, %v1615_v4 }
 0x4ca   :  { %8096 = vmatpush1.bf16.msra.mxu0 %v11866_v50  ;;  %8127 = vmatprep.mubr.bf16.mxu0 %v14252_v30  ;;  %v11915_v50 = vcombine.high %v1611_v11, %v1615_v4  ;;  %v1420_v11 = vld [vmem:[#allocation11 + $0xb98] sm:$0xff] }
 0x4cb   :  { %8360 = vmatpush1.bf16.msra.mxu1 %v11636_v12  ;;  %8097 = vmatprep.subr.bf16.mxu0 %v11875_v53  ;;  %v11685_v12 = vcombine.high %v1380_v24, %v1384_v51  ;;  %v1619_v53 = vld [vmem:[#allocation11 + $0x11d0] sm:$0xff]  ;;  %v1424_v4 = vld [vmem:[#allocation11 + $0xbb8] sm:$0xff]  ;;  %v11716_v51 = vcombine.low %v1412_v52, %v1416_v32 }
 0x4cc   :  { %8361 = vmatprep.subr.bf16.mxu1 %v11645_v23  ;;  %v1623_v23 = vld [vmem:[#allocation11 + $0x11f0] sm:$0xff] }
 0x4cd   :  { %v11922_v43 = vcombine.low %v1619_v53, %v1623_v23 }
 0x4ce   :  { %8098 = vmatpush1.bf16.msra.mxu0 %v11874_v29  ;;  %v11923_v29 = vcombine.high %v1619_v53, %v1623_v23  ;;  %v1428_v53 = vld [vmem:[#allocation11 + $0xbd8] sm:$0xff] }
 0x4cf   :  { %8362 = vmatpush1.bf16.msra.mxu1 %v11644_v31  ;;  %8099 = vmatprep.subr.bf16.mxu0 %v11883_v21  ;;  %v11693_v31 = vcombine.high %v1388_v7, %v1392_v13  ;;  %v1627_v21 = vld [vmem:[#allocation11 + $0x1210] sm:$0xff]  ;;  %v1432_v23 = vld [vmem:[#allocation11 + $0xbf8] sm:$0xff]  ;;  %v11724_v13 = vcombine.low %v1420_v11, %v1424_v4 }
 0x4d0   :  { %8363 = vmatprep.subr.bf16.mxu1 %v11653_v49  ;;  %v1631_v49 = vld [vmem:[#allocation11 + $0x1230] sm:$0xff] }
 0x4d1   :  { %v11930_v3 = vcombine.low %v1627_v21, %v1631_v49 }
 0x4d2   :  { %8100 = vmatpush1.bf16.msra.mxu0 %v11882_v40  ;;  %v11931_v40 = vcombine.high %v1627_v21, %v1631_v49  ;;  %v1436_v21 = vld [vmem:[#allocation11 + $0xc18] sm:$0xff] }
 0x4d3   :  { %8364 = vmatpush1.bf16.msra.mxu1 %v11652_v14  ;;  %8101 = vmatprep.subr.bf16.mxu0 %v11891_v62  ;;  %v11701_v14 = vcombine.high %v1396_v16, %v1400_v42  ;;  %v1635_v62 = vld [vmem:[#allocation11 + $0x1250] sm:$0xff]  ;;  %v1440_v49 = vld [vmem:[#allocation11 + $0xc38] sm:$0xff]  ;;  %v11732_v42 = vcombine.low %v1428_v53, %v1432_v23 }
 0x4d4   :  { %8365 = vmatprep.subr.bf16.mxu1 %v11661_v47  ;;  %v1639_v47 = vld [vmem:[#allocation11 + $0x1270] sm:$0xff] }
 0x4d5   :  { %v11938_v25 = vcombine.low %v1635_v62, %v1639_v47 }
 0x4d6   :  { %8102 = vmatpush1.bf16.msra.mxu0 %v11890_v36  ;;  %v11939_v36 = vcombine.high %v1635_v62, %v1639_v47  ;;  %v1444_v62 = vld [vmem:[#allocation11 + $0xc58] sm:$0xff] }
 0x4d7   :  { %8366 = vmatpush1.bf16.msra.mxu1 %v11660_v38  ;;  %8103 = vmatprep.subr.bf16.mxu0 %v11899_v46  ;;  %v11709_v38 = vcombine.high %v1404_v48, %v1408_v10  ;;  %v1643_v46 = vld [vmem:[#allocation11 + $0x1290] sm:$0xff]  ;;  %v1448_v47 = vld [vmem:[#allocation11 + $0xc78] sm:$0xff]  ;;  %v11740_v10 = vcombine.low %v1436_v21, %v1440_v49 }
 0x4d8   :  { %8367 = vmatprep.subr.bf16.mxu1 %v11669_v63  ;;  %v1647_v63 = vld [vmem:[#allocation11 + $0x12b0] sm:$0xff] }
 0x4d9   :  { %v11946_v24 = vcombine.low %v1643_v46, %v1647_v63 }
 0x4da   :  { %8104 = vmatpush1.bf16.msra.mxu0 %v11898_v17  ;;  %v11947_v17 = vcombine.high %v1643_v46, %v1647_v63  ;;  %v1452_v46 = vld [vmem:[#allocation11 + $0xc98] sm:$0xff] }
 0x4db   :  { %8368 = vmatpush1.bf16.msra.mxu1 %v11668_v18  ;;  %8105 = vmatprep.subr.bf16.mxu0 %v11907_v1  ;;  %v11717_v18 = vcombine.high %v1412_v52, %v1416_v32  ;;  %v1651_v1 = vld [vmem:[#allocation11 + $0x12d0] sm:$0xff]  ;;  %v1456_v63 = vld [vmem:[#allocation11 + $0xcb8] sm:$0xff]  ;;  %v11748_v32 = vcombine.low %v1444_v62, %v1448_v47 }
 0x4dc   :  { %8369 = vmatprep.subr.bf16.mxu1 %v11677_v56  ;;  %v1655_v56 = vld [vmem:[#allocation11 + $0x12f0] sm:$0xff] }
 0x4dd   :  { %v11954_v7 = vcombine.low %v1651_v1, %v1655_v56 }
 0x4de   :  { %8106 = vmatpush1.bf16.msra.mxu0 %v11906_v41  ;;  %v11955_v41 = vcombine.high %v1651_v1, %v1655_v56  ;;  %v1460_v1 = vld [vmem:[#allocation11 + $0xcd8] sm:$0xff] }
 0x4df   :  { %8370 = vmatpush1.bf16.msra.mxu1 %v11676_v6  ;;  %8107 = vmatprep.subr.bf16.mxu0 %v11915_v50  ;;  %v11725_v6 = vcombine.high %v1420_v11, %v1424_v4  ;;  %v1659_v50 = vld [vmem:[#allocation11 + $0x1310] sm:$0xff]  ;;  %v1464_v56 = vld [vmem:[#allocation11 + $0xcf8] sm:$0xff]  ;;  %v11756_v4 = vcombine.low %v1452_v46, %v1456_v63 }
 0x4e0   :  { %8371 = vmatprep.subr.bf16.mxu1 %v11685_v12  ;;  %v1663_v12 = vld [vmem:[#allocation11 + $0x1330] sm:$0xff] }
 0x4e1   :  { %v11962_v16 = vcombine.low %v1659_v50, %v1663_v12 }
 0x4e2   :  { %8108 = vmatpush1.bf16.msra.mxu0 %v11914_v8  ;;  %v11963_v8 = vcombine.high %v1659_v50, %v1663_v12  ;;  %v11764_v12 = vcombine.low %v1460_v1, %v1464_v56 }
 0x4e3   :  { %8372 = vmatpush1.bf16.msra.mxu1 %v11684_v44  ;;  %8109 = vmatprep.subr.bf16.mxu0 %v11923_v29  ;;  %v11733_v44 = vcombine.high %v1428_v53, %v1432_v23  ;;  %v1667_v29 = vld [vmem:[#allocation11 + $0x1350] sm:$0xff] }
 0x4e4   :  { %8373 = vmatprep.subr.bf16.mxu1 %v11693_v31  ;;  %v1671_v31 = vld [vmem:[#allocation11 + $0x1370] sm:$0xff] }
 0x4e5   :  { %v11970_v48 = vcombine.low %v1667_v29, %v1671_v31 }
 0x4e6   :  { %8110 = vmatpush1.bf16.msra.mxu0 %v11922_v43  ;;  %v11971_v43 = vcombine.high %v1667_v29, %v1671_v31 }
 0x4e7   :  { %8374 = vmatpush1.bf16.msra.mxu1 %v11692_v39  ;;  %8111 = vmatprep.subr.bf16.mxu0 %v11931_v40  ;;  %v11741_v39 = vcombine.high %v1436_v21, %v1440_v49  ;;  %v1675_v40 = vld [vmem:[#allocation11 + $0x1390] sm:$0xff] }
 0x4e8   :  { %8375 = vmatprep.subr.bf16.mxu1 %v11701_v14  ;;  %v1679_v14 = vld [vmem:[#allocation11 + $0x13b0] sm:$0xff] }
 0x4e9   :  { %v11978_v52 = vcombine.low %v1675_v40, %v1679_v14 }
 0x4ea   :  { %8112 = vmatpush1.bf16.msra.mxu0 %v11930_v3  ;;  %v11979_v3 = vcombine.high %v1675_v40, %v1679_v14  ;;  %v2086_v40 = vrot.slane %v14307_v35, %v14035_v61 }
 0x4eb   :  { %8376 = vmatpush1.bf16.msra.mxu1 %v11700_v37  ;;  %8113 = vmatprep.subr.bf16.mxu0 %v11939_v36  ;;  %v11749_v37 = vcombine.high %v1444_v62, %v1448_v47  ;;  %v1683_v36 = vld [vmem:[#allocation11 + $0x13d0] sm:$0xff]  ;;  %v2090_v62 = vrot.slane %v14307_v35, %v14043_v2 }
 0x4ec   :  { %8377 = vmatprep.subr.bf16.mxu1 %v11709_v38  ;;  %v1687_v38 = vld [vmem:[#allocation11 + $0x13f0] sm:$0xff] }
 0x4ed   :  { %v11986_v11 = vcombine.low %v1683_v36, %v1687_v38 }
 0x4ee   :  { %8114 = vmatpush1.bf16.msra.mxu0 %v11938_v25  ;;  %v11987_v25 = vcombine.high %v1683_v36, %v1687_v38  ;;  %v1492_v38 = vld [vmem:[#allocation11 + $0xdd8] sm:$0xff] }
 0x4ef   :  { %8378 = vmatpush1.bf16.msra.mxu1 %v11708_v59  ;;  %8115 = vmatprep.subr.bf16.mxu0 %v11947_v17  ;;  %v11757_v59 = vcombine.high %v1452_v46, %v1456_v63  ;;  %v1691_v17 = vld [vmem:[#allocation11 + $0x1410] sm:$0xff]  ;;  %v1496_v46 = vld [vmem:[#allocation11 + $0xdf8] sm:$0xff] }
 0x4f0   :  { %8379 = vmatprep.subr.bf16.mxu1 %v11717_v18  ;;  %v1695_v18 = vld [vmem:[#allocation11 + $0x1430] sm:$0xff] }
 0x4f1   :  { %v11994_v50 = vcombine.low %v1691_v17, %v1695_v18 }
 0x4f2   :  { %8116 = vmatpush1.bf16.msra.mxu0 %v11946_v24  ;;  %v11995_v24 = vcombine.high %v1691_v17, %v1695_v18 }
 0x4f3   :  { %8380 = vmatpush1.bf16.msra.mxu1 %v11716_v51  ;;  %8117 = vmatprep.subr.bf16.mxu0 %v11955_v41  ;;  %v1699_v51 = vld [vmem:[#allocation11 + $0x1450] sm:$0xff] }
 0x4f4   :  { %8381 = vmatprep.subr.bf16.mxu1 %v11725_v6  ;;  %v1703_v41 = vld [vmem:[#allocation11 + $0x1470] sm:$0xff]  ;;  %v1472_v6 = vld [vmem:[#allocation11 + $0xd38] sm:$0xff] }
 0x4f5   :  { %v12003_v53 = vcombine.high %v1699_v51, %v1703_v41  ;;  %v12002_v29 = vcombine.low %v1699_v51, %v1703_v41  ;;  %v1500_v41 = vld [vmem:[#allocation11 + $0xe18] sm:$0xff] }
 0x4f6   :  { %8118 = vmatpush1.bf16.msra.mxu0 %v11954_v7  ;;  %v1707_v7 = vld [vmem:[#allocation11 + $0x1490] sm:$0xff] }
 0x4f7   :  { %8382 = vmatpush1.bf16.msra.mxu1 %v11724_v13  ;;  %8119 = vmatprep.subr.bf16.mxu0 %v11963_v8  ;;  %v1711_v13 = vld [vmem:[#allocation11 + $0x14b0] sm:$0xff]  ;;  %v1476_v8 = vld [vmem:[#allocation11 + $0xd58] sm:$0xff] }
 0x4f8   :  { %8383 = vmatprep.subr.bf16.mxu1 %v11733_v44  ;;  %v1480_v44 = vld [vmem:[#allocation11 + $0xd78] sm:$0xff]  ;;  %v12011_v21 = vcombine.high %v1707_v7, %v1711_v13  ;;  %v12010_v14 = vcombine.low %v1707_v7, %v1711_v13 }
 0x4f9   :  { %v11781_v49 = vcombine.high %v1476_v8, %v1480_v44  ;;  %v11780_v47 = vcombine.low %v1476_v8, %v1480_v44  ;;  %v1739_v44 = vld [vmem:[#allocation11 + $0x1590] sm:$0xff] }
 0x4fa   :  { %8120 = vmatpush1.bf16.msra.mxu0 %v11962_v16  ;;  %v1715_v16 = vld [vmem:[#allocation11 + $0x14d0] sm:$0xff] }
 0x4fb   :  { %8384 = vmatpush1.bf16.msra.mxu1 %v11732_v42  ;;  %8121 = vmatprep.subr.bf16.mxu0 %v11971_v43  ;;  %v1719_v42 = vld [vmem:[#allocation11 + $0x14f0] sm:$0xff]  ;;  %v1484_v43 = vld [vmem:[#allocation11 + $0xd98] sm:$0xff] }
 0x4fc   :  { %8396 = vmatprep.subr.bf16.mxu1 %v11741_v39  ;;  %v1488_v39 = vld [vmem:[#allocation11 + $0xdb8] sm:$0xff] }
 0x4fd   :  { %v11788_v17 = vcombine.low %v1484_v43, %v1488_v39 }
 0x4fe   :  { %8122 = vmatpush1.bf16.msra.mxu0 %v11970_v48  ;;  %8386 = vmatmul.mubr.bf16.vlgmr.msra.gmra.mrb[20].mxu1 %v14226_v34  ;;  %v11765_v34 = vcombine.high %v1460_v1, %v1464_v56  ;;  %v12019_v48 = vcombine.high %v1715_v16, %v1719_v42 }
 0x4ff   :  { %8397 = vmatpush1.bf16.msra.mxu1 %v11740_v10  ;;  %8428 = vmatprep.mubr.bf16.mxu1 %v14085_v60  ;;  %v1468_v60 = vld [vmem:[#allocation11 + $0xd18] sm:$0xff]  ;;  %v11789_v10 = vcombine.high %v1484_v43, %v1488_v39 }
 0x500   :  { %8123 = vmatprep.subr.bf16.mxu0 %v11979_v3  ;;  %8398 = vmatprep.subr.bf16.mxu1 %v11749_v37  ;;  %v11773_v23 = vcombine.high %v1468_v60, %v1472_v6  ;;  %v11772_v31 = vcombine.low %v1468_v60, %v1472_v6  ;;  %v1723_v3 = vld [vmem:[#allocation11 + $0x1510] sm:$0xff]  ;;  %v1504_v60 = vld [vmem:[#allocation11 + $0xe38] sm:$0xff] }
 0x501   :  { %v1727_v37 = vld [vmem:[#allocation11 + $0x1530] sm:$0xff]  ;;  %v11805_v8 = vcombine.high %v1500_v41, %v1504_v60 }
 0x502   :  { %8124 = vmatpush1.bf16.msra.mxu0 %v11978_v52  ;;  %v12027_v18 = vcombine.high %v1723_v3, %v1727_v37 }
 0x503   :  { %8399 = vmatpush1.bf16.msra.mxu1 %v11748_v32  ;;  %8125 = vmatprep.subr.bf16.mxu0 %v11987_v25  ;;  %v12018_v32 = vcombine.low %v1715_v16, %v1719_v42 }
 0x504   :  { %8400 = vmatprep.subr.bf16.mxu1 %v11757_v59 }
 0x506   :  { %8126 = vmatpush1.bf16.msra.mxu0 %v11986_v11  ;;  %v11797_v11 = vcombine.high %v1492_v38, %v1496_v46 }
 0x507   :  { %8401 = vmatpush1.bf16.msra.mxu1 %v11756_v4  ;;  %8138 = vmatprep.subr.bf16.mxu0 %v11995_v24  ;;  %v1731_v4 = vld [vmem:[#allocation11 + $0x1550] sm:$0xff] }
 0x508   :  { %8402 = vmatprep.subr.bf16.mxu1 %v11765_v34  ;;  %v1735_v24 = vld [vmem:[#allocation11 + $0x1570] sm:$0xff] }
 0x509   :  { %8128 = vmatmul.mubr.bf16.vlgmr.msra.gmra.mrb[24].mxu0 %v14250_v28  ;;  %v12034_v43 = vcombine.low %v1731_v4, %v1735_v24 }
 0x50a   :  { %8139 = vmatpush1.bf16.msra.mxu0 %v11994_v50  ;;  %8170 = vmatprep.mubr.bf16.mxu0 %v14161_v22  ;;  %v12026_v50 = vcombine.low %v1723_v3, %v1727_v37  ;;  %v1520_v3 = vld [vmem:[#allocation11 + $0xeb8] sm:$0xff] }
 0x50b   :  { %8403 = vmatpush1.bf16.msra.mxu1 %v11764_v12  ;;  %8140 = vmatprep.subr.bf16.mxu0 %v12003_v53  ;;  %v11796_v53 = vcombine.low %v1492_v38, %v1496_v46 }
 0x50c   :  { %8404 = vmatprep.subr.bf16.mxu1 %v11773_v23  ;;  %v12035_v23 = vcombine.high %v1731_v4, %v1735_v24  ;;  %v1536_v4 = vld [vmem:[#allocation11 + $0xf38] sm:$0xff] }
 0x50e   :  { %8141 = vmatpush1.bf16.msra.mxu0 %v12002_v29  ;;  %v1743_v29 = vld [vmem:[#allocation11 + $0x15b0] sm:$0xff] }
 0x50f   :  { %8405 = vmatpush1.bf16.msra.mxu1 %v11772_v31  ;;  %8142 = vmatprep.subr.bf16.mxu0 %v12011_v21  ;;  %v1508_v21 = vld [vmem:[#allocation11 + $0xe58] sm:$0xff]  ;;  %v12042_v37 = vcombine.low %v1739_v44, %v1743_v29 }
 0x510   :  { %8406 = vmatprep.subr.bf16.mxu1 %v11781_v49  ;;  %v1512_v49 = vld [vmem:[#allocation11 + $0xe78] sm:$0xff] }
 0x511   :  { %v7914_v36 = vpop.f32.mrb[16].mxu1 }
 0x512   :  { %v12741_v63 = vadd.f32 %v7914_v36, %v2086_v40  ;;  %v7916_v52 = vpop.f32.mrb[17].mxu1  ;;  %8143 = vmatpush1.bf16.msra.mxu0 %v12010_v14  ;;  %v12043_v14 = vcombine.high %v1739_v44, %v1743_v29  ;;  %v11812_v36 = vcombine.low %v1508_v21, %v1512_v49  ;;  %v1783_v44 = vld [vmem:[#allocation11 + $0x16f0] sm:$0xff]  ;;  %v1548_v29 = vld [vmem:[#allocation11 + $0xf98] sm:$0xff] }
 0x513   :  { %v12742_v25 = vadd.f32 %v7916_v52, %v2090_v62  ;;  %v7918_v59 = vpop.f32.mrb[18].mxu1  ;;  %8407 = vmatpush1.bf16.msra.mxu1 %v11780_v47  ;;  %8144 = vmatprep.subr.bf16.mxu0 %v12019_v48  ;;  %v1747_v47 = vld [vmem:[#allocation11 + $0x15d0] sm:$0xff] }
 0x514   :  { %v8629_v35 = vmul.f32 0.2, %v12741_v63  ;;  %v12743_v1 = vadd.f32 %v7918_v59, %v2086_v40  ;;  %v7920_v56 = vpop.f32.mrb[19].mxu1  ;;  %8408 = vmatprep.subr.bf16.mxu1 %v11789_v10  ;;  %vm8613_vm7 = vcmp.gt.f32.partialorder %v12741_v63, 0.0  ;;  %v11804_v40 = vcombine.low %v1500_v41, %v1504_v60  ;;  %v1751_v48 = vld [vmem:[#allocation11 + $0x15f0] sm:$0xff]  ;;  %v1516_v10 = vld [vmem:[#allocation11 + $0xe98] sm:$0xff] }
 0x515   :  { %v8630_v34 = vmul.f32 0.2, %v12742_v25  ;;  %v12744_v51 = vadd.f32 %v7920_v56, %v2090_v62  ;;  %vm8614_vm8 = vcmp.gt.f32.partialorder %v12742_v25, 0.0  ;;  %v11813_v62 = vcombine.high %v1508_v21, %v1512_v49  ;;  %v1759_v52 = vld [vmem:[#allocation11 + $0x1630] sm:$0xff]  ;;  %v1552_v21 = vld [vmem:[#allocation11 + $0xfb8] sm:$0xff] }
 0x516   :  { %vm8621_vm9 = vcmp.gt.f32.partialorder %v12743_v1, 0.0  ;;  %v8637_v6 = vmul.f32 0.2, %v12743_v1  ;;  %8145 = vmatpush1.bf16.msra.mxu0 %v12018_v32  ;;  %v8645_v7 = vsel %vm8613_vm7, %v12741_v63, %v8629_v35  ;;  %v12051_v38 = vcombine.high %v1747_v47, %v1751_v48  ;;  %v1755_v63 = vld [vmem:[#allocation11 + $0x1610] sm:$0xff]  ;;  %v1524_v32 = vld [vmem:[#allocation11 + $0xed8] sm:$0xff] }
 0x517   :  { %vm8622_vm10 = vcmp.gt.f32.partialorder %v12744_v51, 0.0  ;;  %v8638_v12 = vmul.f32 0.2, %v12744_v51  ;;  %8409 = vmatpush1.bf16.msra.mxu1 %v11788_v17  ;;  %8146 = vmatprep.subr.bf16.mxu0 %v12027_v18  ;;  %v8646_v16 = vsel %vm8614_vm8, %v12742_v25, %v8630_v34  ;;  %v11821_v46 = vcombine.high %v1516_v10, %v1520_v3  ;;  %v1528_v25 = vld [vmem:[#allocation11 + $0xef8] sm:$0xff]  ;;  %v1767_v56 = vld [vmem:[#allocation11 + $0x1670] sm:$0xff] }
 0x518   :  { %v8653_v13 = vsel %vm8621_vm9, %v12743_v1, %v8637_v6  ;;  %8410 = vmatprep.subr.bf16.mxu1 %v11797_v11  ;;  %v12050_v59 = vcombine.low %v1747_v47, %v1751_v48  ;;  %v11820_v17 = vcombine.low %v1516_v10, %v1520_v3  ;;  %v12059_v18 = vcombine.high %v1755_v63, %v1759_v52  ;;  %v1763_v1 = vld [vmem:[#allocation11 + $0x1650] sm:$0xff]  ;;  %v1532_v11 = vld [vmem:[#allocation11 + $0xf18] sm:$0xff] }
 0x519   :  { %v14337_v31 = vpack.c.bf16 %v8653_v13, %v8645_v7  ;;  %v8654_v42 = vsel %vm8622_vm10, %v12744_v51, %v8638_v12  ;;  %v11829_v35 = vcombine.high %v1524_v32, %v1528_v25  ;;  %v12058_v24 = vcombine.low %v1755_v63, %v1759_v52  ;;  %v1771_v60 = vld [vmem:[#allocation11 + $0x1690] sm:$0xff]  ;;  %v1544_v12 = vld [vmem:[#allocation11 + $0xf78] sm:$0xff] }
 0x51a   :  { %8147 = vmatpush1.bf16.msra.mxu0 %v12026_v50  ;;  %v14341_v39 = vpack.c.bf16 %v8654_v42, %v8646_v16  ;;  %v11828_v34 = vcombine.low %v1524_v32, %v1528_v25  ;;  %v12067_v51 = vcombine.high %v1763_v1, %v1767_v56  ;;  %v11837_v41 = vcombine.high %v1532_v11, %v1536_v4  ;;  %v1775_v6 = vld [vmem:[#allocation11 + $0x16b0] sm:$0xff]  ;;  %v1540_v50 = vld [vmem:[#allocation11 + $0xf58] sm:$0xff] }
 0x51b   :  { %8411 = vmatpush1.bf16.msra.mxu1 %v11796_v53  ;;  %8148 = vmatprep.subr.bf16.mxu0 %v12035_v23  ;;  %v12066_v53 = vcombine.low %v1763_v1, %v1767_v56  ;;  %v11836_v23 = vcombine.low %v1532_v11, %v1536_v4  ;;  %v12075_v7 = vcombine.high %v1771_v60, %v1775_v6  ;;  %v1560_v47 = vld [vmem:[#allocation11 + $0xff8] sm:$0xff] }
 0x51c   :  { %8412 = vmatprep.subr.bf16.mxu1 %v11805_v8  ;;  %v11845_v13 = vcombine.high %v1540_v50, %v1544_v12  ;;  %v1779_v8 = vld [vmem:[#allocation11 + $0x16d0] sm:$0xff]  ;;  %v12074_v49 = vcombine.low %v1771_v60, %v1775_v6  ;;  %v11844_v16 = vcombine.low %v1540_v50, %v1544_v12  ;;  %v11852_v10 = vcombine.low %v1548_v29, %v1552_v21  ;;  %v1568_v63 = vld [vmem:[#allocation11 + $0x1038] sm:$0xff] }
 0x51d   :  { %v12083_v42 = vcombine.high %v1779_v8, %v1783_v44  ;;  %v12082_v48 = vcombine.low %v1779_v8, %v1783_v44  ;;  %v1576_v1 = vld [vmem:[#allocation11 + $0x1078] sm:$0xff] }
 0x51e   :  { %8149 = vmatpush1.bf16.msra.mxu0 %v12034_v43  ;;  %v11853_v43 = vcombine.high %v1548_v29, %v1552_v21  ;;  %v1584_v60 = vld [vmem:[#allocation11 + $0x10b8] sm:$0xff] }
 0x51f   :  { %8413 = vmatpush1.bf16.msra.mxu1 %v11804_v40  ;;  %8150 = vmatprep.subr.bf16.mxu0 %v12043_v14  ;;  %v1787_v40 = vld [vmem:[#allocation11 + $0x1710] sm:$0xff]  ;;  %v1592_v8 = vld [vmem:[#allocation11 + $0x10f8] sm:$0xff] }
 0x520   :  { %8414 = vmatprep.subr.bf16.mxu1 %v11813_v62  ;;  %v1791_v14 = vld [vmem:[#allocation11 + $0x1730] sm:$0xff]  ;;  %v1556_v62 = vld [vmem:[#allocation11 + $0xfd8] sm:$0xff] }
 0x521   :  { %v12091_v3 = vcombine.high %v1787_v40, %v1791_v14  ;;  %v12090_v52 = vcombine.low %v1787_v40, %v1791_v14  ;;  %v11860_v32 = vcombine.low %v1556_v62, %v1560_v47 }
 0x522   :  { %8151 = vmatpush1.bf16.msra.mxu0 %v12042_v37  ;;  %v11861_v37 = vcombine.high %v1556_v62, %v1560_v47  ;;  %v1835_v47 = vld [vmem:[#allocation11 + $0x1890] sm:$0xff] }
 0x523   :  { %8415 = vmatpush1.bf16.msra.mxu1 %v11812_v36  ;;  %8152 = vmatprep.subr.bf16.mxu0 %v12051_v38  ;;  %v1795_v36 = vld [vmem:[#allocation11 + $0x1750] sm:$0xff] }
 0x524   :  { %8416 = vmatprep.subr.bf16.mxu1 %v11821_v46  ;;  %v1799_v38 = vld [vmem:[#allocation11 + $0x1770] sm:$0xff]  ;;  %v1564_v46 = vld [vmem:[#allocation11 + $0x1018] sm:$0xff] }
 0x525   :  { %v12099_v25 = vcombine.high %v1795_v36, %v1799_v38  ;;  %v12098_v56 = vcombine.low %v1795_v36, %v1799_v38  ;;  %v11868_v11 = vcombine.low %v1564_v46, %v1568_v63 }
 0x526   :  { %8153 = vmatpush1.bf16.msra.mxu0 %v12050_v59  ;;  %v11869_v59 = vcombine.high %v1564_v46, %v1568_v63  ;;  %v1843_v63 = vld [vmem:[#allocation11 + $0x18d0] sm:$0xff] }
 0x527   :  { %8417 = vmatpush1.bf16.msra.mxu1 %v11820_v17  ;;  %8154 = vmatprep.subr.bf16.mxu0 %v12059_v18  ;;  %v1803_v17 = vld [vmem:[#allocation11 + $0x1790] sm:$0xff] }
 0x528   :  { %8418 = vmatprep.subr.bf16.mxu1 %v11829_v35  ;;  %v1807_v18 = vld [vmem:[#allocation11 + $0x17b0] sm:$0xff]  ;;  %v1572_v35 = vld [vmem:[#allocation11 + $0x1058] sm:$0xff] }
 0x529   :  { %v12107_v4 = vcombine.high %v1803_v17, %v1807_v18  ;;  %v12106_v6 = vcombine.low %v1803_v17, %v1807_v18  ;;  %v11876_v50 = vcombine.low %v1572_v35, %v1576_v1 }
 0x52a   :  { %8155 = vmatpush1.bf16.msra.mxu0 %v12058_v24  ;;  %v11877_v24 = vcombine.high %v1572_v35, %v1576_v1  ;;  %v1851_v1 = vld [vmem:[#allocation11 + $0x1910] sm:$0xff] }
 0x52b   :  { %8419 = vmatpush1.bf16.msra.mxu1 %v11828_v34  ;;  %8156 = vmatprep.subr.bf16.mxu0 %v12067_v51  ;;  %v1811_v34 = vld [vmem:[#allocation11 + $0x17d0] sm:$0xff] }
 0x52c   :  { %8420 = vmatprep.subr.bf16.mxu1 %v11837_v41  ;;  %v1815_v51 = vld [vmem:[#allocation11 + $0x17f0] sm:$0xff]  ;;  %v1580_v41 = vld [vmem:[#allocation11 + $0x1098] sm:$0xff] }
 0x52d   :  { %v12115_v12 = vcombine.high %v1811_v34, %v1815_v51  ;;  %v12114_v44 = vcombine.low %v1811_v34, %v1815_v51  ;;  %v11884_v29 = vcombine.low %v1580_v41, %v1584_v60 }
 0x52e   :  { %8157 = vmatpush1.bf16.msra.mxu0 %v12066_v53  ;;  %v11885_v53 = vcombine.high %v1580_v41, %v1584_v60  ;;  %v1859_v60 = vld [vmem:[#allocation11 + $0x1950] sm:$0xff] }
 0x52f   :  { %8421 = vmatpush1.bf16.msra.mxu1 %v11836_v23  ;;  %8158 = vmatprep.subr.bf16.mxu0 %v12075_v7  ;;  %v1819_v23 = vld [vmem:[#allocation11 + $0x1810] sm:$0xff] }
 0x530   :  { %8422 = vmatprep.subr.bf16.mxu1 %v11845_v13  ;;  %v1823_v7 = vld [vmem:[#allocation11 + $0x1830] sm:$0xff]  ;;  %v1588_v13 = vld [vmem:[#allocation11 + $0x10d8] sm:$0xff] }
 0x531   :  { %v12123_v21 = vcombine.high %v1819_v23, %v1823_v7  ;;  %v11892_v40 = vcombine.low %v1588_v13, %v1592_v8 }
 0x532   :  { %8159 = vmatpush1.bf16.msra.mxu0 %v12074_v49  ;;  %v1827_v49 = vld [vmem:[#allocation11 + $0x1850] sm:$0xff] }
 0x533   :  { %8423 = vmatpush1.bf16.msra.mxu1 %v11844_v16  ;;  %8160 = vmatprep.subr.bf16.mxu0 %v12083_v42  ;;  %v1831_v16 = vld [vmem:[#allocation11 + $0x1870] sm:$0xff]  ;;  %v1600_v42 = vld [vmem:[#allocation11 + $0x1138] sm:$0xff] }
 0x534   :  { %8424 = vmatprep.subr.bf16.mxu1 %v11853_v43  ;;  %v12122_v43 = vcombine.low %v1819_v23, %v1823_v7  ;;  %v12131_v14 = vcombine.high %v1827_v49, %v1831_v16 }
 0x536   :  { %8161 = vmatpush1.bf16.msra.mxu0 %v12082_v48  ;;  %v1839_v48 = vld [vmem:[#allocation11 + $0x18b0] sm:$0xff] }
 0x537   :  { %8425 = vmatpush1.bf16.msra.mxu1 %v11852_v10  ;;  %8162 = vmatprep.subr.bf16.mxu0 %v12091_v3  ;;  %v1604_v10 = vld [vmem:[#allocation11 + $0x1158] sm:$0xff]  ;;  %v12139_v38 = vcombine.high %v1835_v47, %v1839_v48 }
 0x538   :  { %8426 = vmatprep.subr.bf16.mxu1 %v11861_v37  ;;  %v1608_v3 = vld [vmem:[#allocation11 + $0x1178] sm:$0xff]  ;;  %v12130_v37 = vcombine.low %v1827_v49, %v1831_v16 }
 0x539   :  { %v11909_v46 = vcombine.high %v1604_v10, %v1608_v3  ;;  %v11908_v17 = vcombine.low %v1604_v10, %v1608_v3  ;;  %v1883_v3 = vld [vmem:[#allocation11 + $0x1a10] sm:$0xff] }
 0x53a   :  { %8163 = vmatpush1.bf16.msra.mxu0 %v12090_v52  ;;  %v1847_v52 = vld [vmem:[#allocation11 + $0x18f0] sm:$0xff] }
 0x53b   :  { %8427 = vmatpush1.bf16.msra.mxu1 %v11860_v32  ;;  %8164 = vmatprep.subr.bf16.mxu0 %v12099_v25  ;;  %v1612_v32 = vld [vmem:[#allocation11 + $0x1198] sm:$0xff]  ;;  %v12147_v18 = vcombine.high %v1843_v63, %v1847_v52 }
 0x53c   :  { %8439 = vmatprep.subr.bf16.mxu1 %v11869_v59  ;;  %v1616_v25 = vld [vmem:[#allocation11 + $0x11b8] sm:$0xff]  ;;  %v12138_v59 = vcombine.low %v1835_v47, %v1839_v48 }
 0x53d   :  { %v11917_v35 = vcombine.high %v1612_v32, %v1616_v25  ;;  %v11916_v34 = vcombine.low %v1612_v32, %v1616_v25  ;;  %v1891_v25 = vld [vmem:[#allocation11 + $0x1a50] sm:$0xff] }
 0x53e   :  { %8165 = vmatpush1.bf16.msra.mxu0 %v12098_v56  ;;  %8429 = vmatmul.mubr.bf16.vlgmr.msra.gmra.mrb[20].mxu1 %v14077_v45  ;;  %v11893_v45 = vcombine.high %v1588_v13, %v1592_v8  ;;  %v1855_v56 = vld [vmem:[#allocation11 + $0x1930] sm:$0xff] }
 0x53f   :  { %8440 = vmatpush1.bf16.msra.mxu1 %v11868_v11  ;;  %8471 = vmatprep.mubr.bf16.mxu1 %v14252_v30  ;;  %v1596_v30 = vld [vmem:[#allocation11 + $0x1118] sm:$0xff]  ;;  %v12155_v51 = vcombine.high %v1851_v1, %v1855_v56  ;;  %v1867_v8 = vld [vmem:[#allocation11 + $0x1990] sm:$0xff] }
 0x540   :  { %8166 = vmatprep.subr.bf16.mxu0 %v12107_v4  ;;  %8441 = vmatprep.subr.bf16.mxu1 %v11877_v24  ;;  %v11901_v62 = vcombine.high %v1596_v30, %v1600_v42  ;;  %v11900_v36 = vcombine.low %v1596_v30, %v1600_v42  ;;  %v1620_v11 = vld [vmem:[#allocation11 + $0x11d8] sm:$0xff]  ;;  %v12146_v24 = vcombine.low %v1843_v63, %v1847_v52  ;;  %v1875_v42 = vld [vmem:[#allocation11 + $0x19d0] sm:$0xff] }
 0x541   :  { %v1624_v4 = vld [vmem:[#allocation11 + $0x11f8] sm:$0xff] }
 0x542   :  { %8167 = vmatpush1.bf16.msra.mxu0 %v12106_v6  ;;  %v11925_v41 = vcombine.high %v1620_v11, %v1624_v4  ;;  %v1863_v6 = vld [vmem:[#allocation11 + $0x1970] sm:$0xff]  ;;  %v11924_v23 = vcombine.low %v1620_v11, %v1624_v4 }
 0x543   :  { %8442 = vmatpush1.bf16.msra.mxu1 %v11876_v50  ;;  %8168 = vmatprep.subr.bf16.mxu0 %v12115_v12  ;;  %v1628_v50 = vld [vmem:[#allocation11 + $0x1218] sm:$0xff]  ;;  %v12163_v7 = vcombine.high %v1859_v60, %v1863_v6  ;;  %v1899_v4 = vld [vmem:[#allocation11 + $0x1a90] sm:$0xff] }
 0x544   :  { %8443 = vmatprep.subr.bf16.mxu1 %v11885_v53  ;;  %v1632_v12 = vld [vmem:[#allocation11 + $0x1238] sm:$0xff]  ;;  %v12154_v53 = vcombine.low %v1851_v1, %v1855_v56 }
 0x545   :  { %v11933_v13 = vcombine.high %v1628_v50, %v1632_v12  ;;  %v11932_v49 = vcombine.low %v1628_v50, %v1632_v12  ;;  %v1907_v12 = vld [vmem:[#allocation11 + $0x1ad0] sm:$0xff] }
 0x546   :  { %8169 = vmatpush1.bf16.msra.mxu0 %v12114_v44  ;;  %v1871_v44 = vld [vmem:[#allocation11 + $0x19b0] sm:$0xff] }
 0x547   :  { %8444 = vmatpush1.bf16.msra.mxu1 %v11884_v29  ;;  %8181 = vmatprep.subr.bf16.mxu0 %v12123_v21  ;;  %v1636_v29 = vld [vmem:[#allocation11 + $0x1258] sm:$0xff]  ;;  %v12171_v16 = vcombine.high %v1867_v8, %v1871_v44 }
 0x548   :  { %8445 = vmatprep.subr.bf16.mxu1 %v11893_v45  ;;  %v1640_v21 = vld [vmem:[#allocation11 + $0x1278] sm:$0xff]  ;;  %v12162_v45 = vcombine.low %v1859_v60, %v1863_v6 }
 0x549   :  { %8171 = vmatmul.mubr.bf16.vlgmr.msra.gmra.mrb[24].mxu0 %v14153_v0  ;;  %v11941_v30 = vcombine.high %v1636_v29, %v1640_v21  ;;  %v11940_v47 = vcombine.low %v1636_v29, %v1640_v21  ;;  %v1915_v21 = vld [vmem:[#allocation11 + $0x1b10] sm:$0xff] }
 0x54a   :  { %8182 = vmatpush1.bf16.msra.mxu0 %v12122_v43  ;;  %8213 = vmatprep.mubr.bf16.mxu0 %v14261_v5  ;;  %v1879_v43 = vld [vmem:[#allocation11 + $0x19f0] sm:$0xff] }
 0x54b   :  { %8446 = vmatpush1.bf16.msra.mxu1 %v11892_v40  ;;  %8183 = vmatprep.subr.bf16.mxu0 %v12131_v14  ;;  %v1644_v40 = vld [vmem:[#allocation11 + $0x1298] sm:$0xff]  ;;  %v12179_v48 = vcombine.high %v1875_v42, %v1879_v43 }
 0x54c   :  { %8447 = vmatprep.subr.bf16.mxu1 %v11901_v62  ;;  %v1648_v14 = vld [vmem:[#allocation11 + $0x12b8] sm:$0xff]  ;;  %v12170_v62 = vcombine.low %v1867_v8, %v1871_v44 }
 0x54d   :  { %v11949_v10 = vcombine.high %v1644_v40, %v1648_v14  ;;  %v11948_v63 = vcombine.low %v1644_v40, %v1648_v14  ;;  %v1923_v14 = vld [vmem:[#allocation11 + $0x1b50] sm:$0xff] }
 0x54e   :  { %8184 = vmatpush1.bf16.msra.mxu0 %v12130_v37  ;;  %v1887_v37 = vld [vmem:[#allocation11 + $0x1a30] sm:$0xff] }
 0x54f   :  { %8448 = vmatpush1.bf16.msra.mxu1 %v11900_v36  ;;  %8185 = vmatprep.subr.bf16.mxu0 %v12139_v38  ;;  %v1652_v36 = vld [vmem:[#allocation11 + $0x12d8] sm:$0xff]  ;;  %v12187_v52 = vcombine.high %v1883_v3, %v1887_v37 }
 0x550   :  { %8449 = vmatprep.subr.bf16.mxu1 %v11909_v46  ;;  %v1656_v38 = vld [vmem:[#allocation11 + $0x12f8] sm:$0xff]  ;;  %v12178_v46 = vcombine.low %v1875_v42, %v1879_v43 }
 0x551   :  { %v11957_v32 = vcombine.high %v1652_v36, %v1656_v38  ;;  %v11956_v1 = vcombine.low %v1652_v36, %v1656_v38  ;;  %v1931_v38 = vld [vmem:[#allocation11 + $0x1b90] sm:$0xff] }
 0x552   :  { %8186 = vmatpush1.bf16.msra.mxu0 %v12138_v59  ;;  %v1895_v59 = vld [vmem:[#allocation11 + $0x1a70] sm:$0xff] }
 0x553   :  { %8450 = vmatpush1.bf16.msra.mxu1 %v11908_v17  ;;  %8187 = vmatprep.subr.bf16.mxu0 %v12147_v18  ;;  %v1660_v17 = vld [vmem:[#allocation11 + $0x1318] sm:$0xff]  ;;  %v12195_v56 = vcombine.high %v1891_v25, %v1895_v59 }
 0x554   :  { %8451 = vmatprep.subr.bf16.mxu1 %v11917_v35  ;;  %v1664_v18 = vld [vmem:[#allocation11 + $0x1338] sm:$0xff]  ;;  %v12186_v35 = vcombine.low %v1883_v3, %v1887_v37 }
 0x555   :  { %v11965_v11 = vcombine.high %v1660_v17, %v1664_v18  ;;  %v11964_v60 = vcombine.low %v1660_v17, %v1664_v18  ;;  %v1939_v18 = vld [vmem:[#allocation11 + $0x1bd0] sm:$0xff] }
 0x556   :  { %8188 = vmatpush1.bf16.msra.mxu0 %v12146_v24  ;;  %v1903_v24 = vld [vmem:[#allocation11 + $0x1ab0] sm:$0xff] }
 0x557   :  { %8452 = vmatpush1.bf16.msra.mxu1 %v11916_v34  ;;  %8189 = vmatprep.subr.bf16.mxu0 %v12155_v51  ;;  %v1668_v34 = vld [vmem:[#allocation11 + $0x1358] sm:$0xff]  ;;  %v12203_v6 = vcombine.high %v1899_v4, %v1903_v24 }
 0x558   :  { %8453 = vmatprep.subr.bf16.mxu1 %v11925_v41  ;;  %v1672_v51 = vld [vmem:[#allocation11 + $0x1378] sm:$0xff]  ;;  %v12194_v41 = vcombine.low %v1891_v25, %v1895_v59 }
 0x559   :  { %v11973_v50 = vcombine.high %v1668_v34, %v1672_v51  ;;  %v11972_v8 = vcombine.low %v1668_v34, %v1672_v51  ;;  %v1947_v51 = vld [vmem:[#allocation11 + $0x1c10] sm:$0xff] }
 0x55a   :  { %8190 = vmatpush1.bf16.msra.mxu0 %v12154_v53  ;;  %v1911_v53 = vld [vmem:[#allocation11 + $0x1af0] sm:$0xff] }
 0x55b   :  { %8454 = vmatpush1.bf16.msra.mxu1 %v11924_v23  ;;  %8191 = vmatprep.subr.bf16.mxu0 %v12163_v7  ;;  %v1676_v23 = vld [vmem:[#allocation11 + $0x1398] sm:$0xff]  ;;  %v12211_v44 = vcombine.high %v1907_v12, %v1911_v53 }
 0x55c   :  { %8455 = vmatprep.subr.bf16.mxu1 %v11933_v13  ;;  %v1680_v7 = vld [vmem:[#allocation11 + $0x13b8] sm:$0xff]  ;;  %v12202_v13 = vcombine.low %v1899_v4, %v1903_v24 }
 0x55d   :  { %v11981_v29 = vcombine.high %v1676_v23, %v1680_v7  ;;  %v11980_v42 = vcombine.low %v1676_v23, %v1680_v7  ;;  %v1955_v23 = vld [vmem:[#allocation11 + $0x1c50] sm:$0xff] }
 0x55e   :  { %8192 = vmatpush1.bf16.msra.mxu0 %v12162_v45  ;;  %v1919_v45 = vld [vmem:[#allocation11 + $0x1b30] sm:$0xff] }
 0x55f   :  { %8456 = vmatpush1.bf16.msra.mxu1 %v11932_v49  ;;  %8193 = vmatprep.subr.bf16.mxu0 %v12171_v16  ;;  %v1684_v49 = vld [vmem:[#allocation11 + $0x13d8] sm:$0xff]  ;;  %v12219_v43 = vcombine.high %v1915_v21, %v1919_v45  ;;  %v1959_v7 = vld [vmem:[#allocation11 + $0x1c70] sm:$0xff] }
 0x560   :  { %8457 = vmatprep.subr.bf16.mxu1 %v11941_v30  ;;  %v1688_v16 = vld [vmem:[#allocation11 + $0x13f8] sm:$0xff]  ;;  %v12210_v30 = vcombine.low %v1907_v12, %v1911_v53 }
 0x561   :  { %v11989_v40 = vcombine.high %v1684_v49, %v1688_v16  ;;  %v11988_v3 = vcombine.low %v1684_v49, %v1688_v16  ;;  %v1967_v49 = vld [vmem:[#allocation11 + $0x1cb0] sm:$0xff]  ;;  %v1732_v16 = vld [vmem:[#allocation11 + $0x1558] sm:$0xff] }
 0x562   :  { %8194 = vmatpush1.bf16.msra.mxu0 %v12170_v62  ;;  %v1927_v62 = vld [vmem:[#allocation11 + $0x1b70] sm:$0xff] }
 0x563   :  { %8458 = vmatpush1.bf16.msra.mxu1 %v11940_v47  ;;  %8195 = vmatprep.subr.bf16.mxu0 %v12179_v48  ;;  %v1692_v47 = vld [vmem:[#allocation11 + $0x1418] sm:$0xff]  ;;  %v12227_v37 = vcombine.high %v1923_v14, %v1927_v62 }
 0x564   :  { %8459 = vmatprep.subr.bf16.mxu1 %v11949_v10  ;;  %v1696_v48 = vld [vmem:[#allocation11 + $0x1438] sm:$0xff]  ;;  %v12218_v10 = vcombine.low %v1915_v21, %v1919_v45  ;;  %v1963_v45 = vld [vmem:[#allocation11 + $0x1c90] sm:$0xff] }
 0x565   :  { %v11997_v36 = vcombine.high %v1692_v47, %v1696_v48  ;;  %v11996_v25 = vcombine.low %v1692_v47, %v1696_v48  ;;  %v1975_v47 = vld [vmem:[#allocation11 + $0x1cf0] sm:$0xff]  ;;  %v1740_v48 = vld [vmem:[#allocation11 + $0x1598] sm:$0xff] }
 0x566   :  { %8196 = vmatpush1.bf16.msra.mxu0 %v12178_v46  ;;  %v1935_v46 = vld [vmem:[#allocation11 + $0x1bb0] sm:$0xff] }
 0x567   :  { %8460 = vmatpush1.bf16.msra.mxu1 %v11948_v63  ;;  %8197 = vmatprep.subr.bf16.mxu0 %v12187_v52  ;;  %v1700_v63 = vld [vmem:[#allocation11 + $0x1458] sm:$0xff]  ;;  %v12235_v59 = vcombine.high %v1931_v38, %v1935_v46 }
 0x568   :  { %8461 = vmatprep.subr.bf16.mxu1 %v11957_v32  ;;  %v1704_v52 = vld [vmem:[#allocation11 + $0x1478] sm:$0xff]  ;;  %v12226_v32 = vcombine.low %v1923_v14, %v1927_v62  ;;  %v1971_v62 = vld [vmem:[#allocation11 + $0x1cd0] sm:$0xff] }
 0x569   :  { %v12005_v17 = vcombine.high %v1700_v63, %v1704_v52  ;;  %v12004_v4 = vcombine.low %v1700_v63, %v1704_v52  ;;  %v1983_v63 = vld [vmem:[#allocation11 + $0x1d30] sm:$0xff]  ;;  %v1748_v52 = vld [vmem:[#allocation11 + $0x15d8] sm:$0xff] }
 0x56a   :  { %8198 = vmatpush1.bf16.msra.mxu0 %v12186_v35  ;;  %v1943_v35 = vld [vmem:[#allocation11 + $0x1bf0] sm:$0xff] }
 0x56b   :  { %8462 = vmatpush1.bf16.msra.mxu1 %v11956_v1  ;;  %8199 = vmatprep.subr.bf16.mxu0 %v12195_v56  ;;  %v1708_v1 = vld [vmem:[#allocation11 + $0x1498] sm:$0xff]  ;;  %v12243_v24 = vcombine.high %v1939_v18, %v1943_v35 }
 0x56c   :  { %8463 = vmatprep.subr.bf16.mxu1 %v11965_v11  ;;  %v1712_v56 = vld [vmem:[#allocation11 + $0x14b8] sm:$0xff]  ;;  %v12234_v11 = vcombine.low %v1931_v38, %v1935_v46  ;;  %v1979_v46 = vld [vmem:[#allocation11 + $0x1d10] sm:$0xff] }
 0x56d   :  { %v12013_v34 = vcombine.high %v1708_v1, %v1712_v56  ;;  %v12012_v12 = vcombine.low %v1708_v1, %v1712_v56  ;;  %v1991_v1 = vld [vmem:[#allocation11 + $0x1d70] sm:$0xff]  ;;  %v1756_v56 = vld [vmem:[#allocation11 + $0x1618] sm:$0xff] }
 0x56e   :  { %8200 = vmatpush1.bf16.msra.mxu0 %v12194_v41  ;;  %v1951_v41 = vld [vmem:[#allocation11 + $0x1c30] sm:$0xff] }
 0x56f   :  { %8464 = vmatpush1.bf16.msra.mxu1 %v11964_v60  ;;  %8201 = vmatprep.subr.bf16.mxu0 %v12203_v6  ;;  %v1716_v60 = vld [vmem:[#allocation11 + $0x14d8] sm:$0xff]  ;;  %v12251_v53 = vcombine.high %v1947_v51, %v1951_v41 }
 0x570   :  { %8465 = vmatprep.subr.bf16.mxu1 %v11973_v50  ;;  %v1720_v6 = vld [vmem:[#allocation11 + $0x14f8] sm:$0xff]  ;;  %v12242_v50 = vcombine.low %v1939_v18, %v1943_v35  ;;  %v1987_v35 = vld [vmem:[#allocation11 + $0x1d50] sm:$0xff] }
 0x572   :  { %8202 = vmatpush1.bf16.msra.mxu0 %v12202_v13  ;;  %v1728_v13 = vld [vmem:[#allocation11 + $0x1538] sm:$0xff] }
 0x573   :  { %8466 = vmatpush1.bf16.msra.mxu1 %v11972_v8  ;;  %8203 = vmatprep.subr.bf16.mxu0 %v12211_v44  ;;  %v12250_v8 = vcombine.low %v1947_v51, %v1951_v41  ;;  %v12020_v44 = vcombine.low %v1716_v60, %v1720_v6  ;;  %v1995_v41 = vld [vmem:[#allocation11 + $0x1d90] sm:$0xff] }
 0x574   :  { %8467 = vmatprep.subr.bf16.mxu1 %v11981_v29  ;;  %v12259_v29 = vcombine.high %v1955_v23, %v1959_v7 }
 0x576   :  { %8204 = vmatpush1.bf16.msra.mxu0 %v12210_v30  ;;  %v1736_v30 = vld [vmem:[#allocation11 + $0x1578] sm:$0xff] }
 0x577   :  { %8468 = vmatpush1.bf16.msra.mxu1 %v11980_v42  ;;  %8205 = vmatprep.subr.bf16.mxu0 %v12219_v43  ;;  %v12258_v42 = vcombine.low %v1955_v23, %v1959_v7  ;;  %v12037_v14 = vcombine.high %v1732_v16, %v1736_v30  ;;  %v2003_v7 = vld [vmem:[#allocation11 + $0x1dd0] sm:$0xff] }
 0x578   :  { %8469 = vmatprep.subr.bf16.mxu1 %v11989_v40  ;;  %v12267_v40 = vcombine.high %v1963_v45, %v1967_v49 }
 0x57a   :  { %8206 = vmatpush1.bf16.msra.mxu0 %v12218_v10  ;;  %v1744_v10 = vld [vmem:[#allocation11 + $0x15b8] sm:$0xff] }
 0x57b   :  { %8470 = vmatpush1.bf16.msra.mxu1 %v11988_v3  ;;  %8207 = vmatprep.subr.bf16.mxu0 %v12227_v37  ;;  %v12266_v3 = vcombine.low %v1963_v45, %v1967_v49  ;;  %v12036_v37 = vcombine.low %v1732_v16, %v1736_v30  ;;  %v12045_v38 = vcombine.high %v1740_v48, %v1744_v10  ;;  %v2011_v49 = vld [vmem:[#allocation11 + $0x1e10] sm:$0xff]  ;;  %v1780_v30 = vld [vmem:[#allocation11 + $0x16d8] sm:$0xff] }
 0x57c   :  { %8482 = vmatprep.subr.bf16.mxu1 %v11997_v36  ;;  %v12275_v36 = vcombine.high %v1971_v62, %v1975_v47  ;;  %v2015_v16 = vld [vmem:[#allocation11 + $0x1e30] sm:$0xff] }
 0x57e   :  { %8208 = vmatpush1.bf16.msra.mxu0 %v12226_v32  ;;  %8472 = vmatmul.mubr.bf16.vlgmr.msra.gmra.mrb[20].mxu1 %v14250_v28  ;;  %v12021_v28 = vcombine.high %v1716_v60, %v1720_v6  ;;  %v1752_v32 = vld [vmem:[#allocation11 + $0x15f8] sm:$0xff]  ;;  %v1999_v60 = vld [vmem:[#allocation11 + $0x1db0] sm:$0xff] }
 0x57f   :  { %8483 = vmatpush1.bf16.msra.mxu1 %v11996_v25  ;;  %8514 = vmatprep.mubr.bf16.mxu1 %v14161_v22  ;;  %v1724_v22 = vld [vmem:[#allocation11 + $0x1518] sm:$0xff]  ;;  %v12274_v25 = vcombine.low %v1971_v62, %v1975_v47  ;;  %v12053_v18 = vcombine.high %v1748_v52, %v1752_v32  ;;  %v2019_v47 = vld [vmem:[#allocation11 + $0x1e50] sm:$0xff] }
 0x580   :  { %8209 = vmatprep.subr.bf16.mxu0 %v12235_v59  ;;  %8484 = vmatprep.subr.bf16.mxu1 %v12005_v17  ;;  %v12029_v21 = vcombine.high %v1724_v22, %v1728_v13  ;;  %v12028_v43 = vcombine.low %v1724_v22, %v1728_v13  ;;  %v12044_v59 = vcombine.low %v1740_v48, %v1744_v10  ;;  %v1764_v6 = vld [vmem:[#allocation11 + $0x1658] sm:$0xff]  ;;  %v2007_v22 = vld [vmem:[#allocation11 + $0x1df0] sm:$0xff] }
 0x581   :  { %v12283_v17 = vcombine.high %v1979_v46, %v1983_v63  ;;  %v1772_v13 = vld [vmem:[#allocation11 + $0x1698] sm:$0xff]  ;;  %v2023_v48 = vld [vmem:[#allocation11 + $0x1e70] sm:$0xff] }
 0x582   :  { %8210 = vmatpush1.bf16.msra.mxu0 %v12234_v11  ;;  %v1760_v11 = vld [vmem:[#allocation11 + $0x1638] sm:$0xff] }
 0x583   :  { %8485 = vmatpush1.bf16.msra.mxu1 %v12004_v4  ;;  %8211 = vmatprep.subr.bf16.mxu0 %v12243_v24  ;;  %v12282_v4 = vcombine.low %v1979_v46, %v1983_v63  ;;  %v12052_v24 = vcombine.low %v1748_v52, %v1752_v32  ;;  %v12061_v51 = vcombine.high %v1756_v56, %v1760_v11  ;;  %v1788_v10 = vld [vmem:[#allocation11 + $0x1718] sm:$0xff]  ;;  %v2027_v63 = vld [vmem:[#allocation11 + $0x1e90] sm:$0xff] }
 0x584   :  { %8486 = vmatprep.subr.bf16.mxu1 %v12013_v34  ;;  %v12291_v34 = vcombine.high %v1987_v35, %v1991_v1  ;;  %v2031_v52 = vld [vmem:[#allocation11 + $0x1eb0] sm:$0xff]  ;;  %v1796_v32 = vld [vmem:[#allocation11 + $0x1758] sm:$0xff] }
 0x586   :  { %8212 = vmatpush1.bf16.msra.mxu0 %v12242_v50  ;;  %v1768_v50 = vld [vmem:[#allocation11 + $0x1678] sm:$0xff] }
 0x587   :  { %8487 = vmatpush1.bf16.msra.mxu1 %v12012_v12  ;;  %8224 = vmatprep.subr.bf16.mxu0 %v12251_v53  ;;  %v12290_v12 = vcombine.low %v1987_v35, %v1991_v1  ;;  %v12060_v53 = vcombine.low %v1756_v56, %v1760_v11  ;;  %v12069_v23 = vcombine.high %v1764_v6, %v1768_v50  ;;  %v2035_v1 = vld [vmem:[#allocation11 + $0x1ed0] sm:$0xff]  ;;  %v1804_v11 = vld [vmem:[#allocation11 + $0x1798] sm:$0xff] }
 0x588   :  { %8488 = vmatprep.subr.bf16.mxu1 %v12021_v28  ;;  %v12299_v28 = vcombine.high %v1995_v41, %v1999_v60  ;;  %v2039_v56 = vld [vmem:[#allocation11 + $0x1ef0] sm:$0xff] }
 0x589   :  { %8214 = vmatmul.mubr.bf16.vlgmr.msra.gmra.mrb[24].mxu0 %v14259_v26 }
 0x58a   :  { %8225 = vmatpush1.bf16.msra.mxu0 %v12250_v8  ;;  %8256 = vmatprep.mubr.bf16.mxu0 %v14232_v9  ;;  %v1776_v8 = vld [vmem:[#allocation11 + $0x16b8] sm:$0xff] }
 0x58b   :  { %8489 = vmatpush1.bf16.msra.mxu1 %v12020_v44  ;;  %8226 = vmatprep.subr.bf16.mxu0 %v12259_v29  ;;  %v12298_v44 = vcombine.low %v1995_v41, %v1999_v60  ;;  %v12068_v29 = vcombine.low %v1764_v6, %v1768_v50  ;;  %v12077_v45 = vcombine.high %v1772_v13, %v1776_v8  ;;  %v2043_v60 = vld [vmem:[#allocation11 + $0x1f10] sm:$0xff]  ;;  %v1812_v50 = vld [vmem:[#allocation11 + $0x17d8] sm:$0xff] }
 0x58c   :  { %8490 = vmatprep.subr.bf16.mxu1 %v12029_v21  ;;  %v12307_v21 = vcombine.high %v2003_v7, %v2007_v22  ;;  %v2047_v6 = vld [vmem:[#allocation11 + $0x1f30] sm:$0xff] }
 0x58e   :  { %8227 = vmatpush1.bf16.msra.mxu0 %v12258_v42  ;;  %v1784_v42 = vld [vmem:[#allocation11 + $0x16f8] sm:$0xff] }
 0x58f   :  { %8491 = vmatpush1.bf16.msra.mxu1 %v12028_v43  ;;  %8228 = vmatprep.subr.bf16.mxu0 %v12267_v40  ;;  %v12306_v43 = vcombine.low %v2003_v7, %v2007_v22  ;;  %v12076_v40 = vcombine.low %v1772_v13, %v1776_v8  ;;  %v12085_v62 = vcombine.high %v1780_v30, %v1784_v42  ;;  %v2051_v22 = vld [vmem:[#allocation11 + $0x1f50] sm:$0xff]  ;;  %v1820_v8 = vld [vmem:[#allocation11 + $0x1818] sm:$0xff] }
 0x590   :  { %8492 = vmatprep.subr.bf16.mxu1 %v12037_v14  ;;  %v12315_v14 = vcombine.high %v2011_v49, %v2015_v16  ;;  %v2055_v13 = vld [vmem:[#allocation11 + $0x1f70] sm:$0xff] }
 0x592   :  { %8229 = vmatpush1.bf16.msra.mxu0 %v12266_v3  ;;  %v1792_v3 = vld [vmem:[#allocation11 + $0x1738] sm:$0xff] }
 0x593   :  { %8493 = vmatpush1.bf16.msra.mxu1 %v12036_v37  ;;  %8230 = vmatprep.subr.bf16.mxu0 %v12275_v36  ;;  %v12314_v37 = vcombine.low %v2011_v49, %v2015_v16  ;;  %v12084_v36 = vcombine.low %v1780_v30, %v1784_v42  ;;  %v12093_v46 = vcombine.high %v1788_v10, %v1792_v3  ;;  %v2059_v16 = vld [vmem:[#allocation11 + $0x1f90] sm:$0xff]  ;;  %v1828_v42 = vld [vmem:[#allocation11 + $0x1858] sm:$0xff] }
 0x594   :  { %8494 = vmatprep.subr.bf16.mxu1 %v12045_v38  ;;  %v12323_v38 = vcombine.high %v2019_v47, %v2023_v48  ;;  %v2063_v30 = vld [vmem:[#allocation11 + $0x1fb0] sm:$0xff] }
 0x596   :  { %8231 = vmatpush1.bf16.msra.mxu0 %v12274_v25  ;;  %v1800_v25 = vld [vmem:[#allocation11 + $0x1778] sm:$0xff] }
 0x597   :  { %8495 = vmatpush1.bf16.msra.mxu1 %v12044_v59  ;;  %8232 = vmatprep.subr.bf16.mxu0 %v12283_v17  ;;  %v12322_v59 = vcombine.low %v2019_v47, %v2023_v48  ;;  %v12092_v17 = vcombine.low %v1788_v10, %v1792_v3  ;;  %v12101_v35 = vcombine.high %v1796_v32, %v1800_v25  ;;  %v2067_v48 = vld [vmem:[#allocation11 + $0x1fd0] sm:$0xff]  ;;  %v1836_v3 = vld [vmem:[#allocation11 + $0x1898] sm:$0xff] }
 0x598   :  { %8496 = vmatprep.subr.bf16.mxu1 %v12053_v18  ;;  %v12331_v18 = vcombine.high %v2027_v63, %v2031_v52  ;;  %v2071_v10 = vld [vmem:[#allocation11 + $0x1ff0] sm:$0xff] }
 0x59a   :  { %8233 = vmatpush1.bf16.msra.mxu0 %v12282_v4  ;;  %v1808_v4 = vld [vmem:[#allocation11 + $0x17b8] sm:$0xff] }
 0x59b   :  { %8497 = vmatpush1.bf16.msra.mxu1 %v12052_v24  ;;  %8234 = vmatprep.subr.bf16.mxu0 %v12291_v34  ;;  %v12330_v24 = vcombine.low %v2027_v63, %v2031_v52  ;;  %v12100_v34 = vcombine.low %v1796_v32, %v1800_v25  ;;  %v12109_v41 = vcombine.high %v1804_v11, %v1808_v4  ;;  %v1844_v52 = vld [vmem:[#allocation11 + $0x18d8] sm:$0xff] }
 0x59c   :  { %8498 = vmatprep.subr.bf16.mxu1 %v12061_v51  ;;  %v12339_v51 = vcombine.high %v2035_v1, %v2039_v56  ;;  %v1848_v32 = vld [vmem:[#allocation11 + $0x18f8] sm:$0xff]  ;;  %v12370_v25 = vcombine.low %v2067_v48, %v2071_v10 }
 0x59e   :  { %8235 = vmatpush1.bf16.msra.mxu0 %v12290_v12  ;;  %v1816_v12 = vld [vmem:[#allocation11 + $0x17f8] sm:$0xff] }
 0x59f   :  { %8499 = vmatpush1.bf16.msra.mxu1 %v12060_v53  ;;  %8236 = vmatprep.subr.bf16.mxu0 %v12299_v28  ;;  %v12338_v53 = vcombine.low %v2035_v1, %v2039_v56  ;;  %v12108_v28 = vcombine.low %v1804_v11, %v1808_v4  ;;  %v12117_v7 = vcombine.high %v1812_v50, %v1816_v12  ;;  %v12924_v1 = vld [vmem:[#allocation14] ss:$16 sps:$4 sm:$0xff]   ;;  %v12929_v56 = vld [vmem:[#allocation14 + $0x24] ss:$16 sps:$4 sm:$0xff]  }
 0x5a0   :  { %8500 = vmatprep.subr.bf16.mxu1 %v12069_v23  ;;  %v12347_v23 = vcombine.high %v2043_v60, %v2047_v6  ;;  %v1860_v4 = vld [vmem:[#allocation11 + $0x1958] sm:$0xff] }
 0x5a2   :  { %8237 = vmatpush1.bf16.msra.mxu0 %v12298_v44  ;;  %v1824_v44 = vld [vmem:[#allocation11 + $0x1838] sm:$0xff] }
 0x5a3   :  { %8501 = vmatpush1.bf16.msra.mxu1 %v12068_v29  ;;  %8238 = vmatprep.subr.bf16.mxu0 %v12307_v21  ;;  %v12346_v29 = vcombine.low %v2043_v60, %v2047_v6  ;;  %v12116_v21 = vcombine.low %v1812_v50, %v1816_v12  ;;  %v12125_v49 = vcombine.high %v1820_v8, %v1824_v44  ;;  %v1868_v6 = vld [vmem:[#allocation11 + $0x1998] sm:$0xff] }
 0x5a4   :  { %8502 = vmatprep.subr.bf16.mxu1 %v12077_v45  ;;  %v12355_v45 = vcombine.high %v2051_v22, %v2055_v13  ;;  %v1872_v50 = vld [vmem:[#allocation11 + $0x19b8] sm:$0xff] }
 0x5a5   :  { %v12930_v12 = vld [vmem:[#allocation14 + $0x40] ss:$16 sps:$4 sm:$0xff]  }
 0x5a6   :  { %8239 = vmatpush1.bf16.msra.mxu0 %v12306_v43  ;;  %v1832_v43 = vld [vmem:[#allocation11 + $0x1878] sm:$0xff] }
 0x5a7   :  { %8503 = vmatpush1.bf16.msra.mxu1 %v12076_v40  ;;  %8240 = vmatprep.subr.bf16.mxu0 %v12315_v14  ;;  %v12354_v40 = vcombine.low %v2051_v22, %v2055_v13  ;;  %v12124_v14 = vcombine.low %v1820_v8, %v1824_v44  ;;  %v12133_v47 = vcombine.high %v1828_v42, %v1832_v43  ;;  %v1880_v22 = vld [vmem:[#allocation11 + $0x19f8] sm:$0xff] }
 0x5a8   :  { %8504 = vmatprep.subr.bf16.mxu1 %v12085_v62  ;;  %v12363_v62 = vcombine.high %v2059_v16, %v2063_v30  ;;  %v12933_v13 = vld [vmem:[#allocation14 + $0x60] ss:$16 sps:$4 sm:$0xff]   ;;  %v12172_v8 = vcombine.low %v1868_v6, %v1872_v50  ;;  %v12938_v44 = vld [vmem:[#allocation14 + $0x84] ss:$16 sps:$4 sm:$0xff]  }
 0x5aa   :  { %8241 = vmatpush1.bf16.msra.mxu0 %v12314_v37  ;;  %v1840_v37 = vld [vmem:[#allocation11 + $0x18b8] sm:$0xff] }
 0x5ab   :  { %8505 = vmatpush1.bf16.msra.mxu1 %v12084_v36  ;;  %8242 = vmatprep.subr.bf16.mxu0 %v12323_v38  ;;  %v12362_v36 = vcombine.low %v2059_v16, %v2063_v30  ;;  %v12132_v38 = vcombine.low %v1828_v42, %v1832_v43  ;;  %v12141_v63 = vcombine.high %v1836_v3, %v1840_v37  ;;  %v12941_v30 = vld [vmem:[#allocation14 + $0xa4] ss:$16 sps:$4 sm:$0xff]  }
 0x5ac   :  { %8506 = vmatprep.subr.bf16.mxu1 %v12093_v46  ;;  %v12371_v46 = vcombine.high %v2067_v48, %v2071_v10  ;;  %v1892_v43 = vld [vmem:[#allocation11 + $0x1a58] sm:$0xff] }
 0x5ad   :  { %v1900_v10 = vld [vmem:[#allocation11 + $0x1a98] sm:$0xff] }
 0x5ae   :  { %8243 = vmatpush1.bf16.msra.mxu0 %v12322_v59  ;;  %v12140_v59 = vcombine.low %v1836_v3, %v1840_v37  ;;  %v1904_v3 = vld [vmem:[#allocation11 + $0x1ab8] sm:$0xff] }
 0x5af   :  { %8507 = vmatpush1.bf16.msra.mxu1 %v12092_v17  ;;  %8244 = vmatprep.subr.bf16.mxu0 %v12331_v18  ;;  %v12926_v17 = vld [vmem:[#allocation14 + $0x4] ss:$16 sps:$4 sm:$0xff]   ;;  %v12149_v18 = vcombine.high %v1844_v52, %v1848_v32  ;;  %v12942_v37 = vld [vmem:[#allocation14 + $0xc0] ss:$16 sps:$4 sm:$0xff]  }
 0x5b0   :  { %8508 = vmatprep.subr.bf16.mxu1 %v12101_v35  ;;  %v1856_v35 = vld [vmem:[#allocation11 + $0x1938] sm:$0xff] }
 0x5b2   :  { %8245 = vmatpush1.bf16.msra.mxu0 %v12330_v24  ;;  %v1864_v24 = vld [vmem:[#allocation11 + $0x1978] sm:$0xff] }
 0x5b3   :  { %8509 = vmatpush1.bf16.msra.mxu1 %v12100_v34  ;;  %8246 = vmatprep.subr.bf16.mxu0 %v12339_v51  ;;  %v12927_v34 = vld [vmem:[#allocation14 + $0x20] ss:$16 sps:$4 sm:$0xff]   ;;  %v12165_v60 = vcombine.high %v1860_v4, %v1864_v24 }
 0x5b4   :  { %8510 = vmatprep.subr.bf16.mxu1 %v12109_v41  ;;  %v12932_v41 = vld [vmem:[#allocation14 + $0x44] ss:$16 sps:$4 sm:$0xff]  }
 0x5b6   :  { %8247 = vmatpush1.bf16.msra.mxu0 %v12338_v53  ;;  %v12164_v53 = vcombine.low %v1860_v4, %v1864_v24  ;;  %v1928_v4 = vld [vmem:[#allocation11 + $0x1b78] sm:$0xff] }
 0x5b7   :  { %8511 = vmatpush1.bf16.msra.mxu1 %v12108_v28  ;;  %8248 = vmatprep.subr.bf16.mxu0 %v12347_v23  ;;  %v12935_v28 = vld [vmem:[#allocation14 + $0x64] ss:$16 sps:$4 sm:$0xff]   ;;  %v12173_v23 = vcombine.high %v1868_v6, %v1872_v50  ;;  %v12951_v24 = vld [vmem:[#allocation14 + $0x120] ss:$16 sps:$4 sm:$0xff]  }
 0x5b8   :  { %8512 = vmatprep.subr.bf16.mxu1 %v12117_v7  ;;  %v1876_v7 = vld [vmem:[#allocation11 + $0x19d8] sm:$0xff] }
 0x5b9   :  { %v12180_v16 = vcombine.low %v1876_v7, %v1880_v22  ;;  %v1936_v6 = vld [vmem:[#allocation11 + $0x1bb8] sm:$0xff] }
 0x5ba   :  { %8249 = vmatpush1.bf16.msra.mxu0 %v12346_v29  ;;  %v12181_v29 = vcombine.high %v1876_v7, %v1880_v22  ;;  %v12954_v50 = vld [vmem:[#allocation14 + $0x140] ss:$16 sps:$4 sm:$0xff]  }
 0x5bb   :  { %8513 = vmatpush1.bf16.msra.mxu1 %v12116_v21  ;;  %8250 = vmatprep.subr.bf16.mxu0 %v12355_v45  ;;  %v1884_v21 = vld [vmem:[#allocation11 + $0x1a18] sm:$0xff] }
 0x5bc   :  { %8525 = vmatprep.subr.bf16.mxu1 %v12125_v49  ;;  %v1888_v45 = vld [vmem:[#allocation11 + $0x1a38] sm:$0xff] }
 0x5bd   :  { %v12936_v49 = vld [vmem:[#allocation14 + $0x80] ss:$16 sps:$4 sm:$0xff]   ;;  %v12189_v42 = vcombine.high %v1884_v21, %v1888_v45 }
 0x5be   :  { %8251 = vmatpush1.bf16.msra.mxu0 %v12354_v40  ;;  %8515 = vmatmul.mubr.bf16.vlgmr.msra.gmra.mrb[20].mxu1 %v14153_v0  ;;  %v1852_v0 = vld [vmem:[#allocation11 + $0x1918] sm:$0xff] }
 0x5bf   :  { %8526 = vmatpush1.bf16.msra.mxu1 %v12124_v14  ;;  %8557 = vmatprep.mubr.bf16.mxu1 %v14261_v5  ;;  %v12148_v5 = vcombine.low %v1844_v52, %v1848_v32  ;;  %v12157_v11 = vcombine.high %v1852_v0, %v1856_v35  ;;  %v12156_v51 = vcombine.low %v1852_v0, %v1856_v35  ;;  %v1896_v40 = vld [vmem:[#allocation11 + $0x1a78] sm:$0xff] }
 0x5c0   :  { %8252 = vmatprep.subr.bf16.mxu0 %v12363_v62  ;;  %8527 = vmatprep.subr.bf16.mxu1 %v12133_v47  ;;  %v12939_v14 = vld [vmem:[#allocation14 + $0xa0] ss:$16 sps:$4 sm:$0xff]   ;;  %v12188_v62 = vcombine.low %v1884_v21, %v1888_v45  ;;  %v12944_v47 = vld [vmem:[#allocation14 + $0xc4] ss:$16 sps:$4 sm:$0xff]   ;;  %v12197_v48 = vcombine.high %v1892_v43, %v1896_v40 }
 0x5c1   :  { %v1912_v52 = vld [vmem:[#allocation11 + $0x1af8] sm:$0xff] }
 0x5c2   :  { %8253 = vmatpush1.bf16.msra.mxu0 %v12362_v36  ;;  %v12196_v36 = vcombine.low %v1892_v43, %v1896_v40  ;;  %v12945_v32 = vld [vmem:[#allocation14 + $0xe0] ss:$16 sps:$4 sm:$0xff]  }
 0x5c3   :  { %8528 = vmatpush1.bf16.msra.mxu1 %v12132_v38  ;;  %8254 = vmatprep.subr.bf16.mxu0 %v12371_v46  ;;  %v12947_v38 = vld [vmem:[#allocation14 + $0xe4] ss:$16 sps:$4 sm:$0xff]   ;;  %v12205_v46 = vcombine.high %v1900_v10, %v1904_v3  ;;  %v12948_v35 = vld [vmem:[#allocation14 + $0x100] ss:$16 sps:$4 sm:$0xff]  }
 0x5c4   :  { %8529 = vmatprep.subr.bf16.mxu1 %v12141_v63  ;;  %v1908_v63 = vld [vmem:[#allocation11 + $0x1ad8] sm:$0xff] }
 0x5c5   :  { %v1920_v0 = vld [vmem:[#allocation11 + $0x1b38] sm:$0xff] }
 0x5c6   :  { %8255 = vmatpush1.bf16.msra.mxu0 %v12370_v25  ;;  %v12204_v25 = vcombine.low %v1900_v10, %v1904_v3  ;;  %v1944_v7 = vld [vmem:[#allocation11 + $0x1bf8] sm:$0xff] }
 0x5c7   :  { %8530 = vmatpush1.bf16.msra.mxu1 %v12140_v59  ;;  %10225 = vmatprep.subr.bf16.mxu0 %v12926_v17  ;;  %v12950_v59 = vld [vmem:[#allocation14 + $0x104] ss:$16 sps:$4 sm:$0xff]   ;;  %v12213_v17 = vcombine.high %v1908_v63, %v1912_v52  ;;  %v12957_v22 = vld [vmem:[#allocation14 + $0x160] ss:$16 sps:$4 sm:$0xff]  }
 0x5c8   :  { %8531 = vmatprep.subr.bf16.mxu1 %v12149_v18  ;;  %v1916_v18 = vld [vmem:[#allocation11 + $0x1b18] sm:$0xff] }
 0x5c9   :  { %8257 = vmatmul.mubr.bf16.vlgmr.msra.gmra.mrb[24].mxu0 %v14228_v27  ;;  %v1952_v21 = vld [vmem:[#allocation11 + $0x1c38] sm:$0xff] }
 0x5ca   :  { %10226 = vmatpush1.bf16.msra.mxu0 %v12924_v1  ;;  %10257 = vmatprep.mubr.bf16.mxu0 %v14322_v15  ;;  %v12212_v1 = vcombine.low %v1908_v63, %v1912_v52  ;;  %v12960_v45 = vld [vmem:[#allocation14 + $0x180] ss:$16 sps:$4 sm:$0xff]  }
 0x5cb   :  { %8532 = vmatpush1.bf16.msra.mxu1 %v12148_v5  ;;  %10227 = vmatprep.subr.bf16.mxu0 %v12929_v56  ;;  %v12953_v5 = vld [vmem:[#allocation14 + $0x124] ss:$16 sps:$4 sm:$0xff]   ;;  %v12221_v56 = vcombine.high %v1916_v18, %v1920_v0  ;;  %v12963_v40 = vld [vmem:[#allocation14 + $0x1a0] ss:$16 sps:$4 sm:$0xff]  }
 0x5cc   :  { %8533 = vmatprep.subr.bf16.mxu1 %v12157_v11  ;;  %v1924_v11 = vld [vmem:[#allocation11 + $0x1b58] sm:$0xff] }
 0x5cd   :  { %v1960_v43 = vld [vmem:[#allocation11 + $0x1c78] sm:$0xff] }
 0x5ce   :  { %10228 = vmatpush1.bf16.msra.mxu0 %v12927_v34  ;;  %v12220_v34 = vcombine.low %v1916_v18, %v1920_v0  ;;  %v1968_v10 = vld [vmem:[#allocation11 + $0x1cb8] sm:$0xff] }
 0x5cf   :  { %8534 = vmatpush1.bf16.msra.mxu1 %v12156_v51  ;;  %10229 = vmatprep.subr.bf16.mxu0 %v12932_v41  ;;  %v12956_v51 = vld [vmem:[#allocation14 + $0x144] ss:$16 sps:$4 sm:$0xff]   ;;  %v12229_v41 = vcombine.high %v1924_v11, %v1928_v4  ;;  %v12966_v3 = vld [vmem:[#allocation14 + $0x1c0] ss:$16 sps:$4 sm:$0xff]  }
 0x5d0   :  { %8535 = vmatprep.subr.bf16.mxu1 %v12165_v60  ;;  %v1932_v60 = vld [vmem:[#allocation11 + $0x1b98] sm:$0xff] }
 0x5d1   :  { %v1976_v63 = vld [vmem:[#allocation11 + $0x1cf8] sm:$0xff] }
 0x5d2   :  { %10230 = vmatpush1.bf16.msra.mxu0 %v12930_v12  ;;  %v12228_v12 = vcombine.low %v1924_v11, %v1928_v4  ;;  %v12969_v52 = vld [vmem:[#allocation14 + $0x1e0] ss:$16 sps:$4 sm:$0xff]   ;;  %v12977_v0 = vld [vmem:[#allocation14 + $0x224] ss:$16 sps:$4 sm:$0xff]  }
 0x5d3   :  { %8536 = vmatpush1.bf16.msra.mxu1 %v12164_v53  ;;  %10231 = vmatprep.subr.bf16.mxu0 %v12935_v28  ;;  %v12959_v53 = vld [vmem:[#allocation14 + $0x164] ss:$16 sps:$4 sm:$0xff]   ;;  %v12237_v28 = vcombine.high %v1932_v60, %v1936_v6  ;;  %v12972_v18 = vld [vmem:[#allocation14 + $0x200] ss:$16 sps:$4 sm:$0xff]  }
 0x5d4   :  { %8537 = vmatprep.subr.bf16.mxu1 %v12173_v23  ;;  %v1940_v23 = vld [vmem:[#allocation11 + $0x1bd8] sm:$0xff] }
 0x5d5   :  { %v12980_v4 = vld [vmem:[#allocation14 + $0x244] ss:$16 sps:$4 sm:$0xff]  }
 0x5d6   :  { %10232 = vmatpush1.bf16.msra.mxu0 %v12933_v13  ;;  %v12236_v13 = vcombine.low %v1932_v60, %v1936_v6  ;;  %v12983_v6 = vld [vmem:[#allocation14 + $0x264] ss:$16 sps:$4 sm:$0xff]  }
 0x5d7   :  { %8538 = vmatpush1.bf16.msra.mxu1 %v12172_v8  ;;  %10233 = vmatprep.subr.bf16.mxu0 %v12938_v44  ;;  %v12962_v8 = vld [vmem:[#allocation14 + $0x184] ss:$16 sps:$4 sm:$0xff]   ;;  %v12245_v44 = vcombine.high %v1940_v23, %v1944_v7 }
 0x5d8   :  { %8539 = vmatprep.subr.bf16.mxu1 %v12181_v29  ;;  %v1948_v29 = vld [vmem:[#allocation11 + $0x1c18] sm:$0xff] }
 0x5da   :  { %10234 = vmatpush1.bf16.msra.mxu0 %v12936_v49  ;;  %v12244_v49 = vcombine.low %v1940_v23, %v1944_v7  ;;  %v12986_v7 = vld [vmem:[#allocation14 + $0x284] ss:$16 sps:$4 sm:$0xff]  }
 0x5db   :  { %8540 = vmatpush1.bf16.msra.mxu1 %v12180_v16  ;;  %10235 = vmatprep.subr.bf16.mxu0 %v12941_v30  ;;  %v12965_v16 = vld [vmem:[#allocation14 + $0x1a4] ss:$16 sps:$4 sm:$0xff]   ;;  %v12253_v30 = vcombine.high %v1948_v29, %v1952_v21 }
 0x5dc   :  { %8541 = vmatprep.subr.bf16.mxu1 %v12189_v42  ;;  %v1956_v42 = vld [vmem:[#allocation11 + $0x1c58] sm:$0xff] }
 0x5de   :  { %10236 = vmatpush1.bf16.msra.mxu0 %v12939_v14  ;;  %v12252_v14 = vcombine.low %v1948_v29, %v1952_v21  ;;  %v12989_v21 = vld [vmem:[#allocation14 + $0x2a4] ss:$16 sps:$4 sm:$0xff]  }
 0x5df   :  { %8542 = vmatpush1.bf16.msra.mxu1 %v12188_v62  ;;  %10237 = vmatprep.subr.bf16.mxu0 %v12944_v47  ;;  %v12968_v62 = vld [vmem:[#allocation14 + $0x1c4] ss:$16 sps:$4 sm:$0xff]   ;;  %v12261_v47 = vcombine.high %v1956_v42, %v1960_v43 }
 0x5e0   :  { %8543 = vmatprep.subr.bf16.mxu1 %v12197_v48  ;;  %v1964_v48 = vld [vmem:[#allocation11 + $0x1c98] sm:$0xff] }
 0x5e2   :  { %10238 = vmatpush1.bf16.msra.mxu0 %v12942_v37  ;;  %v12260_v37 = vcombine.low %v1956_v42, %v1960_v43  ;;  %v12992_v43 = vld [vmem:[#allocation14 + $0x2c4] ss:$16 sps:$4 sm:$0xff]  }
 0x5e3   :  { %8544 = vmatpush1.bf16.msra.mxu1 %v12196_v36  ;;  %10239 = vmatprep.subr.bf16.mxu0 %v12947_v38  ;;  %v12971_v36 = vld [vmem:[#allocation14 + $0x1e4] ss:$16 sps:$4 sm:$0xff]   ;;  %v12269_v38 = vcombine.high %v1964_v48, %v1968_v10 }
 0x5e4   :  { %8545 = vmatprep.subr.bf16.mxu1 %v12205_v46  ;;  %v1972_v46 = vld [vmem:[#allocation11 + $0x1cd8] sm:$0xff] }
 0x5e6   :  { %10240 = vmatpush1.bf16.msra.mxu0 %v12945_v32  ;;  %v12268_v32 = vcombine.low %v1964_v48, %v1968_v10  ;;  %v12995_v10 = vld [vmem:[#allocation14 + $0x2e4] ss:$16 sps:$4 sm:$0xff]  }
 0x5e7   :  { %8546 = vmatpush1.bf16.msra.mxu1 %v12204_v25  ;;  %10241 = vmatprep.subr.bf16.mxu0 %v12950_v59  ;;  %v12974_v25 = vld [vmem:[#allocation14 + $0x204] ss:$16 sps:$4 sm:$0xff]  }
 0x5e8   :  { %8547 = vmatprep.subr.bf16.mxu1 %v12213_v17  ;;  %v1980_v59 = vld [vmem:[#allocation11 + $0x1d18] sm:$0xff] }
 0x5e9   :  { %v1984_v17 = vld [vmem:[#allocation11 + $0x1d38] sm:$0xff] }
 0x5ea   :  { %10242 = vmatpush1.bf16.msra.mxu0 %v12948_v35  ;;  %v12285_v35 = vcombine.high %v1980_v59, %v1984_v17  ;;  %v12284_v11 = vcombine.low %v1980_v59, %v1984_v17  ;;  %v13001_v17 = vld [vmem:[#allocation14 + $0x324] ss:$16 sps:$4 sm:$0xff]  }
 0x5eb   :  { %8548 = vmatpush1.bf16.msra.mxu1 %v12212_v1  ;;  %10243 = vmatprep.subr.bf16.mxu0 %v12953_v5  ;;  %v1988_v1 = vld [vmem:[#allocation11 + $0x1d58] sm:$0xff] }
 0x5ec   :  { %8549 = vmatprep.subr.bf16.mxu1 %v12221_v56  ;;  %v1992_v5 = vld [vmem:[#allocation11 + $0x1d78] sm:$0xff] }
 0x5ed   :  { %v12975_v56 = vld [vmem:[#allocation14 + $0x220] ss:$16 sps:$4 sm:$0xff]   ;;  %v12292_v60 = vcombine.low %v1988_v1, %v1992_v5 }
 0x5ee   :  { %10244 = vmatpush1.bf16.msra.mxu0 %v12951_v24  ;;  %v12293_v24 = vcombine.high %v1988_v1, %v1992_v5  ;;  %v13004_v5 = vld [vmem:[#allocation14 + $0x344] ss:$16 sps:$4 sm:$0xff]  }
 0x5ef   :  { %8550 = vmatpush1.bf16.msra.mxu1 %v12220_v34  ;;  %10245 = vmatprep.subr.bf16.mxu0 %v12956_v51  ;;  %v1996_v34 = vld [vmem:[#allocation11 + $0x1d98] sm:$0xff] }
 0x5f0   :  { %8551 = vmatprep.subr.bf16.mxu1 %v12229_v41  ;;  %v2000_v51 = vld [vmem:[#allocation11 + $0x1db8] sm:$0xff] }
 0x5f1   :  { %v12978_v41 = vld [vmem:[#allocation14 + $0x240] ss:$16 sps:$4 sm:$0xff]   ;;  %v12300_v23 = vcombine.low %v1996_v34, %v2000_v51 }
 0x5f2   :  { %10246 = vmatpush1.bf16.msra.mxu0 %v12954_v50  ;;  %v12301_v50 = vcombine.high %v1996_v34, %v2000_v51  ;;  %v13007_v51 = vld [vmem:[#allocation14 + $0x364] ss:$16 sps:$4 sm:$0xff]  }
 0x5f3   :  { %8552 = vmatpush1.bf16.msra.mxu1 %v12228_v12  ;;  %10247 = vmatprep.subr.bf16.mxu0 %v12959_v53  ;;  %v2004_v12 = vld [vmem:[#allocation11 + $0x1dd8] sm:$0xff] }
 0x5f4   :  { %8553 = vmatprep.subr.bf16.mxu1 %v12237_v28  ;;  %v2008_v53 = vld [vmem:[#allocation11 + $0x1df8] sm:$0xff] }
 0x5f5   :  { %v12981_v28 = vld [vmem:[#allocation14 + $0x260] ss:$16 sps:$4 sm:$0xff]   ;;  %v12308_v29 = vcombine.low %v2004_v12, %v2008_v53 }
 0x5f6   :  { %10248 = vmatpush1.bf16.msra.mxu0 %v12957_v22  ;;  %v12309_v22 = vcombine.high %v2004_v12, %v2008_v53  ;;  %v13010_v53 = vld [vmem:[#allocation14 + $0x384] ss:$16 sps:$4 sm:$0xff]  }
 0x5f7   :  { %8554 = vmatpush1.bf16.msra.mxu1 %v12236_v13  ;;  %10249 = vmatprep.subr.bf16.mxu0 %v12962_v8  ;;  %v2012_v13 = vld [vmem:[#allocation11 + $0x1e18] sm:$0xff] }
 0x5f8   :  { %8555 = vmatprep.subr.bf16.mxu1 %v12245_v44  ;;  %v2016_v8 = vld [vmem:[#allocation11 + $0x1e38] sm:$0xff] }
 0x5f9   :  { %v12984_v44 = vld [vmem:[#allocation14 + $0x280] ss:$16 sps:$4 sm:$0xff]   ;;  %v12316_v42 = vcombine.low %v2012_v13, %v2016_v8 }
 0x5fa   :  { %10250 = vmatpush1.bf16.msra.mxu0 %v12960_v45  ;;  %v12317_v45 = vcombine.high %v2012_v13, %v2016_v8  ;;  %v13016_v13 = vld [vmem:[#allocation14 + $0xc] ss:$16 sps:$4 sm:$0xff]   ;;  %v13011_v8 = vld [vmem:[#allocation14 + $0x3a0] ss:$16 sps:$4 sm:$0xff]  }
 0x5fb   :  { %8556 = vmatpush1.bf16.msra.mxu1 %v12244_v49  ;;  %10251 = vmatprep.subr.bf16.mxu0 %v12965_v16  ;;  %v2020_v49 = vld [vmem:[#allocation11 + $0x1e58] sm:$0xff] }
 0x5fc   :  { %8568 = vmatprep.subr.bf16.mxu1 %v12253_v30  ;;  %v2024_v16 = vld [vmem:[#allocation11 + $0x1e78] sm:$0xff] }
 0x5fd   :  { %v12987_v30 = vld [vmem:[#allocation14 + $0x2a0] ss:$16 sps:$4 sm:$0xff]   ;;  %v12324_v48 = vcombine.low %v2020_v49, %v2024_v16 }
 0x5fe   :  { %8558 = vmatmul.mubr.bf16.vlgmr.msra.gmra.mrb[20].mxu1 %v14259_v26  ;;  %10252 = vmatpush1.bf16.msra.mxu0 %v12963_v40  ;;  %v12277_v26 = vcombine.high %v1972_v46, %v1976_v63  ;;  %v12325_v40 = vcombine.high %v2020_v49, %v2024_v16  ;;  %v13020_v49 = vld [vmem:[#allocation14 + $0x28] ss:$16 sps:$4 sm:$0xff]   ;;  %v13025_v16 = vld [vmem:[#allocation14 + $0x3e4] ss:$16 sps:$4 sm:$0xff]  }
 0x5ff   :  { %8569 = vmatpush1.bf16.msra.mxu1 %v12252_v14  ;;  %8600 = vmatprep.mubr.bf16.mxu1 %v14232_v9  ;;  %v12276_v9 = vcombine.low %v1972_v46, %v1976_v63  ;;  %v2028_v14 = vld [vmem:[#allocation11 + $0x1e98] sm:$0xff] }
 0x600   :  { %10253 = vmatprep.subr.bf16.mxu0 %v12968_v62  ;;  %8570 = vmatprep.subr.bf16.mxu1 %v12261_v47  ;;  %v2032_v62 = vld [vmem:[#allocation11 + $0x1eb8] sm:$0xff] }
 0x601   :  { %v12990_v47 = vld [vmem:[#allocation14 + $0x2c0] ss:$16 sps:$4 sm:$0xff]   ;;  %v12332_v46 = vcombine.low %v2028_v14, %v2032_v62  ;;  %v12998_v63 = vld [vmem:[#allocation14 + $0x304] ss:$16 sps:$4 sm:$0xff]  }
 0x602   :  { %10254 = vmatpush1.bf16.msra.mxu0 %v12966_v3  ;;  %v12333_v3 = vcombine.high %v2028_v14, %v2032_v62  ;;  %v13031_v14 = vld [vmem:[#allocation14 + $0x6c] ss:$16 sps:$4 sm:$0xff]   ;;  %v13029_v62 = vld [vmem:[#allocation14 + $0x68] ss:$16 sps:$4 sm:$0xff]  }
 0x603   :  { %8571 = vmatpush1.bf16.msra.mxu1 %v12260_v37  ;;  %10255 = vmatprep.subr.bf16.mxu0 %v12971_v36  ;;  %v2036_v37 = vld [vmem:[#allocation11 + $0x1ed8] sm:$0xff] }
 0x604   :  { %8572 = vmatprep.subr.bf16.mxu1 %v12269_v38  ;;  %v2040_v36 = vld [vmem:[#allocation11 + $0x1ef8] sm:$0xff] }
 0x605   :  { %v12993_v38 = vld [vmem:[#allocation14 + $0x2e0] ss:$16 sps:$4 sm:$0xff]   ;;  %v12340_v59 = vcombine.low %v2036_v37, %v2040_v36 }
 0x606   :  { %10256 = vmatpush1.bf16.msra.mxu0 %v12969_v52  ;;  %v12341_v52 = vcombine.high %v2036_v37, %v2040_v36  ;;  %v13037_v37 = vld [vmem:[#allocation14 + $0xac] ss:$16 sps:$4 sm:$0xff]   ;;  %v13065_v36 = vld [vmem:[#allocation14 + $0x440] ss:$16 sps:$4 sm:$0xff]  }
 0x607   :  { %8573 = vmatpush1.bf16.msra.mxu1 %v12268_v32  ;;  %10268 = vmatprep.subr.bf16.mxu0 %v12974_v25  ;;  %v2044_v32 = vld [vmem:[#allocation11 + $0x1f18] sm:$0xff] }
 0x608   :  { %8574 = vmatprep.subr.bf16.mxu1 %v12277_v26  ;;  %v2048_v25 = vld [vmem:[#allocation11 + $0x1f38] sm:$0xff] }
 0x609   :  { %10258 = vmatmul.mubr.bf16.vlgmr.msra.gmra.mrb[28].mxu0 %v14318_v33  ;;  %v12996_v26 = vld [vmem:[#allocation14 + $0x300] ss:$16 sps:$4 sm:$0xff]   ;;  %v12348_v1 = vcombine.low %v2044_v32, %v2048_v25 }
 0x60a   :  { %10269 = vmatpush1.bf16.msra.mxu0 %v12972_v18  ;;  %10300 = vmatprep.mubr.bf16.mxu0 %v14341_v39  ;;  %v12349_v18 = vcombine.high %v2044_v32, %v2048_v25  ;;  %v13038_v32 = vld [vmem:[#allocation14 + $0xc8] ss:$16 sps:$4 sm:$0xff]   ;;  %v13079_v25 = vld [vmem:[#allocation14 + $0x484] ss:$16 sps:$4 sm:$0xff]  }
 0x60b   :  { %8575 = vmatpush1.bf16.msra.mxu1 %v12276_v9  ;;  %10270 = vmatprep.subr.bf16.mxu0 %v12977_v0  ;;  %v2052_v9 = vld [vmem:[#allocation11 + $0x1f58] sm:$0xff] }
 0x60c   :  { %8576 = vmatprep.subr.bf16.mxu1 %v12285_v35  ;;  %v2056_v0 = vld [vmem:[#allocation11 + $0x1f78] sm:$0xff] }
 0x60d   :  { %v12999_v35 = vld [vmem:[#allocation14 + $0x320] ss:$16 sps:$4 sm:$0xff]   ;;  %v12356_v34 = vcombine.low %v2052_v9, %v2056_v0 }
 0x60e   :  { %10271 = vmatpush1.bf16.msra.mxu0 %v12975_v56  ;;  %v12357_v56 = vcombine.high %v2052_v9, %v2056_v0  ;;  %v13046_v9 = vld [vmem:[#allocation14 + $0x10c] ss:$16 sps:$4 sm:$0xff]   ;;  %v13083_v0 = vld [vmem:[#allocation14 + $0x4a0] ss:$16 sps:$4 sm:$0xff]  }
 0x60f   :  { %8577 = vmatpush1.bf16.msra.mxu1 %v12284_v11  ;;  %10272 = vmatprep.subr.bf16.mxu0 %v12980_v4  ;;  %v2060_v11 = vld [vmem:[#allocation11 + $0x1f98] sm:$0xff] }
 0x610   :  { %8578 = vmatprep.subr.bf16.mxu1 %v12293_v24  ;;  %v2064_v4 = vld [vmem:[#allocation11 + $0x1fb8] sm:$0xff] }
 0x611   :  { %v13002_v24 = vld [vmem:[#allocation14 + $0x340] ss:$16 sps:$4 sm:$0xff]   ;;  %v12364_v12 = vcombine.low %v2060_v11, %v2064_v4 }
 0x612   :  { %10273 = vmatpush1.bf16.msra.mxu0 %v12978_v41  ;;  %v12365_v41 = vcombine.high %v2060_v11, %v2064_v4  ;;  %v13047_v11 = vld [vmem:[#allocation14 + $0x128] ss:$16 sps:$4 sm:$0xff]   ;;  %v13097_v4 = vld [vmem:[#allocation14 + $0x4e4] ss:$16 sps:$4 sm:$0xff]  }
 0x613   :  { %8579 = vmatpush1.bf16.msra.mxu1 %v12292_v60  ;;  %10274 = vmatprep.subr.bf16.mxu0 %v12983_v6  ;;  %v2068_v60 = vld [vmem:[#allocation11 + $0x1fd8] sm:$0xff] }
 0x614   :  { %8580 = vmatprep.subr.bf16.mxu1 %v12301_v50  ;;  %v2072_v6 = vld [vmem:[#allocation11 + $0x1ff8] sm:$0xff] }
 0x615   :  { %v13005_v50 = vld [vmem:[#allocation14 + $0x360] ss:$16 sps:$4 sm:$0xff]  }
 0x616   :  { %10275 = vmatpush1.bf16.msra.mxu0 %v12981_v28  ;;  %v12373_v28 = vcombine.high %v2068_v60, %v2072_v6 }
 0x617   :  { %8581 = vmatpush1.bf16.msra.mxu1 %v12300_v23  ;;  %10276 = vmatprep.subr.bf16.mxu0 %v12986_v7  ;;  %v13008_v23 = vld [vmem:[#allocation14 + $0x380] ss:$16 sps:$4 sm:$0xff]   ;;  %v12372_v7 = vcombine.low %v2068_v60, %v2072_v6  ;;  %v13058_v60 = vld [vmem:[#allocation14 + $0x16c] ss:$16 sps:$4 sm:$0xff]  }
 0x618   :  { %8582 = vmatprep.subr.bf16.mxu1 %v12309_v22  ;;  %v13013_v22 = vld [vmem:[#allocation14 + $0x3a4] ss:$16 sps:$4 sm:$0xff]   ;;  %v13101_v6 = vld [vmem:[#allocation14 + $0x500] ss:$16 sps:$4 sm:$0xff]  }
 0x61a   :  { %10277 = vmatpush1.bf16.msra.mxu0 %v12984_v44  ;;  %v13014_v44 = vld [vmem:[#allocation14 + $0x8] ss:$16 sps:$4 sm:$0xff]  }
 0x61b   :  { %8583 = vmatpush1.bf16.msra.mxu1 %v12308_v29  ;;  %10278 = vmatprep.subr.bf16.mxu0 %v12989_v21  ;;  %v13019_v29 = vld [vmem:[#allocation14 + $0x3c4] ss:$16 sps:$4 sm:$0xff]   ;;  %v13022_v21 = vld [vmem:[#allocation14 + $0x2c] ss:$16 sps:$4 sm:$0xff]  }
 0x61c   :  { %8584 = vmatprep.subr.bf16.mxu1 %v12317_v45  ;;  %v13017_v45 = vld [vmem:[#allocation14 + $0x3c0] ss:$16 sps:$4 sm:$0xff]  }
 0x61e   :  { %10279 = vmatpush1.bf16.msra.mxu0 %v12987_v30  ;;  %v13028_v30 = vld [vmem:[#allocation14 + $0x4c] ss:$16 sps:$4 sm:$0xff]  }
 0x61f   :  { %8585 = vmatpush1.bf16.msra.mxu1 %v12316_v42  ;;  %10280 = vmatprep.subr.bf16.mxu0 %v12992_v43  ;;  %v13023_v42 = vld [vmem:[#allocation14 + $0x3e0] ss:$16 sps:$4 sm:$0xff]   ;;  %v13026_v43 = vld [vmem:[#allocation14 + $0x48] ss:$16 sps:$4 sm:$0xff]  }
 0x620   :  { %8586 = vmatprep.subr.bf16.mxu1 %v12325_v40  ;;  %v13055_v40 = vld [vmem:[#allocation14 + $0x404] ss:$16 sps:$4 sm:$0xff]  }
 0x622   :  { %10281 = vmatpush1.bf16.msra.mxu0 %v12990_v47  ;;  %v13061_v47 = vld [vmem:[#allocation14 + $0x424] ss:$16 sps:$4 sm:$0xff]  }
 0x623   :  { %8587 = vmatpush1.bf16.msra.mxu1 %v12324_v48  ;;  %10282 = vmatprep.subr.bf16.mxu0 %v12995_v10  ;;  %v13059_v48 = vld [vmem:[#allocation14 + $0x420] ss:$16 sps:$4 sm:$0xff]   ;;  %v13032_v10 = vld [vmem:[#allocation14 + $0x88] ss:$16 sps:$4 sm:$0xff]  }
 0x624   :  { %8588 = vmatprep.subr.bf16.mxu1 %v12333_v3  ;;  %v13067_v3 = vld [vmem:[#allocation14 + $0x444] ss:$16 sps:$4 sm:$0xff]  }
 0x626   :  { %10283 = vmatpush1.bf16.msra.mxu0 %v12993_v38  ;;  %v13035_v38 = vld [vmem:[#allocation14 + $0xa8] ss:$16 sps:$4 sm:$0xff]  }
 0x627   :  { %8589 = vmatpush1.bf16.msra.mxu1 %v12332_v46  ;;  %10284 = vmatprep.subr.bf16.mxu0 %v12998_v63  ;;  %v13073_v46 = vld [vmem:[#allocation14 + $0x464] ss:$16 sps:$4 sm:$0xff]   ;;  %v13040_v63 = vld [vmem:[#allocation14 + $0xcc] ss:$16 sps:$4 sm:$0xff]  }
 0x628   :  { %8590 = vmatprep.subr.bf16.mxu1 %v12341_v52  ;;  %v13071_v52 = vld [vmem:[#allocation14 + $0x460] ss:$16 sps:$4 sm:$0xff]  }
 0x62a   :  { %10285 = vmatpush1.bf16.msra.mxu0 %v12996_v26  ;;  %v13043_v26 = vld [vmem:[#allocation14 + $0xec] ss:$16 sps:$4 sm:$0xff]  }
 0x62b   :  { %8591 = vmatpush1.bf16.msra.mxu1 %v12340_v59  ;;  %10286 = vmatprep.subr.bf16.mxu0 %v13001_v17  ;;  %v13077_v59 = vld [vmem:[#allocation14 + $0x480] ss:$16 sps:$4 sm:$0xff]   ;;  %v13041_v17 = vld [vmem:[#allocation14 + $0xe8] ss:$16 sps:$4 sm:$0xff]  }
 0x62c   :  { %8592 = vmatprep.subr.bf16.mxu1 %v12349_v18  ;;  %v13085_v18 = vld [vmem:[#allocation14 + $0x4a4] ss:$16 sps:$4 sm:$0xff]  }
 0x62e   :  { %10287 = vmatpush1.bf16.msra.mxu0 %v12999_v35  ;;  %v13044_v35 = vld [vmem:[#allocation14 + $0x108] ss:$16 sps:$4 sm:$0xff]  }
 0x62f   :  { %8593 = vmatpush1.bf16.msra.mxu1 %v12348_v1  ;;  %10288 = vmatprep.subr.bf16.mxu0 %v13004_v5  ;;  %v13091_v1 = vld [vmem:[#allocation14 + $0x4c4] ss:$16 sps:$4 sm:$0xff]   ;;  %v13049_v5 = vld [vmem:[#allocation14 + $0x12c] ss:$16 sps:$4 sm:$0xff]  }
 0x630   :  { %8594 = vmatprep.subr.bf16.mxu1 %v12357_v56  ;;  %v13089_v56 = vld [vmem:[#allocation14 + $0x4c0] ss:$16 sps:$4 sm:$0xff]  }
 0x632   :  { %10289 = vmatpush1.bf16.msra.mxu0 %v13002_v24  ;;  %v13052_v24 = vld [vmem:[#allocation14 + $0x14c] ss:$16 sps:$4 sm:$0xff]  }
 0x633   :  { %8595 = vmatpush1.bf16.msra.mxu1 %v12356_v34  ;;  %10290 = vmatprep.subr.bf16.mxu0 %v13007_v51  ;;  %v13095_v34 = vld [vmem:[#allocation14 + $0x4e0] ss:$16 sps:$4 sm:$0xff]   ;;  %v13050_v51 = vld [vmem:[#allocation14 + $0x148] ss:$16 sps:$4 sm:$0xff]  }
 0x634   :  { %8596 = vmatprep.subr.bf16.mxu1 %v12365_v41  ;;  %v13103_v41 = vld [vmem:[#allocation14 + $0x504] ss:$16 sps:$4 sm:$0xff]  }
 0x636   :  { %10291 = vmatpush1.bf16.msra.mxu0 %v13005_v50  ;;  %v13056_v50 = vld [vmem:[#allocation14 + $0x168] ss:$16 sps:$4 sm:$0xff]  }
 0x637   :  { %8597 = vmatpush1.bf16.msra.mxu1 %v12364_v12  ;;  %10292 = vmatprep.subr.bf16.mxu0 %v13010_v53  ;;  %v13109_v12 = vld [vmem:[#allocation14 + $0x524] ss:$16 sps:$4 sm:$0xff]   ;;  %v13064_v53 = vld [vmem:[#allocation14 + $0x18c] ss:$16 sps:$4 sm:$0xff]  }
 0x638   :  { %8598 = vmatprep.subr.bf16.mxu1 %v12373_v28  ;;  %v13107_v28 = vld [vmem:[#allocation14 + $0x520] ss:$16 sps:$4 sm:$0xff]  }
 0x63a   :  { %10293 = vmatpush1.bf16.msra.mxu0 %v13008_v23  ;;  %v13062_v23 = vld [vmem:[#allocation14 + $0x188] ss:$16 sps:$4 sm:$0xff]  }
 0x63b   :  { %8599 = vmatpush1.bf16.msra.mxu1 %v12372_v7  ;;  %10294 = vmatprep.subr.bf16.mxu0 %v13013_v22  ;;  %v13115_v7 = vld [vmem:[#allocation14 + $0x544] ss:$16 sps:$4 sm:$0xff]   ;;  %v13070_v22 = vld [vmem:[#allocation14 + $0x1ac] ss:$16 sps:$4 sm:$0xff]  }
 0x63c   :  { %10397 = vmatprep.subr.bf16.mxu1 %v13016_v13  ;;  %v13113_v13 = vld [vmem:[#allocation14 + $0x540] ss:$16 sps:$4 sm:$0xff]  }
 0x63e   :  { %8601 = vmatmul.mubr.bf16.vlgmr.msra.gmra.mrb[20].mxu1 %v14228_v27  ;;  %10295 = vmatpush1.bf16.msra.mxu0 %v13011_v8  ;;  %v13053_v27 = vld [vmem:[#allocation14 + $0x400] ss:$16 sps:$4 sm:$0xff]   ;;  %v13068_v8 = vld [vmem:[#allocation14 + $0x1a8] ss:$16 sps:$4 sm:$0xff]  }
 0x63f   :  { %10398 = vmatpush1.bf16.msra.mxu1 %v13014_v44  ;;  %10429 = vmatprep.mubr.bf16.mxu1 %v14322_v15  ;;  %v13034_v15 = vld [vmem:[#allocation14 + $0x8c] ss:$16 sps:$4 sm:$0xff]   ;;  %v13121_v44 = vld [vmem:[#allocation14 + $0x564] ss:$16 sps:$4 sm:$0xff]  }
 0x640   :  { %10296 = vmatprep.subr.bf16.mxu0 %v13019_v29  ;;  %10399 = vmatprep.subr.bf16.mxu1 %v13022_v21  ;;  %v13076_v29 = vld [vmem:[#allocation14 + $0x1cc] ss:$16 sps:$4 sm:$0xff]   ;;  %v13119_v21 = vld [vmem:[#allocation14 + $0x560] ss:$16 sps:$4 sm:$0xff]  }
 0x642   :  { %10297 = vmatpush1.bf16.msra.mxu0 %v13017_v45  ;;  %v13074_v45 = vld [vmem:[#allocation14 + $0x1c8] ss:$16 sps:$4 sm:$0xff]  }
 0x643   :  { %10400 = vmatpush1.bf16.msra.mxu1 %v13020_v49  ;;  %10298 = vmatprep.subr.bf16.mxu0 %v13025_v16  ;;  %v13127_v49 = vld [vmem:[#allocation14 + $0x584] ss:$16 sps:$4 sm:$0xff]   ;;  %v13082_v16 = vld [vmem:[#allocation14 + $0x1ec] ss:$16 sps:$4 sm:$0xff]  }
 0x644   :  { %10401 = vmatprep.subr.bf16.mxu1 %v13028_v30  ;;  %v13125_v30 = vld [vmem:[#allocation14 + $0x580] ss:$16 sps:$4 sm:$0xff]  }
 0x646   :  { %10299 = vmatpush1.bf16.msra.mxu0 %v13023_v42  ;;  %v13080_v42 = vld [vmem:[#allocation14 + $0x1e8] ss:$16 sps:$4 sm:$0xff]  }
 0x647   :  { %10402 = vmatpush1.bf16.msra.mxu1 %v13026_v43  ;;  %10311 = vmatprep.subr.bf16.mxu0 %v13055_v40  ;;  %v13133_v43 = vld [vmem:[#allocation14 + $0x5a4] ss:$16 sps:$4 sm:$0xff]   ;;  %v13088_v40 = vld [vmem:[#allocation14 + $0x20c] ss:$16 sps:$4 sm:$0xff]  }
 0x648   :  { %10403 = vmatprep.subr.bf16.mxu1 %v13031_v14  ;;  %v13131_v14 = vld [vmem:[#allocation14 + $0x5a0] ss:$16 sps:$4 sm:$0xff]  }
 0x649   :  { %10301 = vmatmul.mubr.bf16.vlgmr.msra.gmra.mrb[28].mxu0 %v14337_v31 }
 0x64a   :  { %10312 = vmatpush1.bf16.msra.mxu0 %v13053_v27  ;;  %v13086_v27 = vld [vmem:[#allocation14 + $0x208] ss:$16 sps:$4 sm:$0xff]  }
 0x64b   :  { %10404 = vmatpush1.bf16.msra.mxu1 %v13029_v62  ;;  %10313 = vmatprep.subr.bf16.mxu0 %v13061_v47  ;;  %v13094_v62 = vld [vmem:[#allocation14 + $0x22c] ss:$16 sps:$4 sm:$0xff]   ;;  %v13139_v47 = vld [vmem:[#allocation14 + $0x5c4] ss:$16 sps:$4 sm:$0xff]  }
 0x64c   :  { %10405 = vmatprep.subr.bf16.mxu1 %v13034_v15  ;;  %v13137_v15 = vld [vmem:[#allocation14 + $0x5c0] ss:$16 sps:$4 sm:$0xff]  }
 0x64e   :  { %10314 = vmatpush1.bf16.msra.mxu0 %v13059_v48  ;;  %v13092_v48 = vld [vmem:[#allocation14 + $0x228] ss:$16 sps:$4 sm:$0xff]  }
 0x64f   :  { %10406 = vmatpush1.bf16.msra.mxu1 %v13032_v10  ;;  %10315 = vmatprep.subr.bf16.mxu0 %v13067_v3  ;;  %v13145_v10 = vld [vmem:[#allocation14 + $0x5e4] ss:$16 sps:$4 sm:$0xff]   ;;  %v13100_v3 = vld [vmem:[#allocation14 + $0x24c] ss:$16 sps:$4 sm:$0xff]  }
 0x650   :  { %10407 = vmatprep.subr.bf16.mxu1 %v13037_v37  ;;  %v13143_v37 = vld [vmem:[#allocation14 + $0x5e0] ss:$16 sps:$4 sm:$0xff]  }
 0x652   :  { %10316 = vmatpush1.bf16.msra.mxu0 %v13065_v36  ;;  %v13098_v36 = vld [vmem:[#allocation14 + $0x248] ss:$16 sps:$4 sm:$0xff]  }
 0x653   :  { %10408 = vmatpush1.bf16.msra.mxu1 %v13035_v38  ;;  %10317 = vmatprep.subr.bf16.mxu0 %v13073_v46  ;;  %v13190_v38 = vld [vmem:[#allocation14 + $0x604] ss:$16 sps:$4 sm:$0xff]   ;;  %v13106_v46 = vld [vmem:[#allocation14 + $0x26c] ss:$16 sps:$4 sm:$0xff]  }
 0x654   :  { %10409 = vmatprep.subr.bf16.mxu1 %v13040_v63  ;;  %v13112_v63 = vld [vmem:[#allocation14 + $0x28c] ss:$16 sps:$4 sm:$0xff]  }
 0x656   :  { %10318 = vmatpush1.bf16.msra.mxu0 %v13071_v52  ;;  %v13118_v52 = vld [vmem:[#allocation14 + $0x2ac] ss:$16 sps:$4 sm:$0xff]  }
 0x657   :  { %10410 = vmatpush1.bf16.msra.mxu1 %v13038_v32  ;;  %10319 = vmatprep.subr.bf16.mxu0 %v13079_v25  ;;  %v13116_v32 = vld [vmem:[#allocation14 + $0x2a8] ss:$16 sps:$4 sm:$0xff]   ;;  %v13124_v25 = vld [vmem:[#allocation14 + $0x2cc] ss:$16 sps:$4 sm:$0xff]  }
 0x658   :  { %10411 = vmatprep.subr.bf16.mxu1 %v13043_v26  ;;  %v13122_v26 = vld [vmem:[#allocation14 + $0x2c8] ss:$16 sps:$4 sm:$0xff]  }
 0x65a   :  { %10320 = vmatpush1.bf16.msra.mxu0 %v13077_v59  ;;  %v13130_v59 = vld [vmem:[#allocation14 + $0x2ec] ss:$16 sps:$4 sm:$0xff]  }
 0x65b   :  { %10412 = vmatpush1.bf16.msra.mxu1 %v13041_v17  ;;  %10321 = vmatprep.subr.bf16.mxu0 %v13085_v18  ;;  %v13128_v17 = vld [vmem:[#allocation14 + $0x2e8] ss:$16 sps:$4 sm:$0xff]   ;;  %v13136_v18 = vld [vmem:[#allocation14 + $0x30c] ss:$16 sps:$4 sm:$0xff]  }
 0x65c   :  { %10413 = vmatprep.subr.bf16.mxu1 %v13046_v9  ;;  %v14364_v9 = vld [vmem:[#allocation12] sm:$0xff] }
 0x65e   :  { %10322 = vmatpush1.bf16.msra.mxu0 %v13083_v0  ;;  %v2094_v0 = vrot.slane %v14364_v9, %v14061_v19 }
 0x65f   :  { %10414 = vmatpush1.bf16.msra.mxu1 %v13044_v35  ;;  %10323 = vmatprep.subr.bf16.mxu0 %v13091_v1  ;;  %v2098_v35 = vrot.slane %v14364_v9, %v14063_v20  ;;  %v13134_v1 = vld [vmem:[#allocation14 + $0x308] ss:$16 sps:$4 sm:$0xff]  }
 0x660   :  { %10415 = vmatprep.subr.bf16.mxu1 %v13049_v5 }
 0x662   :  { %10324 = vmatpush1.bf16.msra.mxu0 %v13089_v56  ;;  %v13142_v56 = vld [vmem:[#allocation14 + $0x32c] ss:$16 sps:$4 sm:$0xff]  }
 0x663   :  { %10416 = vmatpush1.bf16.msra.mxu1 %v13047_v11  ;;  %10325 = vmatprep.subr.bf16.mxu0 %v13097_v4 }
 0x664   :  { %10417 = vmatprep.subr.bf16.mxu1 %v13052_v24 }
 0x666   :  { %10326 = vmatpush1.bf16.msra.mxu0 %v13095_v34 }
 0x667   :  { %10418 = vmatpush1.bf16.msra.mxu1 %v13050_v51  ;;  %10327 = vmatprep.subr.bf16.mxu0 %v13103_v41 }
 0x668   :  { %10419 = vmatprep.subr.bf16.mxu1 %v13058_v60 }
 0x66a   :  { %10328 = vmatpush1.bf16.msra.mxu0 %v13101_v6  ;;  %v13140_v6 = vld [vmem:[#allocation14 + $0x328] ss:$16 sps:$4 sm:$0xff]  }
 0x66b   :  { %10420 = vmatpush1.bf16.msra.mxu1 %v13056_v50  ;;  %10329 = vmatprep.subr.bf16.mxu0 %v13109_v12  ;;  %v13148_v12 = vld [vmem:[#allocation14 + $0x34c] ss:$16 sps:$4 sm:$0xff]  }
 0x66c   :  { %10421 = vmatprep.subr.bf16.mxu1 %v13064_v53 }
 0x66e   :  { %10330 = vmatpush1.bf16.msra.mxu0 %v13107_v28 }
 0x66f   :  { %10422 = vmatpush1.bf16.msra.mxu1 %v13062_v23  ;;  %10331 = vmatprep.subr.bf16.mxu0 %v13115_v7  ;;  %v13146_v7 = vld [vmem:[#allocation14 + $0x348] ss:$16 sps:$4 sm:$0xff]  }
 0x670   :  { %10423 = vmatprep.subr.bf16.mxu1 %v13070_v22 }
 0x672   :  { %10332 = vmatpush1.bf16.msra.mxu0 %v13113_v13 }
 0x673   :  { %10424 = vmatpush1.bf16.msra.mxu1 %v13068_v8  ;;  %10333 = vmatprep.subr.bf16.mxu0 %v13121_v44  ;;  %v13151_v44 = vld [vmem:[#allocation14 + $0x36c] ss:$16 sps:$4 sm:$0xff]  }
 0x674   :  { %10425 = vmatprep.subr.bf16.mxu1 %v13076_v29 }
 0x676   :  { %10334 = vmatpush1.bf16.msra.mxu0 %v13119_v21  ;;  %v13188_v21 = vld [vmem:[#allocation14 + $0x600] ss:$16 sps:$4 sm:$0xff]  }
 0x677   :  { %10426 = vmatpush1.bf16.msra.mxu1 %v13074_v45  ;;  %10335 = vmatprep.subr.bf16.mxu0 %v13127_v49  ;;  %v13196_v45 = vld [vmem:[#allocation14 + $0x624] ss:$16 sps:$4 sm:$0xff]   ;;  %v13149_v49 = vld [vmem:[#allocation14 + $0x368] ss:$16 sps:$4 sm:$0xff]  }
 0x678   :  { %10427 = vmatprep.subr.bf16.mxu1 %v13082_v16  ;;  %v13154_v16 = vld [vmem:[#allocation14 + $0x38c] ss:$16 sps:$4 sm:$0xff]  }
 0x67a   :  { %10336 = vmatpush1.bf16.msra.mxu0 %v13125_v30  ;;  %v13194_v30 = vld [vmem:[#allocation14 + $0x620] ss:$16 sps:$4 sm:$0xff]  }
 0x67b   :  { %10428 = vmatpush1.bf16.msra.mxu1 %v13080_v42  ;;  %10337 = vmatprep.subr.bf16.mxu0 %v13133_v43  ;;  %v13202_v42 = vld [vmem:[#allocation14 + $0x644] ss:$16 sps:$4 sm:$0xff]   ;;  %v13152_v43 = vld [vmem:[#allocation14 + $0x388] ss:$16 sps:$4 sm:$0xff]  }
 0x67c   :  { %10440 = vmatprep.subr.bf16.mxu1 %v13088_v40  ;;  %v13157_v40 = vld [vmem:[#allocation14 + $0x3ac] ss:$16 sps:$4 sm:$0xff]  }
 0x67e   :  { %10430 = vmatmul.mubr.bf16.vlgmr.msra.gmra.mrb[24].mxu1 %v14318_v33  ;;  %10338 = vmatpush1.bf16.msra.mxu0 %v13131_v14  ;;  %v13104_v33 = vld [vmem:[#allocation14 + $0x268] ss:$16 sps:$4 sm:$0xff]   ;;  %v13200_v14 = vld [vmem:[#allocation14 + $0x640] ss:$16 sps:$4 sm:$0xff]  }
 0x67f   :  { %10441 = vmatpush1.bf16.msra.mxu1 %v13086_v27  ;;  %10472 = vmatprep.mubr.bf16.mxu1 %v14341_v39  ;;  %v13110_v39 = vld [vmem:[#allocation14 + $0x288] ss:$16 sps:$4 sm:$0xff]   ;;  %v13208_v27 = vld [vmem:[#allocation14 + $0x664] ss:$16 sps:$4 sm:$0xff]  }
 0x680   :  { %10442 = vmatprep.subr.bf16.mxu1 %v13094_v62  ;;  %10339 = vmatprep.subr.bf16.mxu0 %v13139_v47  ;;  %v13155_v62 = vld [vmem:[#allocation14 + $0x3a8] ss:$16 sps:$4 sm:$0xff]   ;;  %v13160_v47 = vld [vmem:[#allocation14 + $0x3cc] ss:$16 sps:$4 sm:$0xff]  }
 0x682   :  { %10340 = vmatpush1.bf16.msra.mxu0 %v13137_v15  ;;  %v13206_v15 = vld [vmem:[#allocation14 + $0x660] ss:$16 sps:$4 sm:$0xff]  }
 0x683   :  { %10443 = vmatpush1.bf16.msra.mxu1 %v13092_v48  ;;  %10341 = vmatprep.subr.bf16.mxu0 %v13145_v10  ;;  %v13214_v48 = vld [vmem:[#allocation14 + $0x684] ss:$16 sps:$4 sm:$0xff]   ;;  %v13158_v10 = vld [vmem:[#allocation14 + $0x3c8] ss:$16 sps:$4 sm:$0xff]  }
 0x684   :  { %10444 = vmatprep.subr.bf16.mxu1 %v13100_v3  ;;  %v13163_v3 = vld [vmem:[#allocation14 + $0x3ec] ss:$16 sps:$4 sm:$0xff]  }
 0x686   :  { %10342 = vmatpush1.bf16.msra.mxu0 %v13143_v37  ;;  %v13212_v37 = vld [vmem:[#allocation14 + $0x680] ss:$16 sps:$4 sm:$0xff]  }
 0x687   :  { %10445 = vmatpush1.bf16.msra.mxu1 %v13098_v36  ;;  %10354 = vmatprep.subr.bf16.mxu0 %v13190_v38  ;;  %v13220_v36 = vld [vmem:[#allocation14 + $0x6a4] ss:$16 sps:$4 sm:$0xff]   ;;  %v13161_v38 = vld [vmem:[#allocation14 + $0x3e8] ss:$16 sps:$4 sm:$0xff]  }
 0x688   :  { %10446 = vmatprep.subr.bf16.mxu1 %v13106_v46  ;;  %v13166_v46 = vld [vmem:[#allocation14 + $0x40c] ss:$16 sps:$4 sm:$0xff]  }
 0x68b   :  { %10447 = vmatpush1.bf16.msra.mxu1 %v13104_v33  ;;  %v13218_v33 = vld [vmem:[#allocation14 + $0x6a0] ss:$16 sps:$4 sm:$0xff]  }
 0x68c   :  { %10448 = vmatprep.subr.bf16.mxu1 %v13112_v63  ;;  %v13226_v63 = vld [vmem:[#allocation14 + $0x6c4] ss:$16 sps:$4 sm:$0xff]  }
 0x68f   :  { %10449 = vmatpush1.bf16.msra.mxu1 %v13110_v39  ;;  %v13164_v39 = vld [vmem:[#allocation14 + $0x408] ss:$16 sps:$4 sm:$0xff]  }
 0x690   :  { %10450 = vmatprep.subr.bf16.mxu1 %v13118_v52  ;;  %v13169_v52 = vld [vmem:[#allocation14 + $0x42c] ss:$16 sps:$4 sm:$0xff]  }
 0x693   :  { %10451 = vmatpush1.bf16.msra.mxu1 %v13116_v32  ;;  %v13224_v32 = vld [vmem:[#allocation14 + $0x6c0] ss:$16 sps:$4 sm:$0xff]  }
 0x694   :  { %10452 = vmatprep.subr.bf16.mxu1 %v13124_v25  ;;  %v13232_v25 = vld [vmem:[#allocation14 + $0x6e4] ss:$16 sps:$4 sm:$0xff]  }
 0x697   :  { %10453 = vmatpush1.bf16.msra.mxu1 %v13122_v26  ;;  %v13167_v26 = vld [vmem:[#allocation14 + $0x428] ss:$16 sps:$4 sm:$0xff]  }
 0x698   :  { %10454 = vmatprep.subr.bf16.mxu1 %v13130_v59  ;;  %v13172_v59 = vld [vmem:[#allocation14 + $0x44c] ss:$16 sps:$4 sm:$0xff]  }
 0x69b   :  { %10455 = vmatpush1.bf16.msra.mxu1 %v13128_v17  ;;  %v13230_v17 = vld [vmem:[#allocation14 + $0x6e0] ss:$16 sps:$4 sm:$0xff]  }
 0x69c   :  { %v8258_v5 = vpop.f32.mrb[24].mxu0  ;;  %10456 = vmatprep.subr.bf16.mxu1 %v13136_v18  ;;  %v13238_v18 = vld [vmem:[#allocation14 + $0x704] ss:$16 sps:$4 sm:$0xff]  }
 0x69d   :  { %v12745_v11 = vadd.f32 %v8258_v5, %v2094_v0  ;;  %v8260_v4 = vpop.f32.mrb[25].mxu0  ;;  %v13244_v5 = vld [vmem:[#allocation14 + $0x724] ss:$16 sps:$4 sm:$0xff]  }
 0x69e   :  { %v12746_v24 = vadd.f32 %v8260_v4, %v2098_v35  ;;  %v8262_v34 = vpop.f32.mrb[26].mxu0  ;;  %v13250_v4 = vld [vmem:[#allocation14 + $0x744] ss:$16 sps:$4 sm:$0xff]  }
 0x69f   :  { %v8631_v51 = vmul.f32 0.2, %v12745_v11  ;;  %v12747_v41 = vadd.f32 %v8262_v34, %v2094_v0  ;;  %v8264_v60 = vpop.f32.mrb[27].mxu0  ;;  %10457 = vmatpush1.bf16.msra.mxu1 %v13134_v1  ;;  %vm8615_vm11 = vcmp.gt.f32.partialorder %v12745_v11, 0.0  ;;  %v13170_v0 = vld [vmem:[#allocation14 + $0x448] ss:$16 sps:$4 sm:$0xff]  }
 0x6a0   :  { %v8632_v50 = vmul.f32 0.2, %v12746_v24  ;;  %v12748_v19 = vadd.f32 %v8264_v60, %v2098_v35  ;;  %10458 = vmatprep.subr.bf16.mxu1 %v13142_v56  ;;  %vm8616_vm12 = vcmp.gt.f32.partialorder %v12746_v24, 0.0  ;;  %v13175_v35 = vld [vmem:[#allocation14 + $0x46c] ss:$16 sps:$4 sm:$0xff]  }
 0x6a1   :  { %vm8623_vm13 = vcmp.gt.f32.partialorder %v12747_v41, 0.0  ;;  %v8639_v20 = vmul.f32 0.2, %v12747_v41  ;;  %v8647_v28 = vsel %vm8615_vm11, %v12745_v11, %v8631_v51  ;;  %v13236_v1 = vld [vmem:[#allocation14 + $0x700] ss:$16 sps:$4 sm:$0xff]  }
 0x6a2   :  { %vm8624_vm14 = vcmp.gt.f32.partialorder %v12748_v19, 0.0  ;;  %v8640_v53 = vmul.f32 0.2, %v12748_v19  ;;  %v8648_v13 = vsel %vm8616_vm12, %v12746_v24, %v8632_v50  ;;  %v13178_v56 = vld [vmem:[#allocation14 + $0x48c] ss:$16 sps:$4 sm:$0xff]  }
 0x6a3   :  { %v8655_v23 = vsel %vm8623_vm13, %v12747_v41, %v8639_v20  ;;  %10459 = vmatpush1.bf16.msra.mxu1 %v13140_v6  ;;  %v13242_v11 = vld [vmem:[#allocation14 + $0x720] ss:$16 sps:$4 sm:$0xff]   ;;  %v13176_v24 = vld [vmem:[#allocation14 + $0x488] ss:$16 sps:$4 sm:$0xff]   ;;  %v13181_v34 = vld [vmem:[#allocation14 + $0x4ac] ss:$16 sps:$4 sm:$0xff]  }
 0x6a4   :  { %v14370_v22 = vpack.c.bf16 %v8655_v23, %v8647_v28  ;;  %10460 = vmatprep.subr.bf16.mxu1 %v13148_v12  ;;  %v8656_v8 = vsel %vm8624_vm14, %v12748_v19, %v8640_v53  ;;  %v13248_v51 = vld [vmem:[#allocation14 + $0x740] ss:$16 sps:$4 sm:$0xff]   ;;  %v13256_v41 = vld [vmem:[#allocation14 + $0x764] ss:$16 sps:$4 sm:$0xff]   ;;  %v13179_v60 = vld [vmem:[#allocation14 + $0x4a8] ss:$16 sps:$4 sm:$0xff]  }
 0x6a5   :  { %v8664_v29 = vpack.c.bf16 %v8656_v8, %v8648_v13  ;;  %v13184_v6 = vld [vmem:[#allocation14 + $0x4cc] ss:$16 sps:$4 sm:$0xff]   ;;  %v13254_v50 = vld [vmem:[#allocation14 + $0x760] ss:$16 sps:$4 sm:$0xff]   ;;  %v13262_v19 = vld [vmem:[#allocation14 + $0x784] ss:$16 sps:$4 sm:$0xff]  }
 0x6a6   :  { %v13182_v12 = vld [vmem:[#allocation14 + $0x4c8] ss:$16 sps:$4 sm:$0xff]   ;;  %v13187_v20 = vld [vmem:[#allocation14 + $0x4ec] ss:$16 sps:$4 sm:$0xff]   ;;  %v13260_v53 = vld [vmem:[#allocation14 + $0x780] ss:$16 sps:$4 sm:$0xff]  }
 0x6a7   :  { %10343 = vmatprep.mubr.bf16.mxu0 %v8664_v29  ;;  %10461 = vmatpush1.bf16.msra.mxu1 %v13146_v7  ;;  %v13268_v28 = vld [vmem:[#allocation14 + $0x7a4] ss:$16 sps:$4 sm:$0xff]   ;;  %v13185_v23 = vld [vmem:[#allocation14 + $0x4e8] ss:$16 sps:$4 sm:$0xff]   ;;  %v13193_v7 = vld [vmem:[#allocation14 + $0x50c] ss:$16 sps:$4 sm:$0xff]  }
 0x6a8   :  { %10344 = vmatmul.mubr.bf16.vlgmr.msra.gmra.mrb[28].mxu0 %v14370_v22  ;;  %10462 = vmatprep.subr.bf16.mxu1 %v13151_v44  ;;  %v13266_v13 = vld [vmem:[#allocation14 + $0x7a0] ss:$16 sps:$4 sm:$0xff]   ;;  %v13274_v8 = vld [vmem:[#allocation14 + $0x7c4] ss:$16 sps:$4 sm:$0xff]   ;;  %v13191_v44 = vld [vmem:[#allocation14 + $0x508] ss:$16 sps:$4 sm:$0xff]  }
 0x6a9   :  { %10355 = vmatpush1.bf16.msra.mxu0 %v13188_v21  ;;  %v13272_v21 = vld [vmem:[#allocation14 + $0x7c0] ss:$16 sps:$4 sm:$0xff]  }
 0x6aa   :  { %10356 = vmatprep.subr.bf16.mxu0 %v13196_v45  ;;  %v13280_v45 = vld [vmem:[#allocation14 + $0x7e4] ss:$16 sps:$4 sm:$0xff]  }
 0x6ab   :  { %10463 = vmatpush1.bf16.msra.mxu1 %v13149_v49  ;;  %v13197_v49 = vld [vmem:[#allocation14 + $0x528] ss:$16 sps:$4 sm:$0xff]  }
 0x6ac   :  { %10464 = vmatprep.subr.bf16.mxu1 %v13154_v16  ;;  %v13205_v16 = vld [vmem:[#allocation14 + $0x54c] ss:$16 sps:$4 sm:$0xff]  }
 0x6ad   :  { %10357 = vmatpush1.bf16.msra.mxu0 %v13194_v30  ;;  %v13278_v30 = vld [vmem:[#allocation14 + $0x7e0] ss:$16 sps:$4 sm:$0xff]  }
 0x6ae   :  { %10358 = vmatprep.subr.bf16.mxu0 %v13202_v42  ;;  %v13310_v42 = vld [vmem:[#allocation17 + $0x4] ss:$8 sps:$4 sm:$0xff]  }
 0x6af   :  { %10465 = vmatpush1.bf16.msra.mxu1 %v13152_v43  ;;  %v13203_v43 = vld [vmem:[#allocation14 + $0x548] ss:$16 sps:$4 sm:$0xff]  }
 0x6b0   :  { %10466 = vmatprep.subr.bf16.mxu1 %v13157_v40  ;;  %v13211_v40 = vld [vmem:[#allocation14 + $0x56c] ss:$16 sps:$4 sm:$0xff]  }
 0x6b1   :  { %10359 = vmatpush1.bf16.msra.mxu0 %v13200_v14  ;;  %v13209_v14 = vld [vmem:[#allocation14 + $0x568] ss:$16 sps:$4 sm:$0xff]  }
 0x6b2   :  { %10360 = vmatprep.subr.bf16.mxu0 %v13208_v27  ;;  %v13217_v27 = vld [vmem:[#allocation14 + $0x58c] ss:$16 sps:$4 sm:$0xff]  }
 0x6b3   :  { %10467 = vmatpush1.bf16.msra.mxu1 %v13155_v62  ;;  %v13215_v62 = vld [vmem:[#allocation14 + $0x588] ss:$16 sps:$4 sm:$0xff]  }
 0x6b4   :  { %10468 = vmatprep.subr.bf16.mxu1 %v13160_v47  ;;  %v13223_v47 = vld [vmem:[#allocation14 + $0x5ac] ss:$16 sps:$4 sm:$0xff]  }
 0x6b5   :  { %10361 = vmatpush1.bf16.msra.mxu0 %v13206_v15  ;;  %v13221_v15 = vld [vmem:[#allocation14 + $0x5a8] ss:$16 sps:$4 sm:$0xff]  }
 0x6b6   :  { %10362 = vmatprep.subr.bf16.mxu0 %v13214_v48  ;;  %v13229_v48 = vld [vmem:[#allocation14 + $0x5cc] ss:$16 sps:$4 sm:$0xff]  }
 0x6b7   :  { %10469 = vmatpush1.bf16.msra.mxu1 %v13158_v10  ;;  %v13227_v10 = vld [vmem:[#allocation14 + $0x5c8] ss:$16 sps:$4 sm:$0xff]  }
 0x6b8   :  { %10470 = vmatprep.subr.bf16.mxu1 %v13163_v3  ;;  %v13235_v3 = vld [vmem:[#allocation14 + $0x5ec] ss:$16 sps:$4 sm:$0xff]  }
 0x6b9   :  { %10363 = vmatpush1.bf16.msra.mxu0 %v13212_v37  ;;  %v13233_v37 = vld [vmem:[#allocation14 + $0x5e8] ss:$16 sps:$4 sm:$0xff]  }
 0x6ba   :  { %10364 = vmatprep.subr.bf16.mxu0 %v13220_v36  ;;  %v13241_v36 = vld [vmem:[#allocation14 + $0x60c] ss:$16 sps:$4 sm:$0xff]  }
 0x6bb   :  { %10471 = vmatpush1.bf16.msra.mxu1 %v13161_v38  ;;  %v13239_v38 = vld [vmem:[#allocation14 + $0x608] ss:$16 sps:$4 sm:$0xff]  }
 0x6bc   :  { %10483 = vmatprep.subr.bf16.mxu1 %v13166_v46  ;;  %v13247_v46 = vld [vmem:[#allocation14 + $0x62c] ss:$16 sps:$4 sm:$0xff]  }
 0x6bd   :  { %10365 = vmatpush1.bf16.msra.mxu0 %v13218_v33  ;;  %v13245_v33 = vld [vmem:[#allocation14 + $0x628] ss:$16 sps:$4 sm:$0xff]  }
 0x6be   :  { %10473 = vmatmul.mubr.bf16.vlgmr.msra.gmra.mrb[24].mxu1 %v14337_v31  ;;  %10366 = vmatprep.subr.bf16.mxu0 %v13226_v63  ;;  %v13173_v31 = vld [vmem:[#allocation14 + $0x468] ss:$16 sps:$4 sm:$0xff]   ;;  %v13253_v63 = vld [vmem:[#allocation14 + $0x64c] ss:$16 sps:$4 sm:$0xff]  }
 0x6bf   :  { %10484 = vmatpush1.bf16.msra.mxu1 %v13164_v39  ;;  %10515 = vmatprep.mubr.bf16.mxu1 %v8664_v29  ;;  %v13199_v29 = vld [vmem:[#allocation14 + $0x52c] ss:$16 sps:$4 sm:$0xff]   ;;  %v13251_v39 = vld [vmem:[#allocation14 + $0x648] ss:$16 sps:$4 sm:$0xff]  }
 0x6c0   :  { %10485 = vmatprep.subr.bf16.mxu1 %v13169_v52  ;;  %v13259_v52 = vld [vmem:[#allocation14 + $0x66c] ss:$16 sps:$4 sm:$0xff]  }
 0x6c1   :  { %10367 = vmatpush1.bf16.msra.mxu0 %v13224_v32  ;;  %v13257_v32 = vld [vmem:[#allocation14 + $0x668] ss:$16 sps:$4 sm:$0xff]  }
 0x6c2   :  { %10368 = vmatprep.subr.bf16.mxu0 %v13232_v25  ;;  %v13265_v25 = vld [vmem:[#allocation14 + $0x68c] ss:$16 sps:$4 sm:$0xff]  }
 0x6c3   :  { %10486 = vmatpush1.bf16.msra.mxu1 %v13167_v26  ;;  %v13263_v26 = vld [vmem:[#allocation14 + $0x688] ss:$16 sps:$4 sm:$0xff]  }
 0x6c4   :  { %10487 = vmatprep.subr.bf16.mxu1 %v13172_v59  ;;  %v13271_v59 = vld [vmem:[#allocation14 + $0x6ac] ss:$16 sps:$4 sm:$0xff]  }
 0x6c5   :  { %10369 = vmatpush1.bf16.msra.mxu0 %v13230_v17  ;;  %v2102_v17 = vrot.slane %v14364_v9, %v14023_v55 }
 0x6c6   :  { %10370 = vmatprep.subr.bf16.mxu0 %v13238_v18  ;;  %v13269_v18 = vld [vmem:[#allocation14 + $0x6a8] ss:$16 sps:$4 sm:$0xff]  }
 0x6c7   :  { %10488 = vmatpush1.bf16.msra.mxu1 %v13170_v0  ;;  %v13277_v0 = vld [vmem:[#allocation14 + $0x6cc] ss:$16 sps:$4 sm:$0xff]  }
 0x6c8   :  { %10489 = vmatprep.subr.bf16.mxu1 %v13175_v35 }
 0x6c9   :  { %10371 = vmatpush1.bf16.msra.mxu0 %v13236_v1 }
 0x6ca   :  { %10372 = vmatprep.subr.bf16.mxu0 %v13244_v5 }
 0x6cb   :  { %10490 = vmatpush1.bf16.msra.mxu1 %v13173_v31 }
 0x6cc   :  { %10491 = vmatprep.subr.bf16.mxu1 %v13178_v56 }
 0x6cd   :  { %10373 = vmatpush1.bf16.msra.mxu0 %v13242_v11  ;;  %v13275_v11 = vld [vmem:[#allocation14 + $0x6c8] ss:$16 sps:$4 sm:$0xff]  }
 0x6ce   :  { %10374 = vmatprep.subr.bf16.mxu0 %v13250_v4 }
 0x6cf   :  { %10492 = vmatpush1.bf16.msra.mxu1 %v13176_v24 }
 0x6d0   :  { %10493 = vmatprep.subr.bf16.mxu1 %v13181_v34 }
 0x6d1   :  { %10375 = vmatpush1.bf16.msra.mxu0 %v13248_v51  ;;  %v13283_v51 = vld [vmem:[#allocation14 + $0x6ec] ss:$16 sps:$4 sm:$0xff]  }
 0x6d2   :  { %10376 = vmatprep.subr.bf16.mxu0 %v13256_v41 }
 0x6d3   :  { %10494 = vmatpush1.bf16.msra.mxu1 %v13179_v60  ;;  %v13281_v60 = vld [vmem:[#allocation14 + $0x6e8] ss:$16 sps:$4 sm:$0xff]  }
 0x6d4   :  { %10495 = vmatprep.subr.bf16.mxu1 %v13184_v6 }
 0x6d5   :  { %10377 = vmatpush1.bf16.msra.mxu0 %v13254_v50 }
 0x6d6   :  { %10378 = vmatprep.subr.bf16.mxu0 %v13262_v19 }
 0x6d7   :  { %10496 = vmatpush1.bf16.msra.mxu1 %v13182_v12 }
 0x6d8   :  { %10497 = vmatprep.subr.bf16.mxu1 %v13187_v20 }
 0x6d9   :  { %10379 = vmatpush1.bf16.msra.mxu0 %v13260_v53  ;;  %v13286_v53 = vld [vmem:[#allocation14 + $0x70c] ss:$16 sps:$4 sm:$0xff]  }
 0x6da   :  { %10380 = vmatprep.subr.bf16.mxu0 %v13268_v28 }
 0x6db   :  { %10498 = vmatpush1.bf16.msra.mxu1 %v13185_v23  ;;  %v13308_v23 = vld [vmem:[#allocation17] ss:$8 sps:$4 sm:$0xff]  }
 0x6dc   :  { %10499 = vmatprep.subr.bf16.mxu1 %v13193_v7  ;;  %v13284_v7 = vld [vmem:[#allocation14 + $0x708] ss:$16 sps:$4 sm:$0xff]  }
 0x6dd   :  { %10381 = vmatpush1.bf16.msra.mxu0 %v13266_v13  ;;  %v13313_v13 = vld [vmem:[#allocation17 + $0x14] ss:$8 sps:$4 sm:$0xff]  }
 0x6de   :  { %10382 = vmatprep.subr.bf16.mxu0 %v13274_v8  ;;  %v13289_v8 = vld [vmem:[#allocation14 + $0x72c] ss:$16 sps:$4 sm:$0xff]  }
 0x6df   :  { %10500 = vmatpush1.bf16.msra.mxu1 %v13191_v44  ;;  %v13311_v44 = vld [vmem:[#allocation17 + $0x10] ss:$8 sps:$4 sm:$0xff]  }
 0x6e0   :  { %10501 = vmatprep.subr.bf16.mxu1 %v13199_v29  ;;  %v13287_v29 = vld [vmem:[#allocation14 + $0x728] ss:$16 sps:$4 sm:$0xff]  }
 0x6e1   :  { %10383 = vmatpush1.bf16.msra.mxu0 %v13272_v21  ;;  %v13316_v21 = vld [vmem:[#allocation17 + $0x24] ss:$8 sps:$4 sm:$0xff]  }
 0x6e2   :  { %10384 = vmatprep.subr.bf16.mxu0 %v13280_v45  ;;  %v13292_v45 = vld [vmem:[#allocation14 + $0x74c] ss:$16 sps:$4 sm:$0xff]  }
 0x6e3   :  { %10502 = vmatpush1.bf16.msra.mxu1 %v13197_v49  ;;  %v13314_v49 = vld [vmem:[#allocation17 + $0x20] ss:$8 sps:$4 sm:$0xff]  }
 0x6e4   :  { %10503 = vmatprep.subr.bf16.mxu1 %v13205_v16  ;;  %v13290_v16 = vld [vmem:[#allocation14 + $0x748] ss:$16 sps:$4 sm:$0xff]  }
 0x6e5   :  { %10385 = vmatpush1.bf16.msra.mxu0 %v13278_v30  ;;  %v13319_v30 = vld [vmem:[#allocation17 + $0x34] ss:$8 sps:$4 sm:$0xff]  }
 0x6e6   :  { %10993 = vmatprep.subr.bf16.mxu0 %v13310_v42  ;;  %v13295_v42 = vld [vmem:[#allocation14 + $0x76c] ss:$16 sps:$4 sm:$0xff]  }
 0x6e7   :  { %10504 = vmatpush1.bf16.msra.mxu1 %v13203_v43  ;;  %v13317_v43 = vld [vmem:[#allocation17 + $0x30] ss:$8 sps:$4 sm:$0xff]  }
 0x6e8   :  { %10505 = vmatprep.subr.bf16.mxu1 %v13211_v40  ;;  %v13293_v40 = vld [vmem:[#allocation14 + $0x768] ss:$16 sps:$4 sm:$0xff]  }
 0x6eb   :  { %10506 = vmatpush1.bf16.msra.mxu1 %v13209_v14  ;;  %v13322_v14 = vld [vmem:[#allocation17 + $0x44] ss:$8 sps:$4 sm:$0xff]  }
 0x6ec   :  { %10507 = vmatprep.subr.bf16.mxu1 %v13217_v27  ;;  %v13298_v27 = vld [vmem:[#allocation14 + $0x78c] ss:$16 sps:$4 sm:$0xff]  }
 0x6ef   :  { %10508 = vmatpush1.bf16.msra.mxu1 %v13215_v62  ;;  %v13320_v62 = vld [vmem:[#allocation17 + $0x40] ss:$8 sps:$4 sm:$0xff]  }
 0x6f0   :  { %10509 = vmatprep.subr.bf16.mxu1 %v13223_v47  ;;  %v13296_v47 = vld [vmem:[#allocation14 + $0x788] ss:$16 sps:$4 sm:$0xff]  }
 0x6f3   :  { %10510 = vmatpush1.bf16.msra.mxu1 %v13221_v15  ;;  %v13325_v15 = vld [vmem:[#allocation17 + $0x54] ss:$8 sps:$4 sm:$0xff]  }
 0x6f4   :  { %10511 = vmatprep.subr.bf16.mxu1 %v13229_v48  ;;  %v13301_v48 = vld [vmem:[#allocation14 + $0x7ac] ss:$16 sps:$4 sm:$0xff]  }
 0x6f7   :  { %10512 = vmatpush1.bf16.msra.mxu1 %v13227_v10  ;;  %v13323_v10 = vld [vmem:[#allocation17 + $0x50] ss:$8 sps:$4 sm:$0xff]  }
 0x6f8   :  { %10513 = vmatprep.subr.bf16.mxu1 %v13235_v3  ;;  %v13299_v3 = vld [vmem:[#allocation14 + $0x7a8] ss:$16 sps:$4 sm:$0xff]  }
 0x6fb   :  { %10514 = vmatpush1.bf16.msra.mxu1 %v13233_v37  ;;  %v13328_v37 = vld [vmem:[#allocation17 + $0x64] ss:$8 sps:$4 sm:$0xff]  }
 0x6fc   :  { %10526 = vmatprep.subr.bf16.mxu1 %v13241_v36  ;;  %v13304_v36 = vld [vmem:[#allocation14 + $0x7cc] ss:$16 sps:$4 sm:$0xff]  }
 0x6fe   :  { %10516 = vmatmul.mubr.bf16.vlgmr.msra.gmra.mrb[24].mxu1 %v14370_v22  ;;  %v2106_v22 = vrot.slane %v14364_v9, %v14029_v58 }
 0x6ff   :  { %10527 = vmatpush1.bf16.msra.mxu1 %v13239_v38  ;;  %v13326_v38 = vld [vmem:[#allocation17 + $0x60] ss:$8 sps:$4 sm:$0xff]  }
 0x700   :  { %10528 = vmatprep.subr.bf16.mxu1 %v13247_v46  ;;  %v13302_v46 = vld [vmem:[#allocation14 + $0x7c8] ss:$16 sps:$4 sm:$0xff]  }
 0x703   :  { %10529 = vmatpush1.bf16.msra.mxu1 %v13245_v33  ;;  %v13331_v33 = vld [vmem:[#allocation17 + $0x74] ss:$8 sps:$4 sm:$0xff]  }
 0x704   :  { %10530 = vmatprep.subr.bf16.mxu1 %v13253_v63  ;;  %v13307_v63 = vld [vmem:[#allocation14 + $0x7ec] ss:$16 sps:$4 sm:$0xff]  }
 0x707   :  { %10531 = vmatpush1.bf16.msra.mxu1 %v13251_v39  ;;  %v13329_v39 = vld [vmem:[#allocation17 + $0x70] ss:$8 sps:$4 sm:$0xff]  }
 0x708   :  { %10532 = vmatprep.subr.bf16.mxu1 %v13259_v52  ;;  %v13305_v52 = vld [vmem:[#allocation14 + $0x7e8] ss:$16 sps:$4 sm:$0xff]  }
 0x70b   :  { %10533 = vmatpush1.bf16.msra.mxu1 %v13257_v32  ;;  %v13334_v32 = vld [vmem:[#allocation17 + $0x84] ss:$8 sps:$4 sm:$0xff]  }
 0x70c   :  { %10534 = vmatprep.subr.bf16.mxu1 %v13265_v25  ;;  %v13332_v25 = vld [vmem:[#allocation17 + $0x80] ss:$8 sps:$4 sm:$0xff]  }
 0x70f   :  { %10535 = vmatpush1.bf16.msra.mxu1 %v13263_v26  ;;  %v13337_v26 = vld [vmem:[#allocation17 + $0x94] ss:$8 sps:$4 sm:$0xff]  }
 0x710   :  { %10536 = vmatprep.subr.bf16.mxu1 %v13271_v59  ;;  %v13335_v59 = vld [vmem:[#allocation17 + $0x90] ss:$8 sps:$4 sm:$0xff]  }
 0x711   :  { %v8602_v35 = vpop.f32.mrb[20].mxu1 }
 0x712   :  { %v12749_v1 = vadd.f32 %v8602_v35, %v2102_v17  ;;  %v8604_v5 = vpop.f32.mrb[21].mxu1  ;;  %v13346_v35 = vld [vmem:[#allocation17 + $0xc4] ss:$8 sps:$4 sm:$0xff]  }
 0x713   :  { %v12750_v31 = vadd.f32 %v8604_v5, %v2106_v22  ;;  %v8606_v56 = vpop.f32.mrb[22].mxu1  ;;  %10537 = vmatpush1.bf16.msra.mxu1 %v13269_v18  ;;  %v13343_v18 = vld [vmem:[#allocation17 + $0xb4] ss:$8 sps:$4 sm:$0xff]  }
 0x714   :  { %v8633_v4 = vmul.f32 0.2, %v12749_v1  ;;  %v12751_v24 = vadd.f32 %v8606_v56, %v2102_v17  ;;  %v8608_v34 = vpop.f32.mrb[23].mxu1  ;;  %10538 = vmatprep.subr.bf16.mxu1 %v13277_v0  ;;  %vm8617_vm15 = vcmp.gt.f32.partialorder %v12749_v1, 0.0  ;;  %v13340_v17 = vld [vmem:[#allocation17 + $0xa4] ss:$8 sps:$4 sm:$0xff]  }
 0x715   :  { %v8634_v55 = vmul.f32 0.2, %v12750_v31  ;;  %v12752_v41 = vadd.f32 %v8608_v34, %v2106_v22  ;;  %vm8618_vm0 = vcmp.gt.f32.partialorder %v12750_v31, 0.0  ;;  %v13338_v22 = vld [vmem:[#allocation17 + $0xa0] ss:$8 sps:$4 sm:$0xff]  }
 0x716   :  { %vm8625_vm1 = vcmp.gt.f32.partialorder %v12751_v24, 0.0  ;;  %v8641_v58 = vmul.f32 0.2, %v12751_v24  ;;  %v8649_v6 = vsel %vm8617_vm15, %v12749_v1, %v8633_v4  ;;  %v13341_v0 = vld [vmem:[#allocation17 + $0xb0] ss:$8 sps:$4 sm:$0xff]  }
 0x717   :  { %vm8626_vm2 = vcmp.gt.f32.partialorder %v12752_v41, 0.0  ;;  %v8642_v9 = vmul.f32 0.2, %v12752_v41  ;;  %10539 = vmatpush1.bf16.msra.mxu1 %v13275_v11  ;;  %v8650_v12 = vsel %vm8618_vm0, %v12750_v31, %v8634_v55  ;;  %v13344_v1 = vld [vmem:[#allocation17 + $0xc0] ss:$8 sps:$4 sm:$0xff]  }
 0x718   :  { %v8657_v50 = vsel %vm8625_vm1, %v12751_v24, %v8641_v58  ;;  %10540 = vmatprep.subr.bf16.mxu1 %v13283_v51  ;;  %v13349_v5 = vld [vmem:[#allocation17 + $0xd4] ss:$8 sps:$4 sm:$0xff]   ;;  %v13347_v31 = vld [vmem:[#allocation17 + $0xd0] ss:$8 sps:$4 sm:$0xff]   ;;  %v13352_v56 = vld [vmem:[#allocation17 + $0xe4] ss:$8 sps:$4 sm:$0xff]  }
 0x719   :  { %v14379_v19 = vpack.c.bf16 %v8657_v50, %v8649_v6  ;;  %v8658_v20 = vsel %vm8626_vm2, %v12752_v41, %v8642_v9  ;;  %v13350_v11 = vld [vmem:[#allocation17 + $0xe0] ss:$8 sps:$4 sm:$0xff]   ;;  %v13355_v4 = vld [vmem:[#allocation17 + $0xf4] ss:$8 sps:$4 sm:$0xff]   ;;  %v13353_v24 = vld [vmem:[#allocation17 + $0xf0] ss:$8 sps:$4 sm:$0xff]  }
 0x71a   :  { %v8666_v28 = vpack.c.bf16 %v8658_v20, %v8650_v12  ;;  %v13358_v34 = vld [vmem:[#allocation17 + $0x104] ss:$8 sps:$4 sm:$0xff]   ;;  %v13408_v9 = vld [vmem:[#allocation20 + $0x50] sm:$0xff]   ;;  %v13410_v6 = vld [vmem:[#allocation20 + $0x58] sm:$0xff]  }
 0x71b   :  { %10541 = vmatpush1.bf16.msra.mxu1 %v13281_v60  ;;  %v13404_v51 = vld [vmem:[#allocation20 + $0x40] sm:$0xff]   ;;  %v13406_v41 = vld [vmem:[#allocation20 + $0x48] sm:$0xff]   ;;  %v13409_v60 = vld [vmem:[#allocation20 + $0x10] sm:$0xff]  }
 0x71c   :  { %10386 = vmatprep.mubr.bf16.mxu0 %v8666_v28  ;;  %10558 = vmatprep.mubr.bf16.mxu1 %v8666_v28  ;;  %v13405_v55 = vld [vmem:[#allocation20] sm:$0xff]   ;;  %v13407_v58 = vld [vmem:[#allocation20 + $0x8] sm:$0xff]   ;;  %v13411_v50 = vld [vmem:[#allocation20 + $0x18] sm:$0xff]  }
 0x71d   :  { %10387 = vmatmul.mubr.bf16.vlgmr.msra.gmra.mrb[28].mxu0 %v14379_v19  ;;  %10542 = vmatprep.subr.bf16.mxu1 %v13286_v53  ;;  %v13413_v12 = vld [vmem:[#allocation20 + $0x20] sm:$0xff]   ;;  %v8923_v20 = vld [vmem:[#allocation15] sm:$0xf] }
 0x71e   :  { %10994 = vmatpush1.bf16.msra.mxu0 %v13308_v23  ;;  %v8928_v53 = vrot.slane %v8923_v20, %v14021_v54  ;;  %v8932_v28 = vrot.slane %v8923_v20, %v14027_v57 }
 0x71f   :  { %10543 = vmatpush1.bf16.msra.mxu1 %v13284_v7  ;;  %10995 = vmatprep.subr.bf16.mxu0 %v13313_v13 }
 0x720   :  { %10544 = vmatprep.subr.bf16.mxu1 %v13289_v8 }
 0x722   :  { %10996 = vmatpush1.bf16.msra.mxu0 %v13311_v44 }
 0x723   :  { %10545 = vmatpush1.bf16.msra.mxu1 %v13287_v29  ;;  %10997 = vmatprep.subr.bf16.mxu0 %v13316_v21 }
 0x724   :  { %10546 = vmatprep.subr.bf16.mxu1 %v13292_v45 }
 0x726   :  { %10998 = vmatpush1.bf16.msra.mxu0 %v13314_v49 }
 0x727   :  { %10547 = vmatpush1.bf16.msra.mxu1 %v13290_v16  ;;  %10999 = vmatprep.subr.bf16.mxu0 %v13319_v30 }
 0x728   :  { %10548 = vmatprep.subr.bf16.mxu1 %v13295_v42 }
 0x72a   :  { %11000 = vmatpush1.bf16.msra.mxu0 %v13317_v43 }
 0x72b   :  { %10549 = vmatpush1.bf16.msra.mxu1 %v13293_v40  ;;  %11001 = vmatprep.subr.bf16.mxu0 %v13322_v14 }
 0x72c   :  { %10550 = vmatprep.subr.bf16.mxu1 %v13298_v27 }
 0x72e   :  { %11002 = vmatpush1.bf16.msra.mxu0 %v13320_v62 }
 0x72f   :  { %10551 = vmatpush1.bf16.msra.mxu1 %v13296_v47  ;;  %11003 = vmatprep.subr.bf16.mxu0 %v13325_v15  ;;  %v13356_v15 = vld [vmem:[#allocation17 + $0x100] ss:$8 sps:$4 sm:$0xff]  }
 0x730   :  { %10552 = vmatprep.subr.bf16.mxu1 %v13301_v48  ;;  %v13361_v48 = vld [vmem:[#allocation17 + $0x114] ss:$8 sps:$4 sm:$0xff]  }
 0x732   :  { %11004 = vmatpush1.bf16.msra.mxu0 %v13323_v10  ;;  %v13359_v10 = vld [vmem:[#allocation17 + $0x110] ss:$8 sps:$4 sm:$0xff]  }
 0x733   :  { %10553 = vmatpush1.bf16.msra.mxu1 %v13299_v3  ;;  %11005 = vmatprep.subr.bf16.mxu0 %v13328_v37  ;;  %v13364_v3 = vld [vmem:[#allocation17 + $0x124] ss:$8 sps:$4 sm:$0xff]   ;;  %v13362_v37 = vld [vmem:[#allocation17 + $0x120] ss:$8 sps:$4 sm:$0xff]  }
 0x734   :  { %10554 = vmatprep.subr.bf16.mxu1 %v13304_v36  ;;  %v13367_v36 = vld [vmem:[#allocation17 + $0x134] ss:$8 sps:$4 sm:$0xff]  }
 0x736   :  { %11006 = vmatpush1.bf16.msra.mxu0 %v13326_v38  ;;  %v13365_v38 = vld [vmem:[#allocation17 + $0x130] ss:$8 sps:$4 sm:$0xff]  }
 0x737   :  { %10555 = vmatpush1.bf16.msra.mxu1 %v13302_v46  ;;  %11007 = vmatprep.subr.bf16.mxu0 %v13331_v33  ;;  %v13370_v46 = vld [vmem:[#allocation17 + $0x144] ss:$8 sps:$4 sm:$0xff]   ;;  %v13368_v33 = vld [vmem:[#allocation17 + $0x140] ss:$8 sps:$4 sm:$0xff]  }
 0x738   :  { %10556 = vmatprep.subr.bf16.mxu1 %v13307_v63  ;;  %v13373_v63 = vld [vmem:[#allocation17 + $0x154] ss:$8 sps:$4 sm:$0xff]  }
 0x73a   :  { %11008 = vmatpush1.bf16.msra.mxu0 %v13329_v39  ;;  %v13371_v39 = vld [vmem:[#allocation17 + $0x150] ss:$8 sps:$4 sm:$0xff]  }
 0x73b   :  { %10557 = vmatpush1.bf16.msra.mxu1 %v13305_v52  ;;  %11009 = vmatprep.subr.bf16.mxu0 %v13334_v32  ;;  %v8936_v52 = vrot.slane %v8923_v20, %v14035_v61  ;;  %v13376_v32 = vld [vmem:[#allocation17 + $0x164] ss:$8 sps:$4 sm:$0xff]   ;;  %v13377_v61 = vld [vmem:[#allocation17 + $0x170] ss:$8 sps:$4 sm:$0xff]  }
 0x73c   :  { %12711 = vmatprep.subr.bf16.mxu1 %v13404_v51 }
 0x73e   :  { %10559 = vmatmul.mubr.bf16.vlgmr.msra.gmra.mrb[24].mxu1 %v14379_v19  ;;  %11010 = vmatpush1.bf16.msra.mxu0 %v13332_v25  ;;  %v13412_v19 = vld [vmem:[#allocation20 + $0x60] sm:$0xff]   ;;  %v8940_v25 = vrot.slane %v8923_v20, %v14043_v2  ;;  %v13391_v20 = vld [vmem:[#allocation17 + $0x1b4] ss:$8 sps:$4 sm:$0xff]  }
 0x73f   :  { %11011 = vmatprep.subr.bf16.mxu0 %v13337_v26  ;;  %12712 = vmatpush3.bf16.msra.mxu1 %v13405_v55 }
 0x740   :  { %12713 = vmatprep.subr.bf16.mxu1 %v13406_v41  ;;  %v13380_v41 = vld [vmem:[#allocation17 + $0x180] ss:$8 sps:$4 sm:$0xff]  }
 0x742   :  { %11012 = vmatpush1.bf16.msra.mxu0 %v13335_v59  ;;  %v13374_v59 = vld [vmem:[#allocation17 + $0x160] ss:$8 sps:$4 sm:$0xff]  }
 0x743   :  { %11013 = vmatprep.subr.bf16.mxu0 %v13340_v17  ;;  %12714 = vmatpush3.bf16.msra.mxu1 %v13407_v58 }
 0x744   :  { %12715 = vmatprep.subr.bf16.mxu1 %v13408_v9 }
 0x746   :  { %11014 = vmatpush1.bf16.msra.mxu0 %v13338_v22 }
 0x747   :  { %11015 = vmatprep.subr.bf16.mxu0 %v13343_v18  ;;  %12716 = vmatpush3.bf16.msra.mxu1 %v13409_v60  ;;  %v13379_v18 = vld [vmem:[#allocation17 + $0x174] ss:$8 sps:$4 sm:$0xff]  }
 0x748   :  { %12717 = vmatprep.subr.bf16.mxu1 %v13410_v6  ;;  %v13385_v6 = vld [vmem:[#allocation17 + $0x194] ss:$8 sps:$4 sm:$0xff]  }
 0x74a   :  { %11016 = vmatpush1.bf16.msra.mxu0 %v13341_v0 }
 0x74b   :  { %11017 = vmatprep.subr.bf16.mxu0 %v13346_v35  ;;  %12718 = vmatpush3.bf16.msra.mxu1 %v13411_v50  ;;  %v13383_v50 = vld [vmem:[#allocation17 + $0x190] ss:$8 sps:$4 sm:$0xff]  }
 0x74c   :  { %12719 = vmatprep.subr.bf16.mxu1 %v13412_v19  ;;  %v13388_v19 = vld [vmem:[#allocation17 + $0x1a4] ss:$8 sps:$4 sm:$0xff]  }
 0x74e   :  { %11018 = vmatpush1.bf16.msra.mxu0 %v13344_v1 }
 0x74f   :  { %11019 = vmatprep.subr.bf16.mxu0 %v13349_v5  ;;  %12720 = vmatpush3.bf16.msra.mxu1 %v13413_v12  ;;  %v13386_v12 = vld [vmem:[#allocation17 + $0x1a0] ss:$8 sps:$4 sm:$0xff]  }
 0x752   :  { %11020 = vmatpush1.bf16.msra.mxu0 %v13347_v31 }
 0x753   :  { %11021 = vmatprep.subr.bf16.mxu0 %v13352_v56 }
 0x756   :  { %11022 = vmatpush1.bf16.msra.mxu0 %v13350_v11 }
 0x757   :  { %11023 = vmatprep.subr.bf16.mxu0 %v13355_v4  ;;  %v13382_v4 = vld [vmem:[#allocation17 + $0x184] ss:$8 sps:$4 sm:$0xff]  }
 0x75a   :  { %11024 = vmatpush1.bf16.msra.mxu0 %v13353_v24 }
 0x75b   :  { %11036 = vmatprep.subr.bf16.mxu0 %v13358_v34 }
 0x7f0   :  { %v10388_v23 = vpop.f32.mrb[28].mxu0 }
 0x7f1   :  { %v12753_v7 = vadd.f32 %v10388_v23, %v8928_v53  ;;  %v10390_v13 = vpop.f32.mrb[29].mxu0  ;;  %v13392_v23 = vld [vmem:[#allocation17 + $0x1c0] ss:$8 sps:$4 sm:$0xff]  }
 0x7f2   :  { %v12754_v8 = vadd.f32 %v10390_v13, %v8932_v28  ;;  %v10392_v44 = vpop.f32.mrb[30].mxu0  ;;  %v13395_v13 = vld [vmem:[#allocation17 + $0x1d0] ss:$8 sps:$4 sm:$0xff]  }
 0x7f3   :  { %v10577_v29 = vmul.f32 0.2, %v12753_v7  ;;  %v12755_v21 = vadd.f32 %v10392_v44, %v8928_v53  ;;  %v10394_v45 = vpop.f32.mrb[31].mxu0  ;;  %vm10569_vm3 = vcmp.gt.f32.partialorder %v12753_v7, 0.0  ;;  %v13389_v53 = vld [vmem:[#allocation17 + $0x1b0] ss:$8 sps:$4 sm:$0xff]  }
 0x7f4   :  { %v10578_v49 = vmul.f32 0.2, %v12754_v8  ;;  %v12756_v16 = vadd.f32 %v10394_v45, %v8932_v28  ;;  %vm10570_vm4 = vcmp.gt.f32.partialorder %v12754_v8, 0.0  ;;  %v13394_v28 = vld [vmem:[#allocation17 + $0x1c4] ss:$8 sps:$4 sm:$0xff]  }
 0x7f5   :  { %vm10573_vm5 = vcmp.gt.f32.partialorder %v12755_v21, 0.0  ;;  %v10581_v30 = vmul.f32 0.2, %v12755_v21  ;;  %v10585_v43 = vsel %vm10569_vm3, %v12753_v7, %v10577_v29  ;;  %v13397_v7 = vld [vmem:[#allocation17 + $0x1d4] ss:$8 sps:$4 sm:$0xff]   ;;  %v13414_v45 = vld [vmem:[#allocation20 + $0x68] sm:$0xff]  }
 0x7f6   :  { %vm10574_vm6 = vcmp.gt.f32.partialorder %v12756_v16, 0.0  ;;  %v10582_v42 = vmul.f32 0.2, %v12756_v16  ;;  %v10586_v27 = vsel %vm10570_vm4, %v12754_v8, %v10578_v49  ;;  %v13400_v8 = vld [vmem:[#allocation17 + $0x1e4] ss:$8 sps:$4 sm:$0xff]   ;;  %12721 = vmatprep.subr.bf16.mxu1 %v13414_v45 }
 0x7f7   :  { %v10589_v40 = vsel %vm10573_vm5, %v12755_v21, %v10581_v30  ;;  %v13398_v44 = vld [vmem:[#allocation17 + $0x1e0] ss:$8 sps:$4 sm:$0xff]   ;;  %v13403_v29 = vld [vmem:[#allocation17 + $0x1f4] ss:$8 sps:$4 sm:$0xff]   ;;  %v13401_v21 = vld [vmem:[#allocation17 + $0x1f0] ss:$8 sps:$4 sm:$0xff]  }
 0x7f8   :  { %v10593_v14 = vpack.c.bf16 %v10589_v40, %v10585_v43  ;;  %v10590_v62 = vsel %vm10574_vm6, %v12756_v16, %v10582_v42  ;;  %v13415_v49 = vld [vmem:[#allocation20 + $0x28] sm:$0xff]   ;;  %v13416_v16 = vld [vmem:[#allocation20 + $0x70] sm:$0xff]   ;;  %v13418_v42 = vld [vmem:[#allocation20 + $0x78] sm:$0xff]  }
 0x7f9   :  { %v10594_v47 = vpack.c.bf16 %v10590_v62, %v10586_v27  ;;  %12722 = vmatpush3.bf16.msra.mxu1 %v13415_v49  ;;  %v13417_v30 = vld [vmem:[#allocation20 + $0x30] sm:$0xff]   ;;  %v13419_v43 = vld [vmem:[#allocation20 + $0x38] sm:$0xff]  }
 0x7fa   :  { %12723 = vmatprep.subr.bf16.mxu1 %v13416_v16  ;;  %v10661_v40 = vld [vmem:[#allocation18] sm:$0x3] }
 0x7fb   :  { %11025 = vmatprep.mubr.bf16.mxu0 %v10594_v47  ;;  %v10670_v27 = vrot.slane %v10661_v40, %v14027_v57 }
 0x7fc   :  { %11026 = vmatmul.mubr.bf16.vlgmr.msra.gmra.mrb[32].mxu0 %v10593_v14  ;;  %v10666_v14 = vrot.slane %v10661_v40, %v14021_v54 }
 0x7fd   :  { %11037 = vmatpush1.bf16.msra.mxu0 %v13356_v15  ;;  %12724 = vmatpush3.bf16.msra.mxu1 %v13417_v30 }
 0x7fe   :  { %11038 = vmatprep.subr.bf16.mxu0 %v13361_v48  ;;  %12725 = vmatprep.subr.bf16.mxu1 %v13418_v42 }
 0x801   :  { %11039 = vmatpush1.bf16.msra.mxu0 %v13359_v10  ;;  %12726 = vmatpush3.bf16.msra.mxu1 %v13419_v43 }
 0x802   :  { %11040 = vmatprep.subr.bf16.mxu0 %v13364_v3 }
 0x805   :  { %11041 = vmatpush1.bf16.msra.mxu0 %v13362_v37 }
 0x806   :  { %11042 = vmatprep.subr.bf16.mxu0 %v13367_v36 }
 0x809   :  { %11043 = vmatpush1.bf16.msra.mxu0 %v13365_v38 }
 0x80a   :  { %11044 = vmatprep.subr.bf16.mxu0 %v13370_v46 }
 0x80d   :  { %11045 = vmatpush1.bf16.msra.mxu0 %v13368_v33 }
 0x80e   :  { %11046 = vmatprep.subr.bf16.mxu0 %v13373_v63 }
 0x811   :  { %11047 = vmatpush1.bf16.msra.mxu0 %v13371_v39  ;;  %v10560_v26 = vpop.f32.mrb[24].mxu1 }
 0x812   :  { %v12757_v17 = vadd.f32 %v10560_v26, %v8936_v52  ;;  %v10562_v22 = vpop.f32.mrb[25].mxu1  ;;  %11048 = vmatprep.subr.bf16.mxu0 %v13376_v32 }
 0x813   :  { %v12758_v0 = vadd.f32 %v10562_v22, %v8940_v25  ;;  %v10564_v35 = vpop.f32.mrb[26].mxu1 }
 0x814   :  { %v10579_v1 = vmul.f32 0.2, %v12757_v17  ;;  %v12759_v5 = vadd.f32 %v10564_v35, %v8936_v52  ;;  %v10566_v31 = vpop.f32.mrb[27].mxu1  ;;  %vm10571_vm7 = vcmp.gt.f32.partialorder %v12757_v17, 0.0 }
 0x815   :  { %v10580_v56 = vmul.f32 0.2, %v12758_v0  ;;  %v12760_v11 = vadd.f32 %v10566_v31, %v8940_v25  ;;  %11049 = vmatpush1.bf16.msra.mxu0 %v13374_v59  ;;  %vm10572_vm8 = vcmp.gt.f32.partialorder %v12758_v0, 0.0  ;;  %v12694_v59 = vld [vmem:[#allocation21] ss:$0 sm:$0xff] }
 0x816   :  { %vm10575_vm9 = vcmp.gt.f32.partialorder %v12759_v5, 0.0  ;;  %v10583_v2 = vmul.f32 0.2, %v12759_v5  ;;  %11050 = vmatprep.subr.bf16.mxu0 %v13379_v18  ;;  %v10587_v34 = vsel %vm10571_vm7, %v12757_v17, %v10579_v1 }
 0x817   :  { %vm10576_vm10 = vcmp.gt.f32.partialorder %v12760_v11, 0.0  ;;  %v10584_v24 = vmul.f32 0.2, %v12760_v11  ;;  %v10588_v58 = vsel %vm10572_vm8, %v12758_v0, %v10580_v56 }
 0x818   :  { %v10591_v51 = vsel %vm10575_vm9, %v12759_v5, %v10583_v2 }
 0x819   :  { %v10595_v55 = vpack.c.bf16 %v10591_v51, %v10587_v34  ;;  %11051 = vmatpush1.bf16.msra.mxu0 %v13377_v61  ;;  %v10592_v9 = vsel %vm10576_vm10, %v12760_v11, %v10584_v24 }
 0x81a   :  { %11052 = vmatprep.subr.bf16.mxu0 %v13382_v4  ;;  %v10596_v60 = vpack.c.bf16 %v10592_v9, %v10588_v58 }
 0x81c   :  { %11068 = vmatprep.mubr.bf16.mxu0 %v10596_v60 }
 0x81d   :  { %11053 = vmatpush1.bf16.msra.mxu0 %v13380_v41 }
 0x81e   :  { %11054 = vmatprep.subr.bf16.mxu0 %v13385_v6 }
 0x821   :  { %11055 = vmatpush1.bf16.msra.mxu0 %v13383_v50 }
 0x822   :  { %11056 = vmatprep.subr.bf16.mxu0 %v13388_v19 }
 0x825   :  { %11057 = vmatpush1.bf16.msra.mxu0 %v13386_v12 }
 0x826   :  { %11058 = vmatprep.subr.bf16.mxu0 %v13391_v20 }
 0x829   :  { %11059 = vmatpush1.bf16.msra.mxu0 %v13389_v53 }
 0x82a   :  { %11060 = vmatprep.subr.bf16.mxu0 %v13394_v28 }
 0x82d   :  { %11061 = vmatpush1.bf16.msra.mxu0 %v13392_v23 }
 0x82e   :  { %11062 = vmatprep.subr.bf16.mxu0 %v13397_v7 }
 0x831   :  { %11063 = vmatpush1.bf16.msra.mxu0 %v13395_v13 }
 0x832   :  { %11064 = vmatprep.subr.bf16.mxu0 %v13400_v8 }
 0x835   :  { %11065 = vmatpush1.bf16.msra.mxu0 %v13398_v44 }
 0x836   :  { %11066 = vmatprep.subr.bf16.mxu0 %v13403_v29 }
 0x839   :  { %11067 = vmatpush1.bf16.msra.mxu0 %v13401_v21 }
 0x83c   :  { %11069 = vmatmul.mubr.bf16.vlgmr.msra.gmra.mrb[32].mxu0 %v10595_v55 }
 0x90f   :  { %v11070_v62 = vpop.f32.mrb[32].mxu0 }
 0x910   :  { %v12761_v47 = vadd.f32 %v11070_v62, %v10666_v14  ;;  %v11072_v15 = vpop.f32.mrb[33].mxu0 }
 0x911   :  { %v12762_v48 = vadd.f32 %v11072_v15, %v10670_v27  ;;  %v11074_v10 = vpop.f32.mrb[34].mxu0 }
 0x912   :  { %v11083_v3 = vmul.f32 0.2, %v12761_v47  ;;  %v12763_v37 = vadd.f32 %v11074_v10, %v10666_v14  ;;  %v11076_v36 = vpop.f32.mrb[35].mxu0  ;;  %vm11079_vm11 = vcmp.gt.f32.partialorder %v12761_v47, 0.0 }
 0x913   :  { %v11084_v38 = vmul.f32 0.2, %v12762_v48  ;;  %v12764_v46 = vadd.f32 %v11076_v36, %v10670_v27  ;;  %vm11080_vm12 = vcmp.gt.f32.partialorder %v12762_v48, 0.0 }
 0x914   :  { %vm11081_vm13 = vcmp.gt.f32.partialorder %v12763_v37, 0.0  ;;  %v11085_v33 = vmul.f32 0.2, %v12763_v37  ;;  %v11087_v39 = vsel %vm11079_vm11, %v12761_v47, %v11083_v3 }
 0x915   :  { %vm11082_vm14 = vcmp.gt.f32.partialorder %v12764_v46, 0.0  ;;  %v11086_v63 = vmul.f32 0.2, %v12764_v46  ;;  %v11088_v57 = vsel %vm11080_vm12, %v12762_v48, %v11084_v38 }
 0x916   :  { %v11089_v54 = vsel %vm11081_vm13, %v12763_v37, %v11085_v33 }
 0x917   :  { %v11091_v52 = vpack.c.bf16 %v11089_v54, %v11087_v39  ;;  %v11090_v32 = vsel %vm11082_vm14, %v12764_v46, %v11086_v63 }
 0x918   :  { %v11092_v25 = vpack.c.bf16 %v11090_v32, %v11088_v57 }
 0x91a   :  { %11260 = vmatprep.mubr.bf16.mxu1 %v11092_v25 }
 0x91b   :  { %11261 = vmatmul.mubr.bf16.vlgmr.msra.gmra.mrb[28].mxu1 %v11091_v52 }
 0x9ee   :  { %v12727_v26 = vpop.f32.mrb[28].mxu1 }
 0x9ef   :  { %v12728_v17 = vpop.f32.mrb[29].mxu1 }
 0x9f0   :  { %v12729_v22 = vadd.f32 %v12728_v17, %v12727_v26  ;;  %v12730_v18 = vpop.f32.mrb[30].mxu1 }
 0x9f1   :  { %v12731_v0 = vpop.f32.mrb[31].mxu1 }
 0x9f2   :  { %v11263_v35 = vadd.f32 %v12729_v22, %v12694_v59  ;;  %v12732_v1 = vadd.f32 %v12731_v0, %v12730_v18 }
 0x9f4   :  { %11269 = vst [vmem:[#allocation23] sm:$0xff] %v11263_v35  ;;  %v11266_v5 = vadd.f32 %v12732_v1, %v12694_v59 }
 0x9f6   :  { %11270 = vst [vmem:[#allocation23 + $0x8] sm:$0xff] %v11266_v5 }
 0x9f7   :  { %13696 = shalt.err (!%p13693_p2)
}
 0x9f8   :  { %s13697_s29 = scalar_lea.hbm %s14416_s12, 256 }
 0x9f9   :  { %p13698_p3 = scmp.ne.s32.totalorder %s14416_s12, %s13697_s29  ;;  %p13701_p4 = scmp.lt.u32.totalorder %s13697_s29, %s14416_s12 }
 0x9fb   :  { %p13703_p5 = pnand %p13701_p4, %p13698_p3 }
 0x9fd   :  { %13706 = shalt.err (!%p13703_p5)
}
 0x9fe   :  { %11282 = dma.vmem_to_hbm [thread:$0]  %s11277_s3, 256, %s14416_s12, [#allocation5], %s13725_s15, %s13725_s15, %s13726_s16  }
 0x9ff   :  { %13721 = dma.done.wait [#allocation5], 256  }
 0xa00   :  { %13722 = vsyncadd [#allocation5], 4294967040 }
 0xa01   :  { %11286 = vsyncpa [#allocation4], 1 }
 0xa02   :  { %11287 = vsyncpa [#allocation7], 1 }
 0xa03   :  { %11288 = vsyncpa [#allocation10], 1 }
 0xa04   :  { %11289 = vsyncpa [#allocation13], 1 }
 0xa05   :  { %11290 = vsyncpa [#allocation16], 1 }
 0xa06   :  { %11291 = vsyncpa [#allocation19], 1 }
 0xa07   :  { %11292 = vsyncpa [#allocation22], 1 }
 0xa08   :  { %11293 = vsyncpa [#allocation5], 1 }

</bundles_post_ra>
